<compile_context>
chip_gen: v5e
topology: v5e:2x2
jax: 0.10.0
libtpu: 0.0.40
codegen_flags: <defaults>
</compile_context>

<pallas_src>
import functools

import jax
import jax.numpy as jnp
from jax.experimental import pallas as pl
from jax.experimental.pallas import tpu as pltpu


BN_EPS = 1e-5


@functools.lru_cache(maxsize=1)
def _vmem_limit_bytes():
    """Generation-aware VMEM ceiling (v7x: 64 MiB physical, v5e/v6e: 128 MiB)."""
    try:
        cap = pltpu.get_tpu_info().vmem_capacity_bytes
    except Exception:
        cap = 64 * 1024 * 1024
    return int(cap * 3 // 4)


# ----------------------------------------------------------------------------
# Pallas kernels
# ----------------------------------------------------------------------------

def _conv_accumulate(x_ref, w_ref, *, kh, kw, stride, ho, wo):
    """Sum over kh*kw taps of (shifted input slab) @ (per-tap weight), f32 acc.

    x_ref: (stride*stride, Hph, Wph, Cin) phase sub-images of the padded input.
    w_ref: (kh*kw, Cin, tn) BN-scale-folded bf16 weights.
    """
    cin = w_ref.shape[1]
    tn = w_ref.shape[2]
    acc = jnp.zeros((ho * wo, tn), jnp.float32)
    for i in range(kh):
        for j in range(kw):
            p = (i % stride) * stride + (j % stride)      # which phase sub-image
            di, dj = i // stride, j // stride             # stride-free offset in it
            slab = x_ref[p, di:di + ho, dj:dj + wo, :].reshape(ho * wo, cin)
            acc = acc + jnp.dot(slab, w_ref[i * kw + j, :, :],
                                preferred_element_type=jnp.float32)
    return acc


def _direct_conv_kernel(x_ref, w_ref, b_ref, o_ref, *, kh, kw, stride, ho, wo, relu):
    """out = conv(x) + bias ; optional ReLU (conv weights carry the folded BN scale)."""
    tn = o_ref.shape[-1]
    acc = _conv_accumulate(x_ref, w_ref, kh=kh, kw=kw, stride=stride, ho=ho, wo=wo)
    y = acc + b_ref[...]
    if relu:
        y = jnp.maximum(y, 0.0)
    o_ref[0] = y.reshape(ho, wo, tn).astype(o_ref.dtype)


def _direct_conv_res_kernel(x_ref, w_ref, b_ref, r_ref, o_ref, *, kh, kw, stride,
                            ho, wo, relu):
    """out = conv(x) + bias + residual ; optional ReLU."""
    tn = o_ref.shape[-1]
    acc = _conv_accumulate(x_ref, w_ref, kh=kh, kw=kw, stride=stride, ho=ho, wo=wo)
    y = acc + b_ref[...] + r_ref[0].reshape(ho * wo, tn).astype(jnp.float32)
    if relu:
        y = jnp.maximum(y, 0.0)
    o_ref[0] = y.reshape(ho, wo, tn).astype(o_ref.dtype)


def _maxpool_kernel(x_ref, o_ref, *, k, stride, ho, wo):
    """Max over k*k shifted slabs of the (-inf padded) phase sub-images."""
    out = None
    for i in range(k):
        for j in range(k):
            p = (i % stride) * stride + (j % stride)
            di, dj = i // stride, j // stride
            slab = x_ref[p, di:di + ho, dj:dj + wo, :]
            out = slab if out is None else jnp.maximum(out, slab)
    o_ref[0] = out


def _head_kernel(x_ref, w_ref, b_ref, o_ref, *, inv_hw):
    """Global average pool over the spatial axis + Linear layer."""
    pooled = jnp.sum(x_ref[...].astype(jnp.float32), axis=1) * inv_hw     # (N, C)
    o_ref[...] = jnp.dot(pooled, w_ref[...],
                         preferred_element_type=jnp.float32) + b_ref[...]


# ----------------------------------------------------------------------------
# Pallas wrappers
# ----------------------------------------------------------------------------

def _phase_split(x, stride, pad, fill=0.0):
    """Pad NHWC x and split into stride*stride phase sub-images (batch-major stack).

    Returns (N*stride*stride, Hp/stride, Wp/stride, C); total bytes == padded input,
    so strided convs need no im2col and stride-1 in-kernel slices suffice.
    """
    n, h, w, c = x.shape
    hp = stride * (-(-(h + 2 * pad) // stride))           # round padded size up to s
    wp = stride * (-(-(w + 2 * pad) // stride))
    xp = jnp.pad(x, ((0, 0), (pad, hp - h - pad), (pad, wp - w - pad), (0, 0)),
                 constant_values=fill)
    phases = [xp[:, a::stride, b::stride, :]
              for a in range(stride) for b in range(stride)]
    stacked = jnp.stack(phases, axis=1)                   # (N, s*s, hp/s, wp/s, C)
    return stacked.reshape(n * stride * stride, hp // stride, wp // stride, c)


def conv2d_pallas(x, w_hwio, scale, bias, *, stride, pad, relu, residual=None):
    """Conv2d (+ folded BN affine) (+ residual add) (+ ReLU) as a direct Pallas conv.

    x:        (N, H, W, Cin) NHWC bf16 activations
    w_hwio:   (kh, kw, Cin, Cout) f32 weights
    scale:    (Cout,) per-channel multiplier (BN gamma/sqrt(var+eps) or 1) -> folded
              into the weights on the host (drops a VPU mul + VMEM stream).
    bias:     (Cout,) per-channel additive term (conv bias folded with BN shift)
    residual: (N, Ho, Wo, Cout) or None, fused into the epilogue.
    """
    kh, kw, cin, cout = w_hwio.shape
    n, h, w, _ = x.shape
    ho = (h + 2 * pad - kh) // stride + 1
    wo = (w + 2 * pad - kw) // stride + 1

    if kh == 1 and kw == 1 and stride > 1:
        # 1x1 strided conv (downsample skip): subsample in the wrapper, run stride-1.
        x = x[:, ::stride, ::stride, :][:, :ho, :wo, :]
        stride = 1

    # Fold BN scale into the weights; bf16 for the MXU.
    w_folded = w_hwio.astype(jnp.float32) * scale.reshape(1, 1, 1, cout)
    wmat = w_folded.reshape(kh * kw, cin, cout).astype(jnp.bfloat16)
    b2 = bias.reshape(1, cout).astype(jnp.float32)

    phases = _phase_split(x.astype(jnp.bfloat16), stride, pad)
    s2 = stride * stride
    hph, wph = phases.shape[1], phases.shape[2]

    # cout tile: 256-aligned (v6e/v7x 256x256 MXU), else 128 (v5e), else full.
    tn = 256 if cout % 256 == 0 else (128 if cout % 128 == 0 else cout)
    grid = (n, cout // tn)

    in_specs = [
        pl.BlockSpec((s2, hph, wph, cin), lambda b, j: (b, 0, 0, 0)),
        pl.BlockSpec((kh * kw, cin, tn), lambda b, j: (0, 0, j)),
        pl.BlockSpec((1, tn), lambda b, j: (0, j)),
    ]
    args = [phases, wmat, b2]
    if residual is not None:
        in_specs.append(pl.BlockSpec((1, ho, wo, tn), lambda b, j: (b, 0, 0, j)))
        args.append(residual.astype(jnp.bfloat16))
        kernel = functools.partial(_direct_conv_res_kernel, kh=kh, kw=kw,
                                   stride=stride, ho=ho, wo=wo, relu=relu)
    else:
        kernel = functools.partial(_direct_conv_kernel, kh=kh, kw=kw,
                                   stride=stride, ho=ho, wo=wo, relu=relu)

    return pl.pallas_call(
        kernel,
        out_shape=jax.ShapeDtypeStruct((n, ho, wo, cout), jnp.bfloat16),
        grid=grid,
        in_specs=in_specs,
        out_specs=pl.BlockSpec((1, ho, wo, tn), lambda b, j: (b, 0, 0, j)),
        compiler_params=pltpu.CompilerParams(
            dimension_semantics=("parallel", "parallel"),
            vmem_limit_bytes=_vmem_limit_bytes()),
    )(*args)


def maxpool_pallas(x, *, ksize=3, stride=2, pad=1):
    """MaxPool2d(kernel=3, stride=2, pad=1) via phase-decomposed shifted max."""
    n, h, w, c = x.shape
    ho = (h + 2 * pad - ksize) // stride + 1
    wo = (w + 2 * pad - ksize) // stride + 1
    phases = _phase_split(x, stride, pad, fill=-jnp.inf)
    s2 = stride * stride
    hph, wph = phases.shape[1], phases.shape[2]
    return pl.pallas_call(
        functools.partial(_maxpool_kernel, k=ksize, stride=stride, ho=ho, wo=wo),
        out_shape=jax.ShapeDtypeStruct((n, ho, wo, c), x.dtype),
        grid=(n,),
        in_specs=[pl.BlockSpec((s2, hph, wph, c), lambda b: (b, 0, 0, 0))],
        out_specs=pl.BlockSpec((1, ho, wo, c), lambda b: (b, 0, 0, 0)),
        compiler_params=pltpu.CompilerParams(
            dimension_semantics=("parallel",),
            vmem_limit_bytes=_vmem_limit_bytes()),
    )(phases)


def head_pallas(x_nhwc, w_fc, b_fc):
    """AdaptiveAvgPool2d(1) + Linear, fused in one small Pallas kernel."""
    n, h, w, c = x_nhwc.shape
    ncls = w_fc.shape[1]
    x3 = x_nhwc.reshape(n, h * w, c)
    return pl.pallas_call(
        functools.partial(_head_kernel, inv_hw=1.0 / float(h * w)),
        out_shape=jax.ShapeDtypeStruct((n, ncls), jnp.float32),
        grid=(1,),
        in_specs=[
            pl.BlockSpec((n, h * w, c), lambda i: (0, 0, 0)),
            pl.BlockSpec((c, ncls), lambda i: (0, 0)),
            pl.BlockSpec((1, ncls), lambda i: (0, 0)),
        ],
        out_specs=pl.BlockSpec((n, ncls), lambda i: (0, 0)),
        compiler_params=pltpu.CompilerParams(
            vmem_limit_bytes=_vmem_limit_bytes()),
    )(x3, w_fc.astype(jnp.float32), b_fc.reshape(1, ncls).astype(jnp.float32))


# ----------------------------------------------------------------------------
# Model: parameter init + forward
# ----------------------------------------------------------------------------

class _KeyGen:
    def __init__(self, seed):
        self.key = jax.random.PRNGKey(seed)

    def __call__(self):
        self.key, sub = jax.random.split(self.key)
        return sub


def _init_conv(kg, kh, kw, cin, cout):
    fan_in = kh * kw * cin
    w = jax.random.normal(kg(), (kh, kw, cin, cout), jnp.float32) / jnp.sqrt(float(fan_in))
    b = 0.01 * jax.random.normal(kg(), (cout,), jnp.float32)
    return {"w": w, "b": b}


def _init_bn(kg, c):
    return {
        "gamma": 1.0 + 0.1 * jax.random.normal(kg(), (c,), jnp.float32),
        "beta": 0.1 * jax.random.normal(kg(), (c,), jnp.float32),
        "mean": 0.05 * jax.random.normal(kg(), (c,), jnp.float32),
        "var": 1.0 + 0.1 * jax.random.uniform(kg(), (c,), jnp.float32),
    }


def _fold_bn(conv_bias, bn):
    """BN(conv(x)+b) in eval mode -> per-channel (scale, bias)."""
    s = bn["gamma"] / jnp.sqrt(bn["var"] + BN_EPS)
    return s, s * (conv_bias - bn["mean"]) + bn["beta"]


def _init_residual(kg, cin, cout, stride):
    return {
        "stride": stride,
        "conv1": _init_conv(kg, 3, 3, cin, cout),
        "bn1": _init_bn(kg, cout),
        "conv2": _init_conv(kg, 3, 3, cout, cout),
        "bn2": _init_bn(kg, cout),
        "conv1x1": _init_conv(kg, 1, 1, cin, cout) if cin != cout else None,
    }


def init_resnet(seed, in_channels, num_classes):
    kg = _KeyGen(seed)
    params = {
        "stem": {"conv": _init_conv(kg, 7, 7, in_channels, 64), "bn": _init_bn(kg, 64)},
        "stages": [
            [_init_residual(kg, 64, 64, 1) for _ in range(3)],
            [_init_residual(kg, 64, 128, 2)] + [_init_residual(kg, 128, 128, 1) for _ in range(4)],
            [_init_residual(kg, 128, 256, 2)] + [_init_residual(kg, 256, 256, 1) for _ in range(5)],
            [_init_residual(kg, 256, 512, 2)] + [_init_residual(kg, 512, 512, 1) for _ in range(2)],
        ],
        "fc": {
            "w": jax.random.normal(kg(), (512, num_classes), jnp.float32) / jnp.sqrt(512.0),
            "b": 0.01 * jax.random.normal(kg(), (num_classes,), jnp.float32),
        },
    }
    return params


def residual_block(x, p):
    stride = p["stride"]
    s1, b1 = _fold_bn(p["conv1"]["b"], p["bn1"])
    o1 = conv2d_pallas(x, p["conv1"]["w"], s1, b1, stride=stride, pad=1, relu=True)

    if p["conv1x1"] is not None:
        cout = p["conv1x1"]["w"].shape[-1]
        # Per the PyTorch module, conv1x1 has no BatchNorm: scale = 1, bias = conv bias.
        skip = conv2d_pallas(
            x, p["conv1x1"]["w"],
            jnp.ones((cout,), jnp.float32), p["conv1x1"]["b"],
            stride=stride, pad=0, relu=False)
    else:
        skip = x

    s2, b2 = _fold_bn(p["conv2"]["b"], p["bn2"])
    return conv2d_pallas(o1, p["conv2"]["w"], s2, b2,
                         stride=1, pad=1, relu=True, residual=skip)


def resnet_forward(x_nchw, params):
    # PyTorch NCHW input -> internal NHWC layout, bf16 activations between layers.
    x = jnp.transpose(x_nchw, (0, 2, 3, 1)).astype(jnp.bfloat16)

    # conv1: Conv(7x7, s2, p3) + BN + ReLU
    s, b = _fold_bn(params["stem"]["conv"]["b"], params["stem"]["bn"])
    x = conv2d_pallas(x, params["stem"]["conv"]["w"], s, b, stride=2, pad=3, relu=True)

    # conv2..conv5: MaxPool(3, s2, p1) + residual stages
    x = maxpool_pallas(x, ksize=3, stride=2, pad=1)
    for stage in params["stages"]:
        for blk in stage:
            x = residual_block(x, blk)

    # avg_pool + flatten + fc
    return head_pallas(x, params["fc"]["w"], params["fc"]["b"])


# ----------------------------------------------------------------------------

if __name__ == "__main__":
    in_channels, num_classes = 3, 10
    batch, spatial = 2, 16

    params = init_resnet(seed=0, in_channels=in_channels, num_classes=num_classes)

    key = jax.random.PRNGKey(0)
    x = jax.random.normal(key, (batch, in_channels, spatial, spatial), jnp.float32)

    logits = resnet_forward(x, params)
    logits = jax.block_until_ready(logits)

    assert logits.shape == (batch, num_classes), logits.shape
    assert bool(jnp.all(jnp.isfinite(logits)))
    print("KERNEL_OK")
</pallas_src>

<mosaic_0001>
module attributes {stable_mosaic.version = 11 : i64} {
  func.func @_direct_conv_kernel(%arg0: i32, %arg1: i32, %arg2: memref<4x11x11x3xbf16, #tpu.memory_space<vmem>>, %arg3: memref<49x3x64xbf16, #tpu.memory_space<vmem>>, %arg4: memref<1x64xf32, #tpu.memory_space<vmem>>, %arg5: memref<1x8x8x64xbf16, #tpu.memory_space<vmem>>) attributes {dimension_semantics = [#tpu.dimension_semantics<parallel>, #tpu.dimension_semantics<parallel>], iteration_bounds = array<i64: 2, 1>, scalar_prefetch = 0 : i64, scratch_operands = 0 : i64, tpu.core_type = #tpu.core_type<tc>, window_params = [{transform_indices = @transform_0, window_bounds = array<i64: 4, 11, 11, 3>}, {transform_indices = @transform_1, window_bounds = array<i64: 49, 3, 64>}, {transform_indices = @transform_2, window_bounds = array<i64: 1, 64>}, {transform_indices = @transform_3, window_bounds = array<i64: 1, 8, 8, 64>}]} {
    %cst = arith.constant 0.000000e+00 : f32
    %0 = vector.broadcast %cst : f32 to vector<64x64xf32>
    %c0 = arith.constant 0 : index
    %c0_0 = arith.constant 0 : index
    %c0_1 = arith.constant 0 : index
    %c0_2 = arith.constant 0 : index
    %1 = vector.load %arg2[%c0, %c0_0, %c0_1, %c0_2] : memref<4x11x11x3xbf16, #tpu.memory_space<vmem>>, vector<1x8x8x3xbf16>
    %2 = vector.shape_cast %1 : vector<1x8x8x3xbf16> to vector<8x8x3xbf16>
    %3 = vector.shape_cast %2 : vector<8x8x3xbf16> to vector<64x3xbf16>
    %c0_3 = arith.constant 0 : index
    %c0_4 = arith.constant 0 : index
    %c0_5 = arith.constant 0 : index
    %4 = vector.load %arg3[%c0_3, %c0_4, %c0_5] : memref<49x3x64xbf16, #tpu.memory_space<vmem>>, vector<1x3x64xbf16>
    %5 = vector.shape_cast %4 : vector<1x3x64xbf16> to vector<3x64xbf16>
    %cst_6 = arith.constant dense<0.000000e+00> : vector<64x64xf32>
    %6 = tpu.matmul %3, %5, %cst_6 {dimension_numbers = #tpu.dot_dimension_numbers<[1], [0], [0], [1], [0, 0, 1, 1], [], []>} : vector<64x3xbf16>, vector<3x64xbf16>, vector<64x64xf32> -> vector<64x64xf32>
    %7 = arith.addf %0, %6 : vector<64x64xf32>
    %c1 = arith.constant 1 : index
    %c0_7 = arith.constant 0 : index
    %c0_8 = arith.constant 0 : index
    %c0_9 = arith.constant 0 : index
    %8 = vector.load %arg2[%c1, %c0_7, %c0_8, %c0_9] : memref<4x11x11x3xbf16, #tpu.memory_space<vmem>>, vector<1x8x8x3xbf16>
    %9 = vector.shape_cast %8 : vector<1x8x8x3xbf16> to vector<8x8x3xbf16>
    %10 = vector.shape_cast %9 : vector<8x8x3xbf16> to vector<64x3xbf16>
    %c1_10 = arith.constant 1 : index
    %c0_11 = arith.constant 0 : index
    %c0_12 = arith.constant 0 : index
    %11 = vector.load %arg3[%c1_10, %c0_11, %c0_12] : memref<49x3x64xbf16, #tpu.memory_space<vmem>>, vector<1x3x64xbf16>
    %12 = vector.shape_cast %11 : vector<1x3x64xbf16> to vector<3x64xbf16>
    %cst_13 = arith.constant dense<0.000000e+00> : vector<64x64xf32>
    %13 = tpu.matmul %10, %12, %cst_13 {dimension_numbers = #tpu.dot_dimension_numbers<[1], [0], [0], [1], [0, 0, 1, 1], [], []>} : vector<64x3xbf16>, vector<3x64xbf16>, vector<64x64xf32> -> vector<64x64xf32>
    %14 = arith.addf %7, %13 : vector<64x64xf32>
    %c0_14 = arith.constant 0 : index
    %c0_15 = arith.constant 0 : index
    %c1_16 = arith.constant 1 : index
    %c0_17 = arith.constant 0 : index
    %15 = vector.load %arg2[%c0_14, %c0_15, %c1_16, %c0_17] : memref<4x11x11x3xbf16, #tpu.memory_space<vmem>>, vector<1x8x8x3xbf16>
    %16 = vector.shape_cast %15 : vector<1x8x8x3xbf16> to vector<8x8x3xbf16>
    %17 = vector.shape_cast %16 : vector<8x8x3xbf16> to vector<64x3xbf16>
    %c2 = arith.constant 2 : index
    %c0_18 = arith.constant 0 : index
    %c0_19 = arith.constant 0 : index
    %18 = vector.load %arg3[%c2, %c0_18, %c0_19] : memref<49x3x64xbf16, #tpu.memory_space<vmem>>, vector<1x3x64xbf16>
    %19 = vector.shape_cast %18 : vector<1x3x64xbf16> to vector<3x64xbf16>
    %cst_20 = arith.constant dense<0.000000e+00> : vector<64x64xf32>
    %20 = tpu.matmul %17, %19, %cst_20 {dimension_numbers = #tpu.dot_dimension_numbers<[1], [0], [0], [1], [0, 0, 1, 1], [], []>} : vector<64x3xbf16>, vector<3x64xbf16>, vector<64x64xf32> -> vector<64x64xf32>
    %21 = arith.addf %14, %20 : vector<64x64xf32>
    %c1_21 = arith.constant 1 : index
    %c0_22 = arith.constant 0 : index
    %c1_23 = arith.constant 1 : index
    %c0_24 = arith.constant 0 : index
    %22 = vector.load %arg2[%c1_21, %c0_22, %c1_23, %c0_24] : memref<4x11x11x3xbf16, #tpu.memory_space<vmem>>, vector<1x8x8x3xbf16>
    %23 = vector.shape_cast %22 : vector<1x8x8x3xbf16> to vector<8x8x3xbf16>
    %24 = vector.shape_cast %23 : vector<8x8x3xbf16> to vector<64x3xbf16>
    %c3 = arith.constant 3 : index
    %c0_25 = arith.constant 0 : index
    %c0_26 = arith.constant 0 : index
    %25 = vector.load %arg3[%c3, %c0_25, %c0_26] : memref<49x3x64xbf16, #tpu.memory_space<vmem>>, vector<1x3x64xbf16>
    %26 = vector.shape_cast %25 : vector<1x3x64xbf16> to vector<3x64xbf16>
    %cst_27 = arith.constant dense<0.000000e+00> : vector<64x64xf32>
    %27 = tpu.matmul %24, %26, %cst_27 {dimension_numbers = #tpu.dot_dimension_numbers<[1], [0], [0], [1], [0, 0, 1, 1], [], []>} : vector<64x3xbf16>, vector<3x64xbf16>, vector<64x64xf32> -> vector<64x64xf32>
    %28 = arith.addf %21, %27 : vector<64x64xf32>
    %c0_28 = arith.constant 0 : index
    %c0_29 = arith.constant 0 : index
    %c2_30 = arith.constant 2 : index
    %c0_31 = arith.constant 0 : index
    %29 = vector.load %arg2[%c0_28, %c0_29, %c2_30, %c0_31] : memref<4x11x11x3xbf16, #tpu.memory_space<vmem>>, vector<1x8x8x3xbf16>
    %30 = vector.shape_cast %29 : vector<1x8x8x3xbf16> to vector<8x8x3xbf16>
    %31 = vector.shape_cast %30 : vector<8x8x3xbf16> to vector<64x3xbf16>
    %c4 = arith.constant 4 : index
    %c0_32 = arith.constant 0 : index
    %c0_33 = arith.constant 0 : index
    %32 = vector.load %arg3[%c4, %c0_32, %c0_33] : memref<49x3x64xbf16, #tpu.memory_space<vmem>>, vector<1x3x64xbf16>
    %33 = vector.shape_cast %32 : vector<1x3x64xbf16> to vector<3x64xbf16>
    %cst_34 = arith.constant dense<0.000000e+00> : vector<64x64xf32>
    %34 = tpu.matmul %31, %33, %cst_34 {dimension_numbers = #tpu.dot_dimension_numbers<[1], [0], [0], [1], [0, 0, 1, 1], [], []>} : vector<64x3xbf16>, vector<3x64xbf16>, vector<64x64xf32> -> vector<64x64xf32>
    %35 = arith.addf %28, %34 : vector<64x64xf32>
    %c1_35 = arith.constant 1 : index
    %c0_36 = arith.constant 0 : index
    %c2_37 = arith.constant 2 : index
    %c0_38 = arith.constant 0 : index
    %36 = vector.load %arg2[%c1_35, %c0_36, %c2_37, %c0_38] : memref<4x11x11x3xbf16, #tpu.memory_space<vmem>>, vector<1x8x8x3xbf16>
    %37 = vector.shape_cast %36 : vector<1x8x8x3xbf16> to vector<8x8x3xbf16>
    %38 = vector.shape_cast %37 : vector<8x8x3xbf16> to vector<64x3xbf16>
    %c5 = arith.constant 5 : index
    %c0_39 = arith.constant 0 : index
    %c0_40 = arith.constant 0 : index
    %39 = vector.load %arg3[%c5, %c0_39, %c0_40] : memref<49x3x64xbf16, #tpu.memory_space<vmem>>, vector<1x3x64xbf16>
    %40 = vector.shape_cast %39 : vector<1x3x64xbf16> to vector<3x64xbf16>
    %cst_41 = arith.constant dense<0.000000e+00> : vector<64x64xf32>
    %41 = tpu.matmul %38, %40, %cst_41 {dimension_numbers = #tpu.dot_dimension_numbers<[1], [0], [0], [1], [0, 0, 1, 1], [], []>} : vector<64x3xbf16>, vector<3x64xbf16>, vector<64x64xf32> -> vector<64x64xf32>
    %42 = arith.addf %35, %41 : vector<64x64xf32>
    %c0_42 = arith.constant 0 : index
    %c0_43 = arith.constant 0 : index
    %c3_44 = arith.constant 3 : index
    %c0_45 = arith.constant 0 : index
    %43 = vector.load %arg2[%c0_42, %c0_43, %c3_44, %c0_45] : memref<4x11x11x3xbf16, #tpu.memory_space<vmem>>, vector<1x8x8x3xbf16>
    %44 = vector.shape_cast %43 : vector<1x8x8x3xbf16> to vector<8x8x3xbf16>
    %45 = vector.shape_cast %44 : vector<8x8x3xbf16> to vector<64x3xbf16>
    %c6 = arith.constant 6 : index
    %c0_46 = arith.constant 0 : index
    %c0_47 = arith.constant 0 : index
    %46 = vector.load %arg3[%c6, %c0_46, %c0_47] : memref<49x3x64xbf16, #tpu.memory_space<vmem>>, vector<1x3x64xbf16>
    %47 = vector.shape_cast %46 : vector<1x3x64xbf16> to vector<3x64xbf16>
    %cst_48 = arith.constant dense<0.000000e+00> : vector<64x64xf32>
    %48 = tpu.matmul %45, %47, %cst_48 {dimension_numbers = #tpu.dot_dimension_numbers<[1], [0], [0], [1], [0, 0, 1, 1], [], []>} : vector<64x3xbf16>, vector<3x64xbf16>, vector<64x64xf32> -> vector<64x64xf32>
    %49 = arith.addf %42, %48 : vector<64x64xf32>
    %c2_49 = arith.constant 2 : index
    %c0_50 = arith.constant 0 : index
    %c0_51 = arith.constant 0 : index
    %c0_52 = arith.constant 0 : index
    %50 = vector.load %arg2[%c2_49, %c0_50, %c0_51, %c0_52] : memref<4x11x11x3xbf16, #tpu.memory_space<vmem>>, vector<1x8x8x3xbf16>
    %51 = vector.shape_cast %50 : vector<1x8x8x3xbf16> to vector<8x8x3xbf16>
    %52 = vector.shape_cast %51 : vector<8x8x3xbf16> to vector<64x3xbf16>
    %c7 = arith.constant 7 : index
    %c0_53 = arith.constant 0 : index
    %c0_54 = arith.constant 0 : index
    %53 = vector.load %arg3[%c7, %c0_53, %c0_54] : memref<49x3x64xbf16, #tpu.memory_space<vmem>>, vector<1x3x64xbf16>
    %54 = vector.shape_cast %53 : vector<1x3x64xbf16> to vector<3x64xbf16>
    %cst_55 = arith.constant dense<0.000000e+00> : vector<64x64xf32>
    %55 = tpu.matmul %52, %54, %cst_55 {dimension_numbers = #tpu.dot_dimension_numbers<[1], [0], [0], [1], [0, 0, 1, 1], [], []>} : vector<64x3xbf16>, vector<3x64xbf16>, vector<64x64xf32> -> vector<64x64xf32>
    %56 = arith.addf %49, %55 : vector<64x64xf32>
    %c3_56 = arith.constant 3 : index
    %c0_57 = arith.constant 0 : index
    %c0_58 = arith.constant 0 : index
    %c0_59 = arith.constant 0 : index
    %57 = vector.load %arg2[%c3_56, %c0_57, %c0_58, %c0_59] : memref<4x11x11x3xbf16, #tpu.memory_space<vmem>>, vector<1x8x8x3xbf16>
    %58 = vector.shape_cast %57 : vector<1x8x8x3xbf16> to vector<8x8x3xbf16>
    %59 = vector.shape_cast %58 : vector<8x8x3xbf16> to vector<64x3xbf16>
    %c8 = arith.constant 8 : index
    %c0_60 = arith.constant 0 : index
    %c0_61 = arith.constant 0 : index
    %60 = vector.load %arg3[%c8, %c0_60, %c0_61] : memref<49x3x64xbf16, #tpu.memory_space<vmem>>, vector<1x3x64xbf16>
    %61 = vector.shape_cast %60 : vector<1x3x64xbf16> to vector<3x64xbf16>
    %cst_62 = arith.constant dense<0.000000e+00> : vector<64x64xf32>
    %62 = tpu.matmul %59, %61, %cst_62 {dimension_numbers = #tpu.dot_dimension_numbers<[1], [0], [0], [1], [0, 0, 1, 1], [], []>} : vector<64x3xbf16>, vector<3x64xbf16>, vector<64x64xf32> -> vector<64x64xf32>
    %63 = arith.addf %56, %62 : vector<64x64xf32>
    %c2_63 = arith.constant 2 : index
    %c0_64 = arith.constant 0 : index
    %c1_65 = arith.constant 1 : index
    %c0_66 = arith.constant 0 : index
    %64 = vector.load %arg2[%c2_63, %c0_64, %c1_65, %c0_66] : memref<4x11x11x3xbf16, #tpu.memory_space<vmem>>, vector<1x8x8x3xbf16>
    %65 = vector.shape_cast %64 : vector<1x8x8x3xbf16> to vector<8x8x3xbf16>
    %66 = vector.shape_cast %65 : vector<8x8x3xbf16> to vector<64x3xbf16>
    %c9 = arith.constant 9 : index
    %c0_67 = arith.constant 0 : index
    %c0_68 = arith.constant 0 : index
    %67 = vector.load %arg3[%c9, %c0_67, %c0_68] : memref<49x3x64xbf16, #tpu.memory_space<vmem>>, vector<1x3x64xbf16>
    %68 = vector.shape_cast %67 : vector<1x3x64xbf16> to vector<3x64xbf16>
    %cst_69 = arith.constant dense<0.000000e+00> : vector<64x64xf32>
    %69 = tpu.matmul %66, %68, %cst_69 {dimension_numbers = #tpu.dot_dimension_numbers<[1], [0], [0], [1], [0, 0, 1, 1], [], []>} : vector<64x3xbf16>, vector<3x64xbf16>, vector<64x64xf32> -> vector<64x64xf32>
    %70 = arith.addf %63, %69 : vector<64x64xf32>
    %c3_70 = arith.constant 3 : index
    %c0_71 = arith.constant 0 : index
    %c1_72 = arith.constant 1 : index
    %c0_73 = arith.constant 0 : index
    %71 = vector.load %arg2[%c3_70, %c0_71, %c1_72, %c0_73] : memref<4x11x11x3xbf16, #tpu.memory_space<vmem>>, vector<1x8x8x3xbf16>
    %72 = vector.shape_cast %71 : vector<1x8x8x3xbf16> to vector<8x8x3xbf16>
    %73 = vector.shape_cast %72 : vector<8x8x3xbf16> to vector<64x3xbf16>
    %c10 = arith.constant 10 : index
    %c0_74 = arith.constant 0 : index
    %c0_75 = arith.constant 0 : index
    %74 = vector.load %arg3[%c10, %c0_74, %c0_75] : memref<49x3x64xbf16, #tpu.memory_space<vmem>>, vector<1x3x64xbf16>
    %75 = vector.shape_cast %74 : vector<1x3x64xbf16> to vector<3x64xbf16>
    %cst_76 = arith.constant dense<0.000000e+00> : vector<64x64xf32>
    %76 = tpu.matmul %73, %75, %cst_76 {dimension_numbers = #tpu.dot_dimension_numbers<[1], [0], [0], [1], [0, 0, 1, 1], [], []>} : vector<64x3xbf16>, vector<3x64xbf16>, vector<64x64xf32> -> vector<64x64xf32>
    %77 = arith.addf %70, %76 : vector<64x64xf32>
    %c2_77 = arith.constant 2 : index
    %c0_78 = arith.constant 0 : index
    %c2_79 = arith.constant 2 : index
    %c0_80 = arith.constant 0 : index
    %78 = vector.load %arg2[%c2_77, %c0_78, %c2_79, %c0_80] : memref<4x11x11x3xbf16, #tpu.memory_space<vmem>>, vector<1x8x8x3xbf16>
    %79 = vector.shape_cast %78 : vector<1x8x8x3xbf16> to vector<8x8x3xbf16>
    %80 = vector.shape_cast %79 : vector<8x8x3xbf16> to vector<64x3xbf16>
    %c11 = arith.constant 11 : index
    %c0_81 = arith.constant 0 : index
    %c0_82 = arith.constant 0 : index
    %81 = vector.load %arg3[%c11, %c0_81, %c0_82] : memref<49x3x64xbf16, #tpu.memory_space<vmem>>, vector<1x3x64xbf16>
    %82 = vector.shape_cast %81 : vector<1x3x64xbf16> to vector<3x64xbf16>
    %cst_83 = arith.constant dense<0.000000e+00> : vector<64x64xf32>
    %83 = tpu.matmul %80, %82, %cst_83 {dimension_numbers = #tpu.dot_dimension_numbers<[1], [0], [0], [1], [0, 0, 1, 1], [], []>} : vector<64x3xbf16>, vector<3x64xbf16>, vector<64x64xf32> -> vector<64x64xf32>
    %84 = arith.addf %77, %83 : vector<64x64xf32>
    %c3_84 = arith.constant 3 : index
    %c0_85 = arith.constant 0 : index
    %c2_86 = arith.constant 2 : index
    %c0_87 = arith.constant 0 : index
    %85 = vector.load %arg2[%c3_84, %c0_85, %c2_86, %c0_87] : memref<4x11x11x3xbf16, #tpu.memory_space<vmem>>, vector<1x8x8x3xbf16>
    %86 = vector.shape_cast %85 : vector<1x8x8x3xbf16> to vector<8x8x3xbf16>
    %87 = vector.shape_cast %86 : vector<8x8x3xbf16> to vector<64x3xbf16>
    %c12 = arith.constant 12 : index
    %c0_88 = arith.constant 0 : index
    %c0_89 = arith.constant 0 : index
    %88 = vector.load %arg3[%c12, %c0_88, %c0_89] : memref<49x3x64xbf16, #tpu.memory_space<vmem>>, vector<1x3x64xbf16>
    %89 = vector.shape_cast %88 : vector<1x3x64xbf16> to vector<3x64xbf16>
    %cst_90 = arith.constant dense<0.000000e+00> : vector<64x64xf32>
    %90 = tpu.matmul %87, %89, %cst_90 {dimension_numbers = #tpu.dot_dimension_numbers<[1], [0], [0], [1], [0, 0, 1, 1], [], []>} : vector<64x3xbf16>, vector<3x64xbf16>, vector<64x64xf32> -> vector<64x64xf32>
    %91 = arith.addf %84, %90 : vector<64x64xf32>
    %c2_91 = arith.constant 2 : index
    %c0_92 = arith.constant 0 : index
    %c3_93 = arith.constant 3 : index
    %c0_94 = arith.constant 0 : index
    %92 = vector.load %arg2[%c2_91, %c0_92, %c3_93, %c0_94] : memref<4x11x11x3xbf16, #tpu.memory_space<vmem>>, vector<1x8x8x3xbf16>
    %93 = vector.shape_cast %92 : vector<1x8x8x3xbf16> to vector<8x8x3xbf16>
    %94 = vector.shape_cast %93 : vector<8x8x3xbf16> to vector<64x3xbf16>
    %c13 = arith.constant 13 : index
    %c0_95 = arith.constant 0 : index
    %c0_96 = arith.constant 0 : index
    %95 = vector.load %arg3[%c13, %c0_95, %c0_96] : memref<49x3x64xbf16, #tpu.memory_space<vmem>>, vector<1x3x64xbf16>
    %96 = vector.shape_cast %95 : vector<1x3x64xbf16> to vector<3x64xbf16>
    %cst_97 = arith.constant dense<0.000000e+00> : vector<64x64xf32>
    %97 = tpu.matmul %94, %96, %cst_97 {dimension_numbers = #tpu.dot_dimension_numbers<[1], [0], [0], [1], [0, 0, 1, 1], [], []>} : vector<64x3xbf16>, vector<3x64xbf16>, vector<64x64xf32> -> vector<64x64xf32>
    %98 = arith.addf %91, %97 : vector<64x64xf32>
    %c0_98 = arith.constant 0 : index
    %c1_99 = arith.constant 1 : index
    %c0_100 = arith.constant 0 : index
    %c0_101 = arith.constant 0 : index
    %99 = vector.load %arg2[%c0_98, %c1_99, %c0_100, %c0_101] : memref<4x11x11x3xbf16, #tpu.memory_space<vmem>>, vector<1x8x8x3xbf16>
    %100 = vector.shape_cast %99 : vector<1x8x8x3xbf16> to vector<8x8x3xbf16>
    %101 = vector.shape_cast %100 : vector<8x8x3xbf16> to vector<64x3xbf16>
    %c14 = arith.constant 14 : index
    %c0_102 = arith.constant 0 : index
    %c0_103 = arith.constant 0 : index
    %102 = vector.load %arg3[%c14, %c0_102, %c0_103] : memref<49x3x64xbf16, #tpu.memory_space<vmem>>, vector<1x3x64xbf16>
    %103 = vector.shape_cast %102 : vector<1x3x64xbf16> to vector<3x64xbf16>
    %cst_104 = arith.constant dense<0.000000e+00> : vector<64x64xf32>
    %104 = tpu.matmul %101, %103, %cst_104 {dimension_numbers = #tpu.dot_dimension_numbers<[1], [0], [0], [1], [0, 0, 1, 1], [], []>} : vector<64x3xbf16>, vector<3x64xbf16>, vector<64x64xf32> -> vector<64x64xf32>
    %105 = arith.addf %98, %104 : vector<64x64xf32>
    %c1_105 = arith.constant 1 : index
    %c1_106 = arith.constant 1 : index
    %c0_107 = arith.constant 0 : index
    %c0_108 = arith.constant 0 : index
    %106 = vector.load %arg2[%c1_105, %c1_106, %c0_107, %c0_108] : memref<4x11x11x3xbf16, #tpu.memory_space<vmem>>, vector<1x8x8x3xbf16>
    %107 = vector.shape_cast %106 : vector<1x8x8x3xbf16> to vector<8x8x3xbf16>
    %108 = vector.shape_cast %107 : vector<8x8x3xbf16> to vector<64x3xbf16>
    %c15 = arith.constant 15 : index
    %c0_109 = arith.constant 0 : index
    %c0_110 = arith.constant 0 : index
    %109 = vector.load %arg3[%c15, %c0_109, %c0_110] : memref<49x3x64xbf16, #tpu.memory_space<vmem>>, vector<1x3x64xbf16>
    %110 = vector.shape_cast %109 : vector<1x3x64xbf16> to vector<3x64xbf16>
    %cst_111 = arith.constant dense<0.000000e+00> : vector<64x64xf32>
    %111 = tpu.matmul %108, %110, %cst_111 {dimension_numbers = #tpu.dot_dimension_numbers<[1], [0], [0], [1], [0, 0, 1, 1], [], []>} : vector<64x3xbf16>, vector<3x64xbf16>, vector<64x64xf32> -> vector<64x64xf32>
    %112 = arith.addf %105, %111 : vector<64x64xf32>
    %c0_112 = arith.constant 0 : index
    %c1_113 = arith.constant 1 : index
    %c1_114 = arith.constant 1 : index
    %c0_115 = arith.constant 0 : index
    %113 = vector.load %arg2[%c0_112, %c1_113, %c1_114, %c0_115] : memref<4x11x11x3xbf16, #tpu.memory_space<vmem>>, vector<1x8x8x3xbf16>
    %114 = vector.shape_cast %113 : vector<1x8x8x3xbf16> to vector<8x8x3xbf16>
    %115 = vector.shape_cast %114 : vector<8x8x3xbf16> to vector<64x3xbf16>
    %c16 = arith.constant 16 : index
    %c0_116 = arith.constant 0 : index
    %c0_117 = arith.constant 0 : index
    %116 = vector.load %arg3[%c16, %c0_116, %c0_117] : memref<49x3x64xbf16, #tpu.memory_space<vmem>>, vector<1x3x64xbf16>
    %117 = vector.shape_cast %116 : vector<1x3x64xbf16> to vector<3x64xbf16>
    %cst_118 = arith.constant dense<0.000000e+00> : vector<64x64xf32>
    %118 = tpu.matmul %115, %117, %cst_118 {dimension_numbers = #tpu.dot_dimension_numbers<[1], [0], [0], [1], [0, 0, 1, 1], [], []>} : vector<64x3xbf16>, vector<3x64xbf16>, vector<64x64xf32> -> vector<64x64xf32>
    %119 = arith.addf %112, %118 : vector<64x64xf32>
    %c1_119 = arith.constant 1 : index
    %c1_120 = arith.constant 1 : index
    %c1_121 = arith.constant 1 : index
    %c0_122 = arith.constant 0 : index
    %120 = vector.load %arg2[%c1_119, %c1_120, %c1_121, %c0_122] : memref<4x11x11x3xbf16, #tpu.memory_space<vmem>>, vector<1x8x8x3xbf16>
    %121 = vector.shape_cast %120 : vector<1x8x8x3xbf16> to vector<8x8x3xbf16>
    %122 = vector.shape_cast %121 : vector<8x8x3xbf16> to vector<64x3xbf16>
    %c17 = arith.constant 17 : index
    %c0_123 = arith.constant 0 : index
    %c0_124 = arith.constant 0 : index
    %123 = vector.load %arg3[%c17, %c0_123, %c0_124] : memref<49x3x64xbf16, #tpu.memory_space<vmem>>, vector<1x3x64xbf16>
    %124 = vector.shape_cast %123 : vector<1x3x64xbf16> to vector<3x64xbf16>
    %cst_125 = arith.constant dense<0.000000e+00> : vector<64x64xf32>
    %125 = tpu.matmul %122, %124, %cst_125 {dimension_numbers = #tpu.dot_dimension_numbers<[1], [0], [0], [1], [0, 0, 1, 1], [], []>} : vector<64x3xbf16>, vector<3x64xbf16>, vector<64x64xf32> -> vector<64x64xf32>
    %126 = arith.addf %119, %125 : vector<64x64xf32>
    %c0_126 = arith.constant 0 : index
    %c1_127 = arith.constant 1 : index
    %c2_128 = arith.constant 2 : index
    %c0_129 = arith.constant 0 : index
    %127 = vector.load %arg2[%c0_126, %c1_127, %c2_128, %c0_129] : memref<4x11x11x3xbf16, #tpu.memory_space<vmem>>, vector<1x8x8x3xbf16>
    %128 = vector.shape_cast %127 : vector<1x8x8x3xbf16> to vector<8x8x3xbf16>
    %129 = vector.shape_cast %128 : vector<8x8x3xbf16> to vector<64x3xbf16>
    %c18 = arith.constant 18 : index
    %c0_130 = arith.constant 0 : index
    %c0_131 = arith.constant 0 : index
    %130 = vector.load %arg3[%c18, %c0_130, %c0_131] : memref<49x3x64xbf16, #tpu.memory_space<vmem>>, vector<1x3x64xbf16>
    %131 = vector.shape_cast %130 : vector<1x3x64xbf16> to vector<3x64xbf16>
    %cst_132 = arith.constant dense<0.000000e+00> : vector<64x64xf32>
    %132 = tpu.matmul %129, %131, %cst_132 {dimension_numbers = #tpu.dot_dimension_numbers<[1], [0], [0], [1], [0, 0, 1, 1], [], []>} : vector<64x3xbf16>, vector<3x64xbf16>, vector<64x64xf32> -> vector<64x64xf32>
    %133 = arith.addf %126, %132 : vector<64x64xf32>
    %c1_133 = arith.constant 1 : index
    %c1_134 = arith.constant 1 : index
    %c2_135 = arith.constant 2 : index
    %c0_136 = arith.constant 0 : index
    %134 = vector.load %arg2[%c1_133, %c1_134, %c2_135, %c0_136] : memref<4x11x11x3xbf16, #tpu.memory_space<vmem>>, vector<1x8x8x3xbf16>
    %135 = vector.shape_cast %134 : vector<1x8x8x3xbf16> to vector<8x8x3xbf16>
    %136 = vector.shape_cast %135 : vector<8x8x3xbf16> to vector<64x3xbf16>
    %c19 = arith.constant 19 : index
    %c0_137 = arith.constant 0 : index
    %c0_138 = arith.constant 0 : index
    %137 = vector.load %arg3[%c19, %c0_137, %c0_138] : memref<49x3x64xbf16, #tpu.memory_space<vmem>>, vector<1x3x64xbf16>
    %138 = vector.shape_cast %137 : vector<1x3x64xbf16> to vector<3x64xbf16>
    %cst_139 = arith.constant dense<0.000000e+00> : vector<64x64xf32>
    %139 = tpu.matmul %136, %138, %cst_139 {dimension_numbers = #tpu.dot_dimension_numbers<[1], [0], [0], [1], [0, 0, 1, 1], [], []>} : vector<64x3xbf16>, vector<3x64xbf16>, vector<64x64xf32> -> vector<64x64xf32>
    %140 = arith.addf %133, %139 : vector<64x64xf32>
    %c0_140 = arith.constant 0 : index
    %c1_141 = arith.constant 1 : index
    %c3_142 = arith.constant 3 : index
    %c0_143 = arith.constant 0 : index
    %141 = vector.load %arg2[%c0_140, %c1_141, %c3_142, %c0_143] : memref<4x11x11x3xbf16, #tpu.memory_space<vmem>>, vector<1x8x8x3xbf16>
    %142 = vector.shape_cast %141 : vector<1x8x8x3xbf16> to vector<8x8x3xbf16>
    %143 = vector.shape_cast %142 : vector<8x8x3xbf16> to vector<64x3xbf16>
    %c20 = arith.constant 20 : index
    %c0_144 = arith.constant 0 : index
    %c0_145 = arith.constant 0 : index
    %144 = vector.load %arg3[%c20, %c0_144, %c0_145] : memref<49x3x64xbf16, #tpu.memory_space<vmem>>, vector<1x3x64xbf16>
    %145 = vector.shape_cast %144 : vector<1x3x64xbf16> to vector<3x64xbf16>
    %cst_146 = arith.constant dense<0.000000e+00> : vector<64x64xf32>
    %146 = tpu.matmul %143, %145, %cst_146 {dimension_numbers = #tpu.dot_dimension_numbers<[1], [0], [0], [1], [0, 0, 1, 1], [], []>} : vector<64x3xbf16>, vector<3x64xbf16>, vector<64x64xf32> -> vector<64x64xf32>
    %147 = arith.addf %140, %146 : vector<64x64xf32>
    %c2_147 = arith.constant 2 : index
    %c1_148 = arith.constant 1 : index
    %c0_149 = arith.constant 0 : index
    %c0_150 = arith.constant 0 : index
    %148 = vector.load %arg2[%c2_147, %c1_148, %c0_149, %c0_150] : memref<4x11x11x3xbf16, #tpu.memory_space<vmem>>, vector<1x8x8x3xbf16>
    %149 = vector.shape_cast %148 : vector<1x8x8x3xbf16> to vector<8x8x3xbf16>
    %150 = vector.shape_cast %149 : vector<8x8x3xbf16> to vector<64x3xbf16>
    %c21 = arith.constant 21 : index
    %c0_151 = arith.constant 0 : index
    %c0_152 = arith.constant 0 : index
    %151 = vector.load %arg3[%c21, %c0_151, %c0_152] : memref<49x3x64xbf16, #tpu.memory_space<vmem>>, vector<1x3x64xbf16>
    %152 = vector.shape_cast %151 : vector<1x3x64xbf16> to vector<3x64xbf16>
    %cst_153 = arith.constant dense<0.000000e+00> : vector<64x64xf32>
    %153 = tpu.matmul %150, %152, %cst_153 {dimension_numbers = #tpu.dot_dimension_numbers<[1], [0], [0], [1], [0, 0, 1, 1], [], []>} : vector<64x3xbf16>, vector<3x64xbf16>, vector<64x64xf32> -> vector<64x64xf32>
    %154 = arith.addf %147, %153 : vector<64x64xf32>
    %c3_154 = arith.constant 3 : index
    %c1_155 = arith.constant 1 : index
    %c0_156 = arith.constant 0 : index
    %c0_157 = arith.constant 0 : index
    %155 = vector.load %arg2[%c3_154, %c1_155, %c0_156, %c0_157] : memref<4x11x11x3xbf16, #tpu.memory_space<vmem>>, vector<1x8x8x3xbf16>
    %156 = vector.shape_cast %155 : vector<1x8x8x3xbf16> to vector<8x8x3xbf16>
    %157 = vector.shape_cast %156 : vector<8x8x3xbf16> to vector<64x3xbf16>
    %c22 = arith.constant 22 : index
    %c0_158 = arith.constant 0 : index
    %c0_159 = arith.constant 0 : index
    %158 = vector.load %arg3[%c22, %c0_158, %c0_159] : memref<49x3x64xbf16, #tpu.memory_space<vmem>>, vector<1x3x64xbf16>
    %159 = vector.shape_cast %158 : vector<1x3x64xbf16> to vector<3x64xbf16>
    %cst_160 = arith.constant dense<0.000000e+00> : vector<64x64xf32>
    %160 = tpu.matmul %157, %159, %cst_160 {dimension_numbers = #tpu.dot_dimension_numbers<[1], [0], [0], [1], [0, 0, 1, 1], [], []>} : vector<64x3xbf16>, vector<3x64xbf16>, vector<64x64xf32> -> vector<64x64xf32>
    %161 = arith.addf %154, %160 : vector<64x64xf32>
    %c2_161 = arith.constant 2 : index
    %c1_162 = arith.constant 1 : index
    %c1_163 = arith.constant 1 : index
    %c0_164 = arith.constant 0 : index
    %162 = vector.load %arg2[%c2_161, %c1_162, %c1_163, %c0_164] : memref<4x11x11x3xbf16, #tpu.memory_space<vmem>>, vector<1x8x8x3xbf16>
    %163 = vector.shape_cast %162 : vector<1x8x8x3xbf16> to vector<8x8x3xbf16>
    %164 = vector.shape_cast %163 : vector<8x8x3xbf16> to vector<64x3xbf16>
    %c23 = arith.constant 23 : index
    %c0_165 = arith.constant 0 : index
    %c0_166 = arith.constant 0 : index
    %165 = vector.load %arg3[%c23, %c0_165, %c0_166] : memref<49x3x64xbf16, #tpu.memory_space<vmem>>, vector<1x3x64xbf16>
    %166 = vector.shape_cast %165 : vector<1x3x64xbf16> to vector<3x64xbf16>
    %cst_167 = arith.constant dense<0.000000e+00> : vector<64x64xf32>
    %167 = tpu.matmul %164, %166, %cst_167 {dimension_numbers = #tpu.dot_dimension_numbers<[1], [0], [0], [1], [0, 0, 1, 1], [], []>} : vector<64x3xbf16>, vector<3x64xbf16>, vector<64x64xf32> -> vector<64x64xf32>
    %168 = arith.addf %161, %167 : vector<64x64xf32>
    %c3_168 = arith.constant 3 : index
    %c1_169 = arith.constant 1 : index
    %c1_170 = arith.constant 1 : index
    %c0_171 = arith.constant 0 : index
    %169 = vector.load %arg2[%c3_168, %c1_169, %c1_170, %c0_171] : memref<4x11x11x3xbf16, #tpu.memory_space<vmem>>, vector<1x8x8x3xbf16>
    %170 = vector.shape_cast %169 : vector<1x8x8x3xbf16> to vector<8x8x3xbf16>
    %171 = vector.shape_cast %170 : vector<8x8x3xbf16> to vector<64x3xbf16>
    %c24 = arith.constant 24 : index
    %c0_172 = arith.constant 0 : index
    %c0_173 = arith.constant 0 : index
    %172 = vector.load %arg3[%c24, %c0_172, %c0_173] : memref<49x3x64xbf16, #tpu.memory_space<vmem>>, vector<1x3x64xbf16>
    %173 = vector.shape_cast %172 : vector<1x3x64xbf16> to vector<3x64xbf16>
    %cst_174 = arith.constant dense<0.000000e+00> : vector<64x64xf32>
    %174 = tpu.matmul %171, %173, %cst_174 {dimension_numbers = #tpu.dot_dimension_numbers<[1], [0], [0], [1], [0, 0, 1, 1], [], []>} : vector<64x3xbf16>, vector<3x64xbf16>, vector<64x64xf32> -> vector<64x64xf32>
    %175 = arith.addf %168, %174 : vector<64x64xf32>
    %c2_175 = arith.constant 2 : index
    %c1_176 = arith.constant 1 : index
    %c2_177 = arith.constant 2 : index
    %c0_178 = arith.constant 0 : index
    %176 = vector.load %arg2[%c2_175, %c1_176, %c2_177, %c0_178] : memref<4x11x11x3xbf16, #tpu.memory_space<vmem>>, vector<1x8x8x3xbf16>
    %177 = vector.shape_cast %176 : vector<1x8x8x3xbf16> to vector<8x8x3xbf16>
    %178 = vector.shape_cast %177 : vector<8x8x3xbf16> to vector<64x3xbf16>
    %c25 = arith.constant 25 : index
    %c0_179 = arith.constant 0 : index
    %c0_180 = arith.constant 0 : index
    %179 = vector.load %arg3[%c25, %c0_179, %c0_180] : memref<49x3x64xbf16, #tpu.memory_space<vmem>>, vector<1x3x64xbf16>
    %180 = vector.shape_cast %179 : vector<1x3x64xbf16> to vector<3x64xbf16>
    %cst_181 = arith.constant dense<0.000000e+00> : vector<64x64xf32>
    %181 = tpu.matmul %178, %180, %cst_181 {dimension_numbers = #tpu.dot_dimension_numbers<[1], [0], [0], [1], [0, 0, 1, 1], [], []>} : vector<64x3xbf16>, vector<3x64xbf16>, vector<64x64xf32> -> vector<64x64xf32>
    %182 = arith.addf %175, %181 : vector<64x64xf32>
    %c3_182 = arith.constant 3 : index
    %c1_183 = arith.constant 1 : index
    %c2_184 = arith.constant 2 : index
    %c0_185 = arith.constant 0 : index
    %183 = vector.load %arg2[%c3_182, %c1_183, %c2_184, %c0_185] : memref<4x11x11x3xbf16, #tpu.memory_space<vmem>>, vector<1x8x8x3xbf16>
    %184 = vector.shape_cast %183 : vector<1x8x8x3xbf16> to vector<8x8x3xbf16>
    %185 = vector.shape_cast %184 : vector<8x8x3xbf16> to vector<64x3xbf16>
    %c26 = arith.constant 26 : index
    %c0_186 = arith.constant 0 : index
    %c0_187 = arith.constant 0 : index
    %186 = vector.load %arg3[%c26, %c0_186, %c0_187] : memref<49x3x64xbf16, #tpu.memory_space<vmem>>, vector<1x3x64xbf16>
    %187 = vector.shape_cast %186 : vector<1x3x64xbf16> to vector<3x64xbf16>
    %cst_188 = arith.constant dense<0.000000e+00> : vector<64x64xf32>
    %188 = tpu.matmul %185, %187, %cst_188 {dimension_numbers = #tpu.dot_dimension_numbers<[1], [0], [0], [1], [0, 0, 1, 1], [], []>} : vector<64x3xbf16>, vector<3x64xbf16>, vector<64x64xf32> -> vector<64x64xf32>
    %189 = arith.addf %182, %188 : vector<64x64xf32>
    %c2_189 = arith.constant 2 : index
    %c1_190 = arith.constant 1 : index
    %c3_191 = arith.constant 3 : index
    %c0_192 = arith.constant 0 : index
    %190 = vector.load %arg2[%c2_189, %c1_190, %c3_191, %c0_192] : memref<4x11x11x3xbf16, #tpu.memory_space<vmem>>, vector<1x8x8x3xbf16>
    %191 = vector.shape_cast %190 : vector<1x8x8x3xbf16> to vector<8x8x3xbf16>
    %192 = vector.shape_cast %191 : vector<8x8x3xbf16> to vector<64x3xbf16>
    %c27 = arith.constant 27 : index
    %c0_193 = arith.constant 0 : index
    %c0_194 = arith.constant 0 : index
    %193 = vector.load %arg3[%c27, %c0_193, %c0_194] : memref<49x3x64xbf16, #tpu.memory_space<vmem>>, vector<1x3x64xbf16>
    %194 = vector.shape_cast %193 : vector<1x3x64xbf16> to vector<3x64xbf16>
    %cst_195 = arith.constant dense<0.000000e+00> : vector<64x64xf32>
    %195 = tpu.matmul %192, %194, %cst_195 {dimension_numbers = #tpu.dot_dimension_numbers<[1], [0], [0], [1], [0, 0, 1, 1], [], []>} : vector<64x3xbf16>, vector<3x64xbf16>, vector<64x64xf32> -> vector<64x64xf32>
    %196 = arith.addf %189, %195 : vector<64x64xf32>
    %c0_196 = arith.constant 0 : index
    %c2_197 = arith.constant 2 : index
    %c0_198 = arith.constant 0 : index
    %c0_199 = arith.constant 0 : index
    %197 = vector.load %arg2[%c0_196, %c2_197, %c0_198, %c0_199] : memref<4x11x11x3xbf16, #tpu.memory_space<vmem>>, vector<1x8x8x3xbf16>
    %198 = vector.shape_cast %197 : vector<1x8x8x3xbf16> to vector<8x8x3xbf16>
    %199 = vector.shape_cast %198 : vector<8x8x3xbf16> to vector<64x3xbf16>
    %c28 = arith.constant 28 : index
    %c0_200 = arith.constant 0 : index
    %c0_201 = arith.constant 0 : index
    %200 = vector.load %arg3[%c28, %c0_200, %c0_201] : memref<49x3x64xbf16, #tpu.memory_space<vmem>>, vector<1x3x64xbf16>
    %201 = vector.shape_cast %200 : vector<1x3x64xbf16> to vector<3x64xbf16>
    %cst_202 = arith.constant dense<0.000000e+00> : vector<64x64xf32>
    %202 = tpu.matmul %199, %201, %cst_202 {dimension_numbers = #tpu.dot_dimension_numbers<[1], [0], [0], [1], [0, 0, 1, 1], [], []>} : vector<64x3xbf16>, vector<3x64xbf16>, vector<64x64xf32> -> vector<64x64xf32>
    %203 = arith.addf %196, %202 : vector<64x64xf32>
    %c1_203 = arith.constant 1 : index
    %c2_204 = arith.constant 2 : index
    %c0_205 = arith.constant 0 : index
    %c0_206 = arith.constant 0 : index
    %204 = vector.load %arg2[%c1_203, %c2_204, %c0_205, %c0_206] : memref<4x11x11x3xbf16, #tpu.memory_space<vmem>>, vector<1x8x8x3xbf16>
    %205 = vector.shape_cast %204 : vector<1x8x8x3xbf16> to vector<8x8x3xbf16>
    %206 = vector.shape_cast %205 : vector<8x8x3xbf16> to vector<64x3xbf16>
    %c29 = arith.constant 29 : index
    %c0_207 = arith.constant 0 : index
    %c0_208 = arith.constant 0 : index
    %207 = vector.load %arg3[%c29, %c0_207, %c0_208] : memref<49x3x64xbf16, #tpu.memory_space<vmem>>, vector<1x3x64xbf16>
    %208 = vector.shape_cast %207 : vector<1x3x64xbf16> to vector<3x64xbf16>
    %cst_209 = arith.constant dense<0.000000e+00> : vector<64x64xf32>
    %209 = tpu.matmul %206, %208, %cst_209 {dimension_numbers = #tpu.dot_dimension_numbers<[1], [0], [0], [1], [0, 0, 1, 1], [], []>} : vector<64x3xbf16>, vector<3x64xbf16>, vector<64x64xf32> -> vector<64x64xf32>
    %210 = arith.addf %203, %209 : vector<64x64xf32>
    %c0_210 = arith.constant 0 : index
    %c2_211 = arith.constant 2 : index
    %c1_212 = arith.constant 1 : index
    %c0_213 = arith.constant 0 : index
    %211 = vector.load %arg2[%c0_210, %c2_211, %c1_212, %c0_213] : memref<4x11x11x3xbf16, #tpu.memory_space<vmem>>, vector<1x8x8x3xbf16>
    %212 = vector.shape_cast %211 : vector<1x8x8x3xbf16> to vector<8x8x3xbf16>
    %213 = vector.shape_cast %212 : vector<8x8x3xbf16> to vector<64x3xbf16>
    %c30 = arith.constant 30 : index
    %c0_214 = arith.constant 0 : index
    %c0_215 = arith.constant 0 : index
    %214 = vector.load %arg3[%c30, %c0_214, %c0_215] : memref<49x3x64xbf16, #tpu.memory_space<vmem>>, vector<1x3x64xbf16>
    %215 = vector.shape_cast %214 : vector<1x3x64xbf16> to vector<3x64xbf16>
    %cst_216 = arith.constant dense<0.000000e+00> : vector<64x64xf32>
    %216 = tpu.matmul %213, %215, %cst_216 {dimension_numbers = #tpu.dot_dimension_numbers<[1], [0], [0], [1], [0, 0, 1, 1], [], []>} : vector<64x3xbf16>, vector<3x64xbf16>, vector<64x64xf32> -> vector<64x64xf32>
    %217 = arith.addf %210, %216 : vector<64x64xf32>
    %c1_217 = arith.constant 1 : index
    %c2_218 = arith.constant 2 : index
    %c1_219 = arith.constant 1 : index
    %c0_220 = arith.constant 0 : index
    %218 = vector.load %arg2[%c1_217, %c2_218, %c1_219, %c0_220] : memref<4x11x11x3xbf16, #tpu.memory_space<vmem>>, vector<1x8x8x3xbf16>
    %219 = vector.shape_cast %218 : vector<1x8x8x3xbf16> to vector<8x8x3xbf16>
    %220 = vector.shape_cast %219 : vector<8x8x3xbf16> to vector<64x3xbf16>
    %c31 = arith.constant 31 : index
    %c0_221 = arith.constant 0 : index
    %c0_222 = arith.constant 0 : index
    %221 = vector.load %arg3[%c31, %c0_221, %c0_222] : memref<49x3x64xbf16, #tpu.memory_space<vmem>>, vector<1x3x64xbf16>
    %222 = vector.shape_cast %221 : vector<1x3x64xbf16> to vector<3x64xbf16>
    %cst_223 = arith.constant dense<0.000000e+00> : vector<64x64xf32>
    %223 = tpu.matmul %220, %222, %cst_223 {dimension_numbers = #tpu.dot_dimension_numbers<[1], [0], [0], [1], [0, 0, 1, 1], [], []>} : vector<64x3xbf16>, vector<3x64xbf16>, vector<64x64xf32> -> vector<64x64xf32>
    %224 = arith.addf %217, %223 : vector<64x64xf32>
    %c0_224 = arith.constant 0 : index
    %c2_225 = arith.constant 2 : index
    %c2_226 = arith.constant 2 : index
    %c0_227 = arith.constant 0 : index
    %225 = vector.load %arg2[%c0_224, %c2_225, %c2_226, %c0_227] : memref<4x11x11x3xbf16, #tpu.memory_space<vmem>>, vector<1x8x8x3xbf16>
    %226 = vector.shape_cast %225 : vector<1x8x8x3xbf16> to vector<8x8x3xbf16>
    %227 = vector.shape_cast %226 : vector<8x8x3xbf16> to vector<64x3xbf16>
    %c32 = arith.constant 32 : index
    %c0_228 = arith.constant 0 : index
    %c0_229 = arith.constant 0 : index
    %228 = vector.load %arg3[%c32, %c0_228, %c0_229] : memref<49x3x64xbf16, #tpu.memory_space<vmem>>, vector<1x3x64xbf16>
    %229 = vector.shape_cast %228 : vector<1x3x64xbf16> to vector<3x64xbf16>
    %cst_230 = arith.constant dense<0.000000e+00> : vector<64x64xf32>
    %230 = tpu.matmul %227, %229, %cst_230 {dimension_numbers = #tpu.dot_dimension_numbers<[1], [0], [0], [1], [0, 0, 1, 1], [], []>} : vector<64x3xbf16>, vector<3x64xbf16>, vector<64x64xf32> -> vector<64x64xf32>
    %231 = arith.addf %224, %230 : vector<64x64xf32>
    %c1_231 = arith.constant 1 : index
    %c2_232 = arith.constant 2 : index
    %c2_233 = arith.constant 2 : index
    %c0_234 = arith.constant 0 : index
    %232 = vector.load %arg2[%c1_231, %c2_232, %c2_233, %c0_234] : memref<4x11x11x3xbf16, #tpu.memory_space<vmem>>, vector<1x8x8x3xbf16>
    %233 = vector.shape_cast %232 : vector<1x8x8x3xbf16> to vector<8x8x3xbf16>
    %234 = vector.shape_cast %233 : vector<8x8x3xbf16> to vector<64x3xbf16>
    %c33 = arith.constant 33 : index
    %c0_235 = arith.constant 0 : index
    %c0_236 = arith.constant 0 : index
    %235 = vector.load %arg3[%c33, %c0_235, %c0_236] : memref<49x3x64xbf16, #tpu.memory_space<vmem>>, vector<1x3x64xbf16>
    %236 = vector.shape_cast %235 : vector<1x3x64xbf16> to vector<3x64xbf16>
    %cst_237 = arith.constant dense<0.000000e+00> : vector<64x64xf32>
    %237 = tpu.matmul %234, %236, %cst_237 {dimension_numbers = #tpu.dot_dimension_numbers<[1], [0], [0], [1], [0, 0, 1, 1], [], []>} : vector<64x3xbf16>, vector<3x64xbf16>, vector<64x64xf32> -> vector<64x64xf32>
    %238 = arith.addf %231, %237 : vector<64x64xf32>
    %c0_238 = arith.constant 0 : index
    %c2_239 = arith.constant 2 : index
    %c3_240 = arith.constant 3 : index
    %c0_241 = arith.constant 0 : index
    %239 = vector.load %arg2[%c0_238, %c2_239, %c3_240, %c0_241] : memref<4x11x11x3xbf16, #tpu.memory_space<vmem>>, vector<1x8x8x3xbf16>
    %240 = vector.shape_cast %239 : vector<1x8x8x3xbf16> to vector<8x8x3xbf16>
    %241 = vector.shape_cast %240 : vector<8x8x3xbf16> to vector<64x3xbf16>
    %c34 = arith.constant 34 : index
    %c0_242 = arith.constant 0 : index
    %c0_243 = arith.constant 0 : index
    %242 = vector.load %arg3[%c34, %c0_242, %c0_243] : memref<49x3x64xbf16, #tpu.memory_space<vmem>>, vector<1x3x64xbf16>
    %243 = vector.shape_cast %242 : vector<1x3x64xbf16> to vector<3x64xbf16>
    %cst_244 = arith.constant dense<0.000000e+00> : vector<64x64xf32>
    %244 = tpu.matmul %241, %243, %cst_244 {dimension_numbers = #tpu.dot_dimension_numbers<[1], [0], [0], [1], [0, 0, 1, 1], [], []>} : vector<64x3xbf16>, vector<3x64xbf16>, vector<64x64xf32> -> vector<64x64xf32>
    %245 = arith.addf %238, %244 : vector<64x64xf32>
    %c2_245 = arith.constant 2 : index
    %c2_246 = arith.constant 2 : index
    %c0_247 = arith.constant 0 : index
    %c0_248 = arith.constant 0 : index
    %246 = vector.load %arg2[%c2_245, %c2_246, %c0_247, %c0_248] : memref<4x11x11x3xbf16, #tpu.memory_space<vmem>>, vector<1x8x8x3xbf16>
    %247 = vector.shape_cast %246 : vector<1x8x8x3xbf16> to vector<8x8x3xbf16>
    %248 = vector.shape_cast %247 : vector<8x8x3xbf16> to vector<64x3xbf16>
    %c35 = arith.constant 35 : index
    %c0_249 = arith.constant 0 : index
    %c0_250 = arith.constant 0 : index
    %249 = vector.load %arg3[%c35, %c0_249, %c0_250] : memref<49x3x64xbf16, #tpu.memory_space<vmem>>, vector<1x3x64xbf16>
    %250 = vector.shape_cast %249 : vector<1x3x64xbf16> to vector<3x64xbf16>
    %cst_251 = arith.constant dense<0.000000e+00> : vector<64x64xf32>
    %251 = tpu.matmul %248, %250, %cst_251 {dimension_numbers = #tpu.dot_dimension_numbers<[1], [0], [0], [1], [0, 0, 1, 1], [], []>} : vector<64x3xbf16>, vector<3x64xbf16>, vector<64x64xf32> -> vector<64x64xf32>
    %252 = arith.addf %245, %251 : vector<64x64xf32>
    %c3_252 = arith.constant 3 : index
    %c2_253 = arith.constant 2 : index
    %c0_254 = arith.constant 0 : index
    %c0_255 = arith.constant 0 : index
    %253 = vector.load %arg2[%c3_252, %c2_253, %c0_254, %c0_255] : memref<4x11x11x3xbf16, #tpu.memory_space<vmem>>, vector<1x8x8x3xbf16>
    %254 = vector.shape_cast %253 : vector<1x8x8x3xbf16> to vector<8x8x3xbf16>
    %255 = vector.shape_cast %254 : vector<8x8x3xbf16> to vector<64x3xbf16>
    %c36 = arith.constant 36 : index
    %c0_256 = arith.constant 0 : index
    %c0_257 = arith.constant 0 : index
    %256 = vector.load %arg3[%c36, %c0_256, %c0_257] : memref<49x3x64xbf16, #tpu.memory_space<vmem>>, vector<1x3x64xbf16>
    %257 = vector.shape_cast %256 : vector<1x3x64xbf16> to vector<3x64xbf16>
    %cst_258 = arith.constant dense<0.000000e+00> : vector<64x64xf32>
    %258 = tpu.matmul %255, %257, %cst_258 {dimension_numbers = #tpu.dot_dimension_numbers<[1], [0], [0], [1], [0, 0, 1, 1], [], []>} : vector<64x3xbf16>, vector<3x64xbf16>, vector<64x64xf32> -> vector<64x64xf32>
    %259 = arith.addf %252, %258 : vector<64x64xf32>
    %c2_259 = arith.constant 2 : index
    %c2_260 = arith.constant 2 : index
    %c1_261 = arith.constant 1 : index
    %c0_262 = arith.constant 0 : index
    %260 = vector.load %arg2[%c2_259, %c2_260, %c1_261, %c0_262] : memref<4x11x11x3xbf16, #tpu.memory_space<vmem>>, vector<1x8x8x3xbf16>
    %261 = vector.shape_cast %260 : vector<1x8x8x3xbf16> to vector<8x8x3xbf16>
    %262 = vector.shape_cast %261 : vector<8x8x3xbf16> to vector<64x3xbf16>
    %c37 = arith.constant 37 : index
    %c0_263 = arith.constant 0 : index
    %c0_264 = arith.constant 0 : index
    %263 = vector.load %arg3[%c37, %c0_263, %c0_264] : memref<49x3x64xbf16, #tpu.memory_space<vmem>>, vector<1x3x64xbf16>
    %264 = vector.shape_cast %263 : vector<1x3x64xbf16> to vector<3x64xbf16>
    %cst_265 = arith.constant dense<0.000000e+00> : vector<64x64xf32>
    %265 = tpu.matmul %262, %264, %cst_265 {dimension_numbers = #tpu.dot_dimension_numbers<[1], [0], [0], [1], [0, 0, 1, 1], [], []>} : vector<64x3xbf16>, vector<3x64xbf16>, vector<64x64xf32> -> vector<64x64xf32>
    %266 = arith.addf %259, %265 : vector<64x64xf32>
    %c3_266 = arith.constant 3 : index
    %c2_267 = arith.constant 2 : index
    %c1_268 = arith.constant 1 : index
    %c0_269 = arith.constant 0 : index
    %267 = vector.load %arg2[%c3_266, %c2_267, %c1_268, %c0_269] : memref<4x11x11x3xbf16, #tpu.memory_space<vmem>>, vector<1x8x8x3xbf16>
    %268 = vector.shape_cast %267 : vector<1x8x8x3xbf16> to vector<8x8x3xbf16>
    %269 = vector.shape_cast %268 : vector<8x8x3xbf16> to vector<64x3xbf16>
    %c38 = arith.constant 38 : index
    %c0_270 = arith.constant 0 : index
    %c0_271 = arith.constant 0 : index
    %270 = vector.load %arg3[%c38, %c0_270, %c0_271] : memref<49x3x64xbf16, #tpu.memory_space<vmem>>, vector<1x3x64xbf16>
    %271 = vector.shape_cast %270 : vector<1x3x64xbf16> to vector<3x64xbf16>
    %cst_272 = arith.constant dense<0.000000e+00> : vector<64x64xf32>
    %272 = tpu.matmul %269, %271, %cst_272 {dimension_numbers = #tpu.dot_dimension_numbers<[1], [0], [0], [1], [0, 0, 1, 1], [], []>} : vector<64x3xbf16>, vector<3x64xbf16>, vector<64x64xf32> -> vector<64x64xf32>
    %273 = arith.addf %266, %272 : vector<64x64xf32>
    %c2_273 = arith.constant 2 : index
    %c2_274 = arith.constant 2 : index
    %c2_275 = arith.constant 2 : index
    %c0_276 = arith.constant 0 : index
    %274 = vector.load %arg2[%c2_273, %c2_274, %c2_275, %c0_276] : memref<4x11x11x3xbf16, #tpu.memory_space<vmem>>, vector<1x8x8x3xbf16>
    %275 = vector.shape_cast %274 : vector<1x8x8x3xbf16> to vector<8x8x3xbf16>
    %276 = vector.shape_cast %275 : vector<8x8x3xbf16> to vector<64x3xbf16>
    %c39 = arith.constant 39 : index
    %c0_277 = arith.constant 0 : index
    %c0_278 = arith.constant 0 : index
    %277 = vector.load %arg3[%c39, %c0_277, %c0_278] : memref<49x3x64xbf16, #tpu.memory_space<vmem>>, vector<1x3x64xbf16>
    %278 = vector.shape_cast %277 : vector<1x3x64xbf16> to vector<3x64xbf16>
    %cst_279 = arith.constant dense<0.000000e+00> : vector<64x64xf32>
    %279 = tpu.matmul %276, %278, %cst_279 {dimension_numbers = #tpu.dot_dimension_numbers<[1], [0], [0], [1], [0, 0, 1, 1], [], []>} : vector<64x3xbf16>, vector<3x64xbf16>, vector<64x64xf32> -> vector<64x64xf32>
    %280 = arith.addf %273, %279 : vector<64x64xf32>
    %c3_280 = arith.constant 3 : index
    %c2_281 = arith.constant 2 : index
    %c2_282 = arith.constant 2 : index
    %c0_283 = arith.constant 0 : index
    %281 = vector.load %arg2[%c3_280, %c2_281, %c2_282, %c0_283] : memref<4x11x11x3xbf16, #tpu.memory_space<vmem>>, vector<1x8x8x3xbf16>
    %282 = vector.shape_cast %281 : vector<1x8x8x3xbf16> to vector<8x8x3xbf16>
    %283 = vector.shape_cast %282 : vector<8x8x3xbf16> to vector<64x3xbf16>
    %c40 = arith.constant 40 : index
    %c0_284 = arith.constant 0 : index
    %c0_285 = arith.constant 0 : index
    %284 = vector.load %arg3[%c40, %c0_284, %c0_285] : memref<49x3x64xbf16, #tpu.memory_space<vmem>>, vector<1x3x64xbf16>
    %285 = vector.shape_cast %284 : vector<1x3x64xbf16> to vector<3x64xbf16>
    %cst_286 = arith.constant dense<0.000000e+00> : vector<64x64xf32>
    %286 = tpu.matmul %283, %285, %cst_286 {dimension_numbers = #tpu.dot_dimension_numbers<[1], [0], [0], [1], [0, 0, 1, 1], [], []>} : vector<64x3xbf16>, vector<3x64xbf16>, vector<64x64xf32> -> vector<64x64xf32>
    %287 = arith.addf %280, %286 : vector<64x64xf32>
    %c2_287 = arith.constant 2 : index
    %c2_288 = arith.constant 2 : index
    %c3_289 = arith.constant 3 : index
    %c0_290 = arith.constant 0 : index
    %288 = vector.load %arg2[%c2_287, %c2_288, %c3_289, %c0_290] : memref<4x11x11x3xbf16, #tpu.memory_space<vmem>>, vector<1x8x8x3xbf16>
    %289 = vector.shape_cast %288 : vector<1x8x8x3xbf16> to vector<8x8x3xbf16>
    %290 = vector.shape_cast %289 : vector<8x8x3xbf16> to vector<64x3xbf16>
    %c41 = arith.constant 41 : index
    %c0_291 = arith.constant 0 : index
    %c0_292 = arith.constant 0 : index
    %291 = vector.load %arg3[%c41, %c0_291, %c0_292] : memref<49x3x64xbf16, #tpu.memory_space<vmem>>, vector<1x3x64xbf16>
    %292 = vector.shape_cast %291 : vector<1x3x64xbf16> to vector<3x64xbf16>
    %cst_293 = arith.constant dense<0.000000e+00> : vector<64x64xf32>
    %293 = tpu.matmul %290, %292, %cst_293 {dimension_numbers = #tpu.dot_dimension_numbers<[1], [0], [0], [1], [0, 0, 1, 1], [], []>} : vector<64x3xbf16>, vector<3x64xbf16>, vector<64x64xf32> -> vector<64x64xf32>
    %294 = arith.addf %287, %293 : vector<64x64xf32>
    %c0_294 = arith.constant 0 : index
    %c3_295 = arith.constant 3 : index
    %c0_296 = arith.constant 0 : index
    %c0_297 = arith.constant 0 : index
    %295 = vector.load %arg2[%c0_294, %c3_295, %c0_296, %c0_297] : memref<4x11x11x3xbf16, #tpu.memory_space<vmem>>, vector<1x8x8x3xbf16>
    %296 = vector.shape_cast %295 : vector<1x8x8x3xbf16> to vector<8x8x3xbf16>
    %297 = vector.shape_cast %296 : vector<8x8x3xbf16> to vector<64x3xbf16>
    %c42 = arith.constant 42 : index
    %c0_298 = arith.constant 0 : index
    %c0_299 = arith.constant 0 : index
    %298 = vector.load %arg3[%c42, %c0_298, %c0_299] : memref<49x3x64xbf16, #tpu.memory_space<vmem>>, vector<1x3x64xbf16>
    %299 = vector.shape_cast %298 : vector<1x3x64xbf16> to vector<3x64xbf16>
    %cst_300 = arith.constant dense<0.000000e+00> : vector<64x64xf32>
    %300 = tpu.matmul %297, %299, %cst_300 {dimension_numbers = #tpu.dot_dimension_numbers<[1], [0], [0], [1], [0, 0, 1, 1], [], []>} : vector<64x3xbf16>, vector<3x64xbf16>, vector<64x64xf32> -> vector<64x64xf32>
    %301 = arith.addf %294, %300 : vector<64x64xf32>
    %c1_301 = arith.constant 1 : index
    %c3_302 = arith.constant 3 : index
    %c0_303 = arith.constant 0 : index
    %c0_304 = arith.constant 0 : index
    %302 = vector.load %arg2[%c1_301, %c3_302, %c0_303, %c0_304] : memref<4x11x11x3xbf16, #tpu.memory_space<vmem>>, vector<1x8x8x3xbf16>
    %303 = vector.shape_cast %302 : vector<1x8x8x3xbf16> to vector<8x8x3xbf16>
    %304 = vector.shape_cast %303 : vector<8x8x3xbf16> to vector<64x3xbf16>
    %c43 = arith.constant 43 : index
    %c0_305 = arith.constant 0 : index
    %c0_306 = arith.constant 0 : index
    %305 = vector.load %arg3[%c43, %c0_305, %c0_306] : memref<49x3x64xbf16, #tpu.memory_space<vmem>>, vector<1x3x64xbf16>
    %306 = vector.shape_cast %305 : vector<1x3x64xbf16> to vector<3x64xbf16>
    %cst_307 = arith.constant dense<0.000000e+00> : vector<64x64xf32>
    %307 = tpu.matmul %304, %306, %cst_307 {dimension_numbers = #tpu.dot_dimension_numbers<[1], [0], [0], [1], [0, 0, 1, 1], [], []>} : vector<64x3xbf16>, vector<3x64xbf16>, vector<64x64xf32> -> vector<64x64xf32>
    %308 = arith.addf %301, %307 : vector<64x64xf32>
    %c0_308 = arith.constant 0 : index
    %c3_309 = arith.constant 3 : index
    %c1_310 = arith.constant 1 : index
    %c0_311 = arith.constant 0 : index
    %309 = vector.load %arg2[%c0_308, %c3_309, %c1_310, %c0_311] : memref<4x11x11x3xbf16, #tpu.memory_space<vmem>>, vector<1x8x8x3xbf16>
    %310 = vector.shape_cast %309 : vector<1x8x8x3xbf16> to vector<8x8x3xbf16>
    %311 = vector.shape_cast %310 : vector<8x8x3xbf16> to vector<64x3xbf16>
    %c44 = arith.constant 44 : index
    %c0_312 = arith.constant 0 : index
    %c0_313 = arith.constant 0 : index
    %312 = vector.load %arg3[%c44, %c0_312, %c0_313] : memref<49x3x64xbf16, #tpu.memory_space<vmem>>, vector<1x3x64xbf16>
    %313 = vector.shape_cast %312 : vector<1x3x64xbf16> to vector<3x64xbf16>
    %cst_314 = arith.constant dense<0.000000e+00> : vector<64x64xf32>
    %314 = tpu.matmul %311, %313, %cst_314 {dimension_numbers = #tpu.dot_dimension_numbers<[1], [0], [0], [1], [0, 0, 1, 1], [], []>} : vector<64x3xbf16>, vector<3x64xbf16>, vector<64x64xf32> -> vector<64x64xf32>
    %315 = arith.addf %308, %314 : vector<64x64xf32>
    %c1_315 = arith.constant 1 : index
    %c3_316 = arith.constant 3 : index
    %c1_317 = arith.constant 1 : index
    %c0_318 = arith.constant 0 : index
    %316 = vector.load %arg2[%c1_315, %c3_316, %c1_317, %c0_318] : memref<4x11x11x3xbf16, #tpu.memory_space<vmem>>, vector<1x8x8x3xbf16>
    %317 = vector.shape_cast %316 : vector<1x8x8x3xbf16> to vector<8x8x3xbf16>
    %318 = vector.shape_cast %317 : vector<8x8x3xbf16> to vector<64x3xbf16>
    %c45 = arith.constant 45 : index
    %c0_319 = arith.constant 0 : index
    %c0_320 = arith.constant 0 : index
    %319 = vector.load %arg3[%c45, %c0_319, %c0_320] : memref<49x3x64xbf16, #tpu.memory_space<vmem>>, vector<1x3x64xbf16>
    %320 = vector.shape_cast %319 : vector<1x3x64xbf16> to vector<3x64xbf16>
    %cst_321 = arith.constant dense<0.000000e+00> : vector<64x64xf32>
    %321 = tpu.matmul %318, %320, %cst_321 {dimension_numbers = #tpu.dot_dimension_numbers<[1], [0], [0], [1], [0, 0, 1, 1], [], []>} : vector<64x3xbf16>, vector<3x64xbf16>, vector<64x64xf32> -> vector<64x64xf32>
    %322 = arith.addf %315, %321 : vector<64x64xf32>
    %c0_322 = arith.constant 0 : index
    %c3_323 = arith.constant 3 : index
    %c2_324 = arith.constant 2 : index
    %c0_325 = arith.constant 0 : index
    %323 = vector.load %arg2[%c0_322, %c3_323, %c2_324, %c0_325] : memref<4x11x11x3xbf16, #tpu.memory_space<vmem>>, vector<1x8x8x3xbf16>
    %324 = vector.shape_cast %323 : vector<1x8x8x3xbf16> to vector<8x8x3xbf16>
    %325 = vector.shape_cast %324 : vector<8x8x3xbf16> to vector<64x3xbf16>
    %c46 = arith.constant 46 : index
    %c0_326 = arith.constant 0 : index
    %c0_327 = arith.constant 0 : index
    %326 = vector.load %arg3[%c46, %c0_326, %c0_327] : memref<49x3x64xbf16, #tpu.memory_space<vmem>>, vector<1x3x64xbf16>
    %327 = vector.shape_cast %326 : vector<1x3x64xbf16> to vector<3x64xbf16>
    %cst_328 = arith.constant dense<0.000000e+00> : vector<64x64xf32>
    %328 = tpu.matmul %325, %327, %cst_328 {dimension_numbers = #tpu.dot_dimension_numbers<[1], [0], [0], [1], [0, 0, 1, 1], [], []>} : vector<64x3xbf16>, vector<3x64xbf16>, vector<64x64xf32> -> vector<64x64xf32>
    %329 = arith.addf %322, %328 : vector<64x64xf32>
    %c1_329 = arith.constant 1 : index
    %c3_330 = arith.constant 3 : index
    %c2_331 = arith.constant 2 : index
    %c0_332 = arith.constant 0 : index
    %330 = vector.load %arg2[%c1_329, %c3_330, %c2_331, %c0_332] : memref<4x11x11x3xbf16, #tpu.memory_space<vmem>>, vector<1x8x8x3xbf16>
    %331 = vector.shape_cast %330 : vector<1x8x8x3xbf16> to vector<8x8x3xbf16>
    %332 = vector.shape_cast %331 : vector<8x8x3xbf16> to vector<64x3xbf16>
    %c47 = arith.constant 47 : index
    %c0_333 = arith.constant 0 : index
    %c0_334 = arith.constant 0 : index
    %333 = vector.load %arg3[%c47, %c0_333, %c0_334] : memref<49x3x64xbf16, #tpu.memory_space<vmem>>, vector<1x3x64xbf16>
    %334 = vector.shape_cast %333 : vector<1x3x64xbf16> to vector<3x64xbf16>
    %cst_335 = arith.constant dense<0.000000e+00> : vector<64x64xf32>
    %335 = tpu.matmul %332, %334, %cst_335 {dimension_numbers = #tpu.dot_dimension_numbers<[1], [0], [0], [1], [0, 0, 1, 1], [], []>} : vector<64x3xbf16>, vector<3x64xbf16>, vector<64x64xf32> -> vector<64x64xf32>
    %336 = arith.addf %329, %335 : vector<64x64xf32>
    %c0_336 = arith.constant 0 : index
    %c3_337 = arith.constant 3 : index
    %c3_338 = arith.constant 3 : index
    %c0_339 = arith.constant 0 : index
    %337 = vector.load %arg2[%c0_336, %c3_337, %c3_338, %c0_339] : memref<4x11x11x3xbf16, #tpu.memory_space<vmem>>, vector<1x8x8x3xbf16>
    %338 = vector.shape_cast %337 : vector<1x8x8x3xbf16> to vector<8x8x3xbf16>
    %339 = vector.shape_cast %338 : vector<8x8x3xbf16> to vector<64x3xbf16>
    %c48 = arith.constant 48 : index
    %c0_340 = arith.constant 0 : index
    %c0_341 = arith.constant 0 : index
    %340 = vector.load %arg3[%c48, %c0_340, %c0_341] : memref<49x3x64xbf16, #tpu.memory_space<vmem>>, vector<1x3x64xbf16>
    %341 = vector.shape_cast %340 : vector<1x3x64xbf16> to vector<3x64xbf16>
    %cst_342 = arith.constant dense<0.000000e+00> : vector<64x64xf32>
    %342 = tpu.matmul %339, %341, %cst_342 {dimension_numbers = #tpu.dot_dimension_numbers<[1], [0], [0], [1], [0, 0, 1, 1], [], []>} : vector<64x3xbf16>, vector<3x64xbf16>, vector<64x64xf32> -> vector<64x64xf32>
    %343 = arith.addf %336, %342 : vector<64x64xf32>
    %c0_343 = arith.constant 0 : index
    %c0_344 = arith.constant 0 : index
    %344 = vector.load %arg4[%c0_343, %c0_344] : memref<1x64xf32, #tpu.memory_space<vmem>>, vector<1x64xf32>
    %345 = vector.broadcast %344 : vector<1x64xf32> to vector<64x64xf32>
    %346 = arith.addf %343, %345 : vector<64x64xf32>
    %cst_345 = arith.constant 0.000000e+00 : f32
    %347 = vector.broadcast %cst_345 : f32 to vector<64x64xf32>
    %348 = arith.maximumf %346, %347 : vector<64x64xf32>
    %349 = vector.shape_cast %348 : vector<64x64xf32> to vector<8x8x64xf32>
    %350 = arith.truncf %349 : vector<8x8x64xf32> to vector<8x8x64xbf16>
    %c0_346 = arith.constant 0 : index
    %c0_347 = arith.constant 0 : index
    %c0_348 = arith.constant 0 : index
    %c0_349 = arith.constant 0 : index
    %351 = vector.load %arg5[%c0_346, %c0_347, %c0_348, %c0_349] : memref<1x8x8x64xbf16, #tpu.memory_space<vmem>>, vector<1x8x8x64xbf16>
    %352 = vector.shape_cast %351 : vector<1x8x8x64xbf16> to vector<8x8x64xbf16>
    %353 = vector.shape_cast %350 : vector<8x8x64xbf16> to vector<1x8x8x64xbf16>
    tpu.vector_store %arg5[%c0_346, %c0_347, %c0_348, %c0_349], %353 {strides = array<i32>} : memref<1x8x8x64xbf16, #tpu.memory_space<vmem>>, vector<1x8x8x64xbf16>,
    return
  }
  func.func @transform_0(%arg0: i32, %arg1: i32) -> (i32, i32, i32, i32) {
    %c0_i32 = arith.constant 0 : i32
    %c0_i32_0 = arith.constant 0 : i32
    %c0_i32_1 = arith.constant 0 : i32
    %c0_i32_2 = arith.constant 0 : i32
    return %arg0, %c0_i32, %c0_i32_0, %c0_i32_1 : i32, i32, i32, i32
  }
  func.func @transform_1(%arg0: i32, %arg1: i32) -> (i32, i32, i32) {
    %c0_i32 = arith.constant 0 : i32
    %c0_i32_0 = arith.constant 0 : i32
    %c0_i32_1 = arith.constant 0 : i32
    return %c0_i32, %c0_i32_0, %arg1 : i32, i32, i32
  }
  func.func @transform_2(%arg0: i32, %arg1: i32) -> (i32, i32) {
    %c0_i32 = arith.constant 0 : i32
    %c0_i32_0 = arith.constant 0 : i32
    return %c0_i32, %arg1 : i32, i32
  }
  func.func @transform_3(%arg0: i32, %arg1: i32) -> (i32, i32, i32, i32) {
    %c0_i32 = arith.constant 0 : i32
    %c0_i32_0 = arith.constant 0 : i32
    %c0_i32_1 = arith.constant 0 : i32
    return %arg0, %c0_i32, %c0_i32_0, %arg1 : i32, i32, i32, i32
  }
}

</mosaic_0001>

<bundles_post_ra>
// kernel: tpu_custom_call.1
= control target key start
LH: loop header
LB: loop body
LE: loop exit
PB: predicated region body
PF: predicated region fallthrough
CT: control target
= control target key end

     0   :  { %8 = vsyncpa [#allocation3], 0  ;;  %s12117_s0 = inlined_call_operand.vmem [shape: bf16[8,11,11,3], index: 0, kind: input, shape index: {}]   ;;  %s12118_s1 = inlined_call_operand.vmem [shape: bf16[49,3,64], index: 1, kind: input, shape index: {}]   ;;  %s12119_s2 = inlined_call_operand.vmem [shape: f32[1,64], index: 2, kind: input, shape index: {}]   ;;  %s12120_s3 = inlined_call_operand.hbm [shape: bf16[2,8,8,64], index: 3, kind: output, shape index: {}]  }
   0x1   :  { %10 = vsyncpa [#allocation3 + $0x1], 0  ;;  %s8763_s12 = smov 0   ;;  %s8765_s13 = smov 0  }
   0x2   :  { %s8767_s14 = smov 0   ;;  %s8769_s15 = smov 0  }
   0x3   :  { %s8771_s16 = smov 0   ;;  %s8773_s17 = smov 0  }
   0x4 LB: > { %s7481_s18 = sadd.s32 4294967295, %s8738_s17   ;;  %s7482_s19 = sadd.s32 4294967294, %s8738_s17   ;;  %s8738_s17 = sphi %s8773_s17, %s16_s17   ;;  %s8734_s16 = sphi %s8771_s16, %s12137_s16   ;;  %s8730_s15 = sphi %s8769_s15, %s12136_s15   ;;  %s8726_s14 = sphi %s8767_s14, %s12135_s14   ;;  %s8722_s13 = sphi %s8765_s13, %s12134_s13   ;;  %s8718_s12 = sphi %s8763_s12, %s12133_s12  }
   0x5   : > { %s28_s20 = sadd.s32 1, %s8734_s16  ;;  %s115_s21 = sadd.s32 1, %s8726_s14 }
   0x6   : > { %p30_p0 = scmp.ge.s32.totalorder %s28_s20, 2  ;;  %p125_p1 = scmp.ne.s32.totalorder %s8726_s14, %s8722_s13 }
   0x7   : > { %p126_p2 = scmp.eq.s32.totalorder %s7481_s18, 1  ;;  %p131_p3 = scmp.ne.s32.totalorder %s8722_s13, %s8718_s12 }
   0x8   : > { %s12139_s20 = smov (%p30_p0, %s28_s20), 0  ;;  %p132_p5 = scmp.eq.s32.totalorder %s7482_s19, 1 }
   0x9   : > { %p8803_p4 = por %p126_p2, %p125_p1  ;;  %s110_s23 = ssub.s32 %s8734_s16, %s12139_s20 }
   0xa   : > { %p7487_p6 = scmp.ge.s32.totalorder %s8738_s17, 1  ;;  %p113_p7 = scmp.eq.s32.totalorder %s110_s23, 0 }
   0xb   : > { %p8810_p8 = por %p132_p5, %p131_p3  ;;  %p173_p9 = scmp.lt.s32.totalorder %s8738_s17, 3 }
   0xc   : > { %s8816_s25 = scalar_select %p113_p7, %s8726_s14, %s115_s21  }
   0xd   : > { %p174_p10 = pnand %p7487_p6, %p173_p9 }
   0xe   : > { %s7489_s28 = sshll.u32 (!%p174_p10), %s8730_s15, 2  ;;  %s202_s6 = sand.u32 (!%p174_p10), 1, %s8722_s13  }
   0xf   : > { %177 = sbr.rel (%p174_p10) target bundleno = 953 (0x3b9), region = 32  ;;  %p206_p11 = scmp.lt.s32.totalorder (!%p174_p10), %s7489_s28, 7 }
  0x10   : > { %s7488_s7 = sshll.u32 (!%p174_p10), %s202_s6, 5  ;;  %s8596_s9 = sshll.u32 (!%p174_p10), %s8730_s15, 5 }
  0x11   : > { %s12031_s8 = scalar_lea.vmem (!%p174_p10), [#allocation2], %s7488_s7  ;;  %s7378_s18 = scalar_lea.hbm (!%p174_p10), %s12120_s3, %s8596_s9 }
  0x12   : > { %s7379_s19 = sshll.u32 (!%p174_p10), %s12031_s8, 4  ;;  %s7381_s21 = sshll.u32 (!%p174_p10), %s7378_s18, 4  ;;  %s7380_s19 = int_to_ptr.vmem [resolvable:$true] %s7379_s19  ;;  %s7382_s21 = int_to_ptr.hbm [resolvable:$true] %s7381_s21 }
  0x13   : > { %s7366_s15 = scalar_lea.sflag (!%p174_p10), [#allocation3], %s202_s6  ;;  %s8674_s26 = sshra.s32 (!%p174_p10), %s7382_s21, 4  ;;  %s8675_s26 = int_to_ptr.hbm [resolvable:$true] %s8674_s26 }
  0x14   : > { %v7499_v0 = vld [vmem:[%s12118_s1 + $0x2] sm:$0x3]  ;;  %vm273_vm0 = vcmask 1040384   ;;  %vm274_vm1 = vcmask 1041408   ;;  %v8740_v1 = vmov 65535   ;;  %s12141_s28 = smov (!%p206_p11, %s7489_s28), 7  ;;  %p8681_p1 = scmp.lt.s32.totalorder %s8675_s26, %s12120_s3 }
  0x15   : > { %v275_v2 = vsel %vm273_vm0, 4294967295, %v8740_v1  ;;  %v7540_v3 = vld [vmem:[%s12118_s1 + $0x4] sm:$0x3]  ;;  %v7561_v5 = vld [vmem:[%s12118_s1 + $0x6] sm:$0x3]  ;;  %s8600_s10 = smul.u32 88, %s12141_s28 }
  0x16   : > { %v8825_v4 = vsel %vm274_vm1, %v275_v2, 0  ;;  %v228_v6 = vld [vmem:[%s12118_s1] sm:$0x3]  ;;  %v7574_v10 = vld [vmem:[%s12118_s1 + $0x8] sm:$0x3]  ;;  %vm260_vm2 = vcmask 23552  }
  0x17   : > { %v278_v7 = vand.u32 %v7499_v0, %v8825_v4  ;;  %v531_v8 = vand.u32 %v7540_v3, %v8825_v4  ;;  %v725_v9 = vand.u32 %v7561_v5, %v8825_v4  ;;  %v342_v11 = vand.u32 %v8825_v4, %v228_v6  ;;  %v7600_v13 = vld [vmem:[%s12118_s1 + $0xc] sm:$0x3]  ;;  %s8847_s23 = scalar_lea.vmem %s12117_s0, %s8600_s10  ;;  %v7613_v14 = vld [vmem:[%s12118_s1 + $0xe] sm:$0x3]  ;;  %v7595_v15 = vld [vmem:[%s12118_s1 + $0xa] sm:$0x3] }
  0x18   : > { %v850_v12 = vand.u32 %v7574_v10, %v8825_v4  ;;  %vm389_vm3 = vsmask.f32 3328  ;;  %v7642_v16 = vld [vmem:[%s12118_s1 + $0x10] sm:$0x3]  ;;  %v7506_v17 = vld [vmem:[%s8847_s23 + $0x68] sm:$0xf]  ;;  %v1193_v24 = vand.u32 %v7600_v13, %v8825_v4  ;;  %v1276_v29 = vand.u32 %v7613_v14, %v8825_v4 }
  0x19   : > { %8597 = vmatpush.bf16.msra.mxu1 %v278_v7  ;;  %8598 = vmatpush.bf16.msra.mxu2 %v278_v7  ;;  %v8545_v18 = vld [vmem:[%s8847_s23 + $0x6c] sm:$0xf0]  ;;  %v7510_v19 = vld [vmem:[%s8847_s23 + $0x78] sm:$0xf]  ;;  %v8546_v21 = vld [vmem:[%s8847_s23 + $0x7c] sm:$0xf0]  ;;  %v972_v30 = vand.u32 %v7595_v15, %v8825_v4  ;;  %v1359_v34 = vand.u32 %v7642_v16, %v8825_v4 }
  0x1a   : > { %8599 = vmatpush.bf16.msra.mxu3 %v278_v7  ;;  %287 = vmatpush.bf16.msra.mxu0 %v278_v7  ;;  %v7507_v20 = vor.u32 %v8545_v18, %v7506_v17  ;;  %v7514_v22 = vld [vmem:[%s8847_s23 + $0x88] sm:$0xf]  ;;  %v8547_v23 = vld [vmem:[%s8847_s23 + $0x8c] sm:$0xf0]  ;;  %v7511_v25 = vor.u32 %v8546_v21, %v7510_v19  ;;  %v7502_v27 = vld [vmem:[%s8847_s23 + $0x58] sm:$0xf] }
  0x1b   : > { %v7515_v26 = vor.u32 %v8547_v23, %v7514_v22  ;;  %v8544_v28 = vld [vmem:[%s8847_s23 + $0x5c] sm:$0xf0]  ;;  %vm788_vm4 = vcmask 1042432   ;;  %v8872_v33 = vld [vmem:[%s8847_s23 + $0x4] sm:$0x1]  ;;  %vm789_vm7 = vcmask 1046532  }
  0x1c   : > { %7517 = vmatmul.msk.bf16.vlgmr.msra.gmra.mxu1 %vm260_vm2, %v7507_v20  ;;  %v7503_v31 = vor.u32 %v8544_v28, %v7502_v27  ;;  %v373_v32 = vld [vmem:[%s8847_s23] sm:$0xf]  ;;  %vm390_vm5 = vsmask.f32 7440  ;;  %7518 = vmatmul.msk.bf16.vlgmr.msra.gmra.mxu2 %vm260_vm2, %v7511_v25  ;;  %v375_v35 = vld [vmem:[%s8847_s23 + $0x8] sm:$0xf]  ;;  %vm8913_vm8 = vmor %vm788_vm4, %vm789_vm7 }
  0x1d   : > { %540 = vmatpush.bf16.msrb.mxu2 %v531_v8  ;;  %351 = vmatpush.bf16.msrb.mxu1 %v342_v11  ;;  %v8879_v36 = vld [vmem:[%s8847_s23 + $0xc] sm:$0x1]  ;;  %v393_v37 = vshrl.u32 %v373_v32, 16  ;;  %v396_v38 = vshll.u32 %v373_v32, 16  ;;  %v402_v39 = vshll.u32 %v8872_v33, 16  ;;  %v407_v40 = vshrl.u32 %v375_v35, 16  ;;  %vm8895_vm6 = vmor %vm389_vm3, %vm390_vm5 }
  0x1e   : > { %734 = vmatpush.bf16.msrb.mxu3 %v725_v9  ;;  %859 = vmatpush.bf16.msrb.mxu0 %v850_v12  ;;  %v410_v41 = vshll.u32 %v375_v35, 16  ;;  %v416_v42 = vshll.u32 %v8879_v36, 16  ;;  %v7545_v43 = vld [vmem:[%s8847_s23 + $0x58] sm:$0xf]  ;;  %v8886_v46 = vld [vmem:[%s8847_s23 + $0x5c] sm:$0x1] }
  0x1f   : > { %7519 = vmatmul.msk.bf16.vlgmr.msra.gmra.mxu3 %vm260_vm2, %v7515_v26  ;;  %7516 = vmatmul.msk.bf16.vlgmr.msra.gmra.mxu0 %vm260_vm2, %v7503_v31  ;;  %v395_v44 = vrot.slane %v393_v37, 4  ;;  %v398_v45 = vrot.slane %v396_v38, 5  ;;  %v7547_v47 = vld [vmem:[%s8847_s23 + $0x60] sm:$0xf]  ;;  %v404_v48 = vrot.slane %v402_v39, 5  ;;  %v409_v49 = vrot.slane %v407_v40, 4 }
  0x20   : > { %v412_v50 = vrot.slane %v410_v41, 5  ;;  %v418_v51 = vrot.slane %v416_v42, 5  ;;  %v8890_v52 = vld [vmem:[%s8847_s23 + $0x64] sm:$0x1]  ;;  %v587_v54 = vshrl.u32 %v7545_v43, 16  ;;  %v590_v55 = vshll.u32 %v7545_v43, 16 }
  0x21   : > { %1202 = vmatpush.bf16.msra.mxu2 %v1193_v24  ;;  %981 = vmatpush.bf16.msra.mxu1 %v972_v30  ;;  %v399_v53 = vor.u32 %v398_v45, %v395_v44  ;;  %v596_v56 = vshll.u32 %v8886_v46, 16  ;;  %v601_v59 = vshrl.u32 %v7547_v47, 16  ;;  %v604_v60 = vshll.u32 %v7547_v47, 16  ;;  %v8901_v1 = vld [vmem:[%s8847_s23] sm:$0xe]  ;;  %s8676_s27 = scalar_lea.hbm %s8675_s26, 32 }
  0x22   : > { %1285 = vmatpush.bf16.msra.mxu3 %v1276_v29  ;;  %1368 = vmatpush.bf16.msra.mxu0 %v1359_v34  ;;  %v413_v58 = vor.u32 %v412_v50, %v409_v49  ;;  %v610_v61 = vshll.u32 %v8890_v52, 16  ;;  %v589_v63 = vrot.slane %v587_v54, 4  ;;  %v592_v0 = vrot.slane %v590_v55, 5  ;;  %v8904_v6 = vld [vmem:[%s8847_s23 + $0x8] sm:$0xe]  ;;  %p8677_p12 = scmp.ne.s32.totalorder %s8675_s26, %s8676_s27  ;;  %s8680_s30 = scalar_lea.hbm %s12120_s3, 64 }
  0x23   : > { %v400_v62 = vrot.slane %v399_v53, 4  ;;  %v603_v3 = vrot.slane %v601_v59, 4  ;;  %v606_v5 = vrot.slane %v604_v60, 5  ;;  %v7522_v7 = vld [vmem:[%s8847_s23] sm:$0xf]  ;;  %v598_v11 = vrot.slane %v596_v56, 5  ;;  %p8682_p2 = scmp.lt.s32.totalorder %s8680_s30, %s8676_s27 }
  0x24   : > { %v414_v2 = vrot.slane %v413_v58, 4  ;;  %v8540_v8 = vld [vmem:[%s8847_s23 + $0x4] sm:$0xf0]  ;;  %v593_v10 = vor.u32 %v592_v0, %v589_v63  ;;  %v612_v12 = vrot.slane %v610_v61, 5  ;;  %v7566_v17 = vrot.slane %v8901_v1, 9  ;;  %p8678_p13 = pnand %p8677_p12, %p8803_p4 }
  0x25   : > { %v405_v9 = vsel %vm8895_vm6, %v400_v62, %v404_v48  ;;  %v607_v15 = vor.u32 %v606_v5, %v603_v3  ;;  %v793_v20 = vrot.slane %v8872_v33, 5  ;;  %v7567_v21 = vrot.slane %v8904_v6, 9  ;;  %v377_v28 = vld [vmem:[%s8847_s23 + $0x10] sm:$0xf]  ;;  %v8931_v33 = vld [vmem:[%s8847_s23 + $0x14] sm:$0x1]  ;;  %p8683_p3 = por %p8682_p2, %p8681_p1 }
  0x26   : > { %v419_v13 = vsel %vm8895_vm6, %v414_v2, %v418_v51  ;;  %v506_v14 = vunpack.c.l.b16 %v405_v9  ;;  %v594_v19 = vrot.slane %v593_v10, 4  ;;  %v7523_v22 = vor.u32 %v8540_v8, %v7522_v7  ;;  %v380_v37 = vld [vmem:[%s8847_s23 + $0x1c] sm:$0x1]  ;;  %v7549_v39 = vld [vmem:[%s8847_s23 + $0x68] sm:$0xf]  ;;  %p8679_p0 = pneg %p8678_p13 }
  0x27   : > { %v507_v18 = vunpack.c.l.b16 %v419_v13  ;;  %v608_v23 = vrot.slane %v607_v15, 4  ;;  %v797_v24 = vrot.slane %v8879_v36, 5  ;;  %v794_v27 = vsel %vm8913_vm8, %v7566_v17, %v793_v20  ;;  %v379_v36 = vld [vmem:[%s8847_s23 + $0x18] sm:$0xf]  ;;  %v8940_v44 = vld [vmem:[%s8847_s23 + $0x6c] sm:$0x1] }
  0x28   : > { %v599_v26 = vsel %vm8895_vm6, %v594_v19, %v598_v11  ;;  %v825_v32 = vunpack.c.l.b16 %v794_v27  ;;  %v421_v38 = vshrl.u32 %v377_v28, 16  ;;  %v424_v42 = vshll.u32 %v377_v28, 16  ;;  %v7551_v50 = vld [vmem:[%s8847_s23 + $0x70] sm:$0xf]  ;;  %v8947_v55 = vld [vmem:[%s8847_s23 + $0x74] sm:$0x1]  ;;  %p8684_p5 = pnand %p8683_p3, %p8679_p0 }
  0x29   : > { %v514_v25 = vpack.c.b16 %v507_v18, %v506_v14  ;;  %v613_v29 = vsel %vm8895_vm6, %v608_v23, %v612_v12  ;;  %v700_v30 = vunpack.c.l.b16 %v599_v26  ;;  %v798_v31 = vsel %vm8913_vm8, %v7567_v21, %v797_v24  ;;  %v8951_v62 = vld [vmem:[%s8847_s23 + $0x10] sm:$0xe]  ;;  %v8954_v10 = vld [vmem:[%s8847_s23 + $0x18] sm:$0xe] }
  0x2a   : > { %v701_v34 = vunpack.c.l.b16 %v613_v29  ;;  %v826_v35 = vunpack.c.l.b16 %v798_v31  ;;  %v430_v43 = vshll.u32 %v8931_v33, 16  ;;  %v1023_v45 = vshrl.u32 %v8901_v1, 16  ;;  %v7526_v11 = vld [vmem:[%s8847_s23 + $0x10] sm:$0xf]  ;;  %v8541_v17 = vld [vmem:[%s8847_s23 + $0x14] sm:$0xf0] }
  0x2b   : > { %v423_v47 = vrot.slane %v421_v38, 4  ;;  %v435_v48 = vshrl.u32 %v379_v36, 16  ;;  %v438_v49 = vshll.u32 %v379_v36, 16  ;;  %v426_v51 = vrot.slane %v424_v42, 5  ;;  %v383_v36 = vld [vmem:[%s8847_s23 + $0x28] sm:$0xf] }
  0x2c   : > { %7536 = vmatmul.msk.bf16.vlgmr.msrb.gmra.mxu1 %vm260_vm2, %v7523_v22  ;;  %7541 = vmatmul.msk.bf16.vlgmr.msrb.gmra.mxu2 %vm260_vm2, %v514_v25  ;;  %v708_v40 = vpack.c.b16 %v701_v34, %v700_v30  ;;  %v833_v41 = vpack.c.b16 %v826_v35, %v825_v32  ;;  %v432_v53 = vrot.slane %v430_v43, 5  ;;  %v444_v54 = vshll.u32 %v380_v37, 16  ;;  %v381_v30 = vld [vmem:[%s8847_s23 + $0x20] sm:$0xf]  ;;  %v8972_v35 = vld [vmem:[%s8847_s23 + $0x24] sm:$0x1] }
  0x2d   : > { %v615_v56 = vshrl.u32 %v7549_v39, 16  ;;  %v437_v58 = vrot.slane %v435_v48, 4  ;;  %v440_v59 = vrot.slane %v438_v49, 5  ;;  %v618_v60 = vshll.u32 %v7549_v39, 16  ;;  %v8978_v43 = vld [vmem:[%s8847_s23 + $0x2c] sm:$0x1] }
  0x2e   : > { %v624_v61 = vshll.u32 %v8940_v44, 16  ;;  %v427_v63 = vor.u32 %v426_v51, %v423_v47  ;;  %v446_v0 = vrot.slane %v444_v54, 5  ;;  %v629_v3 = vshrl.u32 %v7551_v50, 16  ;;  %v7553_v49 = vld [vmem:[%s8847_s23 + $0x78] sm:$0xf] }
  0x2f   : > { %7562 = vmatmul.msk.bf16.vlgmr.msrb.gmra.mxu3 %vm260_vm2, %v708_v40  ;;  %7575 = vmatmul.msk.bf16.vlgmr.msrb.gmra.mxu0 %vm260_vm2, %v833_v41  ;;  %v617_v2 = vrot.slane %v615_v56, 4  ;;  %v441_v5 = vor.u32 %v440_v59, %v437_v58  ;;  %v620_v7 = vrot.slane %v618_v60, 5  ;;  %v632_v9 = vshll.u32 %v7551_v50, 16  ;;  %v8985_v56 = vld [vmem:[%s8847_s23 + $0x7c] sm:$0x1] }
  0x30   : > { %v626_v8 = vrot.slane %v624_v61, 5  ;;  %v428_v12 = vrot.slane %v427_v63, 4  ;;  %v631_v13 = vrot.slane %v629_v3, 4  ;;  %v638_v14 = vshll.u32 %v8947_v55, 16  ;;  %v7555_v63 = vld [vmem:[%s8847_s23 + $0x80] sm:$0xf] }
  0x31   : > { %v7568_v15 = vrot.slane %v8951_v62, 9  ;;  %v442_v18 = vrot.slane %v441_v5, 4  ;;  %v621_v19 = vor.u32 %v620_v7, %v617_v2  ;;  %v634_v20 = vrot.slane %v632_v9, 5 }
  0x32   : > { %v801_v21 = vrot.slane %v8931_v33, 5  ;;  %v433_v22 = vsel %vm8895_vm6, %v428_v12, %v432_v53  ;;  %v640_v23 = vrot.slane %v638_v14, 5  ;;  %v7569_v24 = vrot.slane %v8954_v10, 9 }
  0x33   : > { %v805_v25 = vrot.slane %v380_v37, 5  ;;  %v447_v26 = vsel %vm8895_vm6, %v442_v18, %v446_v0  ;;  %v508_v27 = vunpack.c.l.b16 %v433_v22  ;;  %v622_v28 = vrot.slane %v621_v19, 4 }
  0x34   : > { %v635_v29 = vor.u32 %v634_v20, %v631_v13  ;;  %v7527_v31 = vor.u32 %v8541_v17, %v7526_v11  ;;  %v509_v32 = vunpack.c.l.b16 %v447_v26  ;;  %v802_v33 = vsel %vm8913_vm8, %v7568_v15, %v801_v21  ;;  %v8992_v11 = vld [vmem:[%s8847_s23 + $0x84] sm:$0x1]  ;;  %v8995_v13 = vld [vmem:[%s8847_s23 + $0x20] sm:$0xe] }
  0x35   : > { %v806_v34 = vsel %vm8913_vm8, %v7569_v24, %v805_v25  ;;  %v627_v37 = vsel %vm8895_vm6, %v622_v28, %v626_v8  ;;  %v827_v39 = vunpack.c.l.b16 %v802_v33  ;;  %v449_v47 = vshrl.u32 %v381_v30, 16 }
  0x36   : > { %v636_v38 = vrot.slane %v635_v29, 4  ;;  %v828_v40 = vunpack.c.l.b16 %v806_v34  ;;  %v515_v41 = vpack.c.b16 %v509_v32, %v508_v27  ;;  %v702_v42 = vunpack.c.l.b16 %v627_v37  ;;  %v385_v32 = vld [vmem:[%s8847_s23 + $0x30] sm:$0xf] }
  0x37   : > { %v452_v48 = vshll.u32 %v381_v30, 16  ;;  %v458_v53 = vshll.u32 %v8972_v35, 16  ;;  %v463_v54 = vshrl.u32 %v383_v36, 16  ;;  %v451_v59 = vrot.slane %v449_v47, 4 }
  0x38   : > { %v641_v50 = vsel %vm8895_vm6, %v636_v38, %v640_v23  ;;  %v834_v51 = vpack.c.b16 %v828_v40, %v827_v39  ;;  %v466_v61 = vshll.u32 %v383_v36, 16  ;;  %v472_v3 = vshll.u32 %v8978_v43, 16  ;;  %v9001_v23 = vld [vmem:[%s8847_s23 + $0x28] sm:$0xe]  ;;  %v7530_v38 = vld [vmem:[%s8847_s23 + $0x20] sm:$0xf] }
  0x39   : > { %v703_v58 = vunpack.c.l.b16 %v641_v50  ;;  %v454_v60 = vrot.slane %v452_v48, 5  ;;  %v460_v0 = vrot.slane %v458_v53, 5  ;;  %v465_v2 = vrot.slane %v463_v54, 4  ;;  %v8542_v39 = vld [vmem:[%s8847_s23 + $0x24] sm:$0xf0] }
  0x3a   : > { %v643_v5 = vshrl.u32 %v7553_v49, 16  ;;  %v468_v9 = vrot.slane %v466_v61, 5  ;;  %v646_v12 = vshll.u32 %v7553_v49, 16  ;;  %v474_v14 = vrot.slane %v472_v3, 5  ;;  %v7557_v3 = vld [vmem:[%s8847_s23 + $0x88] sm:$0xf] }
  0x3b   : > { %v709_v7 = vpack.c.b16 %v703_v58, %v702_v42  ;;  %v455_v8 = vor.u32 %v454_v60, %v451_v59  ;;  %v652_v17 = vshll.u32 %v8985_v56, 16  ;;  %v657_v18 = vshrl.u32 %v7555_v63, 16  ;;  %v9025_v60 = vld [vmem:[%s8847_s23 + $0x34] sm:$0x1] }
  0x3c   : > { %7537 = vmatmul.msk.bf16.gmra.mxu1 %vm260_vm2, %v7527_v31  ;;  %7542 = vmatmul.msk.bf16.gmra.mxu2 %vm260_vm2, %v515_v41  ;;  %v645_v15 = vrot.slane %v643_v5, 4  ;;  %v469_v20 = vor.u32 %v468_v9, %v465_v2  ;;  %v648_v21 = vrot.slane %v646_v12, 5  ;;  %v660_v22 = vshll.u32 %v7555_v63, 16  ;;  %v9028_v2 = vld [vmem:[%s8847_s23 + $0x3c] sm:$0x1] }
  0x3d   : > { %v456_v19 = vrot.slane %v455_v8, 4  ;;  %v654_v24 = vrot.slane %v652_v17, 5  ;;  %v659_v25 = vrot.slane %v657_v18, 4  ;;  %v666_v26 = vshll.u32 %v8992_v11, 16  ;;  %v9035_v18 = vld [vmem:[%s8847_s23 + $0x8c] sm:$0x1] }
  0x3e   : > { %v7570_v27 = vrot.slane %v8995_v13, 9  ;;  %v470_v29 = vrot.slane %v469_v20, 4  ;;  %v649_v30 = vor.u32 %v648_v21, %v645_v15  ;;  %v662_v31 = vrot.slane %v660_v22, 5 }
  0x3f   : > { %7563 = vmatmul.msk.bf16.gmra.mxu3 %vm260_vm2, %v709_v7  ;;  %7576 = vmatmul.msk.bf16.gmra.mxu0 %vm260_vm2, %v834_v51  ;;  %v461_v28 = vsel %vm8895_vm6, %v456_v19, %v460_v0  ;;  %v1026_v33 = vshll.u32 %v8901_v1, 16  ;;  %v668_v34 = vrot.slane %v666_v26, 5  ;;  %v809_v36 = vrot.slane %v8972_v35, 5  ;;  %v387_v35 = vld [vmem:[%s8847_s23 + $0x38] sm:$0xf] }
  0x40   : > { %v7571_v37 = vrot.slane %v9001_v23, 9  ;;  %v475_v40 = vsel %vm8895_vm6, %v470_v29, %v474_v14  ;;  %v650_v41 = vrot.slane %v649_v30, 4  ;;  %v663_v42 = vor.u32 %v662_v31, %v659_v25  ;;  %v7559_v19 = vld [vmem:[%s8847_s23 + $0x90] sm:$0xf] }
  0x41   : > { %v813_v47 = vrot.slane %v8978_v43, 5  ;;  %v510_v48 = vunpack.c.l.b16 %v461_v28  ;;  %v511_v49 = vunpack.c.l.b16 %v475_v40  ;;  %v810_v50 = vsel %vm8913_vm8, %v7570_v27, %v809_v36  ;;  %v9044_v36 = vld [vmem:[%s8847_s23 + $0x30] sm:$0xe] }
  0x42   : > { %v477_v51 = vshrl.u32 %v385_v32, 16  ;;  %v1041_v53 = vshrl.u32 %v8904_v6, 16  ;;  %v655_v54 = vsel %vm8895_vm6, %v650_v41, %v654_v24  ;;  %v664_v58 = vrot.slane %v663_v42, 4  ;;  %v9040_v24 = vld [vmem:[%s8847_s23 + $0x94] sm:$0x1] }
  0x43   : > { %v814_v59 = vsel %vm8913_vm8, %v7571_v37, %v813_v47  ;;  %v7531_v43 = vor.u32 %v8542_v39, %v7530_v38  ;;  %v704_v61 = vunpack.c.l.b16 %v655_v54  ;;  %v829_v63 = vunpack.c.l.b16 %v810_v50  ;;  %v9049_v41 = vld [vmem:[%s8847_s23 + $0x38] sm:$0xe] }
  0x44   : > { %v830_v0 = vunpack.c.l.b16 %v814_v59  ;;  %v669_v5 = vsel %vm8895_vm6, %v664_v58, %v668_v34  ;;  %v479_v7 = vrot.slane %v477_v51, 4  ;;  %v480_v8 = vshll.u32 %v385_v32, 16 }
  0x45   : > { %v491_v9 = vshrl.u32 %v387_v35, 16  ;;  %v516_v12 = vpack.c.b16 %v511_v49, %v510_v48  ;;  %v705_v14 = vunpack.c.l.b16 %v669_v5  ;;  %v486_v15 = vshll.u32 %v9025_v60, 16 }
  0x46   : > { %v494_v17 = vshll.u32 %v387_v35, 16  ;;  %v482_v20 = vrot.slane %v480_v8, 5  ;;  %v500_v22 = vshll.u32 %v9028_v2, 16  ;;  %v671_v25 = vshrl.u32 %v7557_v3, 16 }
  0x47   : > { %v493_v21 = vrot.slane %v491_v9, 4  ;;  %v710_v26 = vpack.c.b16 %v705_v14, %v704_v61  ;;  %v835_v27 = vpack.c.b16 %v830_v0, %v829_v63  ;;  %v674_v29 = vshll.u32 %v7557_v3, 16 }
  0x48   : > { %v496_v28 = vrot.slane %v494_v17, 5  ;;  %v483_v30 = vor.u32 %v482_v20, %v479_v7  ;;  %v673_v31 = vrot.slane %v671_v25, 4  ;;  %v680_v32 = vshll.u32 %v9035_v18, 16  ;;  %v1011_v20 = vld [vmem:[%s8847_s23 + $0x4] sm:$0x3] }
  0x49   : > { %v685_v34 = vshrl.u32 %v7559_v19, 16  ;;  %v676_v38 = vrot.slane %v674_v29, 5  ;;  %v688_v39 = vshll.u32 %v7559_v19, 16  ;;  %v694_v40 = vshll.u32 %v9040_v24, 16  ;;  %v1012_v25 = vld [vmem:[%s8847_s23 + $0xc] sm:$0x3] }
  0x4a   : > { %v497_v37 = vor.u32 %v496_v28, %v493_v21  ;;  %v484_v42 = vrot.slane %v483_v30, 4  ;;  %v488_v47 = vrot.slane %v486_v15, 5  ;;  %v502_v48 = vrot.slane %v500_v22, 5  ;;  %v7700_v29 = vld [vmem:[%s12118_s1 + $0x14] sm:$0x3] }
  0x4b   : > { %v687_v49 = vrot.slane %v685_v34, 4  ;;  %v1044_v50 = vshll.u32 %v8904_v6, 16  ;;  %v677_v51 = vor.u32 %v676_v38, %v673_v31  ;;  %v690_v54 = vrot.slane %v688_v39, 5  ;;  %v7679_v38 = vld [vmem:[%s12118_s1 + $0x12] sm:$0x3] }
  0x4c   : > { %7538 = vmatmul.msk.bf16.gmra.mxu1 %vm260_vm2, %v7531_v43  ;;  %7543 = vmatmul.msk.bf16.gmra.mxu2 %vm260_vm2, %v516_v12  ;;  %v498_v35 = vrot.slane %v497_v37, 4  ;;  %v7572_v58 = vrot.slane %v9044_v36, 9  ;;  %v817_v59 = vrot.slane %v9025_v60, 5  ;;  %v7573_v43 = vrot.slane %v9049_v41, 9  ;;  %v7534_v12 = vld [vmem:[%s8847_s23 + $0x30] sm:$0xf] }
  0x4d   : > { %v821_v61 = vrot.slane %v9028_v2, 5  ;;  %v678_v63 = vrot.slane %v677_v51, 4  ;;  %v682_v0 = vrot.slane %v680_v32, 5  ;;  %v691_v3 = vor.u32 %v690_v54, %v687_v49  ;;  %v8543_v2 = vld [vmem:[%s8847_s23 + $0x34] sm:$0xf0] }
  0x4e   : > { %v696_v5 = vrot.slane %v694_v40, 5  ;;  %v1025_v7 = vrot.slane %v1023_v45, 5  ;;  %v489_v8 = vsel %vm8895_vm6, %v484_v42, %v488_v47  ;;  %v503_v9 = vsel %vm8895_vm6, %v498_v35, %v502_v48  ;;  %v7721_v37 = vld [vmem:[%s12118_s1 + $0x16] sm:$0x3]  ;;  %v7579_v40 = vld [vmem:[%s8847_s23 + $0x58] sm:$0xe] }
  0x4f   : > { %7564 = vmatmul.msk.bf16.gmra.mxu3 %vm260_vm2, %v710_v26  ;;  %7577 = vmatmul.msk.bf16.gmra.mxu0 %vm260_vm2, %v835_v27  ;;  %v1028_v60 = vrot.slane %v1026_v33, 6  ;;  %v692_v14 = vrot.slane %v691_v3, 4  ;;  %v1043_v15 = vrot.slane %v1041_v53, 5  ;;  %v1046_v17 = vrot.slane %v1044_v50, 6  ;;  %v7742_v49 = vld [vmem:[%s12118_s1 + $0x18] sm:$0x3] }
  0x50   : > { %v818_v45 = vsel %vm8913_vm8, %v7572_v58, %v817_v59  ;;  %v822_v19 = vsel %vm8913_vm8, %v7573_v43, %v821_v61  ;;  %v512_v21 = vunpack.c.l.b16 %v489_v8  ;;  %v513_v22 = vunpack.c.l.b16 %v503_v9  ;;  %v7580_v50 = vld [vmem:[%s8847_s23 + $0x60] sm:$0xe] }
  0x51   : > { %v683_v1 = vsel %vm8895_vm6, %v678_v63, %v682_v0  ;;  %v697_v33 = vsel %vm8895_vm6, %v692_v14, %v696_v5  ;;  %v7535_v6 = vor.u32 %v8543_v2, %v7534_v12  ;;  %v831_v53 = vunpack.c.l.b16 %v818_v45 }
  0x52   : > { %v832_v26 = vunpack.c.l.b16 %v822_v19  ;;  %v1032_v27 = vshrl.u32 %v1011_v20, 16  ;;  %v1035_v28 = vshll.u32 %v1011_v20, 16  ;;  %v706_v30 = vunpack.c.l.b16 %v683_v1  ;;  %v1013_v20 = vld [vmem:[%s8847_s23 + $0x14] sm:$0x3]  ;;  %v1014_v1 = vld [vmem:[%s8847_s23 + $0x1c] sm:$0x3] }
  0x53   : > { %v707_v31 = vunpack.c.l.b16 %v697_v33  ;;  %v1050_v32 = vshrl.u32 %v1012_v25, 16  ;;  %v1053_v34 = vshll.u32 %v1012_v25, 16  ;;  %v517_v39 = vpack.c.b16 %v513_v22, %v512_v21 }
  0x54   : > { %v1029_v42 = vor.u32 %v1028_v60, %v1025_v7  ;;  %v1034_v47 = vrot.slane %v1032_v27, 5  ;;  %v1047_v48 = vor.u32 %v1046_v17, %v1043_v15  ;;  %v1037_v35 = vrot.slane %v1035_v28, 6 }
  0x55   : > { %v1052_v51 = vrot.slane %v1050_v32, 5  ;;  %v1055_v54 = vrot.slane %v1053_v34, 6  ;;  %v1747_v58 = vand.u32 %v7700_v29, %v8825_v4  ;;  %v836_v59 = vpack.c.b16 %v832_v26, %v831_v53  ;;  %v7616_v34 = vld [vmem:[%s8847_s23 + $0xb0] sm:$0xf] }
  0x56   : > { %v1869_v43 = vand.u32 %v7721_v37, %v8825_v4  ;;  %v1553_v61 = vand.u32 %v7679_v38, %v8825_v4  ;;  %v711_v63 = vpack.c.b16 %v707_v31, %v706_v30  ;;  %vm1019_vm9 = vsmask.f32 2304  ;;  %v8548_v37 = vld [vmem:[%s8847_s23 + $0xb4] sm:$0xf0]  ;;  %v7645_v38 = vld [vmem:[%s8847_s23 + $0x108] sm:$0xf] }
  0x57   : > { %vm1020_vm10 = vsmask.f32 6416  ;;  %1756 = vmatpush.bf16.msrb.mxu2 %v1747_v58  ;;  %v1991_v0 = vand.u32 %v7742_v49, %v8825_v4  ;;  %v915_v3 = vrot.slane %v8886_v46, 5  ;;  %v919_v5 = vrot.slane %v8890_v52, 5 }
  0x58   : > { %v7587_v7 = vrot.slane %v7579_v40, 9  ;;  %v7588_v8 = vrot.slane %v7580_v50, 9  ;;  %1878 = vmatpush.bf16.msrb.mxu3 %v1869_v43  ;;  %v1030_v9 = vrot.slane %v1029_v42, 4  ;;  %v1038_v60 = vor.u32 %v1037_v35, %v1034_v47  ;;  %1562 = vmatpush.bf16.msrb.mxu1 %v1553_v61  ;;  %vm9105_vm11 = vmor %vm1019_vm9, %vm1020_vm10  ;;  %v7581_v42 = vld [vmem:[%s8847_s23 + $0x68] sm:$0xe] }
  0x59   : > { %v1048_v12 = vrot.slane %v1047_v48, 4  ;;  %v1056_v2 = vor.u32 %v1055_v54, %v1052_v51  ;;  %2000 = vmatpush.bf16.msrb.mxu0 %v1991_v0  ;;  %v1059_v45 = vshrl.u32 %v8951_v62, 16  ;;  %v1062_v19 = vshll.u32 %v8951_v62, 16  ;;  %v7582_v47 = vld [vmem:[%s8847_s23 + $0x70] sm:$0xe] }
  0x5a   : > { %v916_v52 = vsel %vm8913_vm8, %v7587_v7, %v915_v3  ;;  %v920_v14 = vsel %vm8913_vm8, %v7588_v8, %v919_v5  ;;  %v1039_v15 = vsel %vm9105_vm11, %v1030_v9, %v1038_v60  ;;  %v1077_v21 = vshrl.u32 %v8954_v10, 16 }
  0x5b   : > { %v1057_v17 = vsel %vm9105_vm11, %v1048_v12, %v1056_v2  ;;  %v1080_v22 = vshll.u32 %v8954_v10, 16  ;;  %v947_v33 = vunpack.c.l.b16 %v916_v52  ;;  %v948_v25 = vunpack.c.l.b16 %v920_v14  ;;  %v1015_v12 = vld [vmem:[%s8847_s23 + $0x24] sm:$0x3]  ;;  %v1016_v52 = vld [vmem:[%s8847_s23 + $0x2c] sm:$0x3] }
  0x5c   : > { %7539 = vmatmul.msk.bf16.gmra.mxu1 %vm260_vm2, %v7535_v6  ;;  %7544 = vmatmul.msk.bf16.gmra.mxu2 %vm260_vm2, %v517_v39  ;;  %v1168_v6 = vunpack.c.l.b16 %v1039_v15  ;;  %v1169_v53 = vunpack.c.l.b16 %v1057_v17  ;;  %v1061_v26 = vrot.slane %v1059_v45, 5  ;;  %v1064_v27 = vrot.slane %v1062_v19, 6  ;;  %v8552_v39 = vld [vmem:[%s8847_s23 + $0x10c] sm:$0xf0] }
  0x5d   : > { %v1068_v28 = vshrl.u32 %v1013_v20, 16  ;;  %v1071_v62 = vshll.u32 %v1013_v20, 16  ;;  %v1079_v29 = vrot.slane %v1077_v21, 5  ;;  %v1082_v30 = vrot.slane %v1080_v22, 6 }
  0x5e   : > { %v1086_v31 = vshrl.u32 %v1014_v1, 16  ;;  %v1089_v32 = vshll.u32 %v1014_v1, 16  ;;  %v955_v10 = vpack.c.b16 %v948_v25, %v947_v33  ;;  %v1176_v40 = vpack.c.b16 %v1169_v53, %v1168_v6 }
  0x5f   : > { %7565 = vmatmul.msk.bf16.gmra.mxu3 %vm260_vm2, %v711_v63  ;;  %7578 = vmatmul.msk.bf16.gmra.mxu0 %vm260_vm2, %v836_v59  ;;  %v1065_v48 = vor.u32 %v1064_v27, %v1061_v26  ;;  %v1070_v49 = vrot.slane %v1068_v28, 5  ;;  %v1073_v50 = vrot.slane %v1071_v62, 6  ;;  %v1083_v35 = vor.u32 %v1082_v30, %v1079_v29  ;;  %v7620_v26 = vld [vmem:[%s8847_s23 + $0xc0] sm:$0xf]  ;;  %v8549_v27 = vld [vmem:[%s8847_s23 + $0xc4] sm:$0xf0] }
  0x60   : > { %v1088_v51 = vrot.slane %v1086_v31, 5  ;;  %v1091_v54 = vrot.slane %v1089_v32, 6  ;;  %v7617_v58 = vor.u32 %v8548_v37, %v7616_v34  ;;  %v7646_v59 = vor.u32 %v8552_v39, %v7645_v38  ;;  %v7649_v28 = vld [vmem:[%s8847_s23 + $0x118] sm:$0xf]  ;;  %v8553_v62 = vld [vmem:[%s8847_s23 + $0x11c] sm:$0xf0] }
  0x61   : > { %v7589_v43 = vrot.slane %v7581_v42, 9  ;;  %v923_v61 = vrot.slane %v8940_v44, 5  ;;  %v7590_v63 = vrot.slane %v7582_v47, 9  ;;  %v927_v0 = vrot.slane %v8947_v55, 5  ;;  %v7583_v31 = vld [vmem:[%s8847_s23 + $0x78] sm:$0xe] }
  0x62   : > { %v1066_v3 = vrot.slane %v1065_v48, 4  ;;  %v1074_v5 = vor.u32 %v1073_v50, %v1070_v49  ;;  %v1095_v7 = vshrl.u32 %v8995_v13, 16  ;;  %v1084_v8 = vrot.slane %v1083_v35, 4  ;;  %v7584_v32 = vld [vmem:[%s8847_s23 + $0x80] sm:$0xe] }
  0x63   : > { %v1092_v9 = vor.u32 %v1091_v54, %v1088_v51  ;;  %v1098_v60 = vshll.u32 %v8995_v13, 16  ;;  %v1113_v44 = vshrl.u32 %v9001_v23, 16  ;;  %v1116_v2 = vshll.u32 %v9001_v23, 16  ;;  %v1017_v50 = vld [vmem:[%s8847_s23 + $0x34] sm:$0x3] }
  0x64   : > { %v924_v55 = vsel %vm8913_vm8, %v7589_v43, %v923_v61  ;;  %v928_v14 = vsel %vm8913_vm8, %v7590_v63, %v927_v0  ;;  %v1075_v13 = vsel %vm9105_vm11, %v1066_v3, %v1074_v5  ;;  %v1097_v15 = vrot.slane %v1095_v7, 5  ;;  %v1018_v35 = vld [vmem:[%s8847_s23 + $0x3c] sm:$0x3] }
  0x65   : > { %v1093_v17 = vsel %vm9105_vm11, %v1084_v8, %v1092_v9  ;;  %v1100_v45 = vrot.slane %v1098_v60, 6  ;;  %v1104_v23 = vshrl.u32 %v1015_v12, 16  ;;  %v1107_v19 = vshll.u32 %v1015_v12, 16 }
  0x66   : > { %v1115_v20 = vrot.slane %v1113_v44, 5  ;;  %v1118_v21 = vrot.slane %v1116_v2, 6  ;;  %v1122_v22 = vshrl.u32 %v1016_v52, 16  ;;  %v1125_v1 = vshll.u32 %v1016_v52, 16 }
  0x67   : > { %v949_v33 = vunpack.c.l.b16 %v924_v55  ;;  %v950_v25 = vunpack.c.l.b16 %v928_v14  ;;  %v1170_v6 = vunpack.c.l.b16 %v1075_v13  ;;  %v1171_v53 = vunpack.c.l.b16 %v1093_v17  ;;  %v7585_v55 = vld [vmem:[%s8847_s23 + $0x88] sm:$0xe] }
  0x68   : > { %v1106_v29 = vrot.slane %v1104_v23, 5  ;;  %v1109_v30 = vrot.slane %v1107_v19, 6  ;;  %v1101_v34 = vor.u32 %v1100_v45, %v1097_v15  ;;  %v1124_v37 = vrot.slane %v1122_v22, 5  ;;  %v7665_v22 = vld [vmem:[%s8847_s23 + $0xb8] sm:$0xf] }
  0x69   : > { %v1127_v38 = vrot.slane %v1125_v1, 6  ;;  %v956_v39 = vpack.c.b16 %v950_v25, %v949_v33  ;;  %v1131_v42 = vshrl.u32 %v9044_v36, 16  ;;  %v1134_v47 = vshll.u32 %v9044_v36, 16  ;;  %v7684_v1 = vld [vmem:[%s8847_s23 + $0x108] sm:$0xf] }
  0x6a   : > { %v1177_v48 = vpack.c.b16 %v1171_v53, %v1170_v6  ;;  %v7650_v49 = vor.u32 %v8553_v62, %v7649_v28  ;;  %v1149_v51 = vshrl.u32 %v9049_v41, 16  ;;  %v1152_v54 = vshll.u32 %v9049_v41, 16  ;;  %v7586_v33 = vld [vmem:[%s8847_s23 + $0x90] sm:$0xe] }
  0x6b   : > { %v7592_v43 = vrot.slane %v7584_v32, 9  ;;  %v935_v61 = vrot.slane %v8992_v11, 5  ;;  %v1102_v63 = vrot.slane %v1101_v34, 4  ;;  %v1110_v0 = vor.u32 %v1109_v30, %v1106_v29  ;;  %v7624_v62 = vld [vmem:[%s8847_s23 + $0xd0] sm:$0xf] }
  0x6c   : > { %7596 = vmatmul.msk.bf16.vlgmr.msra.gmra.mxu1 %vm260_vm2, %v955_v10  ;;  %7601 = vmatmul.msk.bf16.vlgmr.msra.gmra.mxu2 %vm260_vm2, %v1176_v40  ;;  %v1119_v10 = vor.u32 %v1118_v21, %v1115_v20  ;;  %v7621_v40 = vor.u32 %v8549_v27, %v7620_v26  ;;  %v1128_v5 = vor.u32 %v1127_v38, %v1124_v37  ;;  %v1140_v36 = vshrl.u32 %v1017_v50, 16  ;;  %v7663_v21 = vld [vmem:[%s8847_s23 + $0xb0] sm:$0xf]  ;;  %v8550_v29 = vld [vmem:[%s8847_s23 + $0xd4] sm:$0xf0] }
  0x6d   : > { %v1143_v7 = vshll.u32 %v1017_v50, 16  ;;  %v1158_v8 = vshrl.u32 %v1018_v35, 16  ;;  %v1161_v9 = vshll.u32 %v1018_v35, 16  ;;  %v1133_v41 = vrot.slane %v1131_v42, 5  ;;  %v7653_v32 = vld [vmem:[%s8847_s23 + $0x128] sm:$0xf] }
  0x6e   : > { %v1120_v3 = vrot.slane %v1119_v10, 4  ;;  %v1136_v60 = vrot.slane %v1134_v47, 6  ;;  %v1151_v12 = vrot.slane %v1149_v51, 5  ;;  %v936_v44 = vsel %vm8913_vm8, %v7592_v43, %v935_v61  ;;  %v7686_v37 = vld [vmem:[%s8847_s23 + $0x110] sm:$0xf] }
  0x6f   : > { %7630 = vmatmul.msk.bf16.vlgmr.msra.gmra.mxu3 %vm260_vm2, %v7617_v58  ;;  %7659 = vmatmul.msk.bf16.vlgmr.msra.gmra.mxu0 %vm260_vm2, %v7646_v59  ;;  %v7591_v58 = vrot.slane %v7583_v31, 9  ;;  %v931_v59 = vrot.slane %v8985_v56, 5  ;;  %v1154_v56 = vrot.slane %v1152_v54, 6  ;;  %v1111_v2 = vsel %vm9105_vm11, %v1102_v63, %v1110_v0  ;;  %v8554_v50 = vld [vmem:[%s8847_s23 + $0x12c] sm:$0xf0] }
  0x70   : > { %v1129_v52 = vsel %vm9105_vm11, %v1120_v3, %v1128_v5  ;;  %v1142_v14 = vrot.slane %v1140_v36, 5  ;;  %v1145_v13 = vrot.slane %v1143_v7, 6  ;;  %v1160_v15 = vrot.slane %v1158_v8, 5 }
  0x71   : > { %v932_v11 = vsel %vm8913_vm8, %v7591_v58, %v931_v59  ;;  %v1163_v17 = vrot.slane %v1161_v9, 6  ;;  %v952_v23 = vunpack.c.l.b16 %v936_v44  ;;  %v1137_v19 = vor.u32 %v1136_v60, %v1133_v41  ;;  %v9193_v58 = vld [vmem:[%s8847_s23 + $0xbc] sm:$0x1]  ;;  %v9201_v41 = vld [vmem:[%s8847_s23 + $0x10c] sm:$0x1] }
  0x72   : > { %v951_v45 = vunpack.c.l.b16 %v932_v11  ;;  %v1155_v20 = vor.u32 %v1154_v56, %v1151_v12  ;;  %v1415_v25 = vshrl.u32 %v7663_v21, 16  ;;  %v1418_v6 = vshll.u32 %v7663_v21, 16 }
  0x73   : > { %v1429_v53 = vshrl.u32 %v7665_v22, 16  ;;  %v1432_v26 = vshll.u32 %v7665_v22, 16  ;;  %v1172_v27 = vunpack.c.l.b16 %v1111_v2  ;;  %v1173_v28 = vunpack.c.l.b16 %v1129_v52  ;;  %v9221_v22 = vld [vmem:[%s8847_s23 + $0xe4] sm:$0xf0] }
  0x74   : > { %v7593_v30 = vrot.slane %v7585_v55, 9  ;;  %v939_v31 = vrot.slane %v9035_v18, 5  ;;  %v1417_v34 = vrot.slane %v1415_v25, 4  ;;  %v1420_v10 = vrot.slane %v1418_v6, 5 }
  0x75   : > { %v1609_v38 = vshrl.u32 %v7684_v1, 16  ;;  %v943_v42 = vrot.slane %v9040_v24, 5  ;;  %v1138_v47 = vrot.slane %v1137_v19, 4  ;;  %v1156_v35 = vrot.slane %v1155_v20, 4 }
  0x76   : > { %v1164_v51 = vor.u32 %v1163_v17, %v1160_v15  ;;  %v1431_v54 = vrot.slane %v1429_v53, 4  ;;  %v1434_v18 = vrot.slane %v1432_v26, 5  ;;  %v1421_v59 = vor.u32 %v1420_v10, %v1417_v34  ;;  %v9213_v17 = vld [vmem:[%s8847_s23 + $0xe0] sm:$0xf]  ;;  %v9230_v53 = vld [vmem:[%s8847_s23 + $0xb8] sm:$0xe] }
  0x77   : > { %v1623_v61 = vshrl.u32 %v7686_v37, 16  ;;  %v1626_v63 = vshll.u32 %v7686_v37, 16  ;;  %v957_v0 = vpack.c.b16 %v952_v23, %v951_v45  ;;  %v7625_v3 = vor.u32 %v8550_v29, %v7624_v62  ;;  %v9216_v45 = vld [vmem:[%s8847_s23 + $0x114] sm:$0x1]  ;;  %v7797_v37 = vld [vmem:[%s12118_s1 + $0x1e] sm:$0x3] }
  0x78   : > { %v1611_v24 = vrot.slane %v1609_v38, 4  ;;  %v1178_v36 = vpack.c.b16 %v1173_v28, %v1172_v27  ;;  %v7654_v7 = vor.u32 %v8554_v50, %v7653_v32  ;;  %v940_v8 = vsel %vm8913_vm8, %v7593_v30, %v939_v31  ;;  %v7768_v30 = vld [vmem:[%s12118_s1 + $0x1c] sm:$0x3] }
  0x79   : > { %v1165_v12 = vsel %vm9105_vm11, %v1156_v35, %v1164_v51  ;;  %v1435_v56 = vor.u32 %v1434_v18, %v1431_v54  ;;  %v1438_v11 = vshll.u32 %v9193_v58, 16  ;;  %v1422_v44 = vrot.slane %v1421_v59, 4  ;;  %v7688_v54 = vld [vmem:[%s8847_s23 + $0x118] sm:$0xf] }
  0x7a   : > { %v1625_v52 = vrot.slane %v1623_v61, 4  ;;  %v1628_v55 = vrot.slane %v1626_v63, 5  ;;  %v1618_v19 = vshll.u32 %v9201_v41, 16  ;;  %v1175_v21 = vunpack.c.l.b16 %v1165_v12  ;;  %v7834_v12 = vld [vmem:[%s12118_s1 + $0x20] sm:$0x3] }
  0x7b   : > { %v1436_v25 = vrot.slane %v1435_v56, 4  ;;  %v1440_v6 = vrot.slane %v1438_v11, 5  ;;  %v1632_v29 = vshll.u32 %v9216_v45, 16  ;;  %v2292_v10 = vand.u32 %v7768_v30, %v8825_v4  ;;  %v9301_v30 = vld [vmem:[%s8847_s23 + $0x11c] sm:$0x1] }
  0x7c   : > { %7597 = vmatmul.msk.bf16.gmra.mxu1 %vm260_vm2, %v956_v39  ;;  %7602 = vmatmul.msk.bf16.gmra.mxu2 %vm260_vm2, %v1177_v48  ;;  %v1612_v39 = vshll.u32 %v7684_v1, 16  ;;  %v1146_v48 = vor.u32 %v1145_v13, %v1142_v14  ;;  %v9209_v14 = vld [vmem:[%s8847_s23 + $0xb0] sm:$0xe]  ;;  %v953_v13 = vunpack.c.l.b16 %v940_v8  ;;  %v9224_v1 = vld [vmem:[%s8847_s23 + $0x138] sm:$0xf]  ;;  %v1629_v62 = vor.u32 %v1628_v55, %v1625_v52 }
  0x7d   : > { %v7713_v26 = vrot.slane %v9209_v14, 9  ;;  %v1620_v34 = vrot.slane %v1618_v19, 5  ;;  %v7629_v38 = vor.u32 %v9221_v22, %v9213_v17  ;;  %v1441_v50 = vsel %vm8895_vm6, %v1436_v25, %v1440_v6  ;;  %2301 = vmatpush.bf16.msra.mxu2 %v2292_v10  ;;  %v9289_v52 = vld [vmem:[%s8847_s23 + $0xcc] sm:$0x1] }
  0x7e   : > { %v1614_v5 = vrot.slane %v1612_v39, 5  ;;  %v1147_v60 = vsel %vm9105_vm11, %v1138_v47, %v1146_v48  ;;  %v7667_v47 = vld [vmem:[%s8847_s23 + $0xc0] sm:$0xf]  ;;  %v7669_v48 = vld [vmem:[%s8847_s23 + $0xc8] sm:$0xf]  ;;  %v1630_v18 = vrot.slane %v1629_v62, 4 }
  0x7f   : > { %7631 = vmatmul.msk.bf16.gmra.mxu3 %vm260_vm2, %v7621_v40  ;;  %7660 = vmatmul.msk.bf16.gmra.mxu0 %vm260_vm2, %v7650_v49  ;;  %v7594_v40 = vrot.slane %v7586_v33, 9  ;;  %v9189_v49 = vld [vmem:[%s8847_s23 + $0xb4] sm:$0x1]  ;;  %v1174_v20 = vunpack.c.l.b16 %v1147_v60  ;;  %v9227_v33 = vld [vmem:[%s8847_s23 + $0x13c] sm:$0xf0]  ;;  %v1634_v59 = vrot.slane %v1632_v29, 5 }
  0x80   : > { %v1424_v43 = vshll.u32 %v9189_v49, 16  ;;  %v1615_v23 = vor.u32 %v1614_v5, %v1611_v24  ;;  %v1812_v27 = vrot.slane %v9189_v49, 5  ;;  %v7658_v39 = vor.u32 %v9227_v33, %v9224_v1  ;;  %v7755_v60 = vld [vmem:[%s12118_s1 + $0x1a] sm:$0x3]  ;;  %v9344_v1 = vld [vmem:[%s8847_s23 + $0xc8] sm:$0xe] }
  0x81   : > { %v944_v9 = vsel %vm8913_vm8, %v7594_v40, %v943_v42  ;;  %v7714_v40 = vrot.slane %v9230_v53, 9  ;;  %v1816_v42 = vrot.slane %v9193_v58, 5  ;;  %v1179_v49 = vpack.c.b16 %v1175_v21, %v1174_v20  ;;  %v7690_v20 = vld [vmem:[%s8847_s23 + $0x120] sm:$0xf] }
  0x82   : > { %v1426_v2 = vrot.slane %v1424_v43, 5  ;;  %v954_v15 = vunpack.c.l.b16 %v944_v9  ;;  %v1616_v32 = vrot.slane %v1615_v23, 4  ;;  %v9262_v51 = vsel %vm8913_vm8, %v7713_v26, %v1812_v27  ;;  %v7726_v43 = vld [vmem:[%s8847_s23 + $0x108] sm:$0xe]  ;;  %v7727_v9 = vld [vmem:[%s8847_s23 + $0x110] sm:$0xe] }
  0x83   : > { %v2375_v58 = vand.u32 %v7797_v37, %v8825_v4  ;;  %v1443_v61 = vshrl.u32 %v7667_v47, 16  ;;  %v1446_v63 = vshll.u32 %v7667_v47, 16  ;;  %v1637_v24 = vshrl.u32 %v7688_v54, 16 }
  0x84   : > { %v1427_v28 = vsel %vm8895_vm6, %v1422_v44, %v1426_v2  ;;  %v9242_v31 = vpack.c.b16 %v954_v15, %v953_v13  ;;  %v9267_v5 = vunpack.c.l.b16 %v1441_v50  ;;  %v1844_v8 = vunpack.c.l.b16 %v9262_v51  ;;  %v9286_v2 = vld [vmem:[%s8847_s23 + $0xc4] sm:$0x1] }
  0x85   : > { %v9258_v35 = vunpack.c.l.b16 %v1427_v28  ;;  %2384 = vmatpush.bf16.msra.mxu3 %v2375_v58  ;;  %v7734_v56 = vrot.slane %v7726_v43, 9  ;;  %v2209_v11 = vand.u32 %v7755_v60, %v8825_v4  ;;  %v2569_v44 = vand.u32 %v7834_v12, %v8825_v4  ;;  %v9318_v43 = vld [vmem:[%s8847_s23 + $0xc0] sm:$0xe] }
  0x86   : > { %v1445_v55 = vrot.slane %v1443_v61, 4  ;;  %v1934_v13 = vrot.slane %v9201_v41, 5  ;;  %v1448_v15 = vrot.slane %v1446_v63, 5  ;;  %v1635_v21 = vsel %vm8895_vm6, %v1630_v18, %v1634_v59 }
  0x87   : > { %v7735_v25 = vrot.slane %v7727_v9, 9  ;;  %2218 = vmatpush.bf16.msra.mxu1 %v2209_v11  ;;  %2578 = vmatpush.bf16.msra.mxu0 %v2569_v44  ;;  %v1639_v6 = vrot.slane %v1637_v24, 4  ;;  %v1640_v26 = vshll.u32 %v7688_v54, 16  ;;  %v1938_v28 = vrot.slane %v9216_v45, 5 }
  0x88   : > { %v1449_v62 = vor.u32 %v1448_v15, %v1445_v55  ;;  %v1452_v41 = vshll.u32 %v9286_v2, 16  ;;  %v1466_v29 = vshll.u32 %v9289_v52, 16  ;;  %v1651_v10 = vshrl.u32 %v7690_v20, 16 }
  0x89   : > { %v1654_v37 = vshll.u32 %v7690_v20, 16  ;;  %v2039_v45 = vshrl.u32 %v9209_v14, 16  ;;  %v9312_v50 = vunpack.c.l.b16 %v1635_v21  ;;  %v1935_v54 = vsel %vm8913_vm8, %v7734_v56, %v1934_v13  ;;  %v7673_v21 = vld [vmem:[%s8847_s23 + $0xd8] sm:$0xf] }
  0x8a   : > { %v1646_v59 = vshll.u32 %v9301_v30, 16  ;;  %v2057_v58 = vshrl.u32 %v9230_v53, 16  ;;  %v1454_v61 = vrot.slane %v1452_v41, 5  ;;  %v1468_v63 = vrot.slane %v1466_v29, 5 }
  0x8b   : > { %v1653_v24 = vrot.slane %v1651_v10, 4  ;;  %v7715_v9 = vrot.slane %v9318_v43, 9  ;;  %v1820_v60 = vrot.slane %v9286_v2, 5  ;;  %v9354_v44 = vrot.slane %v2039_v45, 5  ;;  %v7692_v45 = vld [vmem:[%s8847_s23 + $0x128] sm:$0xf] }
  0x8c   : > { %7598 = vmatmul.msk.bf16.gmra.mxu1 %vm260_vm2, %v957_v0  ;;  %7603 = vmatmul.msk.bf16.gmra.mxu2 %vm260_vm2, %v1178_v36  ;;  %v1457_v0 = vshrl.u32 %v7669_v48, 16  ;;  %v1621_v36 = vsel %vm8895_vm6, %v1616_v32, %v1620_v34  ;;  %v1642_v34 = vrot.slane %v1640_v26, 5  ;;  %v1824_v20 = vrot.slane %v9289_v52, 5  ;;  %v7729_v52 = vld [vmem:[%s8847_s23 + $0x120] sm:$0xe] }
  0x8d   : > { %v2075_v29 = vshrl.u32 %v9318_v43, 16  ;;  %vm7356_vm12 = vcmask 519168  }
  0x8e   : > { %v1459_v23 = vrot.slane %v1457_v0, 4  ;;  %v1643_v18 = vor.u32 %v1642_v34, %v1639_v6  ;;  %v1450_v0 = vrot.slane %v1449_v62, 4 }
  0x8f   : > { %7632 = vmatmul.msk.bf16.gmra.mxu3 %vm260_vm2, %v7625_v3  ;;  %7661 = vmatmul.msk.bf16.gmra.mxu0 %vm260_vm2, %v7654_v7  ;;  %v1460_v3 = vshll.u32 %v7669_v48, 16  ;;  %v9273_v7 = vsel %vm8913_vm8, %v7714_v40, %v1816_v42  ;;  %v9305_v42 = vunpack.c.l.b16 %v1621_v36  ;;  %v2042_v48 = vshll.u32 %v9209_v14, 16 }
  0x90   : > { %v1845_v47 = vunpack.c.l.b16 %v9273_v7  ;;  %v1939_v14 = vsel %vm8913_vm8, %v7735_v25, %v1938_v28  ;;  %v1656_v36 = vrot.slane %v1654_v37, 5  ;;  %v1966_v7 = vunpack.c.l.b16 %v1935_v54  ;;  %v9398_v54 = vld [vmem:[%s8847_s23 + $0xd4] sm:$0x1] }
  0x91   : > { %v1462_v19 = vrot.slane %v1460_v3, 5  ;;  %v1967_v17 = vunpack.c.l.b16 %v1939_v14  ;;  %v1644_v22 = vrot.slane %v1643_v18, 4  ;;  %v9356_v2 = vrot.slane %v2042_v48, 6  ;;  %v9401_v18 = vld [vmem:[%s8847_s23 + $0xdc] sm:$0x1] }
  0x92   : > { %v1730_v55 = vpack.c.b16 %v9312_v50, %v9305_v42  ;;  %v1455_v13 = vsel %vm8895_vm6, %v1450_v0, %v1454_v61  ;;  %v1942_v0 = vrot.slane %v9301_v30, 5 }
  0x93   : > { %v1463_v32 = vor.u32 %v1462_v19, %v1459_v23  ;;  %v1657_v23 = vor.u32 %v1656_v36, %v1653_v24  ;;  %v7716_v19 = vrot.slane %v9344_v1, 9  ;;  %v1974_v6 = vpack.c.b16 %v1967_v17, %v1966_v7 }
  0x94   : > { %v9382_v62 = vunpack.c.l.b16 %v1455_v13  ;;  %v1668_v17 = vshll.u32 %v7692_v45, 16  ;;  %v1494_v13 = vshll.u32 %v9401_v18, 16 }
  0x95   : > { %v1464_v3 = vrot.slane %v1463_v32, 4  ;;  %v7728_v32 = vld [vmem:[%s8847_s23 + $0x118] sm:$0xe]  ;;  %v1658_v10 = vrot.slane %v1657_v23, 4  ;;  %v9395_v50 = vsel %vm8913_vm8, %v7716_v19, %v1824_v20 }
  0x96   : > { %v1670_v19 = vrot.slane %v1668_v17, 5 }
  0x97   : > { %v1469_v15 = vsel %vm8895_vm6, %v1464_v3, %v1468_v63  ;;  %v7736_v63 = vrot.slane %v7728_v32, 9  ;;  %v1847_v32 = vunpack.c.l.b16 %v9395_v50  ;;  %v9439_v50 = vld [vmem:[%s8847_s23 + $0x134] sm:$0x1] }
  0x98   : > { %v9384_v41 = vunpack.c.l.b16 %v1469_v15 }
  0x99   : > { %v9295_v27 = vpop.f32.mrf.mxu1 }
  0x9c   : > { %v9303_v40 = vpop.f32.mrf.mxu0  ;;  %7599 = vmatmul.msk.bf16.gmra.mxu1 %vm260_vm2, %v9242_v31  ;;  %7604 = vmatmul.msk.bf16.gmra.mxu2 %vm260_vm2, %v1179_v49  ;;  %v9325_v31 = vld [vmem:[%s8847_s23 + $0x124] sm:$0x1]  ;;  %v2060_v49 = vshll.u32 %v9230_v53, 16  ;;  %v1536_v53 = vpack.c.b16 %v9267_v5, %v9258_v35  ;;  %v7671_v35 = vld [vmem:[%s8847_s23 + $0xd0] sm:$0xf]  ;;  %v9367_v5 = vrot.slane %v2057_v58, 5 }
  0x9d   : > { %v1660_v11 = vshll.u32 %v9325_v31, 16  ;;  %v1471_v34 = vshrl.u32 %v7671_v35, 16  ;;  %v1474_v42 = vshll.u32 %v7671_v35, 16  ;;  %v1488_v58 = vshll.u32 %v7673_v21, 16  ;;  %v9414_v35 = vld [vmem:[%s8847_s23 + $0x12c] sm:$0x1] }
  0x9e   : > { %v9376_v25 = vrot.slane %v2060_v49, 6  ;;  %v7737_v49 = vrot.slane %v7729_v52, 9  ;;  %v2093_v52 = vshrl.u32 %v9344_v1, 16 }
  0x9f   : > { %7633 = vmatmul.msk.bf16.gmra.mxu3 %vm260_vm2, %v7629_v38  ;;  %7662 = vmatmul.msk.bf16.gmra.mxu0 %vm260_vm2, %v7658_v39  ;;  %v9338_v12 = vpop.f32.mrf.mxu2  ;;  %v1648_v38 = vrot.slane %v1646_v59, 5  ;;  %v9352_v39 = vpack.c.b16 %v1845_v47, %v1844_v8  ;;  %v9371_v8 = vsel %vm8913_vm8, %v7715_v9, %v1820_v60  ;;  %v9380_v28 = vrot.slane %v1660_v11, 5  ;;  %v7694_v9 = vld [vmem:[%s8847_s23 + $0x130] sm:$0xf] }
  0xa0   : > { %v1846_v37 = vunpack.c.l.b16 %v9371_v8  ;;  %v1485_v47 = vshrl.u32 %v7673_v21, 16  ;;  %v1473_v59 = vrot.slane %v1471_v34, 4  ;;  %v1476_v3 = vrot.slane %v1474_v42, 5  ;;  %v7677_v8 = vld [vmem:[%s8847_s23 + $0xe8] sm:$0xf] }
  0xa1   : > { %v9346_v33 = vpop.f32.mrf.mxu1  ;;  %v1649_v26 = vsel %vm8895_vm6, %v1644_v22, %v1648_v38  ;;  %v1490_v7 = vrot.slane %v1488_v58, 5  ;;  %v1665_v60 = vshrl.u32 %v7692_v45, 16  ;;  %v1946_v38 = vrot.slane %v9325_v31, 5 }
  0xa2   : > { %v9340_v56 = vpop.f32.mrf.mxu3  ;;  %v9391_v48 = vunpack.c.l.b16 %v1649_v26  ;;  %v1487_v24 = vrot.slane %v1485_v47, 4  ;;  %v1480_v11 = vshll.u32 %v9398_v54, 16  ;;  %v1477_v15 = vor.u32 %v1476_v3, %v1473_v59 }
  0xa3   : > { %v1667_v30 = vrot.slane %v1665_v60, 4  ;;  %v9420_v21 = vrot.slane %v2075_v29, 5  ;;  %v2078_v31 = vshll.u32 %v9318_v43, 16  ;;  %v1679_v26 = vshrl.u32 %v7694_v9, 16 }
  0xa4   : > { %v9365_v51 = vpop.f32.mrf.mxu0  ;;  %v1491_v23 = vor.u32 %v1490_v7, %v1487_v24  ;;  %v1943_v34 = vsel %vm8913_vm8, %v7736_v63, %v1942_v0  ;;  %v2096_v42 = vshll.u32 %v9344_v1, 16  ;;  %v1482_v29 = vrot.slane %v1480_v11, 5 }
  0xa5   : > { %v1674_v43 = vshll.u32 %v9414_v35, 16  ;;  %v1496_v45 = vrot.slane %v1494_v13, 5  ;;  %v1671_v59 = vor.u32 %v1670_v19, %v1667_v30  ;;  %v9443_v63 = vrot.slane %v2078_v31, 6  ;;  %v7675_v31 = vld [vmem:[%s8847_s23 + $0xe0] sm:$0xf] }
  0xa6   : > { %v1492_v47 = vrot.slane %v1491_v23, 4  ;;  %v1968_v0 = vunpack.c.l.b16 %v1943_v34  ;;  %v1681_v3 = vrot.slane %v1679_v26, 4  ;;  %v1853_v23 = vpack.c.b16 %v1847_v32, %v1846_v37 }
  0xa7   : > { %v9403_v14 = vpop.f32.mrf.mxu2  ;;  %v9448_v17 = vrot.slane %v1674_v43, 5  ;;  %v9461_v30 = vrot.slane %v2093_v52, 5  ;;  %v9463_v19 = vrot.slane %v2096_v42, 6  ;;  %v7730_v42 = vld [vmem:[%s8847_s23 + $0x128] sm:$0xe]  ;;  %v1499_v43 = vshrl.u32 %v7675_v31, 16 }
  0xa8   : > { %v1497_v13 = vsel %vm8895_vm6, %v1492_v47, %v1496_v45 }
  0xa9   : > { %v353_v36 = vpop.f32.mrf.mxu1  ;;  %v9480_v32 = vunpack.c.l.b16 %v1497_v13  ;;  %v1516_v13 = vshll.u32 %v7677_v8, 16 }
  0xaa   : > { %v9405_v61 = vpop.f32.mrf.mxu3  ;;  %v354_v22 = vadd.f32 %v353_v36, %v9303_v40  ;;  %v1663_v40 = vsel %vm8895_vm6, %v1658_v10, %v9380_v28  ;;  %v1947_v28 = vsel %vm8913_vm8, %v7737_v49, %v1946_v38  ;;  %v9433_v10 = vld [vmem:[%s8847_s23 + $0xd0] sm:$0xe]  ;;  %v1688_v38 = vshll.u32 %v9439_v50, 16 }
  0xab   : > { %v9441_v58 = vunpack.c.l.b16 %v1663_v40  ;;  %v1969_v60 = vunpack.c.l.b16 %v1947_v28  ;;  %v9466_v40 = vld [vmem:[%s8847_s23 + $0xd8] sm:$0xe]  ;;  %v1832_v28 = vrot.slane %v9401_v18, 5  ;;  %v2111_v45 = vshrl.u32 %v9433_v10, 16 }
  0xac   : > { %v861_v20 = vpop.f32.mrf.mxu0  ;;  %7680 = vmatmul.msk.bf16.vlgmr.msrb.gmra.mxu1 %vm260_vm2, %v1536_v53  ;;  %7701 = vmatmul.msk.bf16.vlgmr.msrb.gmra.mxu2 %vm260_vm2, %v1730_v55  ;;  %v1682_v53 = vshll.u32 %v7694_v9, 16  ;;  %v1478_v55 = vrot.slane %v1477_v15, 4  ;;  %v9455_v15 = vrot.slane %v1671_v59, 4  ;;  %v9482_v52 = vrot.slane %v1688_v38, 5 }
  0xad   : > { %v1731_v34 = vpack.c.b16 %v9441_v58, %v9391_v48  ;;  %v1502_v59 = vshll.u32 %v7675_v31, 16 }
  0xae   : > { %v1684_v49 = vrot.slane %v1682_v53, 5  ;;  %v1677_v48 = vsel %vm8895_vm6, %v9455_v15, %v9448_v17  ;;  %v7698_v17 = vld [vmem:[%s8847_s23 + $0x140] sm:$0xf]  ;;  %v9508_v15 = vld [vmem:[%s8847_s23 + $0xec] sm:$0x1] }
  0xaf   : > { %7722 = vmatmul.msk.bf16.vlgmr.msrb.gmra.mxu3 %vm260_vm2, %v9352_v39  ;;  %7743 = vmatmul.msk.bf16.vlgmr.msrb.gmra.mxu0 %vm260_vm2, %v1974_v6  ;;  %v542_v1 = vpop.f32.mrf.mxu2  ;;  %v7717_v39 = vrot.slane %v9433_v10, 9  ;;  %v1828_v6 = vrot.slane %v9398_v54, 5 }
  0xb0   : > { %v562_v24 = vadd.f32 %v542_v1, %v354_v22  ;;  %v1483_v22 = vsel %vm8895_vm6, %v1478_v55, %v1482_v29  ;;  %v1685_v53 = vor.u32 %v1684_v49, %v1681_v3  ;;  %v7731_v29 = vld [vmem:[%s8847_s23 + $0x130] sm:$0xe]  ;;  %v1513_v1 = vshrl.u32 %v7677_v8, 16  ;;  %v7696_v49 = vld [vmem:[%s8847_s23 + $0x138] sm:$0xf] }
  0xb1   : > { %v355_v36 = vpop.f32.mrf.mxu1  ;;  %v9478_v37 = vunpack.c.l.b16 %v1483_v22  ;;  %v1504_v22 = vrot.slane %v1502_v59, 5  ;;  %v1707_v59 = vshrl.u32 %v7698_v17, 16 }
  0xb2   : > { %v736_v7 = vpop.f32.mrf.mxu3  ;;  %v356_v9 = vadd.f32 %v355_v36, %v9365_v51  ;;  %v1537_v51 = vpack.c.b16 %v9384_v41, %v9382_v62  ;;  %v9475_v62 = vsel %vm8913_vm8, %v7717_v39, %v1828_v6  ;;  %v1975_v41 = vpack.c.b16 %v1969_v60, %v1968_v0 }
  0xb3   : > { %v756_v11 = vadd.f32 %v736_v7, %v562_v24  ;;  %v1848_v47 = vunpack.c.l.b16 %v9475_v62  ;;  %v1686_v3 = vrot.slane %v1685_v53, 4  ;;  %v7738_v24 = vrot.slane %v7730_v42, 9 }
  0xb4   : > { %v863_v54 = vpop.f32.mrf.mxu0  ;;  %v1950_v36 = vrot.slane %v9414_v35, 5  ;;  %v1538_v6 = vpack.c.b16 %v9480_v32, %v9478_v37  ;;  %v7739_v7 = vrot.slane %v7731_v29, 9  ;;  %v1954_v60 = vrot.slane %v9439_v50, 5  ;;  %v7818_v37 = vld [vmem:[%s8847_s23 + $0x8] sm:$0xf] }
  0xb5   : > { %v9469_v26 = vadd.f32 %v861_v20, %v756_v11  ;;  %v7718_v20 = vrot.slane %v9466_v40, 9  ;;  %v9502_v11 = vld [vmem:[%s8847_s23 + $0xe4] sm:$0x1]  ;;  %v1515_v31 = vrot.slane %v1513_v1, 4  ;;  %v1693_v53 = vshrl.u32 %v7696_v49, 16 }
  0xb6   : > { %v1696_v42 = vshll.u32 %v7696_v49, 16  ;;  %v1691_v29 = vsel %vm8895_vm6, %v1686_v3, %v9482_v52  ;;  %v1951_v8 = vsel %vm8913_vm8, %v7738_v24, %v1950_v36  ;;  %v1522_v52 = vshll.u32 %v9508_v15, 16 }
  0xb7   : > { %v544_v55 = vpop.f32.mrf.mxu2  ;;  %v1710_v1 = vshll.u32 %v7698_v17, 16  ;;  %v1727_v17 = vunpack.c.l.b16 %v1691_v29  ;;  %v9541_v29 = vld [vmem:[%s8847_s23 + $0xe8] sm:$0xe] }
  0xb8   : > { %v563_v58 = vadd.f32 %v544_v55, %v356_v9  ;;  %v1501_v9 = vrot.slane %v1499_v43, 4  ;;  %v9519_v43 = vld [vmem:[%s8847_s23 + $0x13c] sm:$0x1]  ;;  %v1698_v55 = vrot.slane %v1696_v42, 5 }
  0xb9   : > { %v358_v0 = vpop.f32.mrf.mxu1  ;;  %v1702_v36 = vshll.u32 %v9519_v43, 16 }
  0xba   : > { %v738_v18 = vpop.f32.mrf.mxu3  ;;  %v359_v39 = vadd.f32 %v358_v0, %v9295_v27  ;;  %v1833_v27 = vsel %vm8913_vm8, %v7718_v20, %v1832_v28  ;;  %v1508_v20 = vshll.u32 %v9502_v11, 16  ;;  %v1695_v28 = vrot.slane %v1693_v53, 4 }
  0xbb   : > { %v757_v38 = vadd.f32 %v738_v18, %v563_v58  ;;  %v9527_v0 = vunpack.c.l.b16 %v1677_v48  ;;  %v9535_v48 = vld [vmem:[%s8847_s23 + $0xe0] sm:$0xe] }
  0xbc   : > { %v866_v35 = vpop.f32.mrf.mxu0  ;;  %7681 = vmatmul.msk.bf16.gmra.mxu1 %vm260_vm2, %v1537_v51  ;;  %7702 = vmatmul.msk.bf16.gmra.mxu2 %vm260_vm2, %v1731_v34  ;;  %v1518_v51 = vrot.slane %v1516_v13, 5  ;;  %v1505_v34 = vor.u32 %v1504_v22, %v1501_v9  ;;  %v1699_v24 = vor.u32 %v1698_v55, %v1695_v28  ;;  %v1712_v13 = vrot.slane %v1710_v1, 5 }
  0xbd   : > { %v9510_v50 = vadd.f32 %v863_v54, %v757_v38  ;;  %v1955_v54 = vsel %vm8913_vm8, %v7739_v7, %v1954_v60  ;;  %v9531_v38 = vld [vmem:[%s8847_s23 + $0x144] sm:$0x1]  ;;  %v1970_v9 = vunpack.c.l.b16 %v1951_v8  ;;  %v1510_v42 = vrot.slane %v1508_v20, 5 }
  0xbe   : > { %v1519_v3 = vor.u32 %v1518_v51, %v1515_v31  ;;  %v1971_v22 = vunpack.c.l.b16 %v1955_v54  ;;  %v1506_v53 = vrot.slane %v1505_v34, 4  ;;  %v1524_v51 = vrot.slane %v1522_v52, 5 }
  0xbf   : > { %7723 = vmatmul.msk.bf16.gmra.mxu3 %vm260_vm2, %v1853_v23  ;;  %7744 = vmatmul.msk.bf16.gmra.mxu0 %vm260_vm2, %v1975_v41  ;;  %v547_v58 = vpop.f32.mrf.mxu2  ;;  %v1849_v23 = vunpack.c.l.b16 %v1833_v27  ;;  %v1709_v41 = vrot.slane %v1707_v59, 4  ;;  %v1700_v27 = vrot.slane %v1699_v24, 4  ;;  %v1704_v55 = vrot.slane %v1702_v36, 5  ;;  %v7732_v36 = vld [vmem:[%s8847_s23 + $0x138] sm:$0xe] }
  0xc0   : > { %v564_v49 = vadd.f32 %v547_v58, %v359_v39  ;;  %v1520_v28 = vrot.slane %v1519_v3, 4  ;;  %v1716_v59 = vshll.u32 %v9531_v38, 16  ;;  %v7719_v8 = vrot.slane %v9535_v48, 9 }
  0xc1   : > { %v360_v18 = vpop.f32.mrf.mxu1  ;;  %v1836_v54 = vrot.slane %v9502_v11, 5  ;;  %v9547_v20 = vrot.slane %v2111_v45, 5  ;;  %v2114_v34 = vshll.u32 %v9433_v10, 16  ;;  %v2129_v52 = vshrl.u32 %v9466_v40, 16 }
  0xc2   : > { %v741_v7 = vpop.f32.mrf.mxu3  ;;  %v361_v60 = vadd.f32 %v360_v18, %v9346_v33  ;;  %v1713_v33 = vor.u32 %v1712_v13, %v1709_v41  ;;  %v2132_v58 = vshll.u32 %v9466_v40, 16  ;;  %v1854_v3 = vpack.c.b16 %v1849_v23, %v1848_v47  ;;  %v7747_v13 = vld [vmem:[%s8847_s23 + $0xb4] sm:$0x3] }
  0xc3   : > { %v758_v31 = vadd.f32 %v741_v7, %v564_v49  ;;  %v1976_v24 = vpack.c.b16 %v1971_v22, %v1970_v9  ;;  %v1511_v11 = vsel %vm8895_vm6, %v1506_v53, %v1510_v42  ;;  %v7733_v49 = vld [vmem:[%s8847_s23 + $0x140] sm:$0xe]  ;;  %v1525_v10 = vsel %vm8895_vm6, %v1520_v28, %v1524_v51  ;;  %v7748_v9 = vld [vmem:[%s8847_s23 + $0xbc] sm:$0x3] }
  0xc4   : > { %v868_v39 = vpop.f32.mrf.mxu0  ;;  %v1705_v18 = vsel %vm8895_vm6, %v1700_v27, %v1704_v55  ;;  %v1718_v41 = vrot.slane %v1716_v59, 5  ;;  %v1714_v23 = vrot.slane %v1713_v33, 4  ;;  %v9567_v7 = vsel %vm8913_vm8, %v7719_v8, %v1836_v54 }
  0xc5   : > { %v9538_v1 = vadd.f32 %v866_v35, %v758_v31  ;;  %v1732_v35 = vpack.c.b16 %v1727_v17, %v9527_v0  ;;  %v7720_v0 = vrot.slane %v9541_v29, 9  ;;  %v1840_v17 = vrot.slane %v9508_v15, 5 }
  0xc6   : > { %v7740_v53 = vrot.slane %v7732_v36, 9  ;;  %v1958_v42 = vrot.slane %v9519_v43, 5  ;;  %v7741_v51 = vrot.slane %v7733_v49, 9  ;;  %v2048_v27 = vshrl.u32 %v7747_v13, 16 }
  0xc7   : > { %v549_v45 = vpop.f32.mrf.mxu2  ;;  %v2051_v55 = vshll.u32 %v7747_v13, 16  ;;  %v9578_v15 = vrot.slane %v2114_v34, 6  ;;  %v9582_v33 = vunpack.c.l.b16 %v1525_v10  ;;  %v2066_v43 = vshrl.u32 %v7748_v9, 16 }
  0xc8   : > { %v565_v62 = vadd.f32 %v549_v45, %v361_v60  ;;  %v1962_v60 = vrot.slane %v9531_v38, 5  ;;  %v9587_v38 = vunpack.c.l.b16 %v1705_v18  ;;  %v1850_v54 = vunpack.c.l.b16 %v9567_v7  ;;  %v7876_v18 = vld [vmem:[%s12118_s1 + $0x24] sm:$0x3] }
  0xc9   : > { %v363_v47 = vpop.f32.mrf.mxu1  ;;  %v2069_v36 = vshll.u32 %v7748_v9, 16  ;;  %v1719_v32 = vsel %vm8895_vm6, %v1714_v23, %v1718_v41  ;;  %v1959_v34 = vsel %vm8913_vm8, %v7740_v53, %v1958_v42  ;;  %v2050_v49 = vrot.slane %v2048_v27, 5 }
  0xca   : > { %v743_v22 = vpop.f32.mrf.mxu3  ;;  %v364_v31 = vadd.f32 %v363_v47, %v9338_v12  ;;  %v9580_v12 = vunpack.c.l.b16 %v1511_v11  ;;  %v7820_v11 = vld [vmem:[%s8847_s23 + $0x10] sm:$0xf]  ;;  %v2053_v45 = vrot.slane %v2051_v55, 6  ;;  %v2063_v10 = vor.u32 %v9376_v25, %v9367_v5  ;;  %v7897_v5 = vld [vmem:[%s12118_s1 + $0x26] sm:$0x3] }
  0xcb   : > { %v759_v28 = vadd.f32 %v743_v22, %v565_v62  ;;  %v2071_v62 = vrot.slane %v2069_v36, 6  ;;  %v2445_v47 = vshrl.u32 %v7820_v11, 16  ;;  %v2448_v23 = vshll.u32 %v7820_v11, 16  ;;  %v9620_v55 = vld [vmem:[%s8847_s23 + $0x14] sm:$0x1] }
  0xcc   : > { %v871_v59 = vpop.f32.mrf.mxu0  ;;  %7682 = vmatmul.msk.bf16.gmra.mxu1 %vm260_vm2, %v1538_v6  ;;  %7703 = vmatmul.msk.bf16.gmra.mxu2 %vm260_vm2, %v1732_v35  ;;  %v1841_v6 = vsel %vm8913_vm8, %v7720_v0, %v1840_v17  ;;  %v1963_v35 = vsel %vm8913_vm8, %v7741_v51, %v1962_v60  ;;  %v2068_v0 = vrot.slane %v2066_v43, 5  ;;  %v9614_v17 = vunpack.c.l.b16 %v1719_v32  ;;  %v7910_v11 = vld [vmem:[%s12118_s1 + $0x28] sm:$0x3] }
  0xcd   : > { %v9584_v8 = vadd.f32 %v868_v39, %v759_v28  ;;  %v2045_v39 = vor.u32 %v9356_v2, %v9354_v44  ;;  %v2885_v44 = vand.u32 %v7876_v18, %v8825_v4  ;;  %v2431_v2 = vshrl.u32 %v7818_v37, 16  ;;  %v9617_v28 = vld [vmem:[%s8847_s23 + $0xc] sm:$0x1] }
  0xce   : > { %v1851_v9 = vunpack.c.l.b16 %v1841_v6  ;;  %v1972_v22 = vunpack.c.l.b16 %v1959_v34  ;;  %v2064_v51 = vrot.slane %v2063_v10, 4  ;;  %v2054_v27 = vor.u32 %v2053_v45, %v2050_v49  ;;  %v7749_v10 = vld [vmem:[%s8847_s23 + $0xc4] sm:$0x3] }
  0xcf   : > { %7724 = vmatmul.msk.bf16.gmra.mxu3 %vm260_vm2, %v1854_v3  ;;  %7745 = vmatmul.msk.bf16.gmra.mxu0 %vm260_vm2, %v1976_v24  ;;  %v552_v41 = vpop.f32.mrf.mxu2  ;;  %v2434_v3 = vshll.u32 %v7818_v37, 16  ;;  %v2046_v42 = vrot.slane %v2045_v39, 4  ;;  %v2433_v43 = vrot.slane %v2431_v2, 4  ;;  %v2072_v32 = vor.u32 %v2071_v62, %v2068_v0  ;;  %v7855_v39 = vld [vmem:[%s12118_s1 + $0x22] sm:$0x3] }
  0xd0   : > { %v566_v13 = vadd.f32 %v552_v41, %v364_v31  ;;  %2894 = vmatpush.bf16.msrb.mxu2 %v2885_v44  ;;  %v1973_v31 = vunpack.c.l.b16 %v1963_v35  ;;  %v2447_v6 = vrot.slane %v2445_v47, 4  ;;  %v2450_v34 = vrot.slane %v2448_v23, 5  ;;  %v9648_v44 = vld [vmem:[%s8847_s23 + $0x8] sm:$0xf]  ;;  %v9651_v2 = vld [vmem:[%s8847_s23 + $0xc] sm:$0xf0] }
  0xd1   : > { %v365_v24 = vpop.f32.mrf.mxu1  ;;  %v2436_v36 = vrot.slane %v2434_v3, 5  ;;  %v9633_v35 = vrot.slane %v2129_v52, 5  ;;  %v2763_v49 = vand.u32 %v7855_v39, %v8825_v4  ;;  %v3225_v45 = vand.u32 %v7910_v11, %v8825_v4  ;;  %v9679_v11 = vld [vmem:[%s8847_s23 + $0x1c] sm:$0x1] }
  0xd2   : > { %v746_v25 = vpop.f32.mrf.mxu3  ;;  %v366_v7 = vadd.f32 %v365_v24, %v9403_v14  ;;  %v3007_v14 = vand.u32 %v7897_v5, %v8825_v4  ;;  %v9641_v18 = vrot.slane %v2132_v58, 6  ;;  %v1539_v41 = vpack.c.b16 %v9582_v33, %v9580_v12  ;;  %v7750_v12 = vld [vmem:[%s8847_s23 + $0xcc] sm:$0x3]  ;;  %v7822_v33 = vld [vmem:[%s8847_s23 + $0x18] sm:$0xf] }
  0xd3   : > { %v760_v53 = vadd.f32 %v746_v25, %v566_v13  ;;  %v1733_v52 = vpack.c.b16 %v9614_v17, %v9587_v38  ;;  %v1855_v0 = vpack.c.b16 %v1851_v9, %v1850_v54  ;;  %v1977_v13 = vpack.c.b16 %v1973_v31, %v1972_v22  ;;  %2772 = vmatpush.bf16.msrb.mxu1 %v2763_v49  ;;  %v9682_v49 = vld [vmem:[%s8847_s23 + $0x24] sm:$0x1] }
  0xd4   : > { %v873_v60 = vpop.f32.mrf.mxu0  ;;  %3016 = vmatpush.bf16.msrb.mxu3 %v3007_v14  ;;  %v9655_v24 = vsel %vm9105_vm11, %v2046_v42, %v2054_v27  ;;  %v2437_v40 = vor.u32 %v2436_v36, %v2433_v43  ;;  %v2454_v58 = vshll.u32 %v9620_v55, 16  ;;  %3234 = vmatpush.bf16.msrb.mxu0 %v3225_v45  ;;  %v9662_v62 = vsel %vm9105_vm11, %v2064_v51, %v2072_v32  ;;  %v7824_v42 = vld [vmem:[%s8847_s23 + $0x20] sm:$0xf] }
  0xd5   : > { %v9623_v37 = vadd.f32 %v871_v59, %v760_v53  ;;  %v2440_v59 = vshll.u32 %v9617_v28, 16  ;;  %v2451_v47 = vor.u32 %v2450_v34, %v2447_v6  ;;  %v2084_v23 = vshrl.u32 %v7749_v10, 16 }
  0xd6   : > { %v2087_v22 = vshll.u32 %v7749_v10, 16  ;;  %v2102_v31 = vshrl.u32 %v7750_v12, 16  ;;  %v2459_v27 = vshrl.u32 %v7822_v33, 16  ;;  %v2184_v43 = vunpack.c.l.b16 %v9655_v24 }
  0xd7   : > { %v554_v3 = vpop.f32.mrf.mxu2  ;;  %v9667_v9 = vrot.slane %v2440_v59, 5  ;;  %v2438_v36 = vrot.slane %v2437_v40, 4  ;;  %v2456_v14 = vrot.slane %v2454_v58, 5  ;;  %v2452_v6 = vrot.slane %v2451_v47, 4  ;;  %v9698_v47 = vld [vmem:[%s8847_s23 + $0x64] sm:$0xf0] }
  0xd8   : > { %v567_v38 = vadd.f32 %v554_v3, %v366_v7  ;;  %v2105_v7 = vshll.u32 %v7750_v12, 16  ;;  %v2081_v34 = vor.u32 %v9443_v63, %v9420_v21  ;;  %v2086_v39 = vrot.slane %v2084_v23, 5 }
  0xd9   : > { %v368_v54 = vpop.f32.mrf.mxu1  ;;  %v2089_v59 = vrot.slane %v2087_v22, 6  ;;  %v2461_v45 = vrot.slane %v2459_v27, 4  ;;  %v2462_v10 = vshll.u32 %v7822_v33, 16  ;;  %v2476_v63 = vshll.u32 %v7824_v42, 16 }
  0xda   : > { %v748_v5 = vpop.f32.mrf.mxu3  ;;  %v369_v25 = vadd.f32 %v368_v54, %v9340_v56  ;;  %v2185_v56 = vunpack.c.l.b16 %v9662_v62  ;;  %v2107_v21 = vrot.slane %v2105_v7, 6  ;;  %v2443_v24 = vsel %vm8895_vm6, %v2438_v36, %v9667_v9  ;;  %v9695_v62 = vld [vmem:[%s8847_s23 + $0x60] sm:$0xf]  ;;  %v7751_v7 = vld [vmem:[%s8847_s23 + $0xd4] sm:$0x3] }
  0xdb   : > { %v761_v53 = vadd.f32 %v748_v5, %v567_v38  ;;  %v2464_v40 = vrot.slane %v2462_v10, 5  ;;  %v2468_v58 = vshll.u32 %v9679_v11, 16  ;;  %v2082_v33 = vrot.slane %v2081_v34, 4  ;;  %v7752_v10 = vld [vmem:[%s8847_s23 + $0xdc] sm:$0x3] }
  0xdc   : > { %v876_v51 = vpop.f32.mrf.mxu0  ;;  %7683 = vmatmul.msk.bf16.gmra.mxu1 %vm260_vm2, %v1539_v41  ;;  %7704 = vmatmul.msk.bf16.gmra.mxu2 %vm260_vm2, %v1733_v52  ;;  %v2473_v41 = vshrl.u32 %v7824_v42, 16  ;;  %v2104_v52 = vrot.slane %v2102_v31, 5  ;;  %v2457_v23 = vsel %vm8895_vm6, %v2452_v6, %v2456_v14  ;;  %v2090_v5 = vor.u32 %v2089_v59, %v2086_v39  ;;  %v7826_v42 = vld [vmem:[%s8847_s23 + $0x28] sm:$0xf] }
  0xdd   : > { %v9673_v32 = vadd.f32 %v873_v60, %v761_v53  ;;  %v2099_v60 = vor.u32 %v9463_v19, %v9461_v30  ;;  %v2478_v30 = vrot.slane %v2476_v63, 5  ;;  %v2482_v19 = vshll.u32 %v9682_v49, 16 }
  0xde   : > { %v2475_v12 = vrot.slane %v2473_v41, 4  ;;  %v2108_v53 = vor.u32 %v2107_v21, %v2104_v52  ;;  %v2470_v34 = vrot.slane %v2468_v58, 5  ;;  %v2123_v41 = vshll.u32 %v7751_v7, 16 }
  0xdf   : > { %7725 = vmatmul.msk.bf16.gmra.mxu3 %vm260_vm2, %v1855_v0  ;;  %7746 = vmatmul.msk.bf16.gmra.mxu0 %vm260_vm2, %v1977_v13  ;;  %v557_v3 = vpop.f32.mrf.mxu2  ;;  %v2100_v22 = vrot.slane %v2099_v60, 4  ;;  %v2487_v17 = vshrl.u32 %v7826_v42, 16  ;;  %v2192_v14 = vpack.c.b16 %v2185_v56, %v2184_v43  ;;  %v7801_v6 = vor.u32 %v9698_v47, %v9695_v62 }
  0xe0   : > { %v568_v0 = vadd.f32 %v557_v3, %v369_v25  ;;  %v2465_v25 = vor.u32 %v2464_v40, %v2461_v45  ;;  %v2479_v31 = vor.u32 %v2478_v30, %v2475_v12  ;;  %v2544_v39 = vunpack.c.l.b16 %v2443_v24 }
  0xe1   : > { %v370_v13 = vpop.f32.mrf.mxu1  ;;  %v2545_v59 = vunpack.c.l.b16 %v2457_v23  ;;  %v2091_v45 = vsel %vm9105_vm11, %v2082_v33, %v2090_v5  ;;  %v2109_v60 = vsel %vm9105_vm11, %v2100_v22, %v2108_v53  ;;  %v2138_v52 = vshrl.u32 %v7752_v10, 16  ;;  %v9721_v5 = vld [vmem:[%s8847_s23 + $0x18] sm:$0xf]  ;;  %v7828_v22 = vld [vmem:[%s8847_s23 + $0x30] sm:$0xf] }
  0xe2   : > { %v751_v38 = vpop.f32.mrf.mxu3  ;;  %v371_v54 = vadd.f32 %v370_v13, %v9405_v61  ;;  %v2466_v36 = vrot.slane %v2465_v25, 4  ;;  %v2120_v61 = vshrl.u32 %v7751_v7, 16  ;;  %v2480_v3 = vrot.slane %v2479_v31, 4  ;;  %v9730_v25 = vld [vmem:[%s8847_s23 + $0x70] sm:$0xf] }
  0xe3   : > { %v762_v9 = vadd.f32 %v751_v38, %v568_v0  ;;  %v2484_v13 = vrot.slane %v2482_v19, 5  ;;  %v2141_v21 = vshll.u32 %v7752_v10, 16  ;;  %v2117_v43 = vor.u32 %v9578_v15, %v9547_v20  ;;  %v9724_v20 = vld [vmem:[%s8847_s23 + $0x1c] sm:$0xf0]  ;;  %v9727_v15 = vld [vmem:[%s8847_s23 + $0x2c] sm:$0x1] }
  0xe4   : > { %v878_v27 = vpop.f32.mrf.mxu0  ;;  %v2471_v40 = vsel %vm8895_vm6, %v2466_v36, %v2470_v34  ;;  %v2122_v56 = vrot.slane %v2120_v61, 5  ;;  %v2125_v24 = vrot.slane %v2123_v41, 6  ;;  %v2489_v33 = vrot.slane %v2487_v17, 4  ;;  %v9739_v31 = vld [vmem:[%s8847_s23 + $0x74] sm:$0xf0] }
  0xe5   : > { %v9705_v63 = vadd.f32 %v876_v51, %v762_v9  ;;  %v2485_v0 = vsel %vm8895_vm6, %v2480_v3, %v2484_v13  ;;  %v2490_v30 = vshll.u32 %v7826_v42, 16  ;;  %v2552_v62 = vpack.c.b16 %v2545_v59, %v2544_v39  ;;  %v9744_v10 = vld [vmem:[%s8847_s23 + $0x34] sm:$0x1] }
  0xe6   : > { %v2186_v47 = vunpack.c.l.b16 %v2091_v45  ;;  %v2187_v23 = vunpack.c.l.b16 %v2109_v60  ;;  %v9732_v9 = vunpack.c.l.b16 %v2471_v40  ;;  %v2135_v17 = vor.u32 %v9641_v18, %v9633_v35 }
  0xe7   : > { %v559_v51 = vpop.f32.mrf.mxu2  ;;  %v9741_v7 = vunpack.c.l.b16 %v2485_v0  ;;  %v2118_v42 = vrot.slane %v2117_v43, 4  ;;  %v2126_v36 = vor.u32 %v2125_v24, %v2122_v56  ;;  %v2140_v34 = vrot.slane %v2138_v52, 5 }
  0xe8   : > { %v569_v58 = vadd.f32 %v559_v51, %v371_v54  ;;  %v12129_v41 = vor.u32 %v9651_v2, %v9648_v44  ;;  %v2143_v35 = vrot.slane %v2141_v21, 6  ;;  %v2496_v3 = vshll.u32 %v9727_v15, 16 }
  0xe9   : > { %v983_v12 = vpop.f32.mrf.mxu1  ;;  %v7776_v13 = vor.u32 %v9724_v20, %v9721_v5  ;;  %v2504_v39 = vshll.u32 %v7828_v22, 16  ;;  %v7805_v44 = vor.u32 %v9739_v31, %v9730_v25  ;;  %v2136_v2 = vrot.slane %v2135_v17, 4 }
  0xea   : > { %v753_v19 = vpop.f32.mrf.mxu3  ;;  %v1003_v38 = vadd.f32 %v983_v12, %v9469_v26  ;;  %v2492_v26 = vrot.slane %v2490_v30, 5  ;;  %v2510_v59 = vshll.u32 %v9744_v10, 16  ;;  %v2553_v60 = vpack.c.b16 %v9741_v7, %v9732_v9 }
  0xeb   : > { %v763_v54 = vadd.f32 %v753_v19, %v569_v58  ;;  %v9766_v52 = vsel %vm9105_vm11, %v2118_v42, %v2126_v36  ;;  %v2506_v21 = vrot.slane %v2504_v39, 5  ;;  %v2144_v43 = vor.u32 %v2143_v35, %v2140_v34 }
  0xec   : > { %v1370_v53 = vpop.f32.mrf.mxu0  ;;  %7756 = vmatmul.msk.bf16.vlgmr.msra.gmra.mxu1 %vm260_vm2, %v2192_v14  ;;  %7785 = vmatmul.msk.bf16.vlgmr.msra.gmra.mxu2 %vm260_vm2, %v12129_v41  ;;  %v2493_v18 = vor.u32 %v2492_v26, %v2489_v33  ;;  %v2501_v14 = vshrl.u32 %v7828_v22, 16  ;;  %v2498_v24 = vrot.slane %v2496_v3, 5  ;;  %v2512_v33 = vrot.slane %v2510_v59, 5 }
  0xed   : > { %v9746_v61 = vadd.f32 %v878_v27, %v763_v54  ;;  %v9757_v27 = vpack.c.b16 %v2187_v23, %v2186_v47  ;;  %v2147_v30 = vshrl.u32 %v9535_v48, 16  ;;  %v7753_v47 = vld [vmem:[%s8847_s23 + $0xe4] sm:$0x3]  ;;  %v7754_v23 = vld [vmem:[%s8847_s23 + $0xec] sm:$0x3]  ;;  %v2150_v54 = vshll.u32 %v9535_v48, 16 }
  0xee   : > { %v2494_v56 = vrot.slane %v2493_v18, 4  ;;  %v2156_v42 = vshrl.u32 %v7753_v47, 16  ;;  %v2159_v36 = vshll.u32 %v7753_v47, 16  ;;  %v2168_v35 = vshll.u32 %v9541_v29, 16  ;;  %v7830_v18 = vld [vmem:[%s8847_s23 + $0x38] sm:$0xf] }
  0xef   : > { %7814 = vmatmul.msk.bf16.vlgmr.msra.gmra.mxu3 %vm260_vm2, %v7801_v6  ;;  %7835 = vmatmul.msk.bf16.vlgmr.msra.gmra.mxu0 %vm260_vm2, %v2552_v62  ;;  %v1204_v45 = vpop.f32.mrf.mxu2  ;;  %v2503_v6 = vrot.slane %v2501_v14, 4  ;;  %v2188_v62 = vunpack.c.l.b16 %v9766_v52  ;;  %v2149_v26 = vrot.slane %v2147_v30, 5  ;;  %v2152_v34 = vrot.slane %v2150_v54, 6  ;;  %v7832_v54 = vld [vmem:[%s8847_s23 + $0x40] sm:$0xf] }
  0xf0   : > { %v1224_v51 = vadd.f32 %v1204_v45, %v1003_v38  ;;  %v2165_v38 = vshrl.u32 %v9541_v29, 16  ;;  %v2145_v3 = vsel %vm9105_vm11, %v2136_v2, %v2144_v43  ;;  %v2158_v14 = vrot.slane %v2156_v42, 5  ;;  %v9794_v42 = vld [vmem:[%s8847_s23 + $0x2c] sm:$0xf0] }
  0xf1   : > { %v985_v40 = vpop.f32.mrf.mxu1  ;;  %v2507_v0 = vor.u32 %v2506_v21, %v2503_v6  ;;  %v2161_v48 = vrot.slane %v2159_v36, 6  ;;  %v2174_v39 = vshrl.u32 %v7754_v23, 16  ;;  %v2499_v59 = vsel %vm8895_vm6, %v2494_v56, %v2498_v24  ;;  %v9797_v36 = vld [vmem:[%s8847_s23 + $0x80] sm:$0xf] }
  0xf2   : > { %v1287_v58 = vpop.f32.mrf.mxu3  ;;  %v1004_v12 = vadd.f32 %v985_v40, %v9510_v50  ;;  %v2167_v41 = vrot.slane %v2165_v38, 5  ;;  %v2153_v45 = vor.u32 %v2152_v34, %v2149_v26  ;;  %v2170_v6 = vrot.slane %v2168_v35, 6  ;;  %v9800_v34 = vld [vmem:[%s8847_s23 + $0x84] sm:$0xf0] }
  0xf3   : > { %v1307_v19 = vadd.f32 %v1287_v58, %v1224_v51  ;;  %v2508_v22 = vrot.slane %v2507_v0, 4  ;;  %v2176_v51 = vrot.slane %v2174_v39, 5  ;;  %v2515_v40 = vshrl.u32 %v7830_v18, 16  ;;  %v9786_v0 = vld [vmem:[%s8847_s23 + $0x28] sm:$0xf] }
  0xf4   : > { %v1372_v17 = vpop.f32.mrf.mxu0  ;;  %v2518_v58 = vshll.u32 %v7830_v18, 16  ;;  %v2154_v30 = vrot.slane %v2153_v45, 4  ;;  %v2162_v56 = vor.u32 %v2161_v48, %v2158_v14  ;;  %v2171_v24 = vor.u32 %v2170_v6, %v2167_v41  ;;  %v9809_v48 = vld [vmem:[%s8847_s23 + $0x44] sm:$0x1] }
  0xf5   : > { %v9775_v50 = vadd.f32 %v1370_v53, %v1307_v19  ;;  %v2177_v53 = vshll.u32 %v7754_v23, 16  ;;  %v2513_v29 = vsel %vm8895_vm6, %v2508_v22, %v2512_v33  ;;  %v9789_v19 = vld [vmem:[%s8847_s23 + $0x3c] sm:$0x1]  ;;  %v2517_v38 = vrot.slane %v2515_v40, 4 }
  0xf6   : > { %v2520_v22 = vrot.slane %v2518_v58, 5  ;;  %v9802_v41 = vunpack.c.l.b16 %v2499_v59  ;;  %v9804_v35 = vunpack.c.l.b16 %v2513_v29  ;;  %v2172_v18 = vrot.slane %v2171_v24, 4  ;;  %v9828_v29 = vld [vmem:[%s8847_s23 + $0x3c] sm:$0xf0]  ;;  %v9853_v24 = vld [vmem:[%s8847_s23 + $0x90] sm:$0xf] }
  0xf7   : > { %v1206_v21 = vpop.f32.mrf.mxu2  ;;  %v2179_v33 = vrot.slane %v2177_v53, 6  ;;  %v2524_v39 = vshll.u32 %v9789_v19, 16  ;;  %v2529_v59 = vshrl.u32 %v7832_v54, 16  ;;  %v7780_v6 = vor.u32 %v9794_v42, %v9786_v0 }
  0xf8   : > { %v1225_v2 = vadd.f32 %v1206_v21, %v1004_v12  ;;  %v2189_v12 = vunpack.c.l.b16 %v2145_v3  ;;  %v2521_v3 = vor.u32 %v2520_v22, %v2517_v38  ;;  %v2163_v53 = vsel %vm9105_vm11, %v2154_v30, %v2162_v56  ;;  %v9825_v21 = vld [vmem:[%s8847_s23 + $0x38] sm:$0xf] }
  0xf9   : > { %v988_v43 = vpop.f32.mrf.mxu1  ;;  %v2180_v14 = vor.u32 %v2179_v33, %v2176_v51  ;;  %v2554_v20 = vpack.c.b16 %v9804_v35, %v9802_v41  ;;  %v2538_v25 = vshll.u32 %v9809_v48, 16  ;;  %v2190_v40 = vunpack.c.l.b16 %v2163_v53  ;;  %v7903_v41 = vld [vmem:[%s8847_s23 + $0x14] sm:$0x3] }
  0xfa   : > { %v1289_v47 = vpop.f32.mrf.mxu3  ;;  %v1005_v23 = vadd.f32 %v988_v43, %v9538_v1  ;;  %v9840_v5 = vpack.c.b16 %v2189_v12, %v2188_v62  ;;  %v2522_v7 = vrot.slane %v2521_v3, 4  ;;  %v7784_v62 = vor.u32 %v9828_v29, %v9825_v21  ;;  %v7841_v43 = vld [vmem:[%s8847_s23 + $0x68] sm:$0xf] }
  0xfb   : > { %v1308_v26 = vadd.f32 %v1289_v47, %v1225_v2  ;;  %v2181_v9 = vsel %vm9105_vm11, %v2172_v18, %v2180_v14  ;;  %v2540_v58 = vrot.slane %v2538_v25, 5  ;;  %v7839_v2 = vld [vmem:[%s8847_s23 + $0x60] sm:$0xf]  ;;  %v9856_v47 = vld [vmem:[%s8847_s23 + $0x94] sm:$0xf0]  ;;  %v2642_v12 = vshll.u32 %v7841_v43, 16 }
  0xfc   : > { %v1375_v1 = vpop.f32.mrf.mxu0  ;;  %7757 = vmatmul.msk.bf16.gmra.mxu1 %vm260_vm2, %v9757_v27  ;;  %7786 = vmatmul.msk.bf16.gmra.mxu2 %vm260_vm2, %v7776_v13  ;;  %v7809_v27 = vor.u32 %v9800_v34, %v9797_v36  ;;  %v2531_v13 = vrot.slane %v2529_v59, 4  ;;  %v2191_v22 = vunpack.c.l.b16 %v2181_v9  ;;  %v7860_v59 = vld [vmem:[%s8847_s23 + $0x8] sm:$0xe]  ;;  %v9867_v25 = vld [vmem:[%s8847_s23 + $0x6c] sm:$0x1] }
  0xfd   : > { %v9812_v45 = vadd.f32 %v1372_v17, %v1308_v26  ;;  %v2532_v17 = vshll.u32 %v7832_v54, 16  ;;  %v2628_v54 = vshll.u32 %v7839_v2, 16  ;;  %v2639_v26 = vshrl.u32 %v7841_v43, 16 }
  0xfe   : > { %v2644_v9 = vrot.slane %v2642_v12, 5  ;;  %v3055_v43 = vshrl.u32 %v7860_v59, 16 }
  0xff   : > { %7815 = vmatmul.msk.bf16.gmra.mxu3 %vm260_vm2, %v7805_v44  ;;  %7836 = vmatmul.msk.bf16.gmra.mxu0 %vm260_vm2, %v2553_v60  ;;  %v1209_v31 = vpop.f32.mrf.mxu2  ;;  %v2526_v44 = vrot.slane %v2524_v39, 5  ;;  %v2534_v60 = vrot.slane %v2532_v17, 5 }
 0x100   : > { %v1226_v51 = vadd.f32 %v1209_v31, %v1005_v23  ;;  %v2625_v23 = vshrl.u32 %v7839_v2, 16  ;;  %v2641_v31 = vrot.slane %v2639_v26, 4 }
 0x101   : > { %v990_v52 = vpop.f32.mrf.mxu1  ;;  %v2535_v33 = vor.u32 %v2534_v60, %v2531_v13  ;;  %v2527_v14 = vsel %vm8895_vm6, %v2522_v7, %v2526_v44  ;;  %v7840_v13 = vld [vmem:[%s8847_s23 + $0x64] sm:$0x1]  ;;  %v2648_v44 = vshll.u32 %v9867_v25, 16 }
 0x102   : > { %v1292_v30 = vpop.f32.mrf.mxu3  ;;  %v1006_v56 = vadd.f32 %v990_v52, %v9584_v8  ;;  %v2627_v39 = vrot.slane %v2625_v23, 4  ;;  %v2630_v8 = vrot.slane %v2628_v54, 5  ;;  %v2634_v7 = vshll.u32 %v7840_v13, 16 }
 0x103   : > { %v1309_v38 = vadd.f32 %v1292_v30, %v1226_v51  ;;  %v2536_v3 = vrot.slane %v2535_v33, 4  ;;  %v9872_v52 = vpack.c.b16 %v2191_v22, %v2190_v40  ;;  %v2645_v2 = vor.u32 %v2644_v9, %v2641_v31  ;;  %v7881_v22 = vld [vmem:[%s8847_s23 + $0x60] sm:$0xe] }
 0x104   : > { %v1377_v18 = vpop.f32.mrf.mxu0  ;;  %v2631_v51 = vor.u32 %v2630_v8, %v2627_v39  ;;  %v2636_v23 = vrot.slane %v2634_v7, 5  ;;  %v2650_v54 = vrot.slane %v2648_v44, 5  ;;  %v7861_v39 = vld [vmem:[%s8847_s23 + $0x10] sm:$0xe]  ;;  %v2828_v40 = vrot.slane %v9617_v28, 5 }
 0x105   : > { %v9861_v53 = vadd.f32 %v1375_v1, %v1309_v38  ;;  %v2541_v60 = vsel %vm8895_vm6, %v2536_v3, %v2540_v58  ;;  %v9874_v1 = vunpack.c.l.b16 %v2527_v14  ;;  %v7868_v38 = vrot.slane %v7860_v59, 9 }
 0x106   : > { %v2632_v33 = vrot.slane %v2631_v51, 4  ;;  %v9876_v12 = vunpack.c.l.b16 %v2541_v60  ;;  %v2646_v3 = vrot.slane %v2645_v2, 4  ;;  %v7869_v31 = vrot.slane %v7861_v39, 9  ;;  %v7882_v51 = vld [vmem:[%s8847_s23 + $0x68] sm:$0xe] }
 0x107   : > { %v1211_v30 = vpop.f32.mrf.mxu2  ;;  %v2832_v9 = vrot.slane %v9620_v55, 5  ;;  %v3058_v7 = vshll.u32 %v7860_v59, 16  ;;  %v2829_v60 = vsel %vm8913_vm8, %v7868_v38, %v2828_v40  ;;  %v7902_v2 = vld [vmem:[%s8847_s23 + $0xc] sm:$0x3]  ;;  %v7889_v59 = vrot.slane %v7881_v22, 9 }
 0x108   : > { %v1227_v26 = vadd.f32 %v1211_v30, %v1006_v56  ;;  %v2637_v56 = vsel %vm8895_vm6, %v2632_v33, %v2636_v23  ;;  %v3057_v30 = vrot.slane %v3055_v43, 5  ;;  %v2651_v28 = vsel %vm8895_vm6, %v2646_v3, %v2650_v54 }
 0x109   : > { %v993_v58 = vpop.f32.mrf.mxu1  ;;  %v2833_v55 = vsel %vm8913_vm8, %v7869_v31, %v2832_v9  ;;  %v2950_v33 = vrot.slane %v7840_v13, 5  ;;  %v7890_v23 = vrot.slane %v7882_v51, 9  ;;  %v2954_v54 = vrot.slane %v9867_v25, 5  ;;  %v7989_v31 = vld [vmem:[%s12118_s1 + $0x2e] sm:$0x3] }
 0x10a   : > { %v1294_v14 = vpop.f32.mrf.mxu3  ;;  %v1007_v8 = vadd.f32 %v993_v58, %v9623_v37  ;;  %v2860_v37 = vunpack.c.l.b16 %v2829_v60  ;;  %v2861_v43 = vunpack.c.l.b16 %v2833_v55  ;;  %v3060_v38 = vrot.slane %v3058_v7, 6  ;;  %v7843_v55 = vld [vmem:[%s8847_s23 + $0x70] sm:$0xf] }
 0x10b   : > { %v1310_v44 = vadd.f32 %v1294_v14, %v1227_v26  ;;  %v3064_v58 = vshrl.u32 %v7902_v2, 16  ;;  %v9912_v0 = vunpack.c.l.b16 %v2637_v56  ;;  %v3073_v13 = vshrl.u32 %v7861_v39, 16 }
 0x10c   : > { %v1380_v17 = vpop.f32.mrf.mxu0  ;;  %7758 = vmatmul.msk.bf16.gmra.mxu1 %vm260_vm2, %v9840_v5  ;;  %7787 = vmatmul.msk.bf16.gmra.mxu2 %vm260_vm2, %v7780_v6  ;;  %v2555_v5 = vpack.c.b16 %v9876_v12, %v9874_v1  ;;  %v9914_v42 = vpack.c.b16 %v2861_v43, %v2860_v37  ;;  %v7952_v6 = vld [vmem:[%s12118_s1 + $0x2c] sm:$0x3]  ;;  %v9919_v3 = vunpack.c.l.b16 %v2651_v28  ;;  %v9923_v36 = vsel %vm8913_vm8, %v7889_v59, %v2950_v33  ;;  %v7923_v28 = vld [vmem:[%s12118_s1 + $0x2a] sm:$0x3]  ;;  %v7904_v1 = vld [vmem:[%s8847_s23 + $0x1c] sm:$0x3] }
 0x10d   : > { %v9895_v26 = vadd.f32 %v1377_v18, %v1310_v44  ;;  %v3067_v18 = vshll.u32 %v7902_v2, 16  ;;  %v3391_v34 = vand.u32 %v7952_v6, %v8825_v4  ;;  %v3061_v35 = vor.u32 %v3060_v38, %v3057_v30 }
 0x10e   : > { %v9929_v40 = vsel %vm8913_vm8, %v7890_v23, %v2954_v54  ;;  %v3066_v22 = vrot.slane %v3064_v58, 5  ;;  %v3075_v44 = vrot.slane %v3073_v13, 5  ;;  %v2982_v60 = vunpack.c.l.b16 %v9923_v36  ;;  %v7845_v23 = vld [vmem:[%s8847_s23 + $0x78] sm:$0xf] }
 0x10f   : > { %7816 = vmatmul.msk.bf16.gmra.mxu3 %vm260_vm2, %v7809_v27  ;;  %7837 = vmatmul.msk.bf16.gmra.mxu0 %vm260_vm2, %v2554_v20  ;;  %v1214_v25 = vpop.f32.mrf.mxu2  ;;  %v3069_v14 = vrot.slane %v3067_v18, 6  ;;  %v3062_v7 = vrot.slane %v3061_v35, 4  ;;  %v3082_v30 = vshrl.u32 %v7903_v41, 16  ;;  %v3585_v43 = vand.u32 %v7989_v31, %v8825_v4  ;;  %v9952_v18 = vld [vmem:[%s8847_s23 + $0x74] sm:$0x1] }
 0x110   : > { %v1228_v27 = vadd.f32 %v1214_v25, %v1007_v8  ;;  %3400 = vmatpush.bf16.msra.mxu2 %v3391_v34  ;;  %v3076_v8 = vshll.u32 %v7861_v39, 16  ;;  %v3308_v33 = vand.u32 %v7923_v28, %v8825_v4  ;;  %v8010_v39 = vld [vmem:[%s12118_s1 + $0x30] sm:$0x3]  ;;  %v2983_v13 = vunpack.c.l.b16 %v9929_v40 }
 0x111   : > { %v995_v20 = vpop.f32.mrf.mxu1  ;;  %v3070_v2 = vor.u32 %v3069_v14, %v3066_v22  ;;  %v3084_v58 = vrot.slane %v3082_v30, 5  ;;  %v3779_v6 = vand.u32 %v8010_v39, %v8825_v4  ;;  %3594 = vmatpush.bf16.msra.mxu3 %v3585_v43  ;;  %v2653_v35 = vshrl.u32 %v7843_v55, 16 }
 0x112   : > { %v1297_v9 = vpop.f32.mrf.mxu3  ;;  %v1008_v51 = vadd.f32 %v995_v20, %v9673_v32  ;;  %v3078_v59 = vrot.slane %v3076_v8, 6  ;;  %v3085_v32 = vshll.u32 %v7903_v41, 16  ;;  %3317 = vmatpush.bf16.msra.mxu1 %v3308_v33  ;;  %v9956_v41 = vld [vmem:[%s8847_s23 + $0x7c] sm:$0x1]  ;;  %v2667_v20 = vshrl.u32 %v7845_v23, 16 }
 0x113   : > { %v1311_v56 = vadd.f32 %v1297_v9, %v1228_v27  ;;  %v3071_v38 = vsel %vm9105_vm11, %v3062_v7, %v3070_v2  ;;  %3788 = vmatpush.bf16.msra.mxu0 %v3779_v6  ;;  %v2662_v27 = vshll.u32 %v9952_v18, 16  ;;  %v2670_v22 = vshll.u32 %v7845_v23, 16  ;;  %v7862_v33 = vld [vmem:[%s8847_s23 + $0x18] sm:$0xe] }
 0x114   : > { %v1382_v37 = vpop.f32.mrf.mxu0  ;;  %v3079_v25 = vor.u32 %v3078_v59, %v3075_v44  ;;  %v3087_v34 = vrot.slane %v3085_v32, 6  ;;  %v3200_v7 = vunpack.c.l.b16 %v3071_v38  ;;  %v2655_v40 = vrot.slane %v2653_v35, 4 }
 0x115   : > { %v9946_v54 = vadd.f32 %v1380_v17, %v1311_v56  ;;  %v2656_v17 = vshll.u32 %v7843_v55, 16  ;;  %v2669_v2 = vrot.slane %v2667_v20, 4  ;;  %v2676_v30 = vshll.u32 %v9956_v41, 16 }
 0x116   : > { %v3080_v31 = vrot.slane %v3079_v25, 4  ;;  %v3088_v9 = vor.u32 %v3087_v34, %v3084_v58  ;;  %v2664_v32 = vrot.slane %v2662_v27, 5  ;;  %v2672_v43 = vrot.slane %v2670_v22, 5  ;;  %v7863_v58 = vld [vmem:[%s8847_s23 + $0x20] sm:$0xe] }
 0x117   : > { %v1216_v14 = vpop.f32.mrf.mxu2  ;;  %v2658_v56 = vrot.slane %v2656_v17, 5  ;;  %v7871_v34 = vrot.slane %v7863_v58, 9  ;;  %v2840_v35 = vrot.slane %v9682_v49, 5  ;;  %v7883_v22 = vld [vmem:[%s8847_s23 + $0x70] sm:$0xe]  ;;  %v2678_v21 = vrot.slane %v2676_v30, 5 }
 0x118   : > { %v1229_v44 = vadd.f32 %v1216_v14, %v1008_v51  ;;  %v3089_v59 = vsel %vm9105_vm11, %v3080_v31, %v3088_v9  ;;  %v7870_v51 = vrot.slane %v7862_v33, 9  ;;  %v2673_v25 = vor.u32 %v2672_v43, %v2669_v2  ;;  %v7905_v30 = vld [vmem:[%s8847_s23 + $0x24] sm:$0x3] }
 0x119   : > { %v998_v8 = vpop.f32.mrf.mxu1  ;;  %v3201_v23 = vunpack.c.l.b16 %v3089_v59  ;;  %v2659_v38 = vor.u32 %v2658_v56, %v2655_v40  ;;  %v2746_v31 = vpack.c.b16 %v9919_v3, %v9912_v0  ;;  %v9993_v9 = vpack.c.b16 %v2983_v13, %v2982_v60 }
 0x11a   : > { %v1299_v28 = vpop.f32.mrf.mxu3  ;;  %v1009_v55 = vadd.f32 %v998_v8, %v9705_v63  ;;  %v2836_v63 = vrot.slane %v9679_v11, 5  ;;  %v12130_v11 = vor.u32 %v9856_v47, %v9853_v24  ;;  %v2674_v49 = vrot.slane %v2673_v25, 4 }
 0x11b   : > { %v1312_v39 = vadd.f32 %v1299_v28, %v1229_v44  ;;  %v2660_v27 = vrot.slane %v2659_v38, 4  ;;  %v9995_v24 = vpack.c.b16 %v3201_v23, %v3200_v7  ;;  %v7891_v44 = vrot.slane %v7883_v22, 9 }
 0x11c   : > { %v1385_v6 = vpop.f32.mrf.mxu0  ;;  %7759 = vmatmul.msk.bf16.gmra.mxu1 %vm260_vm2, %v9872_v52  ;;  %7788 = vmatmul.msk.bf16.gmra.mxu2 %vm260_vm2, %v7784_v62  ;;  %v2837_v20 = vsel %vm8913_vm8, %v7870_v51, %v2836_v63  ;;  %v2841_v52 = vsel %vm8913_vm8, %v7871_v34, %v2840_v35  ;;  %v2958_v8 = vrot.slane %v9952_v18, 5  ;;  %v3091_v60 = vshrl.u32 %v7862_v33, 16 }
 0x11d   : > { %v9969_v17 = vadd.f32 %v1382_v37, %v1312_v39  ;;  %v2862_v29 = vunpack.c.l.b16 %v2837_v20  ;;  %v2863_v62 = vunpack.c.l.b16 %v2841_v52  ;;  %v7884_v37 = vld [vmem:[%s8847_s23 + $0x78] sm:$0xe]  ;;  %v2665_v47 = vsel %vm8895_vm6, %v2660_v27, %v2664_v32  ;;  %v7847_v39 = vld [vmem:[%s8847_s23 + $0x80] sm:$0xf] }
 0x11e   : > { %v7892_v36 = vrot.slane %v7884_v37, 9  ;;  %v3094_v13 = vshll.u32 %v7862_v33, 16  ;;  %v2679_v56 = vsel %vm8895_vm6, %v2674_v49, %v2678_v21  ;;  %v10006_v2 = vunpack.c.l.b16 %v2665_v47 }
 0x11f   : > { %7817 = vmatmul.msk.bf16.gmra.mxu3 %vm260_vm2, %v12130_v11  ;;  %7838 = vmatmul.msk.bf16.gmra.mxu0 %vm260_vm2, %v2555_v5  ;;  %v1219_v14 = vpop.f32.mrf.mxu2  ;;  %v10000_v40 = vpack.c.b16 %v2863_v62, %v2862_v29  ;;  %v3100_v28 = vshrl.u32 %v7904_v1, 16  ;;  %v3093_v59 = vrot.slane %v3091_v60, 5  ;;  %v3103_v43 = vshll.u32 %v7904_v1, 16 }
 0x120   : > { %v1230_v12 = vadd.f32 %v1219_v14, %v1009_v55  ;;  %v3096_v32 = vrot.slane %v3094_v13, 6  ;;  %v3109_v18 = vshrl.u32 %v7863_v58, 16  ;;  %v3112_v38 = vshll.u32 %v7863_v58, 16  ;;  %v7849_v14 = vld [vmem:[%s8847_s23 + $0x88] sm:$0xf] }
 0x121   : > { %v1000_v5 = vpop.f32.mrf.mxu1  ;;  %v3102_v33 = vrot.slane %v3100_v28, 5  ;;  %v3105_v25 = vrot.slane %v3103_v43, 6  ;;  %v3118_v34 = vshrl.u32 %v7905_v30, 16  ;;  %v3121_v27 = vshll.u32 %v7905_v30, 16 }
 0x122   : > { %v1302_v0 = vpop.f32.mrf.mxu3  ;;  %v1010_v3 = vadd.f32 %v1000_v5, %v9746_v61  ;;  %v2962_v61 = vrot.slane %v9956_v41, 5  ;;  %v3097_v51 = vor.u32 %v3096_v32, %v3093_v59  ;;  %v3111_v63 = vrot.slane %v3109_v18, 5  ;;  %v10016_v41 = vld [vmem:[%s8847_s23 + $0x84] sm:$0x1] }
 0x123   : > { %v1313_v7 = vadd.f32 %v1302_v0, %v1230_v12  ;;  %v3114_v35 = vrot.slane %v3112_v38, 6  ;;  %v2681_v20 = vshrl.u32 %v7847_v39, 16  ;;  %v2684_v52 = vshll.u32 %v7847_v39, 16 }
 0x124   : > { %v1387_v55 = vpop.f32.mrf.mxu0  ;;  %v2959_v11 = vsel %vm8913_vm8, %v7891_v44, %v2958_v8  ;;  %v3106_v49 = vor.u32 %v3105_v25, %v3102_v33  ;;  %v3120_v21 = vrot.slane %v3118_v34, 5  ;;  %v3123_v37 = vrot.slane %v3121_v27, 6 }
 0x125   : > { %v10010_v23 = vadd.f32 %v1385_v6, %v1313_v7  ;;  %v3098_v6 = vrot.slane %v3097_v51, 4  ;;  %v3115_v62 = vor.u32 %v3114_v35, %v3111_v63  ;;  %v2683_v47 = vrot.slane %v2681_v20, 4  ;;  %v7865_v51 = vld [vmem:[%s8847_s23 + $0x30] sm:$0xe] }
 0x126   : > { %v10020_v5 = vunpack.c.l.b16 %v2679_v56  ;;  %v2963_v44 = vsel %vm8913_vm8, %v7892_v36, %v2962_v61  ;;  %v2686_v8 = vrot.slane %v2684_v52, 5  ;;  %v3124_v13 = vor.u32 %v3123_v37, %v3120_v21  ;;  %v7864_v36 = vld [vmem:[%s8847_s23 + $0x28] sm:$0xe] }
 0x127   : > { %v1221_v22 = vpop.f32.mrf.mxu2  ;;  %v3116_v60 = vrot.slane %v3115_v62, 4  ;;  %v3107_v30 = vsel %vm9105_vm11, %v3098_v6, %v3106_v49  ;;  %v2695_v28 = vshrl.u32 %v7849_v14, 16  ;;  %v2698_v59 = vshll.u32 %v7849_v14, 16  ;;  %v7886_v14 = vld [vmem:[%s8847_s23 + $0x88] sm:$0xe] }
 0x128   : > { %v1231_v29 = vadd.f32 %v1221_v22, %v1010_v3  ;;  %v2690_v3 = vshll.u32 %v10016_v41, 16  ;;  %v2687_v56 = vor.u32 %v2686_v8, %v2683_v47  ;;  %v7872_v18 = vrot.slane %v7864_v36, 9  ;;  %v7906_v47 = vld [vmem:[%s8847_s23 + $0x2c] sm:$0x3] }
 0x129   : > { %v1564_v58 = vpop.f32.mrf.mxu1  ;;  %v3125_v43 = vsel %vm9105_vm11, %v3116_v60, %v3124_v13  ;;  %v2984_v39 = vunpack.c.l.b16 %v2959_v11  ;;  %v2985_v61 = vunpack.c.l.b16 %v2963_v44  ;;  %v2697_v33 = vrot.slane %v2695_v28, 4  ;;  %v7907_v60 = vld [vmem:[%s8847_s23 + $0x34] sm:$0x3] }
 0x12a   : > { %v1304_v1 = vpop.f32.mrf.mxu3  ;;  %v1584_v12 = vadd.f32 %v1564_v58, %v9775_v50  ;;  %v10031_v50 = vld [vmem:[%s8847_s23 + $0x8c] sm:$0x1]  ;;  %v2700_v38 = vrot.slane %v2698_v59, 5  ;;  %v7873_v25 = vrot.slane %v7865_v51, 9  ;;  %v3202_v34 = vunpack.c.l.b16 %v3107_v30 }
 0x12b   : > { %v1314_v0 = vadd.f32 %v1304_v1, %v1231_v29  ;;  %v3203_v35 = vunpack.c.l.b16 %v3125_v43  ;;  %v2688_v22 = vrot.slane %v2687_v56, 4  ;;  %v7885_v29 = vld [vmem:[%s8847_s23 + $0x80] sm:$0xe]  ;;  %v2991_v62 = vpack.c.b16 %v2985_v61, %v2984_v39 }
 0x12c   : > { %v10025_v7 = vpop.f32.mrf.mxu0  ;;  %7856 = vmatmul.msk.bf16.vlgmr.msrb.gmra.mxu1 %vm260_vm2, %v2746_v31  ;;  %7877 = vmatmul.msk.bf16.vlgmr.msrb.gmra.mxu2 %vm260_vm2, %v9914_v42  ;;  %v2844_v31 = vrot.slane %v9727_v15, 5  ;;  %v2848_v15 = vrot.slane %v9744_v10, 5  ;;  %v2701_v27 = vor.u32 %v2700_v38, %v2697_v33  ;;  %v2747_v10 = vpack.c.b16 %v10020_v5, %v10006_v2 }
 0x12d   : > { %v10034_v32 = vadd.f32 %v1387_v55, %v1314_v0  ;;  %v2704_v55 = vshll.u32 %v10031_v50, 16  ;;  %v3127_v1 = vshrl.u32 %v7864_v36, 16  ;;  %v3209_v44 = vpack.c.b16 %v3203_v35, %v3202_v34  ;;  %v7853_v35 = vld [vmem:[%s8847_s23 + $0x98] sm:$0xf] }
 0x12e   : > { %v2845_v42 = vsel %vm8913_vm8, %v7872_v18, %v2844_v31  ;;  %v2849_v11 = vsel %vm8913_vm8, %v7873_v25, %v2848_v15  ;;  %v2702_v8 = vrot.slane %v2701_v27, 4  ;;  %v7893_v5 = vrot.slane %v7885_v29, 9 }
 0x12f   : > { %7898 = vmatmul.msk.bf16.vlgmr.msrb.gmra.mxu3 %vm260_vm2, %v9993_v9  ;;  %7911 = vmatmul.msk.bf16.vlgmr.msrb.gmra.mxu0 %vm260_vm2, %v9995_v24  ;;  %v1758_v63 = vpop.f32.mrf.mxu2  ;;  %v2864_v20 = vunpack.c.l.b16 %v2845_v42  ;;  %v2692_v24 = vrot.slane %v2690_v3, 5  ;;  %v2865_v21 = vunpack.c.l.b16 %v2849_v11  ;;  %v2706_v37 = vrot.slane %v2704_v55, 5  ;;  %v7851_v42 = vld [vmem:[%s8847_s23 + $0x90] sm:$0xf] }
 0x130   : > { %v1778_v9 = vadd.f32 %v1758_v63, %v1584_v12  ;;  %v2966_v13 = vrot.slane %v10016_v41, 5  ;;  %v3129_v3 = vrot.slane %v3127_v1, 5  ;;  %v7894_v30 = vrot.slane %v7886_v14, 9 }
 0x131   : > { %v1566_v52 = vpop.f32.mrf.mxu1  ;;  %v10062_v0 = vpack.c.b16 %v2865_v21, %v2864_v20  ;;  %v2693_v2 = vsel %vm8895_vm6, %v2688_v22, %v2692_v24  ;;  %v3136_v28 = vshrl.u32 %v7906_v47, 16  ;;  %v3139_v59 = vshll.u32 %v7906_v47, 16 }
 0x132   : > { %v1880_v6 = vpop.f32.mrf.mxu3  ;;  %v1585_v49 = vadd.f32 %v1566_v52, %v9812_v45  ;;  %v3130_v45 = vshll.u32 %v7864_v36, 16  ;;  %v2970_v43 = vrot.slane %v10031_v50, 5  ;;  %v3145_v18 = vshrl.u32 %v7865_v51, 16 }
 0x133   : > { %v10056_v58 = vadd.f32 %v1880_v6, %v1778_v9  ;;  %v3148_v31 = vshll.u32 %v7865_v51, 16  ;;  %v3154_v39 = vshrl.u32 %v7907_v60, 16  ;;  %v2707_v36 = vsel %vm8895_vm6, %v2702_v8, %v2706_v37 }
 0x134   : > { %v10060_v12 = vpop.f32.mrf.mxu0  ;;  %v3132_v56 = vrot.slane %v3130_v45, 6  ;;  %v3138_v38 = vrot.slane %v3136_v28, 5  ;;  %v3141_v55 = vrot.slane %v3139_v59, 6  ;;  %v3147_v15 = vrot.slane %v3145_v18, 5  ;;  %v10093_v45 = vld [vmem:[%s8847_s23 + $0x40] sm:$0xe] }
 0x135   : > { %v3150_v63 = vrot.slane %v3148_v31, 6  ;;  %v3156_v34 = vrot.slane %v3154_v39, 5  ;;  %v3157_v9 = vshll.u32 %v7907_v60, 16  ;;  %v2709_v24 = vshrl.u32 %v7851_v42, 16  ;;  %v7866_v60 = vld [vmem:[%s8847_s23 + $0x38] sm:$0xe] }
 0x136   : > { %v3133_v33 = vor.u32 %v3132_v56, %v3129_v3  ;;  %v3142_v51 = vor.u32 %v3141_v55, %v3138_v38  ;;  %v2712_v11 = vshll.u32 %v7851_v42, 16  ;;  %v2723_v21 = vshrl.u32 %v7853_v35, 16 }
 0x137   : > { %v1760_v61 = vpop.f32.mrf.mxu2  ;;  %v3151_v22 = vor.u32 %v3150_v63, %v3147_v15  ;;  %v10083_v29 = vunpack.c.l.b16 %v2707_v36  ;;  %v2967_v37 = vsel %vm8913_vm8, %v7893_v5, %v2966_v13  ;;  %v2971_v47 = vsel %vm8913_vm8, %v7894_v30, %v2970_v43  ;;  %v7908_v15 = vld [vmem:[%s8847_s23 + $0x3c] sm:$0x3] }
 0x138   : > { %v1779_v41 = vadd.f32 %v1760_v61, %v1585_v49  ;;  %v3134_v20 = vrot.slane %v3133_v33, 4  ;;  %v3159_v49 = vrot.slane %v3157_v9, 6  ;;  %v2726_v8 = vshll.u32 %v7853_v35, 16  ;;  %v10106_v61 = vld [vmem:[%s8847_s23 + $0x9c] sm:$0x1] }
 0x139   : > { %v1569_v25 = vpop.f32.mrf.mxu1  ;;  %v3152_v14 = vrot.slane %v3151_v22, 4  ;;  %v2714_v5 = vrot.slane %v2712_v11, 5  ;;  %v7874_v13 = vrot.slane %v7866_v60, 9  ;;  %v2852_v3 = vrot.slane %v9789_v19, 5  ;;  %v7887_v9 = vld [vmem:[%s8847_s23 + $0x90] sm:$0xe] }
 0x13a   : > { %v1882_v27 = vpop.f32.mrf.mxu3  ;;  %v1586_v50 = vadd.f32 %v1569_v25, %v9861_v53  ;;  %v10081_v53 = vunpack.c.l.b16 %v2693_v2  ;;  %v3160_v1 = vor.u32 %v3159_v49, %v3156_v34  ;;  %v2711_v2 = vrot.slane %v2709_v24, 4 }
 0x13b   : > { %v10074_v52 = vadd.f32 %v1882_v27, %v1779_v41  ;;  %v2725_v56 = vrot.slane %v2723_v21, 4  ;;  %v2728_v28 = vrot.slane %v2726_v8, 5  ;;  %v7875_v59 = vrot.slane %v10093_v45, 9  ;;  %v7909_v8 = vld [vmem:[%s8847_s23 + $0x44] sm:$0x3] }
 0x13c   : > { %v10076_v6 = vpop.f32.mrf.mxu0  ;;  %7857 = vmatmul.msk.bf16.gmra.mxu1 %vm260_vm2, %v2747_v10  ;;  %7878 = vmatmul.msk.bf16.gmra.mxu2 %vm260_vm2, %v10000_v40  ;;  %v3143_v10 = vsel %vm9105_vm11, %v3134_v20, %v3142_v51  ;;  %v10098_v40 = vld [vmem:[%s8847_s23 + $0x94] sm:$0x1]  ;;  %v2856_v43 = vrot.slane %v9809_v48, 5  ;;  %v2986_v31 = vunpack.c.l.b16 %v2967_v37  ;;  %v3161_v39 = vsel %vm9105_vm11, %v3152_v14, %v3160_v1 }
 0x13d   : > { %v2718_v33 = vshll.u32 %v10098_v40, 16  ;;  %v2853_v38 = vsel %vm8913_vm8, %v7874_v13, %v2852_v3  ;;  %v3204_v42 = vunpack.c.l.b16 %v3143_v10  ;;  %v2715_v41 = vor.u32 %v2714_v5, %v2711_v2 }
 0x13e   : > { %v2857_v48 = vsel %vm8913_vm8, %v7875_v59, %v2856_v43  ;;  %v2866_v25 = vunpack.c.l.b16 %v2853_v38  ;;  %v3205_v34 = vunpack.c.l.b16 %v3161_v39  ;;  %v2729_v35 = vor.u32 %v2728_v28, %v2725_v56 }
 0x13f   : > { %7899 = vmatmul.msk.bf16.gmra.mxu3 %vm260_vm2, %v2991_v62  ;;  %7912 = vmatmul.msk.bf16.gmra.mxu0 %vm260_vm2, %v3209_v44  ;;  %v1763_v30 = vpop.f32.mrf.mxu2  ;;  %v2987_v44 = vunpack.c.l.b16 %v2971_v47  ;;  %v2732_v27 = vshll.u32 %v10106_v61, 16  ;;  %v2748_v20 = vpack.c.b16 %v10083_v29, %v10081_v53  ;;  %v3166_v22 = vshll.u32 %v7866_v60, 16 }
 0x140   : > { %v1780_v18 = vadd.f32 %v1763_v30, %v1586_v50  ;;  %v3163_v50 = vshrl.u32 %v7866_v60, 16  ;;  %v3172_v24 = vshrl.u32 %v7908_v15, 16  ;;  %v2716_v49 = vrot.slane %v2715_v41, 4 }
 0x141   : > { %v1571_v62 = vpop.f32.mrf.mxu1  ;;  %v2992_v11 = vpack.c.b16 %v2987_v44, %v2986_v31  ;;  %v2720_v21 = vrot.slane %v2718_v33, 5  ;;  %v3210_v47 = vpack.c.b16 %v3205_v34, %v3204_v42  ;;  %v2730_v10 = vrot.slane %v2729_v35, 4  ;;  %v7975_v34 = vld [vmem:[%s8847_s23 + $0xc0] sm:$0xf] }
 0x142   : > { %v1885_v36 = vpop.f32.mrf.mxu3  ;;  %v1587_v19 = vadd.f32 %v1571_v62, %v9895_v26  ;;  %v2867_v26 = vunpack.c.l.b16 %v2857_v48  ;;  %v3165_v37 = vrot.slane %v3163_v50, 5  ;;  %v2734_v1 = vrot.slane %v2732_v27, 5 }
 0x143   : > { %v1902_v55 = vadd.f32 %v1885_v36, %v1780_v18  ;;  %v3168_v2 = vrot.slane %v3166_v22, 6  ;;  %v7895_v3 = vrot.slane %v7887_v9, 9  ;;  %v3175_v53 = vshll.u32 %v7908_v15, 16  ;;  %v7888_v18 = vld [vmem:[%s8847_s23 + $0x98] sm:$0xe] }
 0x144   : > { %v2009_v63 = vpop.f32.mrf.mxu0  ;;  %v10118_v51 = vpack.c.b16 %v2867_v26, %v2866_v25  ;;  %v3181_v29 = vshrl.u32 %v10093_v45, 16  ;;  %v3174_v28 = vrot.slane %v3172_v24, 5  ;;  %v3184_v59 = vshll.u32 %v10093_v45, 16 }
 0x145   : > { %v3169_v56 = vor.u32 %v3168_v2, %v3165_v37  ;;  %v3177_v62 = vrot.slane %v3175_v53, 6  ;;  %v3190_v44 = vshrl.u32 %v7909_v8, 16  ;;  %v2974_v36 = vrot.slane %v10098_v40, 5  ;;  %v7994_v37 = vld [vmem:[%s8847_s23 + $0x110] sm:$0xf] }
 0x146   : > { %v3183_v31 = vrot.slane %v3181_v29, 5  ;;  %v3193_v33 = vshll.u32 %v7909_v8, 16  ;;  %v2721_v45 = vsel %vm8895_vm6, %v2716_v49, %v2720_v21  ;;  %v10140_v48 = vadd.f32 %v10060_v12, %v10074_v52  ;;  %v10166_v8 = vld [vmem:[%s8847_s23 + $0xbc] sm:$0x1]  ;;  %v7996_v2 = vld [vmem:[%s8847_s23 + $0x118] sm:$0xf] }
 0x147   : > { %v1765_v14 = vpop.f32.mrf.mxu2  ;;  %v3192_v38 = vrot.slane %v3190_v44, 5  ;;  %v10143_v40 = vadd.f32 %v10076_v6, %v1902_v55  ;;  %v7896_v42 = vrot.slane %v7888_v18, 9  ;;  %v2978_v15 = vrot.slane %v10106_v61, 5  ;;  %v8052_v61 = vld [vmem:[%s12118_s1 + $0x34] sm:$0x3] }
 0x148   : > { %v1781_v5 = vadd.f32 %v1765_v14, %v1587_v19  ;;  %v3186_v19 = vrot.slane %v3184_v59, 6  ;;  %v3195_v25 = vrot.slane %v3193_v33, 6  ;;  %v3170_v12 = vrot.slane %v3169_v56, 4  ;;  %v10173_v29 = vld [vmem:[%s8847_s23 + $0xc4] sm:$0x1] }
 0x149   : > { %v1574_v13 = vpop.f32.mrf.mxu1  ;;  %v3178_v52 = vor.u32 %v3177_v62, %v3174_v28  ;;  %v2975_v55 = vsel %vm8913_vm8, %v7895_v3, %v2974_v36  ;;  %v3461_v9 = vshrl.u32 %v7975_v34, 16  ;;  %v3464_v21 = vshll.u32 %v7975_v34, 16  ;;  %v10177_v62 = vld [vmem:[%s8847_s23 + $0x114] sm:$0x1]  ;;  %v10180_v36 = vld [vmem:[%s8847_s23 + $0x11c] sm:$0x1] }
 0x14a   : > { %v1887_v30 = vpop.f32.mrf.mxu3  ;;  %v1588_v60 = vadd.f32 %v1574_v13, %v9946_v54  ;;  %v10132_v54 = vadd.f32 %v10025_v7, %v10056_v58  ;;  %v3187_v41 = vor.u32 %v3186_v19, %v3183_v31  ;;  %v7973_v7 = vld [vmem:[%s8847_s23 + $0xb8] sm:$0xf]  ;;  %v4023_v53 = vand.u32 %v8052_v61, %v8825_v4 }
 0x14b   : > { %v1903_v43 = vadd.f32 %v1887_v30, %v1781_v5  ;;  %v3447_v27 = vshrl.u32 %v7973_v7, 16  ;;  %v3463_v30 = vrot.slane %v3461_v9, 4  ;;  %v3641_v56 = vshrl.u32 %v7994_v37, 16 }
 0x14c   : > { %v10126_v39 = vpop.f32.mrf.mxu0  ;;  %7858 = vmatmul.msk.bf16.gmra.mxu1 %vm260_vm2, %v2748_v20  ;;  %7879 = vmatmul.msk.bf16.gmra.mxu2 %vm260_vm2, %v10062_v0  ;;  %v2735_v0 = vsel %vm8895_vm6, %v2730_v10, %v2734_v1  ;;  %v3188_v35 = vrot.slane %v3187_v41, 4  ;;  %v3450_v20 = vshll.u32 %v7973_v7, 16  ;;  %v2988_v10 = vunpack.c.l.b16 %v2975_v55  ;;  %v8031_v55 = vld [vmem:[%s12118_s1 + $0x32] sm:$0x3] }
 0x14d   : > { %v10146_v58 = vadd.f32 %v2009_v63, %v1903_v43  ;;  %v3196_v63 = vor.u32 %v3195_v25, %v3192_v38  ;;  %v2745_v49 = vunpack.c.l.b16 %v2735_v0  ;;  %v3179_v1 = vsel %vm9105_vm11, %v3170_v12, %v3178_v52  ;;  %4032 = vmatpush.bf16.msrb.mxu2 %v4023_v53  ;;  %v8065_v0 = vld [vmem:[%s12118_s1 + $0x36] sm:$0x3] }
 0x14e   : > { %v3449_v13 = vrot.slane %v3447_v27, 4  ;;  %v3452_v3 = vrot.slane %v3450_v20, 5  ;;  %v3644_v28 = vshll.u32 %v7994_v37, 16  ;;  %v3206_v43 = vunpack.c.l.b16 %v3179_v1 }
 0x14f   : > { %7900 = vmatmul.msk.bf16.gmra.mxu3 %vm260_vm2, %v2992_v11  ;;  %7913 = vmatmul.msk.bf16.gmra.mxu0 %vm260_vm2, %v3210_v47  ;;  %v1768_v6 = vpop.f32.mrf.mxu2  ;;  %v2744_v11 = vunpack.c.l.b16 %v2721_v45  ;;  %v2979_v47 = vsel %vm8913_vm8, %v7896_v42, %v2978_v15  ;;  %v3456_v18 = vshll.u32 %v10166_v8, 16  ;;  %v3655_v31 = vshrl.u32 %v7996_v2, 16 }
 0x150   : > { %v1782_v26 = vadd.f32 %v1768_v6, %v1588_v60  ;;  %v3466_v60 = vrot.slane %v3464_v21, 5  ;;  %v2989_v59 = vunpack.c.l.b16 %v2979_v47  ;;  %v3643_v19 = vrot.slane %v3641_v56, 4 }
 0x151   : > { %v1576_v50 = vpop.f32.mrf.mxu1  ;;  %v3646_v33 = vrot.slane %v3644_v28, 5  ;;  %v3658_v45 = vshll.u32 %v7996_v2, 16  ;;  %v2749_v42 = vpack.c.b16 %v2745_v49, %v2744_v11  ;;  %v3453_v41 = vor.u32 %v3452_v3, %v3449_v13 }
 0x152   : > { %v1890_v22 = vpop.f32.mrf.mxu3  ;;  %v1589_v24 = vadd.f32 %v1576_v50, %v9969_v17  ;;  %v3197_v17 = vsel %vm9105_vm11, %v3188_v35, %v3196_v63  ;;  %v3470_v25 = vshll.u32 %v10173_v29, 16  ;;  %v3657_v7 = vrot.slane %v3655_v31, 4  ;;  %v8078_v35 = vld [vmem:[%s12118_s1 + $0x38] sm:$0x3] }
 0x153   : > { %v1904_v14 = vadd.f32 %v1890_v22, %v1782_v26  ;;  %v3207_v44 = vunpack.c.l.b16 %v3197_v17  ;;  %v3467_v52 = vor.u32 %v3466_v60, %v3463_v30  ;;  %v3650_v34 = vshll.u32 %v10177_v62, 16  ;;  %v7977_v17 = vld [vmem:[%s8847_s23 + $0xc8] sm:$0xf] }
 0x154   : > { %v2014_v5 = vpop.f32.mrf.mxu0  ;;  %v3660_v6 = vrot.slane %v3658_v45, 5  ;;  %v2993_v26 = vpack.c.b16 %v2989_v59, %v2988_v10  ;;  %v3647_v50 = vor.u32 %v3646_v33, %v3643_v19  ;;  %v3664_v20 = vshll.u32 %v10180_v36, 16  ;;  %v7926_v19 = vld [vmem:[%s8847_s23 + $0xb8] sm:$0xf]  ;;  %v8564_v33 = vld [vmem:[%s8847_s23 + $0xbc] sm:$0xf0] }
 0x155   : > { %v3211_v61 = vpack.c.b16 %v3207_v44, %v3206_v43  ;;  %v3458_v22 = vrot.slane %v3456_v18, 5  ;;  %v4241_v49 = vand.u32 %v8065_v0, %v8825_v4  ;;  %v3901_v21 = vand.u32 %v8031_v55, %v8825_v4  ;;  %v7998_v43 = vld [vmem:[%s8847_s23 + $0x120] sm:$0xf]  ;;  %v8000_v18 = vld [vmem:[%s8847_s23 + $0x128] sm:$0xf] }
 0x156   : > { %v4324_v37 = vand.u32 %v8078_v35, %v8825_v4  ;;  %v3454_v47 = vrot.slane %v3453_v41, 4  ;;  %v3468_v10 = vrot.slane %v3467_v52, 4  ;;  %v3472_v1 = vrot.slane %v3470_v25, 5  ;;  %v10224_v25 = vld [vmem:[%s8847_s23 + $0xcc] sm:$0x1] }
 0x157   : > { %v1770_v38 = vpop.f32.mrf.mxu2  ;;  %v3652_v2 = vrot.slane %v3650_v34, 5  ;;  %v3648_v13 = vrot.slane %v3647_v50, 4  ;;  %v3666_v53 = vrot.slane %v3664_v20, 5  ;;  %4250 = vmatpush.bf16.msrb.mxu3 %v4241_v49  ;;  %3910 = vmatpush.bf16.msrb.mxu1 %v3901_v21  ;;  %v3672_v52 = vshll.u32 %v7998_v43, 16 }
 0x158   : > { %v1783_v15 = vadd.f32 %v1770_v38, %v1589_v24  ;;  %v3661_v24 = vor.u32 %v3660_v6, %v3657_v7  ;;  %4333 = vmatpush.bf16.msrb.mxu0 %v4324_v37  ;;  %v3459_v59 = vsel %vm8895_vm6, %v3454_v47, %v3458_v22  ;;  %v3683_v34 = vshrl.u32 %v8000_v18, 16  ;;  %v10235_v47 = vld [vmem:[%s8847_s23 + $0x124] sm:$0x1] }
 0x159   : > { %v1579_v12 = vpop.f32.mrf.mxu1  ;;  %v3653_v45 = vsel %vm8895_vm6, %v3648_v13, %v3652_v2  ;;  %v3560_v6 = vunpack.c.l.b16 %v3459_v59  ;;  %v3686_v35 = vshll.u32 %v8000_v18, 16  ;;  %v3678_v18 = vshll.u32 %v10235_v47, 16 }
 0x15a   : > { %v1892_v63 = vpop.f32.mrf.mxu3  ;;  %v1590_v27 = vadd.f32 %v1579_v12, %v10010_v23  ;;  %v10200_v23 = vadd.f32 %v10126_v39, %v1904_v14  ;;  %v3662_v3 = vrot.slane %v3661_v24, 4  ;;  %v3475_v39 = vshrl.u32 %v7977_v17, 16 }
 0x15b   : > { %v1905_v9 = vadd.f32 %v1892_v63, %v1783_v15  ;;  %v3478_v14 = vshll.u32 %v7977_v17, 16  ;;  %v7927_v63 = vor.u32 %v8564_v33, %v7926_v19  ;;  %v3754_v50 = vunpack.c.l.b16 %v3653_v45 }
 0x15c   : > { %v2017_v11 = vpop.f32.mrf.mxu0  ;;  %7859 = vmatmul.msk.bf16.gmra.mxu1 %vm260_vm2, %v2749_v42  ;;  %7880 = vmatmul.msk.bf16.gmra.mxu2 %vm260_vm2, %v10118_v51  ;;  %v7979_v51 = vld [vmem:[%s8847_s23 + $0xd0] sm:$0xf]  ;;  %v3667_v38 = vsel %vm8895_vm6, %v3662_v3, %v3666_v53  ;;  %v3477_v7 = vrot.slane %v3475_v39, 4  ;;  %v3685_v2 = vrot.slane %v3683_v34, 4  ;;  %v3688_v17 = vrot.slane %v3686_v35, 5 }
 0x15d   : > { %v10205_v30 = vadd.f32 %v2014_v5, %v1905_v9  ;;  %v3473_v5 = vsel %vm8895_vm6, %v3468_v10, %v3472_v1  ;;  %v3489_v42 = vshrl.u32 %v7979_v51, 16  ;;  %v3480_v0 = vrot.slane %v3478_v14, 5  ;;  %v10238_v39 = vld [vmem:[%s8847_s23 + $0x12c] sm:$0x1] }
 0x15e   : > { %v3492_v15 = vshll.u32 %v7979_v51, 16  ;;  %v3561_v55 = vunpack.c.l.b16 %v3473_v5  ;;  %v3755_v20 = vunpack.c.l.b16 %v3667_v38  ;;  %v3484_v9 = vshll.u32 %v10224_v25, 16  ;;  %v7983_v38 = vld [vmem:[%s8847_s23 + $0xe0] sm:$0xf] }
 0x15f   : > { %7901 = vmatmul.msk.bf16.gmra.mxu3 %vm260_vm2, %v2993_v26  ;;  %7914 = vmatmul.msk.bf16.gmra.mxu0 %vm260_vm2, %v3211_v61  ;;  %v1773_v60 = vpop.f32.mrf.mxu2  ;;  %v8568_v26 = vld [vmem:[%s8847_s23 + $0x114] sm:$0xf0]  ;;  %v10230_v61 = vld [vmem:[%s8847_s23 + $0xd4] sm:$0x1]  ;;  %v3481_v22 = vor.u32 %v3480_v0, %v3477_v7  ;;  %v3491_v24 = vrot.slane %v3489_v42, 4  ;;  %v3674_v1 = vrot.slane %v3672_v52, 5  ;;  %v3689_v19 = vor.u32 %v3688_v17, %v3685_v2 }
 0x160   : > { %v1784_v56 = vadd.f32 %v1773_v60, %v1590_v27  ;;  %v7955_v27 = vld [vmem:[%s8847_s23 + $0x110] sm:$0xf]  ;;  %v3494_v49 = vrot.slane %v3492_v15, 5  ;;  %v3568_v51 = vpack.c.b16 %v3561_v55, %v3560_v6  ;;  %v3692_v33 = vshll.u32 %v10238_v39, 16 }
 0x161   : > { %v1581_v28 = vpop.f32.mrf.mxu1  ;;  %v7956_v53 = vor.u32 %v8568_v26, %v7955_v27  ;;  %v3482_v5 = vrot.slane %v3481_v22, 4  ;;  %v3680_v0 = vrot.slane %v3678_v18, 5  ;;  %v8002_v15 = vld [vmem:[%s8847_s23 + $0x130] sm:$0xf]  ;;  %v3690_v34 = vrot.slane %v3689_v19, 4 }
 0x162   : > { %v1895_v31 = vpop.f32.mrf.mxu3  ;;  %v1591_v44 = vadd.f32 %v1581_v28, %v10034_v32  ;;  %v3669_v32 = vshrl.u32 %v7998_v43, 16  ;;  %v3498_v28 = vshll.u32 %v10230_v61, 16  ;;  %v3495_v43 = vor.u32 %v3494_v49, %v3491_v24  ;;  %v7930_v49 = vld [vmem:[%s8847_s23 + $0xc8] sm:$0xf] }
 0x163   : > { %v1906_v41 = vadd.f32 %v1895_v31, %v1784_v56  ;;  %v3486_v56 = vrot.slane %v3484_v9, 5  ;;  %v3517_v27 = vshrl.u32 %v7983_v38, 16  ;;  %v3520_v26 = vshll.u32 %v7983_v38, 16  ;;  %v10276_v38 = vld [vmem:[%s8847_s23 + $0x134] sm:$0x1] }
 0x164   : > { %v2019_v12 = vpop.f32.mrf.mxu0  ;;  %v3671_v10 = vrot.slane %v3669_v32, 4  ;;  %v3500_v7 = vrot.slane %v3498_v28, 5  ;;  %v3697_v22 = vshrl.u32 %v8002_v15, 16  ;;  %v3700_v2 = vshll.u32 %v8002_v15, 16 }
 0x165   : > { %v10232_v21 = vadd.f32 %v2017_v11, %v1906_v41  ;;  %v3762_v11 = vpack.c.b16 %v3755_v20, %v3754_v50  ;;  %v3487_v42 = vsel %vm8895_vm6, %v3482_v5, %v3486_v56  ;;  %v3496_v41 = vrot.slane %v3495_v43, 4  ;;  %v8004_v50 = vld [vmem:[%s8847_s23 + $0x138] sm:$0xf]  ;;  %v10271_v43 = vld [vmem:[%s8847_s23 + $0xe4] sm:$0x1] }
 0x166   : > { %v3519_v28 = vrot.slane %v3517_v27, 4  ;;  %v3699_v18 = vrot.slane %v3697_v22, 4 }
 0x167   : > { %v1775_v37 = vpop.f32.mrf.mxu2 }
 0x168   : > { %v1785_v13 = vadd.f32 %v1775_v37, %v1591_v44  ;;  %v3675_v44 = vor.u32 %v3674_v1, %v3671_v10  ;;  %v8565_v37 = vld [vmem:[%s8847_s23 + $0xcc] sm:$0xf0]  ;;  %v3501_v10 = vsel %vm8895_vm6, %v3496_v41, %v3500_v7  ;;  %v3562_v1 = vunpack.c.l.b16 %v3487_v42 }
 0x169   : > { %v2220_v3 = vpop.f32.mrf.mxu1  ;;  %v3563_v5 = vunpack.c.l.b16 %v3501_v10  ;;  %v10291_v10 = vld [vmem:[%s8847_s23 + $0xdc] sm:$0xf0] }
 0x16a   : > { %v1897_v14 = vpop.f32.mrf.mxu3  ;;  %v2240_v60 = vadd.f32 %v2220_v3, %v10132_v54  ;;  %v7981_v54 = vld [vmem:[%s8847_s23 + $0xd8] sm:$0xf]  ;;  %v3676_v52 = vrot.slane %v3675_v44, 4  ;;  %v8569_v3 = vld [vmem:[%s8847_s23 + $0x124] sm:$0xf0]  ;;  %v3702_v44 = vrot.slane %v3700_v2, 5 }
 0x16b   : > { %v1907_v59 = vadd.f32 %v1897_v14, %v1785_v13  ;;  %v3503_v6 = vshrl.u32 %v7981_v54, 16  ;;  %v7959_v13 = vld [vmem:[%s8847_s23 + $0x120] sm:$0xf]  ;;  %v3714_v14 = vshll.u32 %v8004_v50, 16  ;;  %v3569_v27 = vpack.c.b16 %v3563_v5, %v3562_v1 }
 0x16c   : > { %v2580_v31 = vpop.f32.mrf.mxu0  ;;  %7940 = vmatmul.msk.bf16.vlgmr.msra.gmra.mxu1 %vm260_vm2, %v7927_v63  ;;  %7969 = vmatmul.msk.bf16.vlgmr.msra.gmra.mxu2 %vm260_vm2, %v7956_v53  ;;  %v3506_v63 = vshll.u32 %v7981_v54, 16  ;;  %v3681_v53 = vsel %vm8895_vm6, %v3676_v52, %v3680_v0  ;;  %v7931_v0 = vor.u32 %v8565_v37, %v7930_v49  ;;  %v7960_v15 = vor.u32 %v8569_v3, %v7959_v13  ;;  %v10280_v52 = vld [vmem:[%s8847_s23 + $0x13c] sm:$0x1]  ;;  %v10288_v37 = vld [vmem:[%s8847_s23 + $0xd8] sm:$0xf] }
 0x16d   : > { %v10247_v45 = vadd.f32 %v2019_v12, %v1907_v59  ;;  %v3694_v12 = vrot.slane %v3692_v33, 5  ;;  %v3522_v59 = vrot.slane %v3520_v26, 5  ;;  %v3756_v33 = vunpack.c.l.b16 %v3681_v53  ;;  %v7985_v3 = vld [vmem:[%s8847_s23 + $0xe8] sm:$0xf] }
 0x16e   : > { %v3508_v56 = vrot.slane %v3506_v63, 5  ;;  %v3716_v41 = vrot.slane %v3714_v14, 5  ;;  %v3703_v26 = vor.u32 %v3702_v44, %v3699_v18  ;;  %v7987_v14 = vld [vmem:[%s8847_s23 + $0xf0] sm:$0xf]  ;;  %v8006_v44 = vld [vmem:[%s8847_s23 + $0x140] sm:$0xf] }
 0x16f   : > { %7990 = vmatmul.msk.bf16.vlgmr.msra.gmra.mxu3 %vm260_vm2, %v3568_v51  ;;  %8011 = vmatmul.msk.bf16.vlgmr.msra.gmra.mxu0 %vm260_vm2, %v3762_v11  ;;  %v2303_v32 = vpop.f32.mrf.mxu2  ;;  %v3711_v51 = vshrl.u32 %v8004_v50, 16  ;;  %v3505_v11 = vrot.slane %v3503_v6, 4  ;;  %v3706_v50 = vshll.u32 %v10276_v38, 16  ;;  %v3545_v5 = vshrl.u32 %v7987_v14, 16 }
 0x170   : > { %v2323_v55 = vadd.f32 %v2303_v32, %v2240_v60  ;;  %v10268_v60 = vld [vmem:[%s8847_s23 + $0xdc] sm:$0x1]  ;;  %v3548_v18 = vshll.u32 %v7987_v14, 16  ;;  %v8570_v14 = vld [vmem:[%s8847_s23 + $0x134] sm:$0xf0] }
 0x171   : > { %v2222_v35 = vpop.f32.mrf.mxu1  ;;  %v3713_v42 = vrot.slane %v3711_v51, 4  ;;  %v3512_v32 = vshll.u32 %v10268_v60, 16  ;;  %v3509_v6 = vor.u32 %v3508_v56, %v3505_v11  ;;  %v3708_v51 = vrot.slane %v3706_v50, 5 }
 0x172   : > { %v2386_v20 = vpop.f32.mrf.mxu3  ;;  %v2241_v9 = vadd.f32 %v2222_v35, %v10140_v48  ;;  %v3695_v48 = vsel %vm8895_vm6, %v3690_v34, %v3694_v12  ;;  %v3531_v11 = vshrl.u32 %v7985_v3, 16  ;;  %v3534_v56 = vshll.u32 %v7985_v3, 16 }
 0x173   : > { %v2406_v24 = vadd.f32 %v2386_v20, %v2323_v55  ;;  %v3757_v54 = vunpack.c.l.b16 %v3695_v48  ;;  %v3526_v55 = vshll.u32 %v10271_v43, 16  ;;  %v3514_v2 = vrot.slane %v3512_v32, 5 }
 0x174   : > { %v2582_v17 = vpop.f32.mrf.mxu0  ;;  %v3704_v48 = vrot.slane %v3703_v26, 4  ;;  %v3547_v32 = vrot.slane %v3545_v5, 4 }
 0x175   : > { %v10273_v19 = vadd.f32 %v2580_v31, %v2406_v24  ;;  %v3523_v31 = vor.u32 %v3522_v59, %v3519_v28  ;;  %v3763_v22 = vpack.c.b16 %v3757_v54, %v3756_v33  ;;  %v3717_v24 = vor.u32 %v3716_v41, %v3713_v42 }
 0x176   : > { %v3528_v13 = vrot.slane %v3526_v55, 5  ;;  %v3536_v54 = vrot.slane %v3534_v56, 5  ;;  %v3725_v42 = vshrl.u32 %v8006_v44, 16 }
 0x177   : > { %v2305_v7 = vpop.f32.mrf.mxu2  ;;  %v3524_v1 = vrot.slane %v3523_v31, 4  ;;  %v3718_v28 = vrot.slane %v3717_v24, 4 }
 0x178   : > { %v2324_v34 = vadd.f32 %v2305_v7, %v2241_v9  ;;  %v3720_v9 = vshll.u32 %v10280_v52, 16 }
 0x179   : > { %v2225_v12 = vpop.f32.mrf.mxu1 }
 0x17a   : > { %v2388_v35 = vpop.f32.mrf.mxu3  ;;  %v2242_v63 = vadd.f32 %v2225_v12, %v10143_v40  ;;  %v3510_v40 = vrot.slane %v3509_v6, 4  ;;  %v3722_v59 = vrot.slane %v3720_v9, 5  ;;  %v8008_v12 = vld [vmem:[%s8847_s23 + $0x148] sm:$0xf] }
 0x17b   : > { %v2407_v20 = vadd.f32 %v2388_v35, %v2324_v34  ;;  %v3550_v34 = vrot.slane %v3548_v18, 5  ;;  %v3529_v35 = vsel %vm8895_vm6, %v3524_v1, %v3528_v13  ;;  %v10325_v13 = vld [vmem:[%s8847_s23 + $0x14c] sm:$0x1] }
 0x17c   : > { %v2585_v49 = vpop.f32.mrf.mxu0  ;;  %7941 = vmatmul.msk.bf16.gmra.mxu1 %vm260_vm2, %v7931_v0  ;;  %7970 = vmatmul.msk.bf16.gmra.mxu2 %vm260_vm2, %v7960_v15  ;;  %v7935_v0 = vor.u32 %v10291_v10, %v10288_v37  ;;  %v10304_v15 = vld [vmem:[%s8847_s23 + $0xec] sm:$0x1]  ;;  %v3515_v55 = vsel %vm8895_vm6, %v3510_v40, %v3514_v2  ;;  %v3723_v50 = vsel %vm8895_vm6, %v3718_v28, %v3722_v59  ;;  %v10321_v37 = vld [vmem:[%s8847_s23 + $0x144] sm:$0x1]  ;;  %v3739_v10 = vshrl.u32 %v8008_v12, 16 }
 0x17d   : > { %v10295_v53 = vadd.f32 %v2582_v17, %v2407_v20  ;;  %v3533_v17 = vrot.slane %v3531_v11, 4  ;;  %v3727_v20 = vrot.slane %v3725_v42, 4  ;;  %v3540_v9 = vshll.u32 %v10304_v15, 16 }
 0x17e   : > { %v3742_v2 = vshll.u32 %v8008_v12, 16  ;;  %v3551_v40 = vor.u32 %v3550_v34, %v3547_v32  ;;  %v3564_v11 = vunpack.c.l.b16 %v3515_v55  ;;  %v3565_v56 = vunpack.c.l.b16 %v3529_v35 }
 0x17f   : > { %7991 = vmatmul.msk.bf16.gmra.mxu3 %vm260_vm2, %v3569_v27  ;;  %8012 = vmatmul.msk.bf16.gmra.mxu0 %vm260_vm2, %v3763_v22  ;;  %v2308_v33 = vpop.f32.mrf.mxu2  ;;  %v10315_v27 = vld [vmem:[%s8847_s23 + $0xf4] sm:$0x1]  ;;  %v3537_v24 = vor.u32 %v3536_v54, %v3533_v17  ;;  %v3741_v28 = vrot.slane %v3739_v10, 4  ;;  %v3759_v18 = vunpack.c.l.b16 %v3723_v50  ;;  %v3542_v42 = vrot.slane %v3540_v9, 5  ;;  %v10344_v10 = vld [vmem:[%s8847_s23 + $0x140] sm:$0xf] }
 0x180   : > { %v2325_v41 = vadd.f32 %v2308_v33, %v2242_v63  ;;  %v3709_v63 = vsel %vm8895_vm6, %v3704_v48, %v3708_v51  ;;  %v3554_v1 = vshll.u32 %v10315_v27, 16  ;;  %v7963_v51 = vld [vmem:[%s8847_s23 + $0x130] sm:$0xf]  ;;  %v3744_v59 = vrot.slane %v3742_v2, 5  ;;  %v10347_v2 = vld [vmem:[%s8847_s23 + $0x144] sm:$0xf0] }
 0x181   : > { %v2227_v7 = vpop.f32.mrf.mxu1  ;;  %v3758_v5 = vunpack.c.l.b16 %v3709_v63  ;;  %v3734_v33 = vshll.u32 %v10321_v37, 16  ;;  %v3538_v54 = vrot.slane %v3537_v24, 4  ;;  %v7964_v34 = vor.u32 %v8570_v14, %v7963_v51  ;;  %v10355_v51 = vld [vmem:[%s8847_s23 + $0xb8] sm:$0xe]  ;;  %v8036_v14 = vld [vmem:[%s8847_s23 + $0x110] sm:$0xe] }
 0x182   : > { %v2391_v6 = vpop.f32.mrf.mxu3  ;;  %v2243_v31 = vadd.f32 %v2227_v7, %v10146_v58  ;;  %v3728_v58 = vshll.u32 %v8006_v44, 16  ;;  %v3552_v12 = vrot.slane %v3551_v40, 4  ;;  %v3570_v63 = vpack.c.b16 %v3565_v56, %v3564_v11  ;;  %v8037_v11 = vld [vmem:[%s8847_s23 + $0x118] sm:$0xe] }
 0x183   : > { %v2408_v26 = vadd.f32 %v2391_v6, %v2325_v41  ;;  %v3745_v41 = vor.u32 %v3744_v59, %v3741_v28  ;;  %v3556_v6 = vrot.slane %v3554_v1, 5  ;;  %v3764_v50 = vpack.c.b16 %v3759_v18, %v3758_v5 }
 0x184   : > { %v2587_v22 = vpop.f32.mrf.mxu0  ;;  %v3730_v3 = vrot.slane %v3728_v58, 5  ;;  %v10338_v58 = vld [vmem:[%s8847_s23 + $0xec] sm:$0xf0]  ;;  %v3736_v24 = vrot.slane %v3734_v33, 5  ;;  %v8044_v56 = vrot.slane %v8036_v14, 9  ;;  %v3966_v28 = vrot.slane %v10177_v62, 5 }
 0x185   : > { %v10327_v48 = vadd.f32 %v2585_v49, %v2408_v26  ;;  %v3748_v49 = vshll.u32 %v10325_v13, 16  ;;  %v3746_v40 = vrot.slane %v3745_v41, 4  ;;  %v8045_v59 = vrot.slane %v8037_v11, 9  ;;  %v8057_v41 = vld [vmem:[%s8847_s23 + $0xbc] sm:$0x3] }
 0x186   : > { %v3731_v44 = vor.u32 %v3730_v3, %v3727_v20  ;;  %v10335_v20 = vld [vmem:[%s8847_s23 + $0xe8] sm:$0xf]  ;;  %v3557_v3 = vsel %vm8895_vm6, %v3552_v12, %v3556_v6  ;;  %v3970_v5 = vrot.slane %v10180_v36, 5  ;;  %v10376_v36 = vld [vmem:[%s8847_s23 + $0xc0] sm:$0xe] }
 0x187   : > { %v2310_v17 = vpop.f32.mrf.mxu2  ;;  %v3750_v1 = vrot.slane %v3748_v49, 5  ;;  %v10373_v62 = vunpack.c.l.b16 %v3557_v3  ;;  %v4071_v49 = vshrl.u32 %v10355_v51, 16 }
 0x188   : > { %v2326_v7 = vadd.f32 %v2310_v17, %v2243_v31  ;;  %v3732_v31 = vrot.slane %v3731_v44, 4 }
 0x189   : > { %v2230_v32 = vpop.f32.mrf.mxu1  ;;  %v4073_v11 = vrot.slane %v4071_v49, 5  ;;  %v8023_v49 = vrot.slane %v10355_v51, 9 }
 0x18a   : > { %v2393_v55 = vpop.f32.mrf.mxu3  ;;  %v2244_v35 = vadd.f32 %v2230_v32, %v10200_v23  ;;  %v3543_v23 = vsel %vm8895_vm6, %v3538_v54, %v3542_v42  ;;  %v3967_v54 = vsel %vm8913_vm8, %v8044_v56, %v3966_v28  ;;  %v3971_v42 = vsel %vm8913_vm8, %v8045_v59, %v3970_v5  ;;  %v8107_v59 = vld [vmem:[%s12118_s1 + $0x3a] sm:$0x3] }
 0x18b   : > { %v2409_v26 = vadd.f32 %v2393_v55, %v2326_v7  ;;  %v10369_v33 = vunpack.c.l.b16 %v3543_v23  ;;  %v3998_v12 = vunpack.c.l.b16 %v3967_v54  ;;  %v3999_v6 = vunpack.c.l.b16 %v3971_v42  ;;  %v8186_v42 = vld [vmem:[%s12118_s1 + $0x40] sm:$0x3] }
 0x18c   : > { %v10340_v9 = vpop.f32.mrf.mxu0  ;;  %7942 = vmatmul.msk.bf16.gmra.mxu1 %vm260_vm2, %v7935_v0  ;;  %7971 = vmatmul.msk.bf16.gmra.mxu2 %vm260_vm2, %v7964_v34  ;;  %v3751_v34 = vsel %vm8895_vm6, %v3746_v40, %v3750_v1  ;;  %v4080_v40 = vshrl.u32 %v8057_v41, 16  ;;  %v4089_v1 = vshrl.u32 %v10376_v36, 16  ;;  %v4083_v56 = vshll.u32 %v8057_v41, 16 }
 0x18d   : > { %v10359_v0 = vadd.f32 %v2587_v22, %v2409_v26  ;;  %v3737_v22 = vsel %vm8895_vm6, %v3732_v31, %v3736_v24  ;;  %v8058_v31 = vld [vmem:[%s8847_s23 + $0xc4] sm:$0x3]  ;;  %v4074_v24 = vshll.u32 %v10355_v51, 16  ;;  %v10395_v3 = vpack.c.b16 %v3999_v6, %v3998_v12 }
 0x18e   : > { %v10387_v26 = vunpack.c.l.b16 %v3737_v22  ;;  %v4092_v28 = vshll.u32 %v10376_v36, 16  ;;  %v4091_v5 = vrot.slane %v4089_v1, 5  ;;  %v4098_v22 = vshrl.u32 %v8058_v31, 16 }
 0x18f   : > { %7992 = vmatmul.msk.bf16.gmra.mxu3 %vm260_vm2, %v3570_v63  ;;  %8013 = vmatmul.msk.bf16.gmra.mxu0 %vm260_vm2, %v3764_v50  ;;  %v2313_v17 = vpop.f32.mrf.mxu2  ;;  %v3844_v50 = vrot.slane %v10166_v8, 5  ;;  %v4076_v8 = vrot.slane %v4074_v24, 6  ;;  %v3848_v41 = vrot.slane %v10173_v29, 5  ;;  %v8024_v12 = vrot.slane %v10376_v36, 9 }
 0x190   : > { %v2327_v7 = vadd.f32 %v2313_v17, %v2244_v35  ;;  %v8144_v35 = vld [vmem:[%s12118_s1 + $0x3c] sm:$0x3]  ;;  %v4101_v17 = vshll.u32 %v8058_v31, 16  ;;  %v4082_v6 = vrot.slane %v4080_v40, 5  ;;  %v4407_v31 = vand.u32 %v8107_v59, %v8825_v4  ;;  %v8039_v59 = vld [vmem:[%s8847_s23 + $0x128] sm:$0xe] }
 0x191   : > { %v2232_v32 = vpop.f32.mrf.mxu1  ;;  %v4601_v54 = vand.u32 %v8144_v35, %v8825_v4  ;;  %v4077_v35 = vor.u32 %v4076_v8, %v4073_v11  ;;  %v4085_v1 = vrot.slane %v4083_v56, 6  ;;  %v4917_v44 = vand.u32 %v8186_v42, %v8825_v4 }
 0x192   : > { %v2396_v55 = vpop.f32.mrf.mxu3  ;;  %v2245_v63 = vadd.f32 %v2232_v32, %v10205_v30  ;;  %v8165_v30 = vld [vmem:[%s12118_s1 + $0x3e] sm:$0x3]  ;;  %v4094_v32 = vrot.slane %v4092_v28, 6  ;;  %v4100_v28 = vrot.slane %v4098_v22, 5  ;;  %v4103_v36 = vrot.slane %v4101_v17, 6  ;;  %4416 = vmatpush.bf16.msra.mxu1 %v4407_v31 }
 0x193   : > { %v2410_v23 = vadd.f32 %v2396_v55, %v2327_v7  ;;  %v3761_v7 = vunpack.c.l.b16 %v3751_v34  ;;  %4610 = vmatpush.bf16.msra.mxu2 %v4601_v54  ;;  %v4795_v55 = vand.u32 %v8165_v30, %v8825_v4  ;;  %4926 = vmatpush.bf16.msra.mxu0 %v4917_v44  ;;  %v3571_v8 = vpack.c.b16 %v10373_v62, %v10369_v33  ;;  %v10431_v44 = vld [vmem:[%s8847_s23 + $0xc8] sm:$0xe] }
 0x194   : > { %v2592_v14 = vpop.f32.mrf.mxu0  ;;  %v4095_v29 = vor.u32 %v4094_v32, %v4091_v5  ;;  %v3845_v56 = vsel %vm8913_vm8, %v8023_v49, %v3844_v50  ;;  %v12132_v33 = vor.u32 %v10347_v2, %v10344_v10  ;;  %v4078_v62 = vrot.slane %v4077_v35, 4 }
 0x195   : > { %v10416_v34 = vadd.f32 %v10340_v9, %v2410_v23  ;;  %4804 = vmatpush.bf16.msra.mxu3 %v4795_v55  ;;  %v3765_v9 = vpack.c.b16 %v3761_v7, %v10387_v26  ;;  %v12131_v23 = vor.u32 %v10338_v58, %v10335_v20  ;;  %v4104_v20 = vor.u32 %v4103_v36, %v4100_v28  ;;  %v8038_v58 = vld [vmem:[%s8847_s23 + $0x120] sm:$0xe]  ;;  %v8018_v7 = vld [vmem:[%s8847_s23 + $0xd0] sm:$0xe] }
 0x196   : > { %v4096_v26 = vrot.slane %v4095_v29, 4  ;;  %v8046_v50 = vrot.slane %v8038_v58, 9  ;;  %v3974_v22 = vrot.slane %v10235_v47, 5  ;;  %v8047_v17 = vrot.slane %v8039_v59, 9  ;;  %v8081_v58 = vld [vmem:[%s8847_s23 + $0x10] sm:$0xf] }
 0x197   : > { %v2315_v24 = vpop.f32.mrf.mxu2  ;;  %v3978_v54 = vrot.slane %v10238_v39, 5  ;;  %v4107_v10 = vshrl.u32 %v10431_v44, 16  ;;  %v3876_v42 = vunpack.c.l.b16 %v3845_v56  ;;  %v8025_v59 = vrot.slane %v10431_v44, 9 }
 0x198   : > { %v2328_v51 = vadd.f32 %v2315_v24, %v2245_v63  ;;  %v4105_v35 = vsel %vm9105_vm11, %v4096_v26, %v4104_v20 }
 0x199   : > { %v2235_v18 = vpop.f32.mrf.mxu1  ;;  %v3979_v47 = vsel %vm8913_vm8, %v8047_v17, %v3978_v54  ;;  %v4109_v36 = vrot.slane %v4107_v10, 5  ;;  %v4217_v20 = vunpack.c.l.b16 %v4105_v35  ;;  %v8572_v54 = vld [vmem:[%s8847_s23 + $0x14] sm:$0xf0]  ;;  %v8026_v10 = vrot.slane %v8018_v7, 9 }
 0x19a   : > { %v2398_v40 = vpop.f32.mrf.mxu3  ;;  %v2246_v30 = vadd.f32 %v2235_v18, %v10232_v21  ;;  %v3849_v21 = vsel %vm8913_vm8, %v8024_v12, %v3848_v41  ;;  %v4086_v18 = vor.u32 %v4085_v1, %v4082_v6  ;;  %v4001_v12 = vunpack.c.l.b16 %v3979_v47  ;;  %v8059_v6 = vld [vmem:[%s8847_s23 + $0xcc] sm:$0x3]  ;;  %v8060_v1 = vld [vmem:[%s8847_s23 + $0xd4] sm:$0x3] }
 0x19b   : > { %v2411_v11 = vadd.f32 %v2398_v40, %v2328_v51  ;;  %v3877_v32 = vunpack.c.l.b16 %v3849_v21  ;;  %v4110_v51 = vshll.u32 %v10431_v44, 16  ;;  %v4125_v40 = vshrl.u32 %v8018_v7, 16 }
 0x19c   : > { %v2595_v63 = vpop.f32.mrf.mxu0  ;;  %7943 = vmatmul.msk.bf16.gmra.mxu1 %vm260_vm2, %v12131_v23  ;;  %7972 = vmatmul.msk.bf16.gmra.mxu2 %vm260_vm2, %v12132_v33  ;;  %v4087_v24 = vsel %vm9105_vm11, %v4078_v62, %v4086_v18  ;;  %v4134_v56 = vshrl.u32 %v8060_v1, 16  ;;  %v4137_v21 = vshll.u32 %v8060_v1, 16 }
 0x19d   : > { %v10439_v5 = vadd.f32 %v2592_v14, %v2411_v11  ;;  %v3975_v14 = vsel %vm8913_vm8, %v8046_v50, %v3974_v22  ;;  %v4112_v11 = vrot.slane %v4110_v51, 6  ;;  %v4127_v23 = vrot.slane %v4125_v40, 5  ;;  %v8040_v51 = vld [vmem:[%s8847_s23 + $0x130] sm:$0xe] }
 0x19e   : > { %v4000_v39 = vunpack.c.l.b16 %v3975_v14  ;;  %v3884_v18 = vpack.c.b16 %v3877_v32, %v3876_v42  ;;  %v4216_v33 = vunpack.c.l.b16 %v4087_v24  ;;  %v3852_v50 = vrot.slane %v10224_v25, 5  ;;  %v10475_v24 = vld [vmem:[%s8847_s23 + $0xd8] sm:$0xe] }
 0x19f   : > { %7993 = vmatmul.msk.bf16.gmra.mxu3 %vm260_vm2, %v3571_v8  ;;  %8014 = vmatmul.msk.bf16.gmra.mxu0 %vm260_vm2, %v3765_v9  ;;  %v2318_v2 = vpop.f32.mrf.mxu2  ;;  %v4116_v8 = vshrl.u32 %v8059_v6, 16  ;;  %v4128_v9 = vshll.u32 %v8018_v7, 16  ;;  %v3856_v22 = vrot.slane %v10230_v61, 5  ;;  %v4139_v32 = vrot.slane %v4137_v21, 6 }
 0x1a0   : > { %v2329_v49 = vadd.f32 %v2318_v2, %v2246_v30  ;;  %v10459_v28 = vpack.c.b16 %v4001_v12, %v4000_v39  ;;  %v4113_v2 = vor.u32 %v4112_v11, %v4109_v36  ;;  %v4224_v12 = vpack.c.b16 %v4217_v20, %v4216_v33  ;;  %v8061_v20 = vld [vmem:[%s8847_s23 + $0xdc] sm:$0x3] }
 0x1a1   : > { %v2237_v41 = vpop.f32.mrf.mxu1  ;;  %v4130_v62 = vrot.slane %v4128_v9, 6  ;;  %v4118_v14 = vrot.slane %v4116_v8, 5  ;;  %v8082_v61 = vor.u32 %v8572_v54, %v8081_v58  ;;  %v3853_v7 = vsel %vm8913_vm8, %v8025_v59, %v3852_v50 }
 0x1a2   : > { %v2401_v55 = vpop.f32.mrf.mxu3  ;;  %v2247_v31 = vadd.f32 %v2237_v41, %v10247_v45  ;;  %v4119_v45 = vshll.u32 %v8059_v6, 16  ;;  %v8048_v40 = vrot.slane %v8040_v51, 9  ;;  %v3982_v11 = vrot.slane %v10276_v38, 5 }
 0x1a3   : > { %v2412_v29 = vadd.f32 %v2401_v55, %v2329_v49  ;;  %v4131_v41 = vor.u32 %v4130_v62, %v4127_v23  ;;  %v3857_v55 = vsel %vm8913_vm8, %v8026_v10, %v3856_v22  ;;  %v3878_v23 = vunpack.c.l.b16 %v3853_v7 }
 0x1a4   : > { %v2597_v30 = vpop.f32.mrf.mxu0  ;;  %v4121_v47 = vrot.slane %v4119_v45, 6  ;;  %v3986_v45 = vrot.slane %v10280_v52, 5  ;;  %v3879_v33 = vunpack.c.l.b16 %v3857_v55  ;;  %v4146_v54 = vshll.u32 %v10475_v24, 16 }
 0x1a5   : > { %v10461_v26 = vadd.f32 %v2595_v63, %v2412_v29  ;;  %v4136_v63 = vrot.slane %v4134_v56, 5  ;;  %v4132_v35 = vrot.slane %v4131_v41, 4  ;;  %v8041_v29 = vld [vmem:[%s8847_s23 + $0x138] sm:$0xe]  ;;  %v8020_v56 = vld [vmem:[%s8847_s23 + $0xe0] sm:$0xe] }
 0x1a6   : > { %v8049_v8 = vrot.slane %v8041_v29, 9  ;;  %v4152_v41 = vshrl.u32 %v8061_v20, 16  ;;  %v8573_v29 = vld [vmem:[%s8847_s23 + $0x24] sm:$0xf0] }
 0x1a7   : > { %v2320_v17 = vpop.f32.mrf.mxu2  ;;  %v4140_v1 = vor.u32 %v4139_v32, %v4136_v63  ;;  %v4164_v63 = vshll.u32 %v8020_v56, 16 }
 0x1a8   : > { %v2330_v42 = vadd.f32 %v2320_v17, %v2247_v31  ;;  %v4122_v31 = vor.u32 %v4121_v47, %v4118_v14  ;;  %v3987_v38 = vsel %vm8913_vm8, %v8049_v8, %v3986_v45  ;;  %v8062_v17 = vld [vmem:[%s8847_s23 + $0xe4] sm:$0x3]  ;;  %v4161_v47 = vshrl.u32 %v8020_v56, 16 }
 0x1a9   : > { %v2774_v49 = vpop.f32.mrf.mxu1  ;;  %v4003_v62 = vunpack.c.l.b16 %v3987_v38  ;;  %v4141_v22 = vsel %vm9105_vm11, %v4132_v35, %v4140_v1  ;;  %v3860_v35 = vrot.slane %v10268_v60, 5  ;;  %v3864_v1 = vrot.slane %v10271_v43, 5 }
 0x1aa   : > { %v2403_v39 = vpop.f32.mrf.mxu3  ;;  %v2794_v44 = vadd.f32 %v2774_v49, %v10273_v19  ;;  %v4114_v19 = vrot.slane %v4113_v2, 4  ;;  %v4148_v49 = vrot.slane %v4146_v54, 6  ;;  %v4163_v32 = vrot.slane %v4161_v47, 5 }
 0x1ab   : > { %v2413_v25 = vadd.f32 %v2403_v39, %v2330_v42  ;;  %v4170_v39 = vshrl.u32 %v8062_v17, 16  ;;  %v4219_v55 = vunpack.c.l.b16 %v4141_v22  ;;  %v4154_v8 = vrot.slane %v4152_v41, 5  ;;  %v10531_v41 = vld [vmem:[%s8847_s23 + $0xf0] sm:$0xe] }
 0x1ac   : > { %v3236_v6 = vpop.f32.mrf.mxu0  ;;  %8032 = vmatmul.msk.bf16.vlgmr.msrb.gmra.mxu1 %vm260_vm2, %v3884_v18  ;;  %8053 = vmatmul.msk.bf16.vlgmr.msrb.gmra.mxu2 %vm260_vm2, %v10395_v3  ;;  %v4143_v3 = vshrl.u32 %v10475_v24, 16  ;;  %v4123_v50 = vsel %vm9105_vm11, %v4114_v19, %v4122_v31  ;;  %v8085_v31 = vld [vmem:[%s8847_s23 + $0x20] sm:$0xf]  ;;  %v8027_v19 = vrot.slane %v10475_v24, 9  ;;  %v3990_v54 = vrot.slane %v10321_v37, 5 }
 0x1ad   : > { %v10481_v36 = vadd.f32 %v2597_v30, %v2413_v25  ;;  %v3983_v30 = vsel %vm8913_vm8, %v8048_v40, %v3982_v11  ;;  %v3885_v25 = vpack.c.b16 %v3879_v33, %v3878_v23  ;;  %v8028_v40 = vrot.slane %v8020_v56, 9 }
 0x1ae   : > { %v4002_v52 = vunpack.c.l.b16 %v3983_v30  ;;  %v4145_v14 = vrot.slane %v4143_v3, 5  ;;  %v8086_v43 = vor.u32 %v8573_v29, %v8085_v31  ;;  %v3861_v56 = vsel %vm8913_vm8, %v8027_v19, %v3860_v35  ;;  %v8064_v31 = vld [vmem:[%s8847_s23 + $0xf4] sm:$0x3] }
 0x1af   : > { %8066 = vmatmul.msk.bf16.vlgmr.msrb.gmra.mxu3 %vm260_vm2, %v4224_v12  ;;  %8095 = vmatmul.msk.bf16.vlgmr.msrb.gmra.mxu0 %vm260_vm2, %v8082_v61  ;;  %v2896_v9 = vpop.f32.mrf.mxu2  ;;  %v4218_v12 = vunpack.c.l.b16 %v4123_v50  ;;  %v4166_v61 = vrot.slane %v4164_v63, 6  ;;  %v3865_v33 = vsel %vm8913_vm8, %v8028_v40, %v3864_v1  ;;  %v8043_v50 = vld [vmem:[%s8847_s23 + $0x148] sm:$0xe]  ;;  %v4197_v29 = vshrl.u32 %v10531_v41, 16 }
 0x1b0   : > { %v2916_v21 = vadd.f32 %v2896_v9, %v2794_v44  ;;  %v10501_v2 = vpack.c.b16 %v4003_v62, %v4002_v52  ;;  %v4173_v44 = vshll.u32 %v8062_v17, 16  ;;  %v4149_v11 = vor.u32 %v4148_v49, %v4145_v14  ;;  %v10517_v62 = vld [vmem:[%s8847_s23 + $0xe8] sm:$0xe] }
 0x1b1   : > { %v2776_v18 = vpop.f32.mrf.mxu1  ;;  %v4167_v23 = vor.u32 %v4166_v61, %v4163_v32  ;;  %v3994_v14 = vrot.slane %v10325_v13, 5  ;;  %v3880_v49 = vunpack.c.l.b16 %v3861_v56  ;;  %v3881_v13 = vunpack.c.l.b16 %v3865_v33 }
 0x1b2   : > { %v3018_v58 = vpop.f32.mrf.mxu3  ;;  %v2795_v59 = vadd.f32 %v2776_v18, %v10295_v53  ;;  %v4155_v53 = vshll.u32 %v8061_v20, 16  ;;  %v4175_v30 = vrot.slane %v4173_v44, 6  ;;  %v8063_v44 = vld [vmem:[%s8847_s23 + $0xec] sm:$0x3]  ;;  %v4182_v19 = vshll.u32 %v10517_v62, 16 }
 0x1b3   : > { %v3038_v10 = vadd.f32 %v3018_v58, %v2916_v21  ;;  %v4225_v21 = vpack.c.b16 %v4219_v55, %v4218_v12  ;;  %v4168_v20 = vrot.slane %v4167_v23, 4  ;;  %v4209_v23 = vshll.u32 %v8064_v31, 16 }
 0x1b4   : > { %v3238_v42 = vpop.f32.mrf.mxu0  ;;  %v4157_v45 = vrot.slane %v4155_v53, 6  ;;  %v3886_v56 = vpack.c.b16 %v3881_v13, %v3880_v49  ;;  %v8128_v13 = vld [vmem:[%s8847_s23 + $0x10] sm:$0xf] }
 0x1b5   : > { %v10503_v7 = vadd.f32 %v3236_v6, %v3038_v10  ;;  %v4172_v6 = vrot.slane %v4170_v39, 5  ;;  %v8051_v10 = vrot.slane %v8043_v50, 9 }
 0x1b6   : > { %v4158_v52 = vor.u32 %v4157_v45, %v4154_v8  ;;  %v4191_v8 = vshll.u32 %v8063_v44, 16  ;;  %v4200_v45 = vshll.u32 %v10531_v41, 16 }
 0x1b7   : > { %v2898_v51 = vpop.f32.mrf.mxu2  ;;  %v4176_v58 = vor.u32 %v4175_v30, %v4172_v6  ;;  %v3995_v37 = vsel %vm8913_vm8, %v8051_v10, %v3994_v14  ;;  %v3868_v14 = vrot.slane %v10304_v15, 5 }
 0x1b8   : > { %v2917_v3 = vadd.f32 %v2898_v51, %v2795_v59  ;;  %v8042_v59 = vld [vmem:[%s8847_s23 + $0x140] sm:$0xe]  ;;  %v4005_v39 = vunpack.c.l.b16 %v3995_v37  ;;  %v4202_v6 = vrot.slane %v4200_v45, 6  ;;  %v8030_v37 = vrot.slane %v10531_v41, 9 }
 0x1b9   : > { %v2779_v9 = vpop.f32.mrf.mxu1  ;;  %v8050_v17 = vrot.slane %v8042_v59, 9  ;;  %v4177_v55 = vsel %vm9105_vm11, %v4168_v20, %v4176_v58  ;;  %v4466_v41 = vshll.u32 %v8128_v13, 16 }
 0x1ba   : > { %v3020_v38 = vpop.f32.mrf.mxu3  ;;  %v2796_v24 = vadd.f32 %v2779_v9, %v10327_v48  ;;  %v4150_v48 = vrot.slane %v4149_v11, 4  ;;  %v4184_v11 = vrot.slane %v4182_v19, 6  ;;  %v4206_v9 = vshrl.u32 %v8064_v31, 16 }
 0x1bb   : > { %v3039_v60 = vadd.f32 %v3020_v38, %v2917_v3  ;;  %v4199_v3 = vrot.slane %v4197_v29, 5  ;;  %v4468_v29 = vrot.slane %v4466_v41, 5 }
 0x1bc   : > { %v3241_v18 = vpop.f32.mrf.mxu0  ;;  %8033 = vmatmul.msk.bf16.gmra.mxu1 %vm260_vm2, %v3885_v25  ;;  %8054 = vmatmul.msk.bf16.gmra.mxu2 %vm260_vm2, %v10459_v28  ;;  %v4179_v28 = vshrl.u32 %v10517_v62, 16  ;;  %v4159_v61 = vsel %vm9105_vm11, %v4150_v48, %v4158_v52  ;;  %v4193_v48 = vrot.slane %v4191_v8, 6  ;;  %v4208_v50 = vrot.slane %v4206_v9, 5 }
 0x1bd   : > { %v10523_v22 = vadd.f32 %v3238_v42, %v3039_v60  ;;  %v3991_v42 = vsel %vm8913_vm8, %v8050_v17, %v3990_v54  ;;  %v4220_v38 = vunpack.c.l.b16 %v4159_v61  ;;  %v8089_v60 = vld [vmem:[%s8847_s23 + $0x30] sm:$0xf]  ;;  %v4203_v59 = vor.u32 %v4202_v6, %v4199_v3  ;;  %v10575_v61 = vld [vmem:[%s8847_s23 + $0x14] sm:$0x1] }
 0x1be   : > { %v4004_v32 = vunpack.c.l.b16 %v3991_v42  ;;  %v4181_v51 = vrot.slane %v4179_v28, 5  ;;  %v4211_v17 = vrot.slane %v4209_v23, 6  ;;  %v3872_v28 = vrot.slane %v10315_v27, 5 }
 0x1bf   : > { %8067 = vmatmul.msk.bf16.gmra.mxu3 %vm260_vm2, %v4225_v21  ;;  %8096 = vmatmul.msk.bf16.gmra.mxu0 %vm260_vm2, %v8086_v43  ;;  %v2901_v47 = vpop.f32.mrf.mxu2  ;;  %v8574_v21 = vld [vmem:[%s8847_s23 + $0x34] sm:$0xf0]  ;;  %v8029_v42 = vrot.slane %v10517_v62, 9  ;;  %v4204_v15 = vrot.slane %v4203_v59, 4  ;;  %v4463_v62 = vshrl.u32 %v8128_v13, 16 }
 0x1c0   : > { %v2918_v53 = vadd.f32 %v2901_v47, %v2796_v24  ;;  %v10545_v1 = vpack.c.b16 %v4005_v39, %v4004_v32  ;;  %v4221_v24 = vunpack.c.l.b16 %v4177_v55  ;;  %v4185_v33 = vor.u32 %v4184_v11, %v4181_v51  ;;  %v8130_v32 = vld [vmem:[%s8847_s23 + $0x18] sm:$0xf]  ;;  %v10578_v55 = vld [vmem:[%s8847_s23 + $0x1c] sm:$0x1]  ;;  %v8151_v11 = vld [vmem:[%s8847_s23 + $0x70] sm:$0xf] }
 0x1c1   : > { %v2781_v63 = vpop.f32.mrf.mxu1  ;;  %v4212_v27 = vor.u32 %v4211_v17, %v4208_v50  ;;  %v4480_v31 = vshll.u32 %v8130_v32, 16  ;;  %v4465_v51 = vrot.slane %v4463_v62, 4  ;;  %v8093_v59 = vld [vmem:[%s8847_s23 + $0x40] sm:$0xf]  ;;  %v4674_v50 = vshll.u32 %v8151_v11, 16 }
 0x1c2   : > { %v3023_v25 = vpop.f32.mrf.mxu3  ;;  %v2797_v12 = vadd.f32 %v2781_v63, %v10359_v0  ;;  %v4188_v0 = vshrl.u32 %v8063_v44, 16  ;;  %v4226_v49 = vpack.c.b16 %v4221_v24, %v4220_v38  ;;  %v4186_v63 = vrot.slane %v4185_v33, 4 }
 0x1c3   : > { %v3040_v35 = vadd.f32 %v3023_v25, %v2918_v53  ;;  %v4477_v44 = vshrl.u32 %v8130_v32, 16  ;;  %v8149_v25 = vld [vmem:[%s8847_s23 + $0x68] sm:$0xf]  ;;  %v4213_v45 = vsel %vm9105_vm11, %v4204_v15, %v4212_v27  ;;  %v4482_v3 = vrot.slane %v4480_v31, 5 }
 0x1c4   : > { %v3243_v40 = vpop.f32.mrf.mxu0  ;;  %v4190_v52 = vrot.slane %v4188_v0, 5  ;;  %v4657_v9 = vshrl.u32 %v8149_v25, 16  ;;  %v4472_v38 = vshll.u32 %v10575_v61, 16  ;;  %v4486_v24 = vshll.u32 %v10578_v55, 16 }
 0x1c5   : > { %v10549_v30 = vadd.f32 %v3241_v18, %v3040_v35  ;;  %v8090_v18 = vor.u32 %v8574_v21, %v8089_v60  ;;  %v4660_v60 = vshll.u32 %v8149_v25, 16  ;;  %v8220_v21 = vld [vmem:[%s12118_s1 + $0x44] sm:$0x3] }
 0x1c6   : > { %v4474_v13 = vrot.slane %v4472_v38, 5  ;;  %v4488_v27 = vrot.slane %v4486_v24, 5  ;;  %v4860_v24 = vrot.slane %v10575_v61, 5 }
 0x1c7   : > { %v2903_v43 = vpop.f32.mrf.mxu2 }
 0x1c8   : > { %v2919_v20 = vadd.f32 %v2903_v43, %v2797_v12  ;;  %v3869_v12 = vsel %vm8913_vm8, %v8029_v42, %v3868_v14  ;;  %v4662_v14 = vrot.slane %v4660_v60, 5 }
 0x1c9   : > { %v2784_v58 = vpop.f32.mrf.mxu1 }
 0x1ca   : > { %v3025_v54 = vpop.f32.mrf.mxu3  ;;  %v2798_v10 = vadd.f32 %v2784_v58, %v10416_v34  ;;  %v4194_v34 = vor.u32 %v4193_v48, %v4190_v52  ;;  %v10592_v52 = vld [vmem:[%s8847_s23 + $0x6c] sm:$0x1]  ;;  %v4671_v48 = vshrl.u32 %v8151_v11, 16  ;;  %v3882_v58 = vunpack.c.l.b16 %v3869_v12 }
 0x1cb   : > { %v3041_v47 = vadd.f32 %v3025_v54, %v2919_v20  ;;  %v8575_v54 = vld [vmem:[%s8847_s23 + $0x44] sm:$0xf0] }
 0x1cc   : > { %v10558_v53 = vpop.f32.mrf.mxu0  ;;  %8034 = vmatmul.msk.bf16.gmra.mxu1 %vm260_vm2, %v3886_v56  ;;  %8055 = vmatmul.msk.bf16.gmra.mxu2 %vm260_vm2, %v10501_v2  ;;  %v3873_v2 = vsel %vm8913_vm8, %v8030_v37, %v3872_v28  ;;  %v4195_v35 = vsel %vm9105_vm11, %v4186_v63, %v4194_v34  ;;  %v4469_v56 = vor.u32 %v4468_v29, %v4465_v51  ;;  %v4673_v42 = vrot.slane %v4671_v48, 4  ;;  %v8233_v63 = vld [vmem:[%s12118_s1 + $0x46] sm:$0x3]  ;;  %v8262_v51 = vld [vmem:[%s12118_s1 + $0x48] sm:$0x3] }
 0x1cd   : > { %v10565_v39 = vadd.f32 %v3243_v40, %v3041_v47  ;;  %v4479_v40 = vrot.slane %v4477_v44, 4  ;;  %v4222_v17 = vunpack.c.l.b16 %v4195_v35  ;;  %v5257_v28 = vand.u32 %v8220_v21, %v8825_v4  ;;  %v10606_v44 = vld [vmem:[%s8847_s23 + $0x10] sm:$0xe]  ;;  %v8207_v35 = vld [vmem:[%s12118_s1 + $0x42] sm:$0x3] }
 0x1ce   : > { %v4223_v47 = vunpack.c.l.b16 %v4213_v45  ;;  %v4676_v37 = vrot.slane %v4674_v50, 5  ;;  %v4470_v34 = vrot.slane %v4469_v56, 4  ;;  %v10619_v45 = vld [vmem:[%s8847_s23 + $0x18] sm:$0xe]  ;;  %v5039_v60 = vand.u32 %v8207_v35, %v8825_v4  ;;  %v8132_v56 = vld [vmem:[%s8847_s23 + $0x20] sm:$0xf] }
 0x1cf   : > { %8068 = vmatmul.msk.bf16.gmra.mxu3 %vm260_vm2, %v4226_v49  ;;  %8097 = vmatmul.msk.bf16.gmra.mxu0 %vm260_vm2, %v8090_v18  ;;  %v2906_v19 = vpop.f32.mrf.mxu2  ;;  %v4483_v33 = vor.u32 %v4482_v3, %v4479_v40  ;;  %v4659_v18 = vrot.slane %v4657_v9, 4  ;;  %v4666_v49 = vshll.u32 %v10592_v52, 16  ;;  %v5423_v21 = vand.u32 %v8262_v51, %v8825_v4  ;;  %v10670_v51 = vld [vmem:[%s8847_s23 + $0x7c] sm:$0x1] }
 0x1d0   : > { %v2920_v0 = vadd.f32 %v2906_v19, %v2798_v10  ;;  %v10597_v10 = vld [vmem:[%s8847_s23 + $0x74] sm:$0x1]  ;;  %5266 = vmatpush.bf16.msrb.mxu2 %v5257_v28  ;;  %v5340_v19 = vand.u32 %v8233_v63, %v8825_v4  ;;  %v4227_v11 = vpack.c.b16 %v4223_v47, %v4222_v17  ;;  %v4475_v9 = vsel %vm8895_vm6, %v4470_v34, %v4474_v13 }
 0x1d1   : > { %v2786_v8 = vpop.f32.mrf.mxu1  ;;  %v4484_v15 = vrot.slane %v4483_v33, 4  ;;  %v4680_v41 = vshll.u32 %v10597_v10, 16  ;;  %v4663_v31 = vor.u32 %v4662_v14, %v4659_v18  ;;  %v8179_v48 = vrot.slane %v10619_v45, 9  ;;  %5048 = vmatpush.bf16.msrb.mxu1 %v5039_v60  ;;  %5432 = vmatpush.bf16.msrb.mxu0 %v5423_v21  ;;  %v8153_v18 = vld [vmem:[%s8847_s23 + $0x78] sm:$0xf] }
 0x1d2   : > { %v3028_v23 = vpop.f32.mrf.mxu3  ;;  %v2799_v6 = vadd.f32 %v2786_v8, %v10439_v5  ;;  %v3883_v5 = vunpack.c.l.b16 %v3873_v2  ;;  %v8094_v2 = vor.u32 %v8575_v54, %v8093_v59  ;;  %v4677_v8 = vor.u32 %v4676_v37, %v4673_v42  ;;  %5349 = vmatpush.bf16.msrb.mxu3 %v5340_v19  ;;  %v8155_v42 = vld [vmem:[%s8847_s23 + $0x80] sm:$0xf] }
 0x1d3   : > { %v3042_v43 = vadd.f32 %v3028_v23, %v2920_v0  ;;  %v10616_v0 = vrot.slane %v4666_v49, 5  ;;  %v4489_v23 = vsel %vm8895_vm6, %v4484_v15, %v4488_v27  ;;  %v4664_v33 = vrot.slane %v4663_v31, 4  ;;  %v10660_v15 = vld [vmem:[%s8847_s23 + $0x2c] sm:$0x1] }
 0x1d4   : > { %v3248_v20 = vpop.f32.mrf.mxu0  ;;  %v3887_v62 = vpack.c.b16 %v3883_v5, %v3882_v58  ;;  %v8134_v58 = vld [vmem:[%s8847_s23 + $0x28] sm:$0xf]  ;;  %v4678_v61 = vrot.slane %v4677_v8, 4  ;;  %v4864_v50 = vrot.slane %v10578_v55, 5  ;;  %v4491_v17 = vshrl.u32 %v8132_v56, 16 }
 0x1d5   : > { %v10638_v5 = vadd.f32 %v10558_v53, %v3042_v43  ;;  %v4494_v54 = vshll.u32 %v8132_v56, 16  ;;  %v10648_v53 = vunpack.c.l.b16 %v4489_v23  ;;  %v10651_v43 = vld [vmem:[%s8847_s23 + $0x24] sm:$0x1]  ;;  %v4508_v55 = vshll.u32 %v8134_v58, 16 }
 0x1d6   : > { %v4493_v47 = vrot.slane %v4491_v17, 4  ;;  %v4685_v37 = vshrl.u32 %v8153_v18, 16  ;;  %v4669_v13 = vsel %vm8895_vm6, %v4664_v33, %v10616_v0  ;;  %v4688_v31 = vshll.u32 %v8153_v18, 16  ;;  %v8576_v0 = vld [vmem:[%s8847_s23 + $0x6c] sm:$0xf0] }
 0x1d7   : > { %v2908_v32 = vpop.f32.mrf.mxu2  ;;  %v4496_v49 = vrot.slane %v4494_v54, 5  ;;  %v4500_v35 = vshll.u32 %v10651_v43, 16  ;;  %v4770_v23 = vunpack.c.l.b16 %v4669_v13  ;;  %v4694_v33 = vshll.u32 %v10670_v51, 16 }
 0x1d8   : > { %v2921_v25 = vadd.f32 %v2908_v32, %v2799_v6  ;;  %v8178_v6 = vrot.slane %v10606_v44, 9  ;;  %v4510_v32 = vrot.slane %v4508_v55, 5 }
 0x1d9   : > { %v2789_v12 = vpop.f32.mrf.mxu1  ;;  %v4497_v8 = vor.u32 %v4496_v49, %v4493_v47  ;;  %v4502_v18 = vrot.slane %v4500_v35, 5 }
 0x1da   : > { %v3030_v29 = vpop.f32.mrf.mxu3  ;;  %v2800_v40 = vadd.f32 %v2789_v12, %v10461_v26  ;;  %v4682_v26 = vrot.slane %v4680_v41, 5  ;;  %v4861_v28 = vsel %vm8913_vm8, %v8178_v6, %v4860_v24  ;;  %v10675_v24 = vld [vmem:[%s8847_s23 + $0x84] sm:$0x1] }
 0x1db   : > { %v3043_v3 = vadd.f32 %v3030_v29, %v2921_v25  ;;  %v8110_v25 = vld [vmem:[%s8847_s23 + $0x68] sm:$0xf]  ;;  %v4687_v29 = vrot.slane %v4685_v37, 4  ;;  %v4892_v6 = vunpack.c.l.b16 %v4861_v28  ;;  %v4498_v54 = vrot.slane %v4497_v8, 4 }
 0x1dc   : > { %v10626_v38 = vpop.f32.mrf.mxu0  ;;  %8035 = vmatmul.msk.bf16.gmra.mxu1 %vm260_vm2, %v3887_v62  ;;  %8056 = vmatmul.msk.bf16.gmra.mxu2 %vm260_vm2, %v10545_v1  ;;  %v10646_v1 = vunpack.c.l.b16 %v4475_v9  ;;  %v4683_v12 = vsel %vm8895_vm6, %v4678_v61, %v4682_v26  ;;  %v4702_v9 = vshll.u32 %v8155_v42, 16  ;;  %v4708_v55 = vshll.u32 %v10675_v24, 16  ;;  %v10685_v37 = vld [vmem:[%s8847_s23 + $0x28] sm:$0xe] }
 0x1dd   : > { %v10640_v59 = vadd.f32 %v3248_v20, %v3043_v3  ;;  %v4505_v20 = vshrl.u32 %v8134_v58, 16  ;;  %v4690_v3 = vrot.slane %v4688_v31, 5  ;;  %v4771_v21 = vunpack.c.l.b16 %v4683_v12  ;;  %v8136_v31 = vld [vmem:[%s8847_s23 + $0x30] sm:$0xf] }
 0x1de   : > { %v8111_v58 = vor.u32 %v8576_v0, %v8110_v25  ;;  %v4584_v61 = vpack.c.b16 %v10648_v53, %v10646_v1  ;;  %v4868_v25 = vrot.slane %v10651_v43, 5  ;;  %v4710_v43 = vrot.slane %v4708_v55, 5 }
 0x1df   : > { %8069 = vmatmul.msk.bf16.gmra.mxu3 %vm260_vm2, %v4227_v11  ;;  %8098 = vmatmul.msk.bf16.gmra.mxu0 %vm260_vm2, %v8094_v2  ;;  %v2911_v14 = vpop.f32.mrf.mxu2  ;;  %v4507_v27 = vrot.slane %v4505_v20, 4  ;;  %v4865_v2 = vsel %vm8913_vm8, %v8179_v48, %v4864_v50  ;;  %v4704_v48 = vrot.slane %v4702_v9, 5  ;;  %v4691_v50 = vor.u32 %v4690_v3, %v4687_v29  ;;  %v8138_v29 = vld [vmem:[%s8847_s23 + $0x38] sm:$0xf] }
 0x1e0   : > { %v2922_v63 = vadd.f32 %v2911_v14, %v2800_v40  ;;  %v4699_v40 = vshrl.u32 %v8155_v42, 16  ;;  %v4893_v56 = vunpack.c.l.b16 %v4865_v2  ;;  %v10682_v14 = vld [vmem:[%s8847_s23 + $0x20] sm:$0xe]  ;;  %v8181_v2 = vrot.slane %v10685_v37, 9 }
 0x1e1   : > { %v2791_v34 = vpop.f32.mrf.mxu1  ;;  %v4511_v26 = vor.u32 %v4510_v32, %v4507_v27  ;;  %v4696_v27 = vrot.slane %v4694_v33, 5  ;;  %v4519_v0 = vshrl.u32 %v8136_v31, 16  ;;  %v4522_v8 = vshll.u32 %v8136_v31, 16  ;;  %v8114_v33 = vld [vmem:[%s8847_s23 + $0x78] sm:$0xf] }
 0x1e2   : > { %v3033_v62 = vpop.f32.mrf.mxu3  ;;  %v2801_v41 = vadd.f32 %v2791_v34, %v10481_v36  ;;  %v4514_v36 = vshll.u32 %v10660_v15, 16  ;;  %v4701_v60 = vrot.slane %v4699_v40, 4  ;;  %v4778_v34 = vpack.c.b16 %v4771_v21, %v4770_v23  ;;  %v8157_v23 = vld [vmem:[%s8847_s23 + $0x88] sm:$0xf] }
 0x1e3   : > { %v3044_v19 = vadd.f32 %v3033_v62, %v2922_v63  ;;  %v4512_v49 = vrot.slane %v4511_v26, 4  ;;  %v4900_v13 = vpack.c.b16 %v4893_v56, %v4892_v6  ;;  %v4692_v62 = vrot.slane %v4691_v50, 4  ;;  %v8159_v50 = vld [vmem:[%s8847_s23 + $0x90] sm:$0xf] }
 0x1e4   : > { %v3253_v11 = vpop.f32.mrf.mxu0  ;;  %v4516_v20 = vrot.slane %v4514_v36, 5  ;;  %v4705_v42 = vor.u32 %v4704_v48, %v4701_v60  ;;  %v4533_v3 = vshrl.u32 %v8138_v29, 16  ;;  %v4536_v9 = vshll.u32 %v8138_v29, 16 }
 0x1e5   : > { %v10688_v63 = vadd.f32 %v10626_v38, %v3044_v19  ;;  %v4503_v38 = vsel %vm8895_vm6, %v4498_v54, %v4502_v18  ;;  %v8577_v18 = vld [vmem:[%s8847_s23 + $0x7c] sm:$0xf0] }
 0x1e6   : > { %v4517_v19 = vsel %vm8895_vm6, %v4512_v49, %v4516_v20  ;;  %v4706_v35 = vrot.slane %v4705_v42, 4  ;;  %v10714_v6 = vunpack.c.l.b16 %v4503_v38  ;;  %v10730_v42 = vld [vmem:[%s8847_s23 + $0x3c] sm:$0x1]  ;;  %v8115_v38 = vor.u32 %v8577_v18, %v8114_v33 }
 0x1e7   : > { %v2913_v17 = vpop.f32.mrf.mxu2  ;;  %v10716_v26 = vunpack.c.l.b16 %v4517_v19  ;;  %v10737_v19 = vld [vmem:[%s8847_s23 + $0x8c] sm:$0x1] }
 0x1e8   : > { %v2923_v28 = vadd.f32 %v2913_v17, %v2801_v41  ;;  %v8180_v41 = vrot.slane %v10682_v14, 9  ;;  %v4711_v48 = vsel %vm8895_vm6, %v4706_v35, %v4710_v43  ;;  %v10740_v35 = vld [vmem:[%s8847_s23 + $0x94] sm:$0x1] }
 0x1e9   : > { %v3319_v47 = vpop.f32.mrf.mxu1 }
 0x1ea   : > { %v3035_v1 = vpop.f32.mrf.mxu3  ;;  %v3339_v53 = vadd.f32 %v3319_v47, %v10503_v7  ;;  %v4872_v7 = vrot.slane %v10660_v15, 5  ;;  %v4697_v15 = vsel %vm8895_vm6, %v4692_v62, %v4696_v27  ;;  %v4869_v36 = vsel %vm8913_vm8, %v8180_v41, %v4868_v25 }
 0x1eb   : > { %v3045_v32 = vadd.f32 %v3035_v1, %v2923_v28  ;;  %v4772_v20 = vunpack.c.l.b16 %v4697_v15  ;;  %v4894_v55 = vunpack.c.l.b16 %v4869_v36  ;;  %v10727_v28 = vld [vmem:[%s8847_s23 + $0x34] sm:$0x1]  ;;  %v4713_v47 = vshrl.u32 %v8157_v23, 16 }
 0x1ec   : > { %v10693_v12 = vpop.f32.mrf.mxu0  ;;  %8124 = vmatmul.msk.bf16.vlgmr.msra.gmra.mxu1 %vm260_vm2, %v8111_v58  ;;  %8145 = vmatmul.msk.bf16.vlgmr.msra.gmra.mxu2 %vm260_vm2, %v4584_v61  ;;  %v4873_v60 = vsel %vm8913_vm8, %v8181_v2, %v4872_v7  ;;  %v4521_v58 = vrot.slane %v4519_v0, 4  ;;  %v4524_v61 = vrot.slane %v4522_v8, 5  ;;  %v4535_v1 = vrot.slane %v4533_v3, 4 }
 0x1ed   : > { %v10705_v40 = vadd.f32 %v3253_v11, %v3045_v32  ;;  %v4773_v27 = vunpack.c.l.b16 %v4711_v48  ;;  %v4895_v32 = vunpack.c.l.b16 %v4873_v60  ;;  %v4727_v62 = vshrl.u32 %v8159_v50, 16 }
 0x1ee   : > { %v4730_v41 = vshll.u32 %v8159_v50, 16  ;;  %v4528_v25 = vshll.u32 %v10727_v28, 16  ;;  %v4542_v2 = vshll.u32 %v10730_v42, 16  ;;  %v4585_v7 = vpack.c.b16 %v10716_v26, %v10714_v6  ;;  %v10746_v6 = vld [vmem:[%s8847_s23 + $0x38] sm:$0xe] }
 0x1ef   : > { %8166 = vmatmul.msk.bf16.vlgmr.msra.gmra.mxu3 %vm260_vm2, %v4778_v34  ;;  %8187 = vmatmul.msk.bf16.vlgmr.msra.gmra.mxu0 %vm260_vm2, %v4900_v13  ;;  %v3402_v11 = vpop.f32.mrf.mxu2  ;;  %v4716_v34 = vshll.u32 %v8157_v23, 16  ;;  %v4715_v43 = vrot.slane %v4713_v47, 4  ;;  %v4779_v8 = vpack.c.b16 %v4773_v27, %v4772_v20  ;;  %v4901_v15 = vpack.c.b16 %v4895_v32, %v4894_v55 }
 0x1f0   : > { %v3422_v21 = vadd.f32 %v3402_v11, %v3339_v53  ;;  %v4538_v53 = vrot.slane %v4536_v9, 5  ;;  %v4729_v36 = vrot.slane %v4727_v62, 4  ;;  %v4732_v3 = vrot.slane %v4730_v41, 5  ;;  %v10743_v9 = vld [vmem:[%s8847_s23 + $0x30] sm:$0xe] }
 0x1f1   : > { %v3321_v56 = vpop.f32.mrf.mxu1  ;;  %v4718_v29 = vrot.slane %v4716_v34, 5  ;;  %v4544_v48 = vrot.slane %v4542_v2, 5  ;;  %v8182_v18 = vrot.slane %v10743_v9, 9  ;;  %v4876_v55 = vrot.slane %v10727_v28, 5 }
 0x1f2   : > { %v3596_v17 = vpop.f32.mrf.mxu3  ;;  %v3340_v54 = vadd.f32 %v3321_v56, %v10523_v22  ;;  %v4525_v22 = vor.u32 %v4524_v61, %v4521_v58  ;;  %v4539_v31 = vor.u32 %v4538_v53, %v4535_v1  ;;  %v4722_v58 = vshll.u32 %v10737_v19, 16  ;;  %v8142_v53 = vld [vmem:[%s8847_s23 + $0x48] sm:$0xf] }
 0x1f3   : > { %v3616_v49 = vadd.f32 %v3596_v17, %v3422_v21  ;;  %v4530_v21 = vrot.slane %v4528_v25, 5  ;;  %v4736_v61 = vshll.u32 %v10740_v35, 16  ;;  %v4880_v47 = vrot.slane %v10730_v42, 5 }
 0x1f4   : > { %v3792_v13 = vpop.f32.mrf.mxu0  ;;  %v4526_v60 = vrot.slane %v4525_v22, 4  ;;  %v4540_v17 = vrot.slane %v4539_v31, 4  ;;  %v4724_v27 = vrot.slane %v4722_v58, 5  ;;  %v8161_v22 = vld [vmem:[%s8847_s23 + $0x98] sm:$0xf]  ;;  %v4561_v25 = vshrl.u32 %v8142_v53, 16 }
 0x1f5   : > { %v10749_v26 = vadd.f32 %v10693_v12, %v3616_v49  ;;  %v4733_v12 = vor.u32 %v4732_v3, %v4729_v36  ;;  %v8140_v49 = vld [vmem:[%s8847_s23 + $0x40] sm:$0xf]  ;;  %v4738_v32 = vrot.slane %v4736_v61, 5  ;;  %v4877_v31 = vsel %vm8913_vm8, %v8182_v18, %v4876_v55  ;;  %v8118_v18 = vld [vmem:[%s8847_s23 + $0x88] sm:$0xf] }
 0x1f6   : > { %v4531_v1 = vsel %vm8895_vm6, %v4526_v60, %v4530_v21  ;;  %v4547_v62 = vshrl.u32 %v8140_v49, 16  ;;  %v4550_v41 = vshll.u32 %v8140_v49, 16  ;;  %v4545_v28 = vsel %vm8895_vm6, %v4540_v17, %v4544_v48  ;;  %v10782_v60 = vld [vmem:[%s8847_s23 + $0x44] sm:$0x1] }
 0x1f7   : > { %v3404_v0 = vpop.f32.mrf.mxu2  ;;  %v4741_v3 = vshrl.u32 %v8161_v22, 16  ;;  %v4563_v21 = vrot.slane %v4561_v25, 4  ;;  %v4744_v48 = vshll.u32 %v8161_v22, 16  ;;  %v4581_v61 = vunpack.c.l.b16 %v4545_v28 }
 0x1f8   : > { %v3423_v23 = vadd.f32 %v3404_v0, %v3340_v54  ;;  %v4719_v54 = vor.u32 %v4718_v29, %v4715_v43  ;;  %v8163_v29 = vld [vmem:[%s8847_s23 + $0xa0] sm:$0xf]  ;;  %v4552_v36 = vrot.slane %v4550_v41, 5 }
 0x1f9   : > { %v3324_v11 = vpop.f32.mrf.mxu1  ;;  %v4755_v17 = vshrl.u32 %v8163_v29, 16  ;;  %v4743_v41 = vrot.slane %v4741_v3, 4  ;;  %v4746_v22 = vrot.slane %v4744_v48, 5 }
 0x1fa   : > { %v3598_v56 = vpop.f32.mrf.mxu3  ;;  %v3341_v33 = vadd.f32 %v3324_v11, %v10549_v30  ;;  %v8183_v30 = vrot.slane %v10746_v6, 9  ;;  %v4720_v42 = vrot.slane %v4719_v54, 4 }
 0x1fb   : > { %v3617_v50 = vadd.f32 %v3598_v56, %v3423_v23  ;;  %v4757_v25 = vrot.slane %v4755_v17, 4 }
 0x1fc   : > { %v10755_v20 = vpop.f32.mrf.mxu0  ;;  %8125 = vmatmul.msk.bf16.gmra.mxu1 %vm260_vm2, %v8115_v38  ;;  %8146 = vmatmul.msk.bf16.gmra.mxu2 %vm260_vm2, %v4585_v7  ;;  %v4564_v38 = vshll.u32 %v8142_v53, 16  ;;  %v4734_v7 = vrot.slane %v4733_v12, 4  ;;  %v4881_v43 = vsel %vm8913_vm8, %v8183_v30, %v4880_v47  ;;  %v4896_v12 = vunpack.c.l.b16 %v4877_v31  ;;  %v8578_v47 = vld [vmem:[%s8847_s23 + $0x8c] sm:$0xf0]  ;;  %v10795_v53 = vld [vmem:[%s8847_s23 + $0x9c] sm:$0x1] }
 0x1fd   : > { %v10766_v34 = vadd.f32 %v3792_v13, %v3617_v50  ;;  %v10773_v13 = vunpack.c.l.b16 %v4531_v1  ;;  %v10787_v50 = vld [vmem:[%s8847_s23 + $0x4c] sm:$0x1]  ;;  %v4897_v55 = vunpack.c.l.b16 %v4881_v43  ;;  %v4758_v30 = vshll.u32 %v8163_v29, 16  ;;  %v10800_v43 = vld [vmem:[%s8847_s23 + $0xa4] sm:$0x1] }
 0x1fe   : > { %v4566_v56 = vrot.slane %v4564_v38, 5  ;;  %v4556_v1 = vshll.u32 %v10782_v60, 16  ;;  %v4750_v29 = vshll.u32 %v10795_v53, 16 }
 0x1ff   : > { %8167 = vmatmul.msk.bf16.gmra.mxu3 %vm260_vm2, %v4779_v8  ;;  %8188 = vmatmul.msk.bf16.gmra.mxu0 %vm260_vm2, %v4901_v15  ;;  %v3407_v2 = vpop.f32.mrf.mxu2  ;;  %v4549_v15 = vrot.slane %v4547_v62, 4  ;;  %v4760_v38 = vrot.slane %v4758_v30, 5  ;;  %v4902_v31 = vpack.c.b16 %v4897_v55, %v4896_v12  ;;  %v4884_v55 = vrot.slane %v10782_v60, 5 }
 0x200   : > { %v3424_v0 = vadd.f32 %v3407_v2, %v3341_v33  ;;  %v4725_v33 = vsel %vm8895_vm6, %v4720_v42, %v4724_v27  ;;  %v4567_v62 = vor.u32 %v4566_v56, %v4563_v21  ;;  %v4570_v27 = vshll.u32 %v10787_v50, 16 }
 0x201   : > { %v3326_v8 = vpop.f32.mrf.mxu1  ;;  %v4553_v49 = vor.u32 %v4552_v36, %v4549_v15  ;;  %v4774_v28 = vunpack.c.l.b16 %v4725_v33  ;;  %v8119_v2 = vor.u32 %v8578_v47, %v8118_v18  ;;  %v4558_v36 = vrot.slane %v4556_v1, 5 }
 0x202   : > { %v3601_v23 = vpop.f32.mrf.mxu3  ;;  %v3342_v11 = vadd.f32 %v3326_v8, %v10565_v39  ;;  %v4739_v39 = vsel %vm8895_vm6, %v4734_v7, %v4738_v32  ;;  %v4586_v7 = vpack.c.b16 %v4581_v61, %v10773_v13  ;;  %v4568_v56 = vrot.slane %v4567_v62, 4  ;;  %v10808_v13 = vld [vmem:[%s8847_s23 + $0x40] sm:$0xe] }
 0x203   : > { %v3618_v58 = vadd.f32 %v3601_v23, %v3424_v0  ;;  %v4775_v42 = vunpack.c.l.b16 %v4739_v39  ;;  %v4554_v15 = vrot.slane %v4553_v49, 4  ;;  %v4572_v48 = vrot.slane %v4570_v27, 5 }
 0x204   : > { %v3797_v54 = vpop.f32.mrf.mxu0  ;;  %v4747_v33 = vor.u32 %v4746_v22, %v4743_v41  ;;  %v4761_v18 = vor.u32 %v4760_v38, %v4757_v25  ;;  %v4764_v39 = vshll.u32 %v10800_v43, 16  ;;  %v4888_v62 = vrot.slane %v10787_v50, 5 }
 0x205   : > { %v10804_v3 = vadd.f32 %v10755_v20, %v3618_v58  ;;  %v4780_v17 = vpack.c.b16 %v4775_v42, %v4774_v28  ;;  %v4752_v20 = vrot.slane %v4750_v29, 5  ;;  %v8184_v58 = vrot.slane %v10808_v13, 9 }
 0x206   : > { %v4573_v47 = vsel %vm8895_vm6, %v4568_v56, %v4572_v48  ;;  %v4748_v49 = vrot.slane %v4747_v33, 4  ;;  %v4762_v27 = vrot.slane %v4761_v18, 4  ;;  %v4766_v41 = vrot.slane %v4764_v39, 5  ;;  %v8579_v56 = vld [vmem:[%s8847_s23 + $0x9c] sm:$0xf0] }
 0x207   : > { %v3409_v32 = vpop.f32.mrf.mxu2  ;;  %v5087_v28 = vshrl.u32 %v10606_v44, 16  ;;  %v5090_v42 = vshll.u32 %v10606_v44, 16  ;;  %v4885_v50 = vsel %vm8913_vm8, %v8184_v58, %v4884_v55 }
 0x208   : > { %v3425_v0 = vadd.f32 %v3409_v32, %v3342_v11  ;;  %v10812_v11 = vld [vmem:[%s8847_s23 + $0x48] sm:$0xe]  ;;  %v8122_v32 = vld [vmem:[%s8847_s23 + $0x98] sm:$0xf] }
 0x209   : > { %v3329_v8 = vpop.f32.mrf.mxu1  ;;  %v8185_v1 = vrot.slane %v10812_v11, 9  ;;  %v5092_v18 = vrot.slane %v5090_v42, 6 }
 0x20a   : > { %v3603_v23 = vpop.f32.mrf.mxu3  ;;  %v3343_v21 = vadd.f32 %v3329_v8, %v10638_v5  ;;  %v4559_v5 = vsel %vm8895_vm6, %v4554_v15, %v4558_v36  ;;  %v4753_v8 = vsel %vm8895_vm6, %v4748_v49, %v4752_v20  ;;  %v5108_v15 = vshll.u32 %v10619_v45, 16  ;;  %v8320_v36 = vld [vmem:[%s12118_s1 + $0x4c] sm:$0x3] }
 0x20b   : > { %v3619_v61 = vadd.f32 %v3603_v23, %v3425_v0  ;;  %v10828_v60 = vunpack.c.l.b16 %v4559_v5  ;;  %v4889_v44 = vsel %vm8913_vm8, %v8185_v1, %v4888_v62  ;;  %v8341_v23 = vld [vmem:[%s12118_s1 + $0x4e] sm:$0x3]  ;;  %v8362_v5 = vld [vmem:[%s12118_s1 + $0x50] sm:$0x3]  ;;  %v8123_v1 = vor.u32 %v8579_v56, %v8122_v32 }
 0x20c   : > { %v3800_v12 = vpop.f32.mrf.mxu0  ;;  %8126 = vmatmul.msk.bf16.gmra.mxu1 %vm260_vm2, %v8119_v2  ;;  %8147 = vmatmul.msk.bf16.gmra.mxu2 %vm260_vm2, %v4586_v7  ;;  %v10834_v2 = vunpack.c.l.b16 %v4573_v47  ;;  %v8213_v7 = vld [vmem:[%s8847_s23 + $0x1c] sm:$0x3]  ;;  %v5110_v58 = vrot.slane %v5108_v15, 6  ;;  %v5811_v47 = vand.u32 %v8320_v36, %v8825_v4  ;;  %v5933_v49 = vand.u32 %v8341_v23, %v8825_v4  ;;  %v8192_v15 = vld [vmem:[%s8847_s23 + $0x70] sm:$0xe] }
 0x20d   : > { %v10820_v30 = vadd.f32 %v3797_v54, %v3619_v61  ;;  %v8212_v54 = vld [vmem:[%s8847_s23 + $0x14] sm:$0x3]  ;;  %v8299_v61 = vld [vmem:[%s12118_s1 + $0x4a] sm:$0x3]  ;;  %v5114_v20 = vshrl.u32 %v8213_v7, 16  ;;  %v5117_v55 = vshll.u32 %v8213_v7, 16  ;;  %v4776_v62 = vunpack.c.l.b16 %v4753_v8 }
 0x20e   : > { %v5096_v48 = vshrl.u32 %v8212_v54, 16  ;;  %v5099_v33 = vshll.u32 %v8212_v54, 16  ;;  %v4899_v54 = vunpack.c.l.b16 %v4889_v44  ;;  %5820 = vmatpush.bf16.msra.mxu2 %v5811_v47  ;;  %5942 = vmatpush.bf16.msra.mxu3 %v5933_v49  ;;  %v8191_v8 = vld [vmem:[%s8847_s23 + $0x68] sm:$0xe] }
 0x20f   : > { %8168 = vmatmul.msk.bf16.gmra.mxu3 %vm260_vm2, %v4780_v17  ;;  %8189 = vmatmul.msk.bf16.gmra.mxu0 %vm260_vm2, %v4902_v31  ;;  %v3412_v22 = vpop.f32.mrf.mxu2  ;;  %v5105_v31 = vshrl.u32 %v10619_v45, 16  ;;  %v5089_v17 = vrot.slane %v5087_v28, 5  ;;  %v6055_v28 = vand.u32 %v8362_v5, %v8825_v4  ;;  %v5116_v44 = vrot.slane %v5114_v20, 5 }
 0x210   : > { %v3426_v25 = vadd.f32 %v3412_v22, %v3343_v21  ;;  %v5098_v32 = vrot.slane %v5096_v48, 5  ;;  %v5119_v23 = vrot.slane %v5117_v55, 6  ;;  %v4986_v48 = vrot.slane %v10597_v10, 5 }
 0x211   : > { %v3331_v38 = vpop.f32.mrf.mxu1  ;;  %v5107_v39 = vrot.slane %v5105_v31, 5  ;;  %v5093_v7 = vor.u32 %v5092_v18, %v5089_v17  ;;  %v5101_v31 = vrot.slane %v5099_v33, 6  ;;  %6064 = vmatpush.bf16.msra.mxu0 %v6055_v28  ;;  %v5123_v5 = vshrl.u32 %v10682_v14, 16 }
 0x212   : > { %v3606_v29 = vpop.f32.mrf.mxu3  ;;  %v3344_v0 = vadd.f32 %v3331_v38, %v10640_v59  ;;  %v4767_v59 = vsel %vm8895_vm6, %v4762_v27, %v4766_v41  ;;  %v4898_v27 = vunpack.c.l.b16 %v4885_v50  ;;  %v5617_v41 = vand.u32 %v8299_v61, %v8825_v4 }
 0x213   : > { %v3620_v21 = vadd.f32 %v3606_v29, %v3426_v25  ;;  %v4777_v22 = vunpack.c.l.b16 %v4767_v59  ;;  %v4587_v38 = vpack.c.b16 %v10834_v2, %v10828_v60  ;;  %v5111_v36 = vor.u32 %v5110_v58, %v5107_v39 }
 0x214   : > { %v3802_v45 = vpop.f32.mrf.mxu0  ;;  %5626 = vmatpush.bf16.msra.mxu1 %v5617_v41  ;;  %v4903_v2 = vpack.c.b16 %v4899_v54, %v4898_v27  ;;  %v8200_v61 = vrot.slane %v8192_v15, 9  ;;  %v5094_v17 = vrot.slane %v5093_v7, 4  ;;  %v5102_v18 = vor.u32 %v5101_v31, %v5098_v32 }
 0x215   : > { %v10865_v42 = vadd.f32 %v3800_v12, %v3620_v21  ;;  %v4982_v21 = vrot.slane %v10592_v52, 5  ;;  %v4781_v60 = vpack.c.b16 %v4777_v22, %v4776_v62  ;;  %v5112_v39 = vrot.slane %v5111_v36, 4  ;;  %v8214_v52 = vld [vmem:[%s8847_s23 + $0x24] sm:$0x3]  ;;  %v8215_v62 = vld [vmem:[%s8847_s23 + $0x2c] sm:$0x3] }
 0x216   : > { %v5126_v58 = vshll.u32 %v10682_v14, 16  ;;  %v5141_v10 = vshrl.u32 %v10685_v37, 16  ;;  %v5144_v55 = vshll.u32 %v10685_v37, 16  ;;  %v5132_v22 = vshrl.u32 %v8214_v52, 16 }
 0x217   : > { %v3414_v25 = vpop.f32.mrf.mxu2  ;;  %v5135_v54 = vshll.u32 %v8214_v52, 16 }
 0x218   : > { %v3427_v50 = vadd.f32 %v3414_v25, %v3344_v0  ;;  %v8199_v0 = vrot.slane %v8191_v8, 9  ;;  %v5125_v25 = vrot.slane %v5123_v5, 5  ;;  %v5143_v7 = vrot.slane %v5141_v10, 5 }
 0x219   : > { %v3334_v29 = vpop.f32.mrf.mxu1  ;;  %v5146_v31 = vrot.slane %v5144_v55, 6 }
 0x21a   : > { %v3608_v56 = vpop.f32.mrf.mxu3  ;;  %v3345_v12 = vadd.f32 %v3334_v29, %v10688_v63  ;;  %v5120_v63 = vor.u32 %v5119_v23, %v5116_v44  ;;  %v4983_v49 = vsel %vm8913_vm8, %v8199_v0, %v4982_v21  ;;  %v5153_v29 = vshll.u32 %v8215_v62, 16  ;;  %v8236_v44 = vld [vmem:[%s8847_s23 + $0xc0] sm:$0xf]  ;;  %v8265_v21 = vld [vmem:[%s8847_s23 + $0x118] sm:$0xf] }
 0x21b   : > { %v3621_v59 = vadd.f32 %v3608_v56, %v3427_v50  ;;  %v5150_v50 = vshrl.u32 %v8215_v62, 16  ;;  %v5014_v15 = vunpack.c.l.b16 %v4983_v49  ;;  %v8194_v0 = vld [vmem:[%s8847_s23 + $0x80] sm:$0xe]  ;;  %v4990_v49 = vrot.slane %v10670_v51, 5 }
 0x21c   : > { %v3805_v33 = vpop.f32.mrf.mxu0  ;;  %8127 = vmatmul.msk.bf16.gmra.mxu1 %vm260_vm2, %v8123_v1  ;;  %8148 = vmatmul.msk.bf16.gmra.mxu2 %vm260_vm2, %v4587_v38  ;;  %v5103_v1 = vsel %vm9105_vm11, %v5094_v17, %v5102_v18  ;;  %v5121_v41 = vsel %vm9105_vm11, %v5112_v39, %v5120_v63  ;;  %v5128_v38 = vrot.slane %v5126_v58, 6  ;;  %v5147_v17 = vor.u32 %v5146_v31, %v5143_v7 }
 0x21d   : > { %v10876_v20 = vadd.f32 %v3802_v45, %v3621_v59  ;;  %v4987_v45 = vsel %vm8913_vm8, %v8200_v61, %v4986_v48  ;;  %v5232_v23 = vunpack.c.l.b16 %v5103_v1  ;;  %v5233_v56 = vunpack.c.l.b16 %v5121_v41  ;;  %v8584_v59 = vld [vmem:[%s8847_s23 + $0x11c] sm:$0xf0]  ;;  %v8193_v48 = vld [vmem:[%s8847_s23 + $0x78] sm:$0xe] }
 0x21e   : > { %v5015_v36 = vunpack.c.l.b16 %v4987_v45  ;;  %v5129_v61 = vor.u32 %v5128_v38, %v5125_v25  ;;  %v5152_v18 = vrot.slane %v5150_v50, 5  ;;  %v5155_v39 = vrot.slane %v5153_v29, 6 }
 0x21f   : > { %8169 = vmatmul.msk.bf16.gmra.mxu3 %vm260_vm2, %v4781_v60  ;;  %8190 = vmatmul.msk.bf16.gmra.mxu0 %vm260_vm2, %v4903_v2  ;;  %v3417_v47 = vpop.f32.mrf.mxu2  ;;  %v5134_v60 = vrot.slane %v5132_v22, 5  ;;  %v5137_v2 = vrot.slane %v5135_v54, 6  ;;  %v8266_v58 = vor.u32 %v8584_v59, %v8265_v21  ;;  %v8201_v62 = vrot.slane %v8193_v48, 9 }
 0x220   : > { %v3428_v14 = vadd.f32 %v3417_v47, %v3345_v12  ;;  %v8580_v12 = vld [vmem:[%s8847_s23 + $0xc4] sm:$0xf0]  ;;  %v5022_v52 = vpack.c.b16 %v5015_v36, %v5014_v15  ;;  %v5240_v47 = vpack.c.b16 %v5233_v56, %v5232_v23  ;;  %v5130_v22 = vrot.slane %v5129_v61, 4  ;;  %v8217_v15 = vld [vmem:[%s8847_s23 + $0x3c] sm:$0x3] }
 0x221   : > { %v3336_v27 = vpop.f32.mrf.mxu1  ;;  %v8237_v5 = vor.u32 %v8580_v12, %v8236_v44  ;;  %v5148_v54 = vrot.slane %v5147_v17, 4  ;;  %v5159_v38 = vshrl.u32 %v10743_v9, 16  ;;  %v5162_v7 = vshll.u32 %v10743_v9, 16 }
 0x222   : > { %v3611_v37 = vpop.f32.mrf.mxu3  ;;  %v3346_v28 = vadd.f32 %v3336_v27, %v10705_v40  ;;  %v5138_v27 = vor.u32 %v5137_v2, %v5134_v60  ;;  %v5177_v50 = vshrl.u32 %v10746_v6, 16  ;;  %v5180_v29 = vshll.u32 %v10746_v6, 16  ;;  %v8195_v60 = vld [vmem:[%s8847_s23 + $0x88] sm:$0xe] }
 0x223   : > { %v3622_v32 = vadd.f32 %v3611_v37, %v3428_v14  ;;  %v8202_v14 = vrot.slane %v8194_v0, 9  ;;  %v5156_v37 = vor.u32 %v5155_v39, %v5152_v18  ;;  %v5161_v36 = vrot.slane %v5159_v38, 5  ;;  %v8196_v39 = vld [vmem:[%s8847_s23 + $0x90] sm:$0xe] }
 0x224   : > { %v3807_v8 = vpop.f32.mrf.mxu0  ;;  %v5164_v9 = vrot.slane %v5162_v7, 6  ;;  %v5179_v2 = vrot.slane %v5177_v50, 5  ;;  %v5182_v18 = vrot.slane %v5180_v29, 6 }
 0x225   : > { %v10899_v40 = vadd.f32 %v3805_v33, %v3622_v32  ;;  %v4994_v33 = vrot.slane %v10675_v24, 5  ;;  %v4991_v24 = vsel %vm8913_vm8, %v8201_v62, %v4990_v49  ;;  %v5139_v32 = vsel %vm9105_vm11, %v5130_v22, %v5138_v27  ;;  %v8240_v27 = vld [vmem:[%s8847_s23 + $0xd0] sm:$0xf] }
 0x226   : > { %v5157_v31 = vsel %vm9105_vm11, %v5148_v54, %v5156_v37  ;;  %v5016_v21 = vunpack.c.l.b16 %v4991_v24  ;;  %v5234_v61 = vunpack.c.l.b16 %v5139_v32  ;;  %v8204_v62 = vrot.slane %v8196_v39, 9  ;;  %v8581_v54 = vld [vmem:[%s8847_s23 + $0xd4] sm:$0xf0]  ;;  %v8269_v37 = vld [vmem:[%s8847_s23 + $0x128] sm:$0xf] }
 0x227   : > { %v3419_v63 = vpop.f32.mrf.mxu2  ;;  %v5235_v17 = vunpack.c.l.b16 %v5157_v31  ;;  %v5216_v39 = vshll.u32 %v10812_v11, 16 }
 0x228   : > { %v3429_v10 = vadd.f32 %v3419_v63, %v3346_v28  ;;  %v8216_v28 = vld [vmem:[%s8847_s23 + $0x34] sm:$0x3]  ;;  %v4998_v63 = vrot.slane %v10737_v19, 5 }
 0x229   : > { %v3912_v55 = vpop.f32.mrf.mxu1  ;;  %v5168_v44 = vshrl.u32 %v8216_v28, 16  ;;  %v5171_v23 = vshll.u32 %v8216_v28, 16  ;;  %v5241_v22 = vpack.c.b16 %v5235_v17, %v5234_v61  ;;  %v8585_v28 = vld [vmem:[%s8847_s23 + $0x12c] sm:$0xf0]  ;;  %v5006_v17 = vrot.slane %v10795_v53, 5 }
 0x22a   : > { %v3613_v45 = vpop.f32.mrf.mxu3  ;;  %v3932_v1 = vadd.f32 %v3912_v55, %v10749_v26  ;;  %v4995_v26 = vsel %vm8913_vm8, %v8202_v14, %v4994_v33  ;;  %v5165_v55 = vor.u32 %v5164_v9, %v5161_v36  ;;  %v5183_v33 = vor.u32 %v5182_v18, %v5179_v2 }
 0x22b   : > { %v3623_v41 = vadd.f32 %v3613_v45, %v3429_v10  ;;  %v5017_v59 = vunpack.c.l.b16 %v4995_v26  ;;  %v8203_v10 = vrot.slane %v8195_v60, 9  ;;  %v5173_v49 = vrot.slane %v5171_v23, 6 }
 0x22c   : > { %v4335_v25 = vpop.f32.mrf.mxu0  ;;  %8208 = vmatmul.msk.bf16.vlgmr.msrb.gmra.mxu1 %vm260_vm2, %v5022_v52  ;;  %8221 = vmatmul.msk.bf16.vlgmr.msrb.gmra.mxu2 %vm260_vm2, %v5240_v47  ;;  %v5186_v52 = vshrl.u32 %v8217_v15, 16  ;;  %v5170_v47 = vrot.slane %v5168_v44, 5  ;;  %v5002_v14 = vrot.slane %v10740_v35, 5  ;;  %v5166_v32 = vrot.slane %v5165_v55, 4 }
 0x22d   : > { %v10909_v51 = vadd.f32 %v3807_v8, %v3623_v41  ;;  %v5023_v41 = vpack.c.b16 %v5017_v59, %v5016_v21  ;;  %v10939_v24 = vsel %vm8913_vm8, %v8203_v10, %v4998_v63  ;;  %v8270_v36 = vor.u32 %v8585_v28, %v8269_v37  ;;  %v8198_v21 = vld [vmem:[%s8847_s23 + $0xa0] sm:$0xe]  ;;  %v8218_v59 = vld [vmem:[%s8847_s23 + $0x44] sm:$0x3] }
 0x22e   : > { %v5174_v26 = vor.u32 %v5173_v49, %v5170_v47  ;;  %v5003_v29 = vsel %vm8913_vm8, %v8204_v62, %v5002_v14  ;;  %v5018_v44 = vunpack.c.l.b16 %v10939_v24  ;;  %v5195_v2 = vshrl.u32 %v10808_v13, 16 }
 0x22f   : > { %8250 = vmatmul.msk.bf16.vlgmr.msrb.gmra.mxu3 %vm260_vm2, %v8237_v5  ;;  %8279 = vmatmul.msk.bf16.vlgmr.msrb.gmra.mxu0 %vm260_vm2, %v8266_v58  ;;  %v4034_v8 = vpop.f32.mrf.mxu2  ;;  %v5189_v5 = vshll.u32 %v8217_v15, 16  ;;  %v8241_v15 = vor.u32 %v8581_v54, %v8240_v27  ;;  %v5019_v23 = vunpack.c.l.b16 %v5003_v29  ;;  %v5207_v61 = vshll.u32 %v8218_v59, 16 }
 0x230   : > { %v4054_v56 = vadd.f32 %v4034_v8, %v3932_v1  ;;  %v5010_v18 = vrot.slane %v10800_v43, 5  ;;  %v5197_v10 = vrot.slane %v5195_v2, 5  ;;  %v5218_v14 = vrot.slane %v5216_v39, 6  ;;  %v10984_v2 = vld [vmem:[%s8847_s23 + $0xf4] sm:$0xf0] }
 0x231   : > { %v3914_v12 = vpop.f32.mrf.mxu1  ;;  %v5191_v45 = vrot.slane %v5189_v5, 6  ;;  %v8206_v5 = vrot.slane %v8198_v21, 9  ;;  %v5024_v29 = vpack.c.b16 %v5019_v23, %v5018_v44  ;;  %v10990_v44 = vld [vmem:[%s8847_s23 + $0x14c] sm:$0xf0] }
 0x232   : > { %v4252_v48 = vpop.f32.mrf.mxu3  ;;  %v3933_v0 = vadd.f32 %v3914_v12, %v10766_v34  ;;  %v5188_v34 = vrot.slane %v5186_v52, 5  ;;  %v8197_v12 = vld [vmem:[%s8847_s23 + $0x98] sm:$0xe] }
 0x233   : > { %v4272_v6 = vadd.f32 %v4252_v48, %v4054_v56  ;;  %v5175_v56 = vsel %vm9105_vm11, %v5166_v32, %v5174_v26  ;;  %v5198_v48 = vshll.u32 %v10808_v13, 16  ;;  %v8205_v52 = vrot.slane %v8197_v12, 9  ;;  %v8244_v32 = vld [vmem:[%s8847_s23 + $0xe0] sm:$0xf] }
 0x234   : > { %v4337_v58 = vpop.f32.mrf.mxu0  ;;  %v5192_v31 = vor.u32 %v5191_v45, %v5188_v34  ;;  %v5236_v62 = vunpack.c.l.b16 %v5175_v56  ;;  %v5011_v37 = vsel %vm8913_vm8, %v8206_v5, %v5010_v18 }
 0x235   : > { %v10930_v1 = vadd.f32 %v4335_v25, %v4272_v6  ;;  %v5184_v25 = vrot.slane %v5183_v33, 4  ;;  %v5213_v6 = vshrl.u32 %v10812_v11, 16  ;;  %v5200_v13 = vrot.slane %v5198_v48, 6  ;;  %v10987_v48 = vld [vmem:[%s8847_s23 + $0x148] sm:$0xf] }
 0x236   : > { %v5209_v33 = vrot.slane %v5207_v61, 6  ;;  %v5007_v54 = vsel %vm8913_vm8, %v8205_v52, %v5006_v17  ;;  %v5021_v56 = vunpack.c.l.b16 %v5011_v37  ;;  %v8278_v5 = vor.u32 %v10990_v44, %v10987_v48  ;;  %v8306_v37 = vld [vmem:[%s8847_s23 + $0x120] sm:$0xf]  ;;  %v11122_v48 = vld [vmem:[%s8847_s23 + $0x12c] sm:$0x1] }
 0x237   : > { %v4036_v19 = vpop.f32.mrf.mxu2  ;;  %v5215_v34 = vrot.slane %v5213_v6, 5  ;;  %v5201_v43 = vor.u32 %v5200_v13, %v5197_v10  ;;  %v8284_v10 = vld [vmem:[%s8847_s23 + $0xc4] sm:$0x1]  ;;  %v8285_v13 = vld [vmem:[%s8847_s23 + $0xc8] sm:$0xf] }
 0x238   : > { %v4055_v38 = vadd.f32 %v4036_v19, %v3933_v0  ;;  %v5204_v0 = vshrl.u32 %v8218_v59, 16 }
 0x239   : > { %v3917_v7 = vpop.f32.mrf.mxu1  ;;  %v5202_v24 = vrot.slane %v5201_v43, 4  ;;  %v8304_v43 = vld [vmem:[%s8847_s23 + $0x118] sm:$0xf] }
 0x23a   : > { %v4254_v35 = vpop.f32.mrf.mxu3  ;;  %v3934_v50 = vadd.f32 %v3917_v7, %v10804_v3  ;;  %v5193_v3 = vsel %vm9105_vm11, %v5184_v25, %v5192_v31  ;;  %v5206_v49 = vrot.slane %v5204_v0, 5  ;;  %v8582_v25 = vld [vmem:[%s8847_s23 + $0xe4] sm:$0xf0] }
 0x23b   : > { %v4273_v8 = vadd.f32 %v4254_v35, %v4055_v38  ;;  %v5237_v27 = vunpack.c.l.b16 %v5193_v3  ;;  %v10977_v3 = vld [vmem:[%s8847_s23 + $0xf0] sm:$0xf]  ;;  %v8245_v17 = vor.u32 %v8582_v25, %v8244_v32 }
 0x23c   : > { %v4340_v9 = vpop.f32.mrf.mxu0  ;;  %8209 = vmatmul.msk.bf16.gmra.mxu1 %vm260_vm2, %v5023_v41  ;;  %8222 = vmatmul.msk.bf16.gmra.mxu2 %vm260_vm2, %v5241_v22  ;;  %v5210_v28 = vor.u32 %v5209_v33, %v5206_v49  ;;  %v5488_v33 = vshll.u32 %v8284_v10, 16 }
 0x23d   : > { %v10954_v60 = vadd.f32 %v4337_v58, %v4273_v8  ;;  %v8219_v58 = vld [vmem:[%s8847_s23 + $0x4c] sm:$0x3]  ;;  %v8273_v8 = vld [vmem:[%s8847_s23 + $0x138] sm:$0xf]  ;;  %v5242_v59 = vpack.c.b16 %v5237_v27, %v5236_v62 }
 0x23e   : > { %v5222_v19 = vshrl.u32 %v8219_v58, 16  ;;  %v5225_v41 = vshll.u32 %v8219_v58, 16  ;;  %v8283_v58 = vld [vmem:[%s8847_s23 + $0xc0] sm:$0xf] }
 0x23f   : > { %8251 = vmatmul.msk.bf16.gmra.mxu3 %vm260_vm2, %v8241_v15  ;;  %8280 = vmatmul.msk.bf16.gmra.mxu0 %vm260_vm2, %v8270_v36  ;;  %v4039_v63 = vpop.f32.mrf.mxu2  ;;  %v8586_v15 = vld [vmem:[%s8847_s23 + $0x13c] sm:$0xf0]  ;;  %v5020_v36 = vunpack.c.l.b16 %v5007_v54  ;;  %v5482_v49 = vshll.u32 %v8283_v58, 16 }
 0x240   : > { %v4056_v55 = vadd.f32 %v4039_v63, %v3934_v50  ;;  %v5224_v26 = vrot.slane %v5222_v19, 5  ;;  %v5227_v38 = vrot.slane %v5225_v41, 6  ;;  %v8274_v18 = vor.u32 %v8586_v15, %v8273_v8 }
 0x241   : > { %v3919_v47 = vpop.f32.mrf.mxu1  ;;  %v11000_v63 = vpack.c.b16 %v5021_v56, %v5020_v36  ;;  %v5484_v19 = vrot.slane %v5482_v49, 5  ;;  %v5490_v41 = vrot.slane %v5488_v33, 5  ;;  %v8388_v33 = vld [vmem:[%s12118_s1 + $0x54] sm:$0x3] }
 0x242   : > { %v4257_v45 = vpop.f32.mrf.mxu3  ;;  %v3935_v53 = vadd.f32 %v3919_v47, %v10820_v30  ;;  %v5219_v30 = vor.u32 %v5218_v14, %v5215_v34  ;;  %v5228_v35 = vor.u32 %v5227_v38, %v5224_v26  ;;  %v5479_v47 = vshrl.u32 %v8283_v58, 16  ;;  %v11018_v14 = vld [vmem:[%s8847_s23 + $0x11c] sm:$0x1] }
 0x243   : > { %v4274_v11 = vadd.f32 %v4257_v45, %v4056_v55  ;;  %v11012_v55 = vld [vmem:[%s8847_s23 + $0xcc] sm:$0x1]  ;;  %v5493_v34 = vshrl.u32 %v8285_v13, 16  ;;  %v5673_v26 = vshrl.u32 %v8304_v43, 16  ;;  %v5676_v38 = vshll.u32 %v8304_v43, 16 }
 0x244   : > { %v4342_v22 = vpop.f32.mrf.mxu0  ;;  %v5220_v31 = vrot.slane %v5219_v30, 4  ;;  %v5502_v62 = vshll.u32 %v11012_v55, 16  ;;  %v5481_v27 = vrot.slane %v5479_v47, 4  ;;  %v5876_v47 = vrot.slane %v8284_v10, 5 }
 0x245   : > { %v10970_v7 = vadd.f32 %v4340_v9, %v4274_v11  ;;  %v10981_v9 = vsel %vm9105_vm11, %v5202_v24, %v5210_v28  ;;  %v5495_v54 = vrot.slane %v5493_v34, 4  ;;  %v5675_v36 = vrot.slane %v5673_v26, 4 }
 0x246   : > { %v10995_v6 = vsel %vm9105_vm11, %v5220_v31, %v5228_v35  ;;  %v5238_v52 = vunpack.c.l.b16 %v10981_v9  ;;  %v5504_v24 = vrot.slane %v5502_v62, 5  ;;  %v5485_v25 = vor.u32 %v5484_v19, %v5481_v27  ;;  %v11026_v31 = vld [vmem:[%s8847_s23 + $0x124] sm:$0x1] }
 0x247   : > { %v4041_v50 = vpop.f32.mrf.mxu2  ;;  %v5239_v45 = vunpack.c.l.b16 %v10995_v6  ;;  %v5682_v35 = vshll.u32 %v11018_v14, 16  ;;  %v5678_v56 = vrot.slane %v5676_v38, 5  ;;  %v5690_v6 = vshll.u32 %v8306_v37, 16  ;;  %v8347_v38 = vld [vmem:[%s8847_s23 + $0x120] sm:$0xe] }
 0x248   : > { %v4057_v12 = vadd.f32 %v4041_v50, %v3935_v53  ;;  %v5496_v53 = vshll.u32 %v8285_v13, 16  ;;  %v5687_v50 = vshrl.u32 %v8306_v37, 16  ;;  %v5486_v9 = vrot.slane %v5485_v25, 4 }
 0x249   : > { %v3922_v21 = vpop.f32.mrf.mxu1  ;;  %v5692_v43 = vrot.slane %v5690_v6, 5  ;;  %v5243_v27 = vpack.c.b16 %v5239_v45, %v5238_v52 }
 0x24a   : > { %v4259_v23 = vpop.f32.mrf.mxu3  ;;  %v3936_v0 = vadd.f32 %v3922_v21, %v10865_v42  ;;  %v8249_v42 = vor.u32 %v10984_v2, %v10977_v3  ;;  %v5498_v30 = vrot.slane %v5496_v53, 5  ;;  %v11034_v21 = vld [vmem:[%s8847_s23 + $0xc8] sm:$0xe]  ;;  %v5491_v58 = vsel %vm8895_vm6, %v5486_v9, %v5490_v41 }
 0x24b   : > { %v4275_v61 = vadd.f32 %v4259_v23, %v4057_v12  ;;  %v11031_v12 = vld [vmem:[%s8847_s23 + $0xc0] sm:$0xe]  ;;  %v5684_v23 = vrot.slane %v5682_v35, 5  ;;  %v8334_v49 = vrot.slane %v11034_v21, 9  ;;  %v11050_v53 = vunpack.c.l.b16 %v5491_v58  ;;  %v8375_v35 = vld [vmem:[%s12118_s1 + $0x52] sm:$0x3] }
 0x24c   : > { %v10997_v39 = vpop.f32.mrf.mxu0  ;;  %8210 = vmatmul.msk.bf16.gmra.mxu1 %vm260_vm2, %v5024_v29  ;;  %8223 = vmatmul.msk.bf16.gmra.mxu2 %vm260_vm2, %v5242_v59  ;;  %v5499_v15 = vor.u32 %v5498_v30, %v5495_v54  ;;  %v8333_v13 = vrot.slane %v11031_v12, 9  ;;  %v5880_v41 = vrot.slane %v11012_v55, 5  ;;  %v8346_v54 = vld [vmem:[%s8847_s23 + $0x118] sm:$0xe]  ;;  %v8417_v55 = vld [vmem:[%s12118_s1 + $0x56] sm:$0x3]  ;;  %v6273_v58 = vand.u32 %v8375_v35, %v8825_v4 }
 0x24d   : > { %v11020_v11 = vadd.f32 %v4342_v22, %v4275_v61 }
 0x24e   : > { %v5877_v10 = vsel %vm8913_vm8, %v8333_v13, %v5876_v47  ;;  %v5881_v45 = vsel %vm8913_vm8, %v8334_v49, %v5880_v41  ;;  %v8287_v13 = vld [vmem:[%s8847_s23 + $0xd0] sm:$0xf]  ;;  %v8289_v47 = vld [vmem:[%s8847_s23 + $0xd8] sm:$0xf]  ;;  %6282 = vmatpush.bf16.msrb.mxu1 %v6273_v58 }
 0x24f   : > { %8252 = vmatmul.msk.bf16.gmra.mxu3 %vm260_vm2, %v8245_v17  ;;  %8281 = vmatmul.msk.bf16.gmra.mxu0 %vm260_vm2, %v8274_v18  ;;  %v4044_v28 = vpop.f32.mrf.mxu2  ;;  %v5500_v17 = vrot.slane %v5499_v15, 4  ;;  %v5679_v18 = vor.u32 %v5678_v56, %v5675_v36  ;;  %v5908_v25 = vunpack.c.l.b16 %v5877_v10  ;;  %v5909_v15 = vunpack.c.l.b16 %v5881_v45  ;;  %v8454_v56 = vld [vmem:[%s12118_s1 + $0x58] sm:$0x3]  ;;  %v8310_v45 = vld [vmem:[%s8847_s23 + $0x130] sm:$0xf] }
 0x250   : > { %v4058_v32 = vadd.f32 %v4044_v28, %v3936_v0  ;;  %v5689_v0 = vrot.slane %v5687_v50, 4  ;;  %v8354_v36 = vrot.slane %v8346_v54, 9  ;;  %v5510_v10 = vshll.u32 %v8287_v13, 16 }
 0x251   : > { %v3924_v22 = vpop.f32.mrf.mxu1  ;;  %v5505_v34 = vsel %vm8895_vm6, %v5500_v17, %v5504_v24  ;;  %v5680_v62 = vrot.slane %v5679_v18, 4  ;;  %v6356_v24 = vand.u32 %v8388_v33, %v8825_v4  ;;  %v6002_v17 = vrot.slane %v11026_v31, 5 }
 0x252   : > { %v4262_v29 = vpop.f32.mrf.mxu3  ;;  %v3937_v8 = vadd.f32 %v3924_v22, %v10876_v20  ;;  %v5696_v20 = vshll.u32 %v11026_v31, 16  ;;  %v11052_v19 = vunpack.c.l.b16 %v5505_v34  ;;  %v5693_v30 = vor.u32 %v5692_v43, %v5689_v0  ;;  %v11104_v34 = vld [vmem:[%s8847_s23 + $0xdc] sm:$0x1] }
 0x253   : > { %v11036_v59 = vadd.f32 %v4262_v29, %v4058_v32  ;;  %v5685_v28 = vsel %vm8895_vm6, %v5680_v62, %v5684_v23  ;;  %6365 = vmatpush.bf16.msrb.mxu2 %v6356_v24  ;;  %v5998_v23 = vrot.slane %v11018_v14, 5  ;;  %v8355_v0 = vrot.slane %v8347_v38, 9  ;;  %v11092_v14 = vld [vmem:[%s8847_s23 + $0xd4] sm:$0x1] }
 0x254   : > { %v11038_v61 = vpop.f32.mrf.mxu0  ;;  %v5698_v26 = vrot.slane %v5696_v20, 5  ;;  %v5600_v52 = vpack.c.b16 %v11052_v19, %v11050_v53  ;;  %v11086_v6 = vunpack.c.l.b16 %v5685_v28  ;;  %v6439_v20 = vand.u32 %v8417_v55, %v8825_v4 }
 0x255   : > { %v6003_v49 = vsel %vm8913_vm8, %v8355_v0, %v6002_v17  ;;  %v6633_v33 = vand.u32 %v8454_v56, %v8825_v4  ;;  %v11106_v62 = vpack.c.b16 %v5909_v15, %v5908_v25  ;;  %v5516_v54 = vshll.u32 %v11092_v14, 16  ;;  %v11133_v0 = vld [vmem:[%s8847_s23 + $0xd0] sm:$0xe] }
 0x256   : > { %6448 = vmatpush.bf16.msrb.mxu3 %v6439_v20  ;;  %v6031_v41 = vunpack.c.l.b16 %v6003_v49  ;;  %v5524_v28 = vshll.u32 %v8289_v47, 16  ;;  %v5512_v2 = vrot.slane %v5510_v10, 5  ;;  %v5718_v58 = vshll.u32 %v8310_v45, 16 }
 0x257   : > { %v4046_v37 = vpop.f32.mrf.mxu2  ;;  %6642 = vmatpush.bf16.msrb.mxu0 %v6633_v33  ;;  %v5518_v38 = vrot.slane %v5516_v54, 5  ;;  %v11139_v33 = vld [vmem:[%s8847_s23 + $0xd8] sm:$0xe] }
 0x258   : > { %v4059_v32 = vadd.f32 %v4046_v37, %v3937_v8  ;;  %v5694_v8 = vrot.slane %v5693_v30, 4  ;;  %v5521_v37 = vshrl.u32 %v8289_v47, 16  ;;  %v8308_v30 = vld [vmem:[%s8847_s23 + $0x128] sm:$0xf]  ;;  %v5720_v54 = vrot.slane %v5718_v58, 5 }
 0x259   : > { %v3927_v22 = vpop.f32.mrf.mxu1  ;;  %v5701_v15 = vshrl.u32 %v8308_v30, 16 }
 0x25a   : > { %v4264_v50 = vpop.f32.mrf.mxu3  ;;  %v3938_v29 = vadd.f32 %v3927_v22, %v10899_v40  ;;  %v5699_v18 = vsel %vm8895_vm6, %v5694_v8, %v5698_v26  ;;  %v5526_v22 = vrot.slane %v5524_v28, 5  ;;  %v11127_v8 = vld [vmem:[%s8847_s23 + $0x134] sm:$0x1] }
 0x25b   : > { %v11076_v9 = vadd.f32 %v4264_v50, %v4059_v32  ;;  %v11096_v31 = vunpack.c.l.b16 %v5699_v18  ;;  %v5523_v32 = vrot.slane %v5521_v37, 4  ;;  %v5703_v20 = vrot.slane %v5701_v15, 4 }
 0x25c   : > { %v11080_v40 = vpop.f32.mrf.mxu0  ;;  %8211 = vmatmul.msk.bf16.gmra.mxu1 %vm260_vm2, %v11000_v63  ;;  %8224 = vmatmul.msk.bf16.gmra.mxu2 %vm260_vm2, %v5243_v27  ;;  %v5999_v63 = vsel %vm8913_vm8, %v8354_v36, %v5998_v23  ;;  %v5507_v27 = vshrl.u32 %v8287_v13, 16  ;;  %v5704_v23 = vshll.u32 %v8308_v30, 16  ;;  %v5724_v49 = vshll.u32 %v11127_v8, 16 }
 0x25d   : > { %v6030_v43 = vunpack.c.l.b16 %v5999_v63  ;;  %v5794_v24 = vpack.c.b16 %v11096_v31, %v11086_v6  ;;  %v5527_v56 = vor.u32 %v5526_v22, %v5523_v32  ;;  %v8335_v37 = vrot.slane %v11133_v0, 9  ;;  %v11198_v6 = vld [vmem:[%s8847_s23 + $0xec] sm:$0x1] }
 0x25e   : > { %v5509_v3 = vrot.slane %v5507_v27, 4  ;;  %v5706_v63 = vrot.slane %v5704_v23, 5  ;;  %v8349_v23 = vld [vmem:[%s8847_s23 + $0x130] sm:$0xe] }
 0x25f   : > { %8253 = vmatmul.msk.bf16.gmra.mxu3 %vm260_vm2, %v8249_v42  ;;  %8282 = vmatmul.msk.bf16.gmra.mxu0 %vm260_vm2, %v8278_v5  ;;  %v4049_v26 = vpop.f32.mrf.mxu2  ;;  %v5530_v42 = vshll.u32 %v11104_v34, 16  ;;  %v6038_v13 = vpack.c.b16 %v6031_v41, %v6030_v43  ;;  %v5528_v47 = vrot.slane %v5527_v56, 4  ;;  %v8348_v41 = vld [vmem:[%s8847_s23 + $0x128] sm:$0xe]  ;;  %v8357_v19 = vrot.slane %v8349_v23, 9 }
 0x260   : > { %v4060_v44 = vadd.f32 %v4049_v26, %v3938_v29  ;;  %v5513_v35 = vor.u32 %v5512_v2, %v5509_v3  ;;  %v5710_v29 = vshll.u32 %v11122_v48, 16  ;;  %v5707_v26 = vor.u32 %v5706_v63, %v5703_v20  ;;  %v8291_v63 = vld [vmem:[%s8847_s23 + $0xe0] sm:$0xf]  ;;  %v11222_v23 = vld [vmem:[%s8847_s23 + $0x144] sm:$0x1] }
 0x261   : > { %v3929_v5 = vpop.f32.mrf.mxu1  ;;  %v5532_v50 = vrot.slane %v5530_v42, 5  ;;  %v5726_v42 = vrot.slane %v5724_v49, 5  ;;  %v11177_v49 = vld [vmem:[%s8847_s23 + $0xe4] sm:$0x1]  ;;  %v5535_v31 = vshrl.u32 %v8291_v63, 16 }
 0x262   : > { %v4267_v25 = vpop.f32.mrf.mxu3  ;;  %v3939_v55 = vadd.f32 %v3929_v5, %v10909_v51  ;;  %v5514_v18 = vrot.slane %v5513_v35, 4  ;;  %v5715_v51 = vshrl.u32 %v8310_v45, 16  ;;  %v5712_v43 = vrot.slane %v5710_v29, 5 }
 0x263   : > { %v11129_v36 = vadd.f32 %v4267_v25, %v4060_v44  ;;  %v5533_v28 = vsel %vm8895_vm6, %v5528_v47, %v5532_v50  ;;  %v5884_v44 = vrot.slane %v11092_v14, 5  ;;  %v8336_v5 = vrot.slane %v11139_v33, 9 }
 0x264   : > { %v11135_v17 = vpop.f32.mrf.mxu0  ;;  %v5519_v27 = vsel %vm8895_vm6, %v5514_v18, %v5518_v38  ;;  %v5717_v10 = vrot.slane %v5715_v51, 4  ;;  %v11151_v22 = vunpack.c.l.b16 %v5533_v28  ;;  %v5708_v45 = vrot.slane %v5707_v26, 4 }
 0x265   : > { %v11146_v30 = vunpack.c.l.b16 %v5519_v27  ;;  %v5888_v25 = vrot.slane %v11104_v34, 5  ;;  %v5885_v56 = vsel %vm8913_vm8, %v8335_v37, %v5884_v44  ;;  %v8356_v14 = vrot.slane %v8348_v41, 9  ;;  %v8312_v41 = vld [vmem:[%s8847_s23 + $0x138] sm:$0xf] }
 0x266   : > { %v5721_v2 = vor.u32 %v5720_v54, %v5717_v10  ;;  %v5910_v18 = vunpack.c.l.b16 %v5885_v56  ;;  %v6006_v47 = vrot.slane %v11122_v48, 5  ;;  %v11188_v27 = vadd.f32 %v10997_v39, %v11036_v59  ;;  %v8293_v10 = vld [vmem:[%s8847_s23 + $0xe8] sm:$0xf] }
 0x267   : > { %v4051_v3 = vpop.f32.mrf.mxu2  ;;  %v5889_v34 = vsel %vm8913_vm8, %v8336_v5, %v5888_v25  ;;  %v5601_v48 = vpack.c.b16 %v11151_v22, %v11146_v30  ;;  %v5544_v37 = vshll.u32 %v11177_v49, 16  ;;  %v5552_v44 = vshll.u32 %v8293_v10, 16 }
 0x268   : > { %v4061_v38 = vadd.f32 %v4051_v3, %v3939_v55  ;;  %v5722_v15 = vrot.slane %v5721_v2, 4  ;;  %v5713_v55 = vsel %vm8895_vm6, %v5708_v45, %v5712_v43  ;;  %v5911_v58 = vunpack.c.l.b16 %v5889_v34 }
 0x269   : > { %v4418_v32 = vpop.f32.mrf.mxu1  ;;  %v11172_v51 = vunpack.c.l.b16 %v5713_v55  ;;  %v11195_v54 = vsel %vm8913_vm8, %v8356_v14, %v6006_v47  ;;  %v5537_v43 = vrot.slane %v5535_v31, 4  ;;  %v5558_v5 = vshll.u32 %v11198_v6, 16  ;;  %v11234_v31 = vld [vmem:[%s8847_s23 + $0xe8] sm:$0xe] }
 0x26a   : > { %v4269_v35 = vpop.f32.mrf.mxu3  ;;  %v4438_v50 = vadd.f32 %v4418_v32, %v10930_v1  ;;  %v5727_v1 = vsel %vm8895_vm6, %v5722_v15, %v5726_v42  ;;  %v11205_v59 = vpack.c.b16 %v5911_v58, %v5910_v18  ;;  %v6032_v26 = vunpack.c.l.b16 %v11195_v54  ;;  %v8314_v32 = vld [vmem:[%s8847_s23 + $0x140] sm:$0xf] }
 0x26b   : > { %v11158_v29 = vadd.f32 %v4269_v35, %v4061_v38  ;;  %v11183_v53 = vunpack.c.l.b16 %v5727_v1  ;;  %v11217_v38 = vld [vmem:[%s8847_s23 + $0x13c] sm:$0x1]  ;;  %v5546_v15 = vrot.slane %v5544_v37, 5  ;;  %v5554_v14 = vrot.slane %v5552_v44, 5 }
 0x26c   : > { %v11164_v20 = vpop.f32.mrf.mxu0  ;;  %8300 = vmatmul.msk.bf16.vlgmr.msra.gmra.mxu1 %vm260_vm2, %v5600_v52  ;;  %8321 = vmatmul.msk.bf16.vlgmr.msra.gmra.mxu2 %vm260_vm2, %v5794_v24  ;;  %v6010_v52 = vrot.slane %v11127_v8, 5  ;;  %v5538_v24 = vshll.u32 %v8291_v63, 16  ;;  %v5560_v55 = vrot.slane %v5558_v5, 5  ;;  %v5729_v34 = vshrl.u32 %v8312_v41, 16 }
 0x26d   : > { %v5795_v39 = vpack.c.b16 %v11183_v53, %v11172_v51  ;;  %v5732_v58 = vshll.u32 %v8312_v41, 16  ;;  %v5738_v47 = vshll.u32 %v11217_v38, 16  ;;  %v5743_v63 = vshrl.u32 %v8314_v32, 16 }
 0x26e   : > { %v11209_v8 = vsel %vm8913_vm8, %v8357_v19, %v6010_v52  ;;  %v11230_v19 = vld [vmem:[%s8847_s23 + $0xe0] sm:$0xe]  ;;  %v5731_v52 = vrot.slane %v5729_v34, 4  ;;  %v5752_v54 = vshll.u32 %v11222_v23, 16  ;;  %v5892_v5 = vrot.slane %v11177_v49, 5 }
 0x26f   : > { %8342 = vmatmul.msk.bf16.vlgmr.msra.gmra.mxu3 %vm260_vm2, %v11106_v62  ;;  %8363 = vmatmul.msk.bf16.vlgmr.msra.gmra.mxu0 %vm260_vm2, %v6038_v13  ;;  %v4612_v28 = vpop.f32.mrf.mxu2  ;;  %v5540_v62 = vrot.slane %v5538_v24, 5  ;;  %v5549_v13 = vshrl.u32 %v8293_v10, 16  ;;  %v6033_v42 = vunpack.c.l.b16 %v11209_v8  ;;  %v5746_v10 = vshll.u32 %v8314_v32, 16  ;;  %v8350_v34 = vld [vmem:[%s8847_s23 + $0x138] sm:$0xe] }
 0x270   : > { %v4632_v3 = vadd.f32 %v4612_v28, %v4438_v50  ;;  %v5734_v8 = vrot.slane %v5732_v58, 5  ;;  %v5740_v37 = vrot.slane %v5738_v47, 5  ;;  %v5745_v28 = vrot.slane %v5743_v63, 4 }
 0x271   : > { %v4420_v2 = vpop.f32.mrf.mxu1  ;;  %v5541_v35 = vor.u32 %v5540_v62, %v5537_v43  ;;  %v5551_v56 = vrot.slane %v5549_v13, 4  ;;  %v5748_v13 = vrot.slane %v5746_v10, 5  ;;  %v5754_v41 = vrot.slane %v5752_v54, 5 }
 0x272   : > { %v4806_v45 = vpop.f32.mrf.mxu3  ;;  %v4439_v25 = vadd.f32 %v4420_v2, %v10954_v60  ;;  %v5735_v2 = vor.u32 %v5734_v8, %v5731_v52  ;;  %v8337_v44 = vrot.slane %v11230_v19, 9  ;;  %v8338_v32 = vrot.slane %v11234_v31, 9 }
 0x273   : > { %v11224_v50 = vadd.f32 %v4806_v45, %v4632_v3  ;;  %v5542_v1 = vrot.slane %v5541_v35, 4  ;;  %v5555_v60 = vor.u32 %v5554_v14, %v5551_v56  ;;  %v5749_v56 = vor.u32 %v5748_v13, %v5745_v28  ;;  %v8295_v28 = vld [vmem:[%s8847_s23 + $0xf0] sm:$0xf]  ;;  %v8297_v13 = vld [vmem:[%s8847_s23 + $0xf8] sm:$0xf] }
 0x274   : > { %v11226_v18 = vpop.f32.mrf.mxu0  ;;  %v5896_v14 = vrot.slane %v11198_v6, 5  ;;  %v5736_v63 = vrot.slane %v5735_v2, 4  ;;  %v5893_v49 = vsel %vm8913_vm8, %v8337_v44, %v5892_v5  ;;  %v6039_v52 = vpack.c.b16 %v6033_v42, %v6032_v26  ;;  %v11304_v2 = vld [vmem:[%s8847_s23 + $0xfc] sm:$0x1] }
 0x275   : > { %v5547_v24 = vsel %vm8895_vm6, %v5542_v1, %v5546_v15  ;;  %v5556_v43 = vrot.slane %v5555_v60, 4  ;;  %v8351_v60 = vld [vmem:[%s8847_s23 + $0x140] sm:$0xe]  ;;  %v5912_v54 = vunpack.c.l.b16 %v5893_v49  ;;  %v8358_v8 = vrot.slane %v8350_v34, 9  ;;  %v8318_v49 = vld [vmem:[%s8847_s23 + $0x150] sm:$0xf] }
 0x276   : > { %v11238_v62 = vunpack.c.l.b16 %v5547_v24  ;;  %v5897_v6 = vsel %vm8913_vm8, %v8338_v32, %v5896_v14  ;;  %v6014_v30 = vrot.slane %v11217_v38, 5  ;;  %v8359_v22 = vrot.slane %v8351_v60, 9 }
 0x277   : > { %v4614_v3 = vpop.f32.mrf.mxu2  ;;  %v5561_v15 = vsel %vm8895_vm6, %v5556_v43, %v5560_v55  ;;  %v5750_v55 = vrot.slane %v5749_v56, 4  ;;  %v5913_v24 = vunpack.c.l.b16 %v5897_v6  ;;  %v6018_v51 = vrot.slane %v11222_v23, 5 }
 0x278   : > { %v4633_v45 = vadd.f32 %v4614_v3, %v4439_v25  ;;  %v11248_v47 = vunpack.c.l.b16 %v5561_v15  ;;  %v11285_v53 = vadd.f32 %v11038_v61, %v11076_v9  ;;  %v11294_v38 = vadd.f32 %v11080_v40, %v11129_v36 }
 0x279   : > { %v4423_v35 = vpop.f32.mrf.mxu1  ;;  %v5755_v26 = vsel %vm8895_vm6, %v5750_v55, %v5754_v41  ;;  %v5563_v41 = vshrl.u32 %v8295_v28, 16  ;;  %v5566_v23 = vshll.u32 %v8295_v28, 16  ;;  %v11299_v9 = vpack.c.b16 %v5913_v24, %v5912_v54  ;;  %v11319_v24 = vld [vmem:[%s8847_s23 + $0x154] sm:$0x1] }
 0x27a   : > { %v4808_v1 = vpop.f32.mrf.mxu3  ;;  %v4440_v58 = vadd.f32 %v4423_v35, %v10970_v7  ;;  %v5741_v7 = vsel %vm8895_vm6, %v5736_v63, %v5740_v37  ;;  %v5602_v37 = vpack.c.b16 %v11248_v47, %v11238_v62  ;;  %v11280_v43 = vunpack.c.l.b16 %v5755_v26  ;;  %v8316_v35 = vld [vmem:[%s8847_s23 + $0x148] sm:$0xf]  ;;  %v11310_v63 = vld [vmem:[%s8847_s23 + $0x14c] sm:$0x1] }
 0x27b   : > { %v11253_v25 = vadd.f32 %v4808_v1, %v4633_v45  ;;  %v11272_v42 = vunpack.c.l.b16 %v5741_v7  ;;  %v5565_v32 = vrot.slane %v5563_v41, 4  ;;  %v5568_v45 = vrot.slane %v5566_v23, 5  ;;  %v11323_v23 = vld [vmem:[%s8847_s23 + $0xf0] sm:$0xe] }
 0x27c   : > { %v11257_v10 = vpop.f32.mrf.mxu0  ;;  %8301 = vmatmul.msk.bf16.gmra.mxu1 %vm260_vm2, %v5601_v48  ;;  %8322 = vmatmul.msk.bf16.gmra.mxu2 %vm260_vm2, %v5795_v39  ;;  %v11276_v48 = vld [vmem:[%s8847_s23 + $0xf4] sm:$0x1]  ;;  %v6015_v39 = vsel %vm8913_vm8, %v8358_v8, %v6014_v30  ;;  %v5577_v34 = vshrl.u32 %v8297_v13, 16  ;;  %v5580_v1 = vshll.u32 %v8297_v13, 16  ;;  %v5760_v8 = vshll.u32 %v8316_v35, 16 }
 0x27d   : > { %v5796_v61 = vpack.c.b16 %v11280_v43, %v11272_v42  ;;  %v5572_v44 = vshll.u32 %v11276_v48, 16  ;;  %v6034_v5 = vunpack.c.l.b16 %v6015_v39  ;;  %v5766_v30 = vshll.u32 %v11310_v63, 16 }
 0x27e   : > { %v5579_v7 = vrot.slane %v5577_v34, 4  ;;  %v5582_v54 = vrot.slane %v5580_v1, 5  ;;  %v5762_v13 = vrot.slane %v5760_v8, 5  ;;  %v5774_v41 = vshll.u32 %v8318_v49, 16  ;;  %v11329_v34 = vld [vmem:[%s8847_s23 + $0xf8] sm:$0xe] }
 0x27f   : > { %8343 = vmatmul.msk.bf16.gmra.mxu3 %vm260_vm2, %v11205_v59  ;;  %8364 = vmatmul.msk.bf16.gmra.mxu0 %vm260_vm2, %v6039_v52  ;;  %v4617_v3 = vpop.f32.mrf.mxu2  ;;  %v6019_v59 = vsel %vm8913_vm8, %v8359_v22, %v6018_v51  ;;  %v5569_v52 = vor.u32 %v5568_v45, %v5565_v32  ;;  %v5574_v55 = vrot.slane %v5572_v44, 5  ;;  %v5771_v22 = vshrl.u32 %v8318_v49, 16  ;;  %v8352_v8 = vld [vmem:[%s8847_s23 + $0x148] sm:$0xe] }
 0x280   : > { %v4634_v40 = vadd.f32 %v4617_v3, %v4440_v58  ;;  %v6035_v14 = vunpack.c.l.b16 %v6019_v59  ;;  %v5586_v58 = vshll.u32 %v11304_v2, 16  ;;  %v5583_v51 = vor.u32 %v5582_v54, %v5579_v7 }
 0x281   : > { %v4425_v36 = vpop.f32.mrf.mxu1  ;;  %v5570_v28 = vrot.slane %v5569_v52, 4  ;;  %v5773_v44 = vrot.slane %v5771_v22, 4  ;;  %v8340_v22 = vrot.slane %v11329_v34, 9  ;;  %v6022_v62 = vrot.slane %v11310_v63, 5  ;;  %v8367_v63 = vld [vmem:[%s8847_s23 + $0xc4] sm:$0x3] }
 0x282   : > { %v4811_v15 = vpop.f32.mrf.mxu3  ;;  %v4441_v56 = vadd.f32 %v4425_v36, %v11020_v11  ;;  %v5757_v11 = vshrl.u32 %v8316_v35, 16  ;;  %v5588_v26 = vrot.slane %v5586_v58, 5  ;;  %v6040_v3 = vpack.c.b16 %v6035_v14, %v6034_v5 }
 0x283   : > { %v11313_v60 = vadd.f32 %v4811_v15, %v4634_v40  ;;  %v5575_v59 = vsel %vm8895_vm6, %v5570_v28, %v5574_v55  ;;  %v5780_v40 = vshll.u32 %v11319_v24, 16  ;;  %v5584_v32 = vrot.slane %v5583_v51, 4  ;;  %v8353_v51 = vld [vmem:[%s8847_s23 + $0x150] sm:$0xe] }
 0x284   : > { %v11316_v6 = vpop.f32.mrf.mxu0  ;;  %v5759_v39 = vrot.slane %v5757_v11, 4  ;;  %v5768_v35 = vrot.slane %v5766_v30, 5  ;;  %v5776_v15 = vrot.slane %v5774_v41, 5  ;;  %v8339_v5 = vrot.slane %v11323_v23, 9 }
 0x285   : > { %v5782_v52 = vrot.slane %v5780_v40, 5  ;;  %v5900_v14 = vrot.slane %v11276_v48, 5  ;;  %v5589_v7 = vsel %vm8895_vm6, %v5584_v32, %v5588_v26  ;;  %v11339_v30 = vunpack.c.l.b16 %v5575_v59 }
 0x286   : > { %v5763_v45 = vor.u32 %v5762_v13, %v5759_v39  ;;  %v5777_v11 = vor.u32 %v5776_v15, %v5773_v44  ;;  %v5904_v26 = vrot.slane %v11304_v2, 5  ;;  %v8360_v41 = vrot.slane %v8352_v8, 9  ;;  %v8438_v8 = vld [vmem:[%s8847_s23 + $0x18] sm:$0xf] }
 0x287   : > { %v4619_v36 = vpop.f32.mrf.mxu2  ;;  %v11353_v48 = vsel %vm8913_vm8, %v8339_v5, %v5900_v14  ;;  %v8361_v59 = vrot.slane %v8353_v51, 9  ;;  %v6026_v2 = vrot.slane %v11319_v24, 5  ;;  %v6115_v14 = vshll.u32 %v8367_v63, 16 }
 0x288   : > { %v4635_v1 = vadd.f32 %v4619_v36, %v4441_v56  ;;  %v5764_v54 = vrot.slane %v5763_v45, 4  ;;  %v11341_v56 = vunpack.c.l.b16 %v5589_v7  ;;  %v5914_v43 = vunpack.c.l.b16 %v11353_v48 }
 0x289   : > { %v4428_v49 = vpop.f32.mrf.mxu1  ;;  %v6023_v24 = vsel %vm8913_vm8, %v8360_v41, %v6022_v62  ;;  %v6117_v51 = vrot.slane %v6115_v14, 6 }
 0x28a   : > { %v4813_v55 = vpop.f32.mrf.mxu3  ;;  %v4442_v58 = vadd.f32 %v4428_v49, %v11188_v27  ;;  %v5778_v27 = vrot.slane %v5777_v11, 4  ;;  %v5769_v13 = vsel %vm8895_vm6, %v5764_v54, %v5768_v35  ;;  %v5603_v42 = vpack.c.b16 %v11341_v56, %v11339_v30  ;;  %v8368_v35 = vld [vmem:[%s8847_s23 + $0xcc] sm:$0x3]  ;;  %v8369_v56 = vld [vmem:[%s8847_s23 + $0xd4] sm:$0x3] }
 0x28b   : > { %v11337_v28 = vadd.f32 %v4813_v55, %v4635_v1  ;;  %v11381_v40 = vunpack.c.l.b16 %v5769_v13  ;;  %v6036_v5 = vunpack.c.l.b16 %v6023_v24  ;;  %v6121_v55 = vshrl.u32 %v11034_v21, 16 }
 0x28c   : > { %v11345_v39 = vpop.f32.mrf.mxu0  ;;  %8302 = vmatmul.msk.bf16.gmra.mxu1 %vm260_vm2, %v5602_v37  ;;  %8323 = vmatmul.msk.bf16.gmra.mxu2 %vm260_vm2, %v5796_v61  ;;  %v5783_v47 = vsel %vm8895_vm6, %v5778_v27, %v5782_v52  ;;  %v11367_v37 = vsel %vm8913_vm8, %v8340_v22, %v5904_v26  ;;  %v11378_v61 = vadd.f32 %v11135_v17, %v11158_v29  ;;  %v6124_v11 = vshll.u32 %v11034_v21, 16  ;;  %v11411_v26 = vld [vmem:[%s8847_s23 + $0x1c] sm:$0x1] }
 0x28d   : > { %v11390_v45 = vunpack.c.l.b16 %v5783_v47  ;;  %v5915_v17 = vunpack.c.l.b16 %v11367_v37  ;;  %v6027_v29 = vsel %vm8913_vm8, %v8361_v59, %v6026_v2  ;;  %v6123_v27 = vrot.slane %v6121_v55, 5  ;;  %v8440_v37 = vld [vmem:[%s8847_s23 + $0x20] sm:$0xf] }
 0x28e   : > { %v6133_v48 = vshll.u32 %v8368_v35, 16  ;;  %v6037_v13 = vunpack.c.l.b16 %v6027_v29  ;;  %v6126_v62 = vrot.slane %v6124_v11, 6  ;;  %v11417_v29 = vld [vmem:[%s8847_s23 + $0x24] sm:$0x1]  ;;  %v11451_v30 = vadd.f32 %v11226_v18, %v11253_v25 }
 0x28f   : > { %8344 = vmatmul.msk.bf16.gmra.mxu3 %vm260_vm2, %v11299_v9  ;;  %8365 = vmatmul.msk.bf16.gmra.mxu0 %vm260_vm2, %v6040_v3  ;;  %v4622_v44 = vpop.f32.mrf.mxu2  ;;  %v11387_v9 = vadd.f32 %v11164_v20, %v11224_v50  ;;  %v6103_v3 = vshrl.u32 %v11031_v12, 16  ;;  %v6106_v20 = vshll.u32 %v11031_v12, 16  ;;  %v6112_v50 = vshrl.u32 %v8367_v63, 16 }
 0x290   : > { %v4636_v36 = vadd.f32 %v4622_v44, %v4442_v58  ;;  %v8496_v58 = vld [vmem:[%s12118_s1 + $0x5c] sm:$0x3]  ;;  %v6130_v12 = vshrl.u32 %v8368_v35, 16  ;;  %v5797_v22 = vpack.c.b16 %v11390_v45, %v11381_v40  ;;  %v6135_v2 = vrot.slane %v6133_v48, 6 }
 0x291   : > { %v4430_v32 = vpop.f32.mrf.mxu1  ;;  %v6105_v49 = vrot.slane %v6103_v3, 5  ;;  %v6108_v54 = vrot.slane %v6106_v20, 6  ;;  %v6949_v21 = vand.u32 %v8496_v58, %v8825_v4  ;;  %v6495_v63 = vshrl.u32 %v8438_v8, 16 }
 0x292   : > { %v4816_v15 = vpop.f32.mrf.mxu3  ;;  %v4443_v1 = vadd.f32 %v4430_v32, %v11285_v53  ;;  %v6114_v53 = vrot.slane %v6112_v50, 5  ;;  %v6132_v47 = vrot.slane %v6130_v12, 5  ;;  %v6127_v3 = vor.u32 %v6126_v62, %v6123_v27 }
 0x293   : > { %v11398_v52 = vadd.f32 %v4816_v15, %v4636_v36  ;;  %v6109_v41 = vor.u32 %v6108_v54, %v6105_v49  ;;  %v6498_v40 = vshll.u32 %v8438_v8, 16  ;;  %v6504_v36 = vshll.u32 %v11411_v26, 16  ;;  %6958 = vmatpush.bf16.msra.mxu2 %v6949_v21  ;;  %v8517_v54 = vld [vmem:[%s12118_s1 + $0x5e] sm:$0x3] }
 0x294   : > { %v11404_v7 = vpop.f32.mrf.mxu0  ;;  %v6118_v59 = vor.u32 %v6117_v51, %v6114_v53  ;;  %v6136_v35 = vor.u32 %v6135_v2, %v6132_v47  ;;  %v6497_v15 = vrot.slane %v6495_v63, 4  ;;  %v6509_v49 = vshrl.u32 %v8440_v37, 16 }
 0x295   : > { %v6110_v24 = vrot.slane %v6109_v41, 4  ;;  %v5919_v14 = vpack.c.b16 %v5915_v17, %v5914_v43  ;;  %v6128_v55 = vrot.slane %v6127_v3, 4  ;;  %v6500_v58 = vrot.slane %v6498_v40, 5  ;;  %v8530_v43 = vld [vmem:[%s12118_s1 + $0x60] sm:$0x3] }
 0x296   : > { %v6041_v11 = vpack.c.b16 %v6037_v13, %v6036_v5  ;;  %v6512_v51 = vshll.u32 %v8440_v37, 16  ;;  %v6518_v27 = vshll.u32 %v11417_v29, 16  ;;  %v6506_v48 = vrot.slane %v6504_v36, 5  ;;  %v11466_v40 = vld [vmem:[%s8847_s23 + $0x18] sm:$0xf] }
 0x297   : > { %v4624_v44 = vpop.f32.mrf.mxu2  ;;  %v11430_v12 = vsel %vm9105_vm11, %v6110_v24, %v6118_v59  ;;  %v11443_v8 = vsel %vm9105_vm11, %v6128_v55, %v6136_v35  ;;  %v6501_v5 = vor.u32 %v6500_v58, %v6497_v15  ;;  %v7071_v13 = vand.u32 %v8517_v54, %v8825_v4  ;;  %v8588_v35 = vld [vmem:[%s8847_s23 + $0x1c] sm:$0xf0] }
 0x298   : > { %v4637_v32 = vadd.f32 %v4624_v44, %v4443_v1  ;;  %v8475_v1 = vld [vmem:[%s12118_s1 + $0x5a] sm:$0x3]  ;;  %v6514_v47 = vrot.slane %v6512_v51, 5  ;;  %v7289_v37 = vand.u32 %v8530_v43, %v8825_v4  ;;  %v11461_v59 = vadd.f32 %v11257_v10, %v11313_v60  ;;  %v8370_v60 = vld [vmem:[%s8847_s23 + $0xdc] sm:$0x3] }
 0x299   : > { %v4433_v45 = vpop.f32.mrf.mxu1  ;;  %v6827_v41 = vand.u32 %v8475_v1, %v8825_v4  ;;  %v6502_v62 = vrot.slane %v6501_v5, 4  ;;  %v6139_v18 = vshrl.u32 %v11133_v0, 16  ;;  %v6142_v25 = vshll.u32 %v11133_v0, 16  ;;  %7080 = vmatpush.bf16.msra.mxu3 %v7071_v13  ;;  %v11486_v13 = vld [vmem:[%s8847_s23 + $0x2c] sm:$0x1] }
 0x29a   : > { %v4818_v20 = vpop.f32.mrf.mxu3  ;;  %v4444_v50 = vadd.f32 %v4433_v45, %v11294_v38  ;;  %v6511_v38 = vrot.slane %v6509_v49, 4  ;;  %v6520_v4 = vrot.slane %v6518_v27, 5  ;;  %v6148_v63 = vshrl.u32 %v8369_v56, 16  ;;  %7298 = vmatpush.bf16.msra.mxu0 %v7289_v37 }
 0x29b   : > { %v11426_v53 = vadd.f32 %v4818_v20, %v4637_v32  ;;  %6836 = vmatpush.bf16.msra.mxu1 %v6827_v41  ;;  %v6151_v44 = vshll.u32 %v8369_v56, 16  ;;  %v6507_v10 = vsel %vm8895_vm6, %v6502_v62, %v6506_v48  ;;  %v6141_v0 = vrot.slane %v6139_v18, 5 }
 0x29c   : > { %v11435_v17 = vpop.f32.mrf.mxu0  ;;  %8303 = vmatmul.msk.bf16.gmra.mxu1 %vm260_vm2, %v5603_v42  ;;  %8324 = vmatmul.msk.bf16.gmra.mxu2 %vm260_vm2, %v5797_v22  ;;  %v6248_v42 = vunpack.c.l.b16 %v11430_v12  ;;  %v6249_v22 = vunpack.c.l.b16 %v11443_v8  ;;  %v6515_v21 = vor.u32 %v6514_v47, %v6511_v38  ;;  %v6144_v36 = vrot.slane %v6142_v25, 6  ;;  %v8442_v8 = vld [vmem:[%s8847_s23 + $0x28] sm:$0xf]  ;;  %v8444_v47 = vld [vmem:[%s8847_s23 + $0x30] sm:$0xf] }
 0x29d   : > { %v6150_v49 = vrot.slane %v6148_v63, 5  ;;  %v6153_v20 = vrot.slane %v6151_v44, 6  ;;  %v6157_v58 = vshrl.u32 %v11139_v33, 16  ;;  %v6160_v54 = vshll.u32 %v11139_v33, 16  ;;  %v11494_v44 = vld [vmem:[%s8847_s23 + $0x34] sm:$0x1] }
 0x29e   : > { %v6516_v15 = vrot.slane %v6515_v21, 4  ;;  %v6145_v55 = vor.u32 %v6144_v36, %v6141_v0  ;;  %v6166_v38 = vshrl.u32 %v8370_v60, 16  ;;  %v6169_v43 = vshll.u32 %v8370_v60, 16 }
 0x29f   : > { %8345 = vmatmul.msk.bf16.gmra.mxu3 %vm260_vm2, %v5919_v14  ;;  %8366 = vmatmul.msk.bf16.gmra.mxu0 %vm260_vm2, %v6041_v11  ;;  %v4627_v2 = vpop.f32.mrf.mxu2  ;;  %v8420_v14 = vld [vmem:[%s8847_s23 + $0x70] sm:$0xf]  ;;  %v8592_v11 = vld [vmem:[%s8847_s23 + $0x74] sm:$0xf0]  ;;  %v6154_v12 = vor.u32 %v6153_v20, %v6150_v49  ;;  %v8392_v5 = vor.u32 %v8588_v35, %v11466_v40  ;;  %v6159_v27 = vrot.slane %v6157_v58, 5  ;;  %v6162_v48 = vrot.slane %v6160_v54, 6 }
 0x2a0   : > { %v4638_v24 = vadd.f32 %v4627_v2, %v4444_v50  ;;  %v6146_v51 = vrot.slane %v6145_v55, 4  ;;  %v6608_v33 = vunpack.c.l.b16 %v6507_v10  ;;  %v6168_v56 = vrot.slane %v6166_v38, 5 }
 0x2a1   : > { %v4435_v3 = vpop.f32.mrf.mxu1  ;;  %v6171_v62 = vrot.slane %v6169_v43, 6  ;;  %v6256_v37 = vpack.c.b16 %v6249_v22, %v6248_v42  ;;  %v8421_v18 = vor.u32 %v8592_v11, %v8420_v14  ;;  %v6163_v25 = vor.u32 %v6162_v48, %v6159_v27 }
 0x2a2   : > { %v4821_v32 = vpop.f32.mrf.mxu3  ;;  %v4445_v45 = vadd.f32 %v4435_v3, %v11378_v61  ;;  %v6521_v61 = vsel %vm8895_vm6, %v6516_v15, %v6520_v4  ;;  %v6523_v2 = vshrl.u32 %v8442_v8, 16  ;;  %v11491_v4 = vsel %vm9105_vm11, %v6146_v51, %v6154_v12 }
 0x2a3   : > { %v11473_v50 = vadd.f32 %v4821_v32, %v4638_v24  ;;  %v6609_v41 = vunpack.c.l.b16 %v6521_v61  ;;  %v6172_v63 = vor.u32 %v6171_v62, %v6168_v56  ;;  %v6526_v24 = vshll.u32 %v8442_v8, 16  ;;  %v8371_v61 = vld [vmem:[%s8847_s23 + $0xe4] sm:$0x3] }
 0x2a4   : > { %v11478_v1 = vpop.f32.mrf.mxu0  ;;  %v6532_v3 = vshll.u32 %v11486_v13, 16  ;;  %v6164_v60 = vrot.slane %v6163_v25, 4  ;;  %v6525_v0 = vrot.slane %v6523_v2, 4  ;;  %v6537_v36 = vshrl.u32 %v8444_v47, 16 }
 0x2a5   : > { %v6616_v32 = vpack.c.b16 %v6609_v41, %v6608_v33  ;;  %v6528_v35 = vrot.slane %v6526_v24, 5  ;;  %v6540_v15 = vshll.u32 %v8444_v47, 16  ;;  %v6250_v20 = vunpack.c.l.b16 %v11491_v4  ;;  %v11523_v41 = vld [vmem:[%s8847_s23 + $0x28] sm:$0xf]  ;;  %v8372_v4 = vld [vmem:[%s8847_s23 + $0xec] sm:$0x3] }
 0x2a6   : > { %v6539_v14 = vrot.slane %v6537_v36, 4  ;;  %v6546_v55 = vshll.u32 %v11494_v44, 16  ;;  %v6534_v54 = vrot.slane %v6532_v3, 5  ;;  %v6173_v12 = vsel %vm9105_vm11, %v6164_v60, %v6172_v63  ;;  %v8446_v36 = vld [vmem:[%s8847_s23 + $0x38] sm:$0xf] }
 0x2a7   : > { %v4629_v21 = vpop.f32.mrf.mxu2  ;;  %v6542_v11 = vrot.slane %v6540_v15, 5  ;;  %v11515_v38 = vadd.f32 %v11345_v39, %v11398_v52  ;;  %v6175_v43 = vshrl.u32 %v11230_v19, 16  ;;  %v6178_v8 = vshll.u32 %v11230_v19, 16  ;;  %v11526_v19 = vld [vmem:[%s8847_s23 + $0x2c] sm:$0xf0] }
 0x2a8   : > { %v4639_v40 = vadd.f32 %v4629_v21, %v4445_v45  ;;  %v6529_v45 = vor.u32 %v6528_v35, %v6525_v0  ;;  %v6187_v33 = vshll.u32 %v8371_v61, 16  ;;  %v6193_v39 = vshrl.u32 %v11234_v31, 16  ;;  %v11532_v21 = vld [vmem:[%s8847_s23 + $0x80] sm:$0xf] }
 0x2a9   : > { %v5050_v10 = vpop.f32.mrf.mxu1  ;;  %v6543_v27 = vor.u32 %v6542_v11, %v6539_v14  ;;  %v6180_v48 = vrot.slane %v6178_v8, 6  ;;  %v6251_v2 = vunpack.c.l.b16 %v6173_v12  ;;  %v8448_v11 = vld [vmem:[%s8847_s23 + $0x40] sm:$0xf]  ;;  %v8396_v12 = vor.u32 %v11526_v19, %v11523_v41 }
 0x2aa   : > { %v4823_v42 = vpop.f32.mrf.mxu3  ;;  %v5070_v22 = vadd.f32 %v5050_v10, %v11387_v9  ;;  %v11507_v9 = vadd.f32 %v11316_v6, %v11337_v28  ;;  %v6530_v51 = vrot.slane %v6529_v45, 4  ;;  %v6548_v6 = vrot.slane %v6546_v55, 5  ;;  %v11537_v10 = vld [vmem:[%s8847_s23 + $0x84] sm:$0xf0] }
 0x2ab   : > { %v11498_v49 = vadd.f32 %v4823_v42, %v4639_v40  ;;  %v6184_v28 = vshrl.u32 %v8371_v61, 16  ;;  %v6544_v62 = vrot.slane %v6543_v27, 4  ;;  %v6189_v24 = vrot.slane %v6187_v33, 6 }
 0x2ac   : > { %v11502_v58 = vpop.f32.mrf.mxu0  ;;  %8376 = vmatmul.msk.bf16.vlgmr.msrb.gmra.mxu1 %vm260_vm2, %v6256_v37  ;;  %8405 = vmatmul.msk.bf16.vlgmr.msrb.gmra.mxu2 %vm260_vm2, %v8392_v5  ;;  %v6177_v5 = vrot.slane %v6175_v43, 5  ;;  %v6535_v56 = vsel %vm8895_vm6, %v6530_v51, %v6534_v54  ;;  %v6196_v37 = vshll.u32 %v11234_v31, 16  ;;  %v6195_v0 = vrot.slane %v6193_v39, 5  ;;  %v11547_v54 = vld [vmem:[%s8847_s23 + $0x3c] sm:$0x1] }
 0x2ad   : > { %v6186_v47 = vrot.slane %v6184_v28, 5  ;;  %v6549_v60 = vsel %vm8895_vm6, %v6544_v62, %v6548_v6  ;;  %v6205_v45 = vshll.u32 %v8372_v4, 16  ;;  %v6257_v61 = vpack.c.b16 %v6251_v2, %v6250_v20 }
 0x2ae   : > { %v6181_v63 = vor.u32 %v6180_v48, %v6177_v5  ;;  %v6198_v31 = vrot.slane %v6196_v37, 6  ;;  %v6611_v14 = vunpack.c.l.b16 %v6549_v60  ;;  %v8425_v43 = vor.u32 %v11537_v10, %v11532_v21  ;;  %v11559_v5 = vld [vmem:[%s8847_s23 + $0x44] sm:$0x1] }
 0x2af   : > { %8434 = vmatmul.msk.bf16.vlgmr.msrb.gmra.mxu3 %vm260_vm2, %v8421_v18  ;;  %8455 = vmatmul.msk.bf16.vlgmr.msrb.gmra.mxu0 %vm260_vm2, %v6616_v32  ;;  %v5268_v52 = vpop.f32.mrf.mxu2  ;;  %v6190_v35 = vor.u32 %v6189_v24, %v6186_v47  ;;  %v6551_v8 = vshrl.u32 %v8446_v36, 16  ;;  %v6207_v28 = vrot.slane %v6205_v45, 6  ;;  %v6554_v33 = vshll.u32 %v8446_v36, 16 }
 0x2b0   : > { %v5288_v18 = vadd.f32 %v5268_v52, %v5070_v22  ;;  %v6610_v22 = vunpack.c.l.b16 %v6535_v56  ;;  %v6182_v32 = vrot.slane %v6181_v63, 4  ;;  %v6199_v55 = vor.u32 %v6198_v31, %v6195_v0  ;;  %v8373_v31 = vld [vmem:[%s8847_s23 + $0xf4] sm:$0x3] }
 0x2b1   : > { %v5052_v25 = vpop.f32.mrf.mxu1  ;;  %v6553_v48 = vrot.slane %v6551_v8, 4  ;;  %v6560_v20 = vshll.u32 %v11547_v54, 16  ;;  %v6565_v39 = vshrl.u32 %v8448_v11, 16  ;;  %v6568_v56 = vshll.u32 %v8448_v11, 16 }
 0x2b2   : > { %v5351_v3 = vpop.f32.mrf.mxu3  ;;  %v5071_v40 = vadd.f32 %v5052_v25, %v11451_v30  ;;  %v6202_v30 = vshrl.u32 %v8372_v4, 16  ;;  %v11556_v51 = vsel %vm9105_vm11, %v6182_v32, %v6190_v35  ;;  %v6200_v27 = vrot.slane %v6199_v55, 4 }
 0x2b3   : > { %v11542_v42 = vadd.f32 %v5351_v3, %v5288_v18  ;;  %v6617_v41 = vpack.c.b16 %v6611_v14, %v6610_v22  ;;  %v11564_v62 = vadd.f32 %v11404_v7, %v11426_v53  ;;  %v6556_v18 = vrot.slane %v6554_v33, 5 }
 0x2b4   : > { %v11544_v15 = vpop.f32.mrf.mxu0  ;;  %v6204_v6 = vrot.slane %v6202_v30, 5  ;;  %v6567_v25 = vrot.slane %v6565_v39, 4  ;;  %v6574_v2 = vshll.u32 %v11559_v5, 16  ;;  %v6252_v63 = vunpack.c.l.b16 %v11556_v51 }
 0x2b5   : > { %v6562_v24 = vrot.slane %v6560_v20, 5  ;;  %v6570_v3 = vrot.slane %v6568_v56, 5  ;;  %v6557_v53 = vor.u32 %v6556_v18, %v6553_v48  ;;  %v6211_v36 = vshrl.u32 %v11323_v23, 16 }
 0x2b6   : > { %v6208_v19 = vor.u32 %v6207_v28, %v6204_v6  ;;  %v6214_v22 = vshll.u32 %v11323_v23, 16  ;;  %v11588_v32 = vadd.f32 %v11478_v1, %v11498_v49  ;;  %v6576_v35 = vrot.slane %v6574_v2, 5  ;;  %v8374_v1 = vld [vmem:[%s8847_s23 + $0xfc] sm:$0x3] }
 0x2b7   : > { %v5270_v52 = vpop.f32.mrf.mxu2  ;;  %v6571_v0 = vor.u32 %v6570_v3, %v6567_v25  ;;  %v6220_v14 = vshrl.u32 %v8373_v31, 16  ;;  %v6223_v55 = vshll.u32 %v8373_v31, 16  ;;  %v6213_v45 = vrot.slane %v6211_v36, 5  ;;  %v11620_v31 = vld [vmem:[%s8847_s23 + $0x54] sm:$0x1] }
 0x2b8   : > { %v5289_v47 = vadd.f32 %v5270_v52, %v5071_v40  ;;  %v6209_v7 = vsel %vm9105_vm11, %v6200_v27, %v6208_v19  ;;  %v11575_v40 = vadd.f32 %v11435_v17, %v11473_v50  ;;  %v11592_v17 = vld [vmem:[%s8847_s23 + $0x3c] sm:$0xf0]  ;;  %v6558_v50 = vrot.slane %v6557_v53, 4 }
 0x2b9   : > { %v5055_v37 = vpop.f32.mrf.mxu1  ;;  %v6572_v30 = vrot.slane %v6571_v0, 4  ;;  %v6216_v11 = vrot.slane %v6214_v22, 6  ;;  %v6253_v23 = vunpack.c.l.b16 %v6209_v7  ;;  %v6222_v49 = vrot.slane %v6220_v14, 5  ;;  %v8594_v14 = vld [vmem:[%s8847_s23 + $0x94] sm:$0xf0] }
 0x2ba   : > { %v5353_v21 = vpop.f32.mrf.mxu3  ;;  %v5072_v4 = vadd.f32 %v5055_v37, %v11461_v59  ;;  %v11581_v59 = vld [vmem:[%s8847_s23 + $0x38] sm:$0xf]  ;;  %v6225_v8 = vrot.slane %v6223_v55, 6  ;;  %v6563_v6 = vsel %vm8895_vm6, %v6558_v50, %v6562_v24  ;;  %v6238_v56 = vshrl.u32 %v8374_v1, 16  ;;  %v8450_v37 = vld [vmem:[%s8847_s23 + $0x48] sm:$0xf] }
 0x2bb   : > { %v11569_v10 = vadd.f32 %v5353_v21, %v5289_v47  ;;  %v8400_v27 = vor.u32 %v11592_v17, %v11581_v59  ;;  %v6217_v28 = vor.u32 %v6216_v11, %v6213_v45  ;;  %v6577_v20 = vsel %vm8895_vm6, %v6572_v30, %v6576_v35  ;;  %v8452_v24 = vld [vmem:[%s8847_s23 + $0x50] sm:$0xf] }
 0x2bc   : > { %v11577_v60 = vpop.f32.mrf.mxu0  ;;  %8377 = vmatmul.msk.bf16.gmra.mxu1 %vm260_vm2, %v6257_v61  ;;  %8406 = vmatmul.msk.bf16.gmra.mxu2 %vm260_vm2, %v8396_v12  ;;  %v6229_v61 = vshrl.u32 %v11329_v34, 16  ;;  %v6232_v12 = vshll.u32 %v11329_v34, 16  ;;  %v6226_v39 = vor.u32 %v6225_v8, %v6222_v49  ;;  %v6241_v47 = vshll.u32 %v8374_v1, 16  ;;  %v8428_v35 = vld [vmem:[%s8847_s23 + $0x90] sm:$0xf] }
 0x2bd   : > { %v6218_v19 = vrot.slane %v6217_v28, 4  ;;  %v6258_v25 = vpack.c.b16 %v6253_v23, %v6252_v63  ;;  %v11607_v2 = vunpack.c.l.b16 %v6563_v6  ;;  %v11615_v7 = vunpack.c.l.b16 %v6577_v20  ;;  %v11636_v6 = vld [vmem:[%s8847_s23 + $0x4c] sm:$0xf0] }
 0x2be   : > { %v6231_v48 = vrot.slane %v6229_v61, 5  ;;  %v6234_v52 = vrot.slane %v6232_v12, 6  ;;  %v6240_v53 = vrot.slane %v6238_v56, 5  ;;  %v6243_v0 = vrot.slane %v6241_v47, 6  ;;  %v11626_v61 = vld [vmem:[%s8847_s23 + $0x48] sm:$0xf] }
 0x2bf   : > { %8435 = vmatmul.msk.bf16.gmra.mxu3 %vm260_vm2, %v8425_v43  ;;  %8456 = vmatmul.msk.bf16.gmra.mxu0 %vm260_vm2, %v6617_v41  ;;  %v5273_v51 = vpop.f32.mrf.mxu2  ;;  %v6579_v22 = vshrl.u32 %v8450_v37, 16  ;;  %v6582_v50 = vshll.u32 %v8450_v37, 16  ;;  %v6593_v45 = vshrl.u32 %v8452_v24, 16  ;;  %v6596_v11 = vshll.u32 %v8452_v24, 16 }
 0x2c0   : > { %v5290_v43 = vadd.f32 %v5273_v51, %v5072_v4  ;;  %v6235_v21 = vor.u32 %v6234_v52, %v6231_v48  ;;  %v11610_v4 = vld [vmem:[%s8847_s23 + $0x4c] sm:$0x1]  ;;  %v6244_v55 = vor.u32 %v6243_v0, %v6240_v53  ;;  %v6602_v49 = vshll.u32 %v11620_v31, 16  ;;  %v11639_v52 = vld [vmem:[%s8847_s23 + $0xa0] sm:$0xf] }
 0x2c1   : > { %v5057_v33 = vpop.f32.mrf.mxu1  ;;  %v6588_v30 = vshll.u32 %v11610_v4, 16  ;;  %v6581_v23 = vrot.slane %v6579_v22, 4  ;;  %v6584_v1 = vrot.slane %v6582_v50, 5  ;;  %v11631_v8 = vadd.f32 %v11502_v58, %v11542_v42  ;;  %v8462_v22 = vld [vmem:[%s8847_s23 + $0x7c] sm:$0x1] }
 0x2c2   : > { %v5356_v34 = vpop.f32.mrf.mxu3  ;;  %v5073_v41 = vadd.f32 %v5057_v33, %v11507_v9  ;;  %v6227_v9 = vsel %vm9105_vm11, %v6218_v19, %v6226_v39  ;;  %v6236_v63 = vrot.slane %v6235_v21, 4  ;;  %v6595_v48 = vrot.slane %v6593_v45, 4  ;;  %v8480_v45 = vld [vmem:[%s8847_s23 + $0x18] sm:$0xe] }
 0x2c3   : > { %v5373_v18 = vadd.f32 %v5356_v34, %v5290_v43  ;;  %v6254_v36 = vunpack.c.l.b16 %v6227_v9  ;;  %v6590_v28 = vrot.slane %v6588_v30, 5  ;;  %v6598_v43 = vrot.slane %v6596_v11, 5  ;;  %v11642_v34 = vld [vmem:[%s8847_s23 + $0xa4] sm:$0xf0] }
 0x2c4   : > { %v11613_v3 = vpop.f32.mrf.mxu0  ;;  %v6245_v51 = vsel %vm9105_vm11, %v6236_v63, %v6244_v55  ;;  %v6585_v19 = vor.u32 %v6584_v1, %v6581_v23  ;;  %v6604_v58 = vrot.slane %v6602_v49, 5  ;;  %v11647_v37 = vadd.f32 %v11544_v15, %v11569_v10 }
 0x2c5   : > { %v6255_v39 = vunpack.c.l.b16 %v6245_v51  ;;  %v6599_v47 = vor.u32 %v6598_v43, %v6595_v48  ;;  %v8429_v24 = vor.u32 %v8594_v14, %v8428_v35  ;;  %v6618_v9 = vpack.c.b16 %v11615_v7, %v11607_v2  ;;  %v8461_v7 = vld [vmem:[%s8847_s23 + $0x78] sm:$0xf] }
 0x2c6   : > { %v6586_v53 = vrot.slane %v6585_v19, 4  ;;  %v8433_v15 = vor.u32 %v11642_v34, %v11639_v52  ;;  %v6892_v63 = vrot.slane %v11411_v26, 5  ;;  %v6703_v59 = vshrl.u32 %v8461_v7, 16  ;;  %v8502_v19 = vld [vmem:[%s8847_s23 + $0x78] sm:$0xe] }
 0x2c7   : > { %v5275_v12 = vpop.f32.mrf.mxu2  ;;  %v6600_v10 = vrot.slane %v6599_v47, 4  ;;  %v11670_v2 = vpack.c.b16 %v6255_v39, %v6254_v36  ;;  %v6706_v30 = vshll.u32 %v8461_v7, 16  ;;  %v6712_v49 = vshll.u32 %v8462_v22, 16  ;;  %v8501_v39 = vld [vmem:[%s8847_s23 + $0x70] sm:$0xe] }
 0x2c8   : > { %v5291_v33 = vadd.f32 %v5275_v12, %v5073_v41  ;;  %v11650_v41 = vadd.f32 %v11577_v60, %v5373_v18  ;;  %v8459_v60 = vld [vmem:[%s8847_s23 + $0x70] sm:$0xf]  ;;  %v8460_v18 = vld [vmem:[%s8847_s23 + $0x74] sm:$0x1]  ;;  %v6705_v1 = vrot.slane %v6703_v59, 4  ;;  %v8488_v51 = vrot.slane %v8480_v45, 9 }
 0x2c9   : > { %v5060_v20 = vpop.f32.mrf.mxu1  ;;  %v6689_v50 = vshrl.u32 %v8459_v60, 16  ;;  %v6692_v35 = vshll.u32 %v8459_v60, 16  ;;  %v6605_v14 = vsel %vm8895_vm6, %v6600_v10, %v6604_v58  ;;  %v6698_v55 = vshll.u32 %v8460_v18, 16  ;;  %v11686_v12 = vld [vmem:[%s8847_s23 + $0x20] sm:$0xe] }
 0x2ca   : > { %v5358_v42 = vpop.f32.mrf.mxu3  ;;  %v5074_v56 = vadd.f32 %v5060_v20, %v11515_v38  ;;  %v8404_v38 = vor.u32 %v11636_v6, %v11626_v61  ;;  %v11682_v17 = vunpack.c.l.b16 %v6605_v14  ;;  %v6708_v20 = vrot.slane %v6706_v30, 5  ;;  %v8522_v30 = vld [vmem:[%s8847_s23 + $0x1c] sm:$0x3]  ;;  %v8466_v6 = vld [vmem:[%s8847_s23 + $0x8c] sm:$0x1] }
 0x2cb   : > { %v11652_v21 = vadd.f32 %v5358_v42, %v5291_v33  ;;  %v6694_v36 = vrot.slane %v6692_v35, 5  ;;  %v6700_v23 = vrot.slane %v6698_v55, 5  ;;  %v6714_v47 = vrot.slane %v6712_v49, 5 }
 0x2cc   : > { %v11656_v0 = vpop.f32.mrf.mxu0  ;;  %8378 = vmatmul.msk.bf16.gmra.mxu1 %vm260_vm2, %v6258_v25  ;;  %8407 = vmatmul.msk.bf16.gmra.mxu2 %vm260_vm2, %v8400_v27  ;;  %v6591_v25 = vsel %vm8895_vm6, %v6586_v53, %v6590_v28  ;;  %v6691_v27 = vrot.slane %v6689_v50, 4  ;;  %v6709_v10 = vor.u32 %v6708_v20, %v6705_v1  ;;  %v6896_v60 = vrot.slane %v11417_v29, 5 }
 0x2cd   : > { %v11678_v26 = vunpack.c.l.b16 %v6591_v25  ;;  %v8509_v50 = vrot.slane %v8501_v39, 9  ;;  %v7014_v35 = vrot.slane %v8460_v18, 5  ;;  %v8510_v14 = vrot.slane %v8502_v19, 9  ;;  %v8523_v19 = vld [vmem:[%s8847_s23 + $0x24] sm:$0x3] }
 0x2ce   : > { %v6695_v33 = vor.u32 %v6694_v36, %v6691_v27  ;;  %v6710_v55 = vrot.slane %v6709_v10, 4  ;;  %v7018_v59 = vrot.slane %v8462_v22, 5  ;;  %v7122_v49 = vshll.u32 %v8480_v45, 16 }
 0x2cf   : > { %8436 = vmatmul.msk.bf16.gmra.mxu3 %vm260_vm2, %v8429_v24  ;;  %8457 = vmatmul.msk.bf16.gmra.mxu0 %vm260_vm2, %v6618_v9  ;;  %v5278_v11 = vpop.f32.mrf.mxu2  ;;  %v6619_v43 = vpack.c.b16 %v11682_v17, %v11678_v26  ;;  %v6893_v24 = vsel %vm8913_vm8, %v8488_v51, %v6892_v63  ;;  %v8489_v9 = vrot.slane %v11686_v12, 9  ;;  %v7015_v29 = vsel %vm8913_vm8, %v8509_v50, %v7014_v35 }
 0x2d0   : > { %v5292_v28 = vadd.f32 %v5278_v11, %v5074_v56  ;;  %v6696_v56 = vrot.slane %v6695_v33, 4  ;;  %v6924_v7 = vunpack.c.l.b16 %v6893_v24  ;;  %v7119_v11 = vshrl.u32 %v8480_v45, 16 }
 0x2d1   : > { %v5062_v48 = vpop.f32.mrf.mxu1  ;;  %v6897_v63 = vsel %vm8913_vm8, %v8489_v9, %v6896_v60  ;;  %v6715_v18 = vsel %vm8895_vm6, %v6710_v55, %v6714_v47  ;;  %v7046_v1 = vunpack.c.l.b16 %v7015_v29  ;;  %v7128_v24 = vshrl.u32 %v8522_v30, 16 }
 0x2d2   : > { %v5361_v58 = vpop.f32.mrf.mxu3  ;;  %v5075_v42 = vadd.f32 %v5062_v48, %v11564_v62  ;;  %v6701_v62 = vsel %vm8895_vm6, %v6696_v56, %v6700_v23  ;;  %v6925_v36 = vunpack.c.l.b16 %v6897_v63  ;;  %v7019_v23 = vsel %vm8913_vm8, %v8510_v14, %v7018_v59  ;;  %v8463_v59 = vld [vmem:[%s8847_s23 + $0x80] sm:$0xf] }
 0x2d3   : > { %v11696_v53 = vadd.f32 %v5361_v58, %v5292_v28  ;;  %v11705_v27 = vunpack.c.l.b16 %v6701_v62  ;;  %v11714_v28 = vunpack.c.l.b16 %v6715_v18  ;;  %v7047_v48 = vunpack.c.l.b16 %v7019_v23 }
 0x2d4   : > { %v11699_v25 = vpop.f32.mrf.mxu0  ;;  %v11716_v22 = vpack.c.b16 %v6925_v36, %v6924_v7  ;;  %v7121_v33 = vrot.slane %v7119_v11, 5  ;;  %v7124_v58 = vrot.slane %v7122_v49, 6  ;;  %v7131_v9 = vshll.u32 %v8522_v30, 16  ;;  %v8464_v30 = vld [vmem:[%s8847_s23 + $0x84] sm:$0x1] }
 0x2d5   : > { %v6810_v45 = vpack.c.b16 %v11714_v28, %v11705_v27  ;;  %v11722_v10 = vpack.c.b16 %v7047_v48, %v7046_v1  ;;  %v7137_v60 = vshrl.u32 %v11686_v12, 16  ;;  %v7130_v50 = vrot.slane %v7128_v24, 5  ;;  %v8465_v11 = vld [vmem:[%s8847_s23 + $0x88] sm:$0xf]  ;;  %v8467_v27 = vld [vmem:[%s8847_s23 + $0x90] sm:$0xf] }
 0x2d6   : > { %v7133_v35 = vrot.slane %v7131_v9, 6  ;;  %v7140_v62 = vshll.u32 %v11686_v12, 16  ;;  %v7146_v55 = vshrl.u32 %v8523_v19, 16  ;;  %v7149_v63 = vshll.u32 %v8523_v19, 16 }
 0x2d7   : > { %v5280_v51 = vpop.f32.mrf.mxu2  ;;  %v6717_v18 = vshrl.u32 %v8463_v59, 16  ;;  %v6720_v49 = vshll.u32 %v8463_v59, 16  ;;  %v6740_v9 = vshll.u32 %v8466_v6, 16 }
 0x2d8   : > { %v5293_v20 = vadd.f32 %v5280_v51, %v5075_v42  ;;  %v7125_v42 = vor.u32 %v7124_v58, %v7121_v33  ;;  %v7134_v29 = vor.u32 %v7133_v35, %v7130_v50  ;;  %v7142_v23 = vrot.slane %v7140_v62, 6 }
 0x2d9   : > { %v5065_v39 = vpop.f32.mrf.mxu1  ;;  %v7148_v12 = vrot.slane %v7146_v55, 5  ;;  %v7151_v1 = vrot.slane %v7149_v63, 6  ;;  %v6722_v34 = vrot.slane %v6720_v49, 5  ;;  %v6742_v63 = vrot.slane %v6740_v9, 5 }
 0x2da   : > { %v5363_v47 = vpop.f32.mrf.mxu3  ;;  %v5076_v56 = vadd.f32 %v5065_v39, %v11575_v40  ;;  %v7139_v40 = vrot.slane %v7137_v60, 5  ;;  %v7126_v36 = vrot.slane %v7125_v42, 4  ;;  %v11757_v60 = vld [vmem:[%s8847_s23 + $0x30] sm:$0xe]  ;;  %v7022_v49 = vrot.slane %v8464_v30, 5 }
 0x2db   : > { %v11725_v7 = vadd.f32 %v5363_v47, %v5293_v20  ;;  %v7152_v33 = vor.u32 %v7151_v1, %v7148_v12  ;;  %v8482_v47 = vld [vmem:[%s8847_s23 + $0x28] sm:$0xe]  ;;  %v8491_v59 = vrot.slane %v11757_v60, 9 }
 0x2dc   : > { %v11727_v14 = vpop.f32.mrf.mxu0  ;;  %8379 = vmatmul.msk.bf16.gmra.mxu1 %vm260_vm2, %v11670_v2  ;;  %8408 = vmatmul.msk.bf16.gmra.mxu2 %vm260_vm2, %v8404_v38  ;;  %v11741_v2 = vadd.f32 %v11613_v3, %v11652_v21  ;;  %v7135_v61 = vsel %vm9105_vm11, %v7126_v36, %v7134_v29  ;;  %v6719_v3 = vrot.slane %v6717_v18, 4  ;;  %v6726_v21 = vshll.u32 %v8464_v30, 16 }
 0x2dd   : > { %v6731_v38 = vshrl.u32 %v8465_v11, 16  ;;  %v7143_v48 = vor.u32 %v7142_v23, %v7139_v40  ;;  %v7264_v52 = vunpack.c.l.b16 %v7135_v61  ;;  %v8490_v35 = vrot.slane %v8482_v47, 9  ;;  %v8503_v40 = vld [vmem:[%s8847_s23 + $0x80] sm:$0xe]  ;;  %v8504_v23 = vld [vmem:[%s8847_s23 + $0x88] sm:$0xe] }
 0x2de   : > { %v6728_v26 = vrot.slane %v6726_v21, 5  ;;  %v6723_v24 = vor.u32 %v6722_v34, %v6719_v3  ;;  %v6904_v18 = vrot.slane %v11494_v44, 5  ;;  %v8511_v1 = vrot.slane %v8503_v40, 9 }
 0x2df   : > { %8437 = vmatmul.msk.bf16.gmra.mxu3 %vm260_vm2, %v8433_v15  ;;  %8458 = vmatmul.msk.bf16.gmra.mxu0 %vm260_vm2, %v6619_v43  ;;  %v5283_v51 = vpop.f32.mrf.mxu2  ;;  %v6733_v17 = vrot.slane %v6731_v38, 4  ;;  %v6734_v43 = vshll.u32 %v8465_v11, 16  ;;  %v7144_v58 = vrot.slane %v7143_v48, 4  ;;  %v7026_v34 = vrot.slane %v8466_v6, 5 }
 0x2e0   : > { %v5294_v15 = vadd.f32 %v5283_v51, %v5076_v56  ;;  %v6900_v56 = vrot.slane %v11486_v13, 5  ;;  %v6905_v38 = vsel %vm8913_vm8, %v8491_v59, %v6904_v18  ;;  %v7023_v44 = vsel %vm8913_vm8, %v8511_v1, %v7022_v49 }
 0x2e1   : > { %v5067_v20 = vpop.f32.mrf.mxu1  ;;  %v6736_v50 = vrot.slane %v6734_v43, 5  ;;  %v7153_v55 = vsel %vm9105_vm11, %v7144_v58, %v7152_v33  ;;  %v6927_v48 = vunpack.c.l.b16 %v6905_v38  ;;  %v8512_v33 = vrot.slane %v8504_v23, 9  ;;  %v11809_v23 = vld [vmem:[%s8847_s23 + $0x94] sm:$0x1] }
 0x2e2   : > { %v5366_v39 = vpop.f32.mrf.mxu3  ;;  %v5077_v19 = vadd.f32 %v5067_v20, %v11588_v32  ;;  %v6724_v32 = vrot.slane %v6723_v24, 4  ;;  %v7265_v36 = vunpack.c.l.b16 %v7153_v55  ;;  %v6901_v11 = vsel %vm8913_vm8, %v8490_v35, %v6900_v56 }
 0x2e3   : > { %v11759_v42 = vadd.f32 %v5366_v39, %v5294_v15  ;;  %v6737_v29 = vor.u32 %v6736_v50, %v6733_v17  ;;  %v6926_v12 = vunpack.c.l.b16 %v6901_v11  ;;  %v7155_v17 = vshrl.u32 %v8482_v47, 16  ;;  %v8525_v50 = vld [vmem:[%s8847_s23 + $0x34] sm:$0x3] }
 0x2e4   : > { %v11763_v62 = vpop.f32.mrf.mxu0  ;;  %v6729_v13 = vsel %vm8895_vm6, %v6724_v32, %v6728_v26  ;;  %v7272_v61 = vpack.c.b16 %v7265_v36, %v7264_v52  ;;  %v7048_v52 = vunpack.c.l.b16 %v7023_v44  ;;  %v8524_v26 = vld [vmem:[%s8847_s23 + $0x2c] sm:$0x3]  ;;  %v7027_v9 = vsel %vm8913_vm8, %v8512_v33, %v7026_v34 }
 0x2e5   : > { %v6738_v3 = vrot.slane %v6737_v29, 4  ;;  %v11774_v21 = vunpack.c.l.b16 %v6729_v13  ;;  %v11786_v24 = vpack.c.b16 %v6927_v48, %v6926_v12  ;;  %v7157_v35 = vrot.slane %v7155_v17, 5 }
 0x2e6   : > { %v7158_v56 = vshll.u32 %v8482_v47, 16  ;;  %v7164_v55 = vshrl.u32 %v8524_v26, 16  ;;  %v7167_v32 = vshll.u32 %v8524_v26, 16  ;;  %v7176_v36 = vshll.u32 %v11757_v60, 16 }
 0x2e7   : > { %v5285_v51 = vpop.f32.mrf.mxu2  ;;  %v6743_v30 = vsel %vm8895_vm6, %v6738_v3, %v6742_v63  ;;  %v7173_v63 = vshrl.u32 %v11757_v60, 16  ;;  %v7182_v29 = vshrl.u32 %v8525_v50, 16  ;;  %v7185_v18 = vshll.u32 %v8525_v50, 16 }
 0x2e8   : > { %v5295_v15 = vadd.f32 %v5285_v51, %v5077_v19  ;;  %v11784_v58 = vunpack.c.l.b16 %v6743_v30  ;;  %v7049_v19 = vunpack.c.l.b16 %v7027_v9  ;;  %v7160_v47 = vrot.slane %v7158_v56, 6 }
 0x2e9   : > { %v5628_v20 = vpop.f32.mrf.mxu1  ;;  %v7166_v28 = vrot.slane %v7164_v55, 5  ;;  %v7169_v11 = vrot.slane %v7167_v32, 6  ;;  %v7178_v13 = vrot.slane %v7176_v36, 6  ;;  %v7184_v12 = vrot.slane %v7182_v29, 5 }
 0x2ea   : > { %v5368_v43 = vpop.f32.mrf.mxu3  ;;  %v5648_v39 = vadd.f32 %v5628_v20, %v11631_v8  ;;  %v6811_v8 = vpack.c.b16 %v11784_v58, %v11774_v21  ;;  %v11804_v59 = vpack.c.b16 %v7049_v19, %v7048_v52  ;;  %v11816_v60 = vadd.f32 %v11656_v0, %v11696_v53  ;;  %v8470_v0 = vld [vmem:[%s8847_s23 + $0x9c] sm:$0x1] }
 0x2eb   : > { %v11791_v6 = vadd.f32 %v5368_v43, %v5295_v15  ;;  %v7170_v49 = vor.u32 %v7169_v11, %v7166_v28  ;;  %v7187_v3 = vrot.slane %v7185_v18, 6  ;;  %v6745_v38 = vshrl.u32 %v8467_v27, 16 }
 0x2ec   : > { %v11793_v40 = vpop.f32.mrf.mxu0  ;;  %8476 = vmatmul.msk.bf16.vlgmr.msra.gmra.mxu1 %vm260_vm2, %v6810_v45  ;;  %8497 = vmatmul.msk.bf16.vlgmr.msra.gmra.mxu2 %vm260_vm2, %v11716_v22  ;;  %v7175_v45 = vrot.slane %v7173_v63, 5  ;;  %v7161_v22 = vor.u32 %v7160_v47, %v7157_v35  ;;  %v6748_v51 = vshll.u32 %v8467_v27, 16  ;;  %v6768_v32 = vshll.u32 %v8470_v0, 16  ;;  %v11832_v63 = vld [vmem:[%s8847_s23 + $0x40] sm:$0xe] }
 0x2ed   : > { %v7188_v30 = vor.u32 %v7187_v3, %v7184_v12  ;;  %v6747_v53 = vrot.slane %v6745_v38, 4  ;;  %v6908_v36 = vrot.slane %v11547_v54, 5  ;;  %v6912_v12 = vrot.slane %v11559_v5, 5 }
 0x2ee   : > { %v7162_v33 = vrot.slane %v7161_v22, 4  ;;  %v7179_v34 = vor.u32 %v7178_v13, %v7175_v45  ;;  %v6750_v52 = vrot.slane %v6748_v51, 5  ;;  %v8505_v45 = vld [vmem:[%s8847_s23 + $0x90] sm:$0xe]  ;;  %v6770_v18 = vrot.slane %v6768_v32, 5 }
 0x2ef   : > { %8518 = vmatmul.msk.bf16.vlgmr.msra.gmra.mxu3 %vm260_vm2, %v11722_v10  ;;  %8531 = vmatmul.msk.bf16.vlgmr.msra.gmra.mxu0 %vm260_vm2, %v7272_v61  ;;  %v5822_v1 = vpop.f32.mrf.mxu2  ;;  %v8469_v10 = vld [vmem:[%s8847_s23 + $0x98] sm:$0xf]  ;;  %v6754_v61 = vshll.u32 %v11809_v23, 16  ;;  %v8493_v13 = vrot.slane %v11832_v63, 9 }
 0x2f0   : > { %v5842_v48 = vadd.f32 %v5822_v1, %v5648_v39  ;;  %v7171_v17 = vsel %vm9105_vm11, %v7162_v33, %v7170_v49  ;;  %v7180_v43 = vrot.slane %v7179_v34, 4  ;;  %v6751_v19 = vor.u32 %v6750_v52, %v6747_v53  ;;  %v8506_v51 = vld [vmem:[%s8847_s23 + $0x98] sm:$0xe] }
 0x2f1   : > { %v5630_v44 = vpop.f32.mrf.mxu1  ;;  %v6756_v39 = vrot.slane %v6754_v61, 5  ;;  %v7266_v50 = vunpack.c.l.b16 %v7171_v17  ;;  %v6759_v35 = vshrl.u32 %v8469_v10, 16  ;;  %v6762_v56 = vshll.u32 %v8469_v10, 16 }
 0x2f2   : > { %v5944_v15 = vpop.f32.mrf.mxu3  ;;  %v5649_v20 = vadd.f32 %v5630_v44, %v11647_v37  ;;  %v8484_v37 = vld [vmem:[%s8847_s23 + $0x38] sm:$0xe]  ;;  %v7189_v55 = vsel %vm9105_vm11, %v7180_v43, %v7188_v30  ;;  %v6752_v27 = vrot.slane %v6751_v19, 4  ;;  %v6913_v34 = vsel %vm8913_vm8, %v8493_v13, %v6912_v12 }
 0x2f3   : > { %v11822_v26 = vadd.f32 %v5944_v15, %v5842_v48  ;;  %v8492_v47 = vrot.slane %v8484_v37, 9  ;;  %v7267_v29 = vunpack.c.l.b16 %v7189_v55  ;;  %v6761_v28 = vrot.slane %v6759_v35, 4  ;;  %v8527_v35 = vld [vmem:[%s8847_s23 + $0x44] sm:$0x3] }
 0x2f4   : > { %v11826_v9 = vpop.f32.mrf.mxu0  ;;  %v6764_v11 = vrot.slane %v6762_v56, 5  ;;  %v6757_v3 = vsel %vm8895_vm6, %v6752_v27, %v6756_v39  ;;  %v8513_v10 = vrot.slane %v8505_v45, 9  ;;  %v6929_v30 = vunpack.c.l.b16 %v6913_v34  ;;  %v8473_v34 = vld [vmem:[%s8847_s23 + $0xa8] sm:$0xf] }
 0x2f5   : > { %v6909_v22 = vsel %vm8913_vm8, %v8492_v47, %v6908_v36  ;;  %v7273_v49 = vpack.c.b16 %v7267_v29, %v7266_v50  ;;  %v11843_v33 = vunpack.c.l.b16 %v6757_v3  ;;  %v7030_v53 = vrot.slane %v11809_v23, 5  ;;  %v8471_v3 = vld [vmem:[%s8847_s23 + $0xa0] sm:$0xf] }
 0x2f6   : > { %v6765_v38 = vor.u32 %v6764_v11, %v6761_v28  ;;  %v6928_v54 = vunpack.c.l.b16 %v6909_v22  ;;  %v8514_v17 = vrot.slane %v8506_v51, 9  ;;  %v7034_v43 = vrot.slane %v8470_v0, 5 }
 0x2f7   : > { %v5824_v1 = vpop.f32.mrf.mxu2  ;;  %v7191_v39 = vshrl.u32 %v8484_v37, 16  ;;  %v7031_v23 = vsel %vm8913_vm8, %v8513_v10, %v7030_v53  ;;  %v7194_v56 = vshll.u32 %v8484_v37, 16  ;;  %v7209_v37 = vshrl.u32 %v11832_v63, 16 }
 0x2f8   : > { %v5843_v48 = vadd.f32 %v5824_v1, %v5649_v20  ;;  %v6766_v15 = vrot.slane %v6765_v38, 4  ;;  %v8526_v20 = vld [vmem:[%s8847_s23 + $0x3c] sm:$0x3]  ;;  %v11860_v19 = vpack.c.b16 %v6929_v30, %v6928_v54  ;;  %v7035_v21 = vsel %vm8913_vm8, %v8514_v17, %v7034_v43  ;;  %v11901_v17 = vld [vmem:[%s8847_s23 + $0xac] sm:$0x1] }
 0x2f9   : > { %v5633_v44 = vpop.f32.mrf.mxu1  ;;  %v7050_v58 = vunpack.c.l.b16 %v7031_v23  ;;  %v7051_v55 = vunpack.c.l.b16 %v7035_v21  ;;  %v7196_v32 = vrot.slane %v7194_v56, 6  ;;  %v7200_v47 = vshrl.u32 %v8526_v20, 16  ;;  %v8486_v56 = vld [vmem:[%s8847_s23 + $0x48] sm:$0xe] }
 0x2fa   : > { %v5946_v61 = vpop.f32.mrf.mxu3  ;;  %v5650_v5 = vadd.f32 %v5633_v44, %v11650_v41  ;;  %v6771_v41 = vsel %vm8895_vm6, %v6766_v15, %v6770_v18  ;;  %v7203_v36 = vshll.u32 %v8526_v20, 16  ;;  %v7212_v29 = vshll.u32 %v11832_v63, 16  ;;  %v11883_v44 = vld [vmem:[%s8847_s23 + $0xa4] sm:$0x1] }
 0x2fb   : > { %v11849_v52 = vadd.f32 %v5946_v61, %v5843_v48  ;;  %v11867_v0 = vunpack.c.l.b16 %v6771_v41  ;;  %v7218_v27 = vshrl.u32 %v8527_v35, 16  ;;  %v11878_v11 = vpack.c.b16 %v7051_v55, %v7050_v58 }
 0x2fc   : > { %v11852_v50 = vpop.f32.mrf.mxu0  ;;  %8477 = vmatmul.msk.bf16.gmra.mxu1 %vm260_vm2, %v6811_v8  ;;  %8498 = vmatmul.msk.bf16.gmra.mxu2 %vm260_vm2, %v11786_v24  ;;  %v7193_v8 = vrot.slane %v7191_v39, 5  ;;  %v7202_v18 = vrot.slane %v7200_v47, 5  ;;  %v7205_v22 = vrot.slane %v7203_v36, 6  ;;  %v7211_v12 = vrot.slane %v7209_v37, 5 }
 0x2fd   : > { %v6812_v24 = vpack.c.b16 %v11867_v0, %v11843_v33  ;;  %v7214_v1 = vrot.slane %v7212_v29, 6  ;;  %v7221_v48 = vshll.u32 %v8527_v35, 16  ;;  %v11894_v15 = vadd.f32 %v11727_v14, %v11759_v42  ;;  %v11909_v29 = vld [vmem:[%s8847_s23 + $0x50] sm:$0xe] }
 0x2fe   : > { %v7197_v45 = vor.u32 %v7196_v32, %v7193_v8  ;;  %v7206_v51 = vor.u32 %v7205_v22, %v7202_v18  ;;  %v6773_v43 = vshrl.u32 %v8471_v3, 16  ;;  %v6776_v20 = vshll.u32 %v8471_v3, 16 }
 0x2ff   : > { %8519 = vmatmul.msk.bf16.gmra.mxu3 %vm260_vm2, %v11804_v59  ;;  %8532 = vmatmul.msk.bf16.gmra.mxu0 %vm260_vm2, %v7273_v49  ;;  %v5827_v28 = vpop.f32.mrf.mxu2  ;;  %v7220_v49 = vrot.slane %v7218_v27, 5  ;;  %v7215_v61 = vor.u32 %v7214_v1, %v7211_v12  ;;  %v7223_v53 = vrot.slane %v7221_v48, 6  ;;  %v6790_v42 = vshll.u32 %v8473_v34, 16 }
 0x300   : > { %v5844_v59 = vadd.f32 %v5827_v28, %v5650_v5  ;;  %v7198_v63 = vrot.slane %v7197_v45, 4  ;;  %v11890_v5 = vadd.f32 %v11699_v25, %v11725_v7  ;;  %v6782_v25 = vshll.u32 %v11883_v44, 16 }
 0x301   : > { %v5635_v13 = vpop.f32.mrf.mxu1  ;;  %v7216_v39 = vrot.slane %v7215_v61, 4  ;;  %v6787_v7 = vshrl.u32 %v8473_v34, 16  ;;  %v7224_v23 = vor.u32 %v7223_v53, %v7220_v49  ;;  %v6775_v35 = vrot.slane %v6773_v43, 4 }
 0x302   : > { %v5949_v38 = vpop.f32.mrf.mxu3  ;;  %v5651_v54 = vadd.f32 %v5635_v13, %v11741_v2  ;;  %v7207_v2 = vsel %vm9105_vm11, %v7198_v63, %v7206_v51  ;;  %v6778_v14 = vrot.slane %v6776_v20, 5  ;;  %v6784_v21 = vrot.slane %v6782_v25, 5  ;;  %v8507_v13 = vld [vmem:[%s8847_s23 + $0xa0] sm:$0xe]  ;;  %v8508_v63 = vld [vmem:[%s8847_s23 + $0xa8] sm:$0xe] }
 0x303   : > { %v11886_v10 = vadd.f32 %v5949_v38, %v5844_v59  ;;  %v7268_v41 = vunpack.c.l.b16 %v7207_v2  ;;  %v6789_v58 = vrot.slane %v6787_v7, 4  ;;  %v6796_v8 = vshll.u32 %v11901_v17, 16 }
 0x304   : > { %v11896_v30 = vpop.f32.mrf.mxu0  ;;  %v8494_v55 = vrot.slane %v8486_v56, 9  ;;  %v7225_v47 = vsel %vm9105_vm11, %v7216_v39, %v7224_v23  ;;  %v6779_v36 = vor.u32 %v6778_v14, %v6775_v35  ;;  %v6792_v37 = vrot.slane %v6790_v42, 5  ;;  %v8528_v39 = vld [vmem:[%s8847_s23 + $0x4c] sm:$0x3] }
 0x305   : > { %v6916_v27 = vrot.slane %v11610_v4, 5  ;;  %v7269_v18 = vunpack.c.l.b16 %v7225_v47  ;;  %v6798_v22 = vrot.slane %v6796_v8, 5  ;;  %v8495_v59 = vrot.slane %v11909_v29, 9 }
 0x306   : > { %v6780_v49 = vrot.slane %v6779_v36, 4  ;;  %v6793_v3 = vor.u32 %v6792_v37, %v6789_v58  ;;  %v6920_v4 = vrot.slane %v11620_v31, 5  ;;  %v8515_v2 = vrot.slane %v8507_v13, 9 }
 0x307   : > { %v5829_v32 = vpop.f32.mrf.mxu2  ;;  %v6917_v38 = vsel %vm8913_vm8, %v8494_v55, %v6916_v27  ;;  %v7274_v48 = vpack.c.b16 %v7269_v18, %v7268_v41  ;;  %v7038_v53 = vrot.slane %v11883_v44, 5  ;;  %v8516_v43 = vrot.slane %v8508_v63, 9 }
 0x308   : > { %v5845_v28 = vadd.f32 %v5829_v32, %v5651_v54  ;;  %v6930_v54 = vunpack.c.l.b16 %v6917_v38  ;;  %v6794_v61 = vrot.slane %v6793_v3, 4  ;;  %v6921_v31 = vsel %vm8913_vm8, %v8495_v59, %v6920_v4 }
 0x309   : > { %v5638_v45 = vpop.f32.mrf.mxu1  ;;  %v7042_v20 = vrot.slane %v11901_v17, 5  ;;  %v6931_v0 = vunpack.c.l.b16 %v6921_v31  ;;  %v7230_v41 = vshll.u32 %v8486_v56, 16  ;;  %v7236_v35 = vshrl.u32 %v8528_v39, 16 }
 0x30a   : > { %v5951_v12 = vpop.f32.mrf.mxu3  ;;  %v5652_v1 = vadd.f32 %v5638_v45, %v11816_v60  ;;  %v6785_v60 = vsel %vm8895_vm6, %v6780_v49, %v6784_v21  ;;  %v6799_v33 = vsel %vm8895_vm6, %v6794_v61, %v6798_v22  ;;  %v8529_v21 = vld [vmem:[%s8847_s23 + $0x54] sm:$0x3]  ;;  %v5461_v59 = vadd.f32 %v11763_v62, %v11791_v6 }
 0x30b   : > { %v5967_v51 = vadd.f32 %v5951_v12, %v5845_v28  ;;  %v6808_v44 = vunpack.c.l.b16 %v6785_v60  ;;  %v6809_v7 = vunpack.c.l.b16 %v6799_v33  ;;  %v6935_v17 = vpack.c.b16 %v6931_v0, %v6930_v54 }
 0x30c   : > { %v11919_v34 = vpop.f32.mrf.mxu0  ;;  %8478 = vmatmul.msk.bf16.gmra.mxu1 %vm260_vm2, %v6812_v24  ;;  %8499 = vmatmul.msk.bf16.gmra.mxu2 %vm260_vm2, %v11860_v19  ;;  %v7227_v24 = vshrl.u32 %v8486_v56, 16  ;;  %v7039_v19 = vsel %vm8913_vm8, %v8515_v2, %v7038_v53  ;;  %v7043_v42 = vsel %vm8913_vm8, %v8516_v43, %v7042_v20  ;;  %v7232_v58 = vrot.slane %v7230_v41, 6 }
 0x30d   : > { %v7052_v32 = vunpack.c.l.b16 %v7039_v19  ;;  %v7238_v47 = vrot.slane %v7236_v35, 5  ;;  %v7245_v56 = vshrl.u32 %v11909_v29, 16  ;;  %v7248_v28 = vshll.u32 %v11909_v29, 16 }
 0x30e   : > { %v7229_v23 = vrot.slane %v7227_v24, 5  ;;  %v7254_v22 = vshrl.u32 %v8529_v21, 16  ;;  %v7257_v16 = vshll.u32 %v8529_v21, 16  ;;  %v11955_v38 = vadd.f32 %v11826_v9, %v11849_v52 }
 0x30f   : > { %8520 = vmatmul.msk.bf16.gmra.mxu3 %vm260_vm2, %v11878_v11  ;;  %8533 = vmatmul.msk.bf16.gmra.mxu0 %vm260_vm2, %v7274_v48  ;;  %v5832_v25 = vpop.f32.mrf.mxu2  ;;  %v7239_v11 = vshll.u32 %v8528_v39, 16  ;;  %v7247_v18 = vrot.slane %v7245_v56, 5  ;;  %v11959_v29 = vadd.f32 %v11852_v50, %v11886_v10  ;;  %v7053_v63 = vunpack.c.l.b16 %v7043_v42 }
 0x310   : > { %v5846_v57 = vadd.f32 %v5832_v25, %v5652_v1  ;;  %v7233_v37 = vor.u32 %v7232_v58, %v7229_v23  ;;  %v7250_v1 = vrot.slane %v7248_v28, 6  ;;  %v7256_v49 = vrot.slane %v7254_v22, 5 }
 0x311   : > { %v5640_v14 = vpop.f32.mrf.mxu1  ;;  %v7241_v27 = vrot.slane %v7239_v11, 6  ;;  %v7259_v3 = vrot.slane %v7257_v16, 6  ;;  %v11964_v48 = vadd.f32 %v11896_v30, %v5967_v51  ;;  %v7057_v10 = vpack.c.b16 %v7053_v63, %v7052_v32 }
 0x312   : > { %v5954_v8 = vpop.f32.mrf.mxu3  ;;  %v5653_v55 = vadd.f32 %v5640_v14, %v11890_v5  ;;  %v7234_v13 = vrot.slane %v7233_v37, 4  ;;  %v11951_v5 = vadd.f32 %v11793_v40, %v11822_v26  ;;  %v7251_v6 = vor.u32 %v7250_v1, %v7247_v18 }
 0x313   : > { %v5968_v36 = vadd.f32 %v5954_v8, %v5846_v57  ;;  %v7242_v12 = vor.u32 %v7241_v27, %v7238_v47  ;;  %v6813_v26 = vpack.c.b16 %v6809_v7, %v6808_v44  ;;  %v7260_v4 = vor.u32 %v7259_v3, %v7256_v49 }
 0x314   : > { %v6078_v45 = vpop.f32.mrf.mxu0  ;;  %v7252_v61 = vrot.slane %v7251_v6, 4 }
 0x315   : > { %v7243_v62 = vsel %vm9105_vm11, %v7234_v13, %v7242_v12  ;;  %v11971_v51 = vadd.f32 %v11919_v34, %v5968_v36 }
 0x316   : > { %v7270_v2 = vunpack.c.l.b16 %v7243_v62  ;;  %v7261_v53 = vsel %vm9105_vm11, %v7252_v61, %v7260_v4 }
 0x317   : > { %v5834_v40 = vpop.f32.mrf.mxu2  ;;  %v7271_v30 = vunpack.c.l.b16 %v7261_v53 }
 0x318   : > { %v5847_v54 = vadd.f32 %v5834_v40, %v5653_v55 }
 0x319   : > { %v5643_v60 = vpop.f32.mrf.mxu1  ;;  %v7275_v43 = vpack.c.b16 %v7271_v30, %v7270_v2 }
 0x31a   : > { %v5956_v9 = vpop.f32.mrf.mxu3  ;;  %v5654_v52 = vadd.f32 %v5643_v60, %v11894_v15 }
 0x31b   : > { %v5969_v50 = vadd.f32 %v5956_v9, %v5847_v54 }
 0x31c   : > { %v6081_v31 = vpop.f32.mrf.mxu0  ;;  %8479 = vmatmul.msk.bf16.gmra.mxu1 %vm260_vm2, %v6813_v26  ;;  %8500 = vmatmul.msk.bf16.gmra.mxu2 %vm260_vm2, %v6935_v17 }
 0x31d   : > { %v11976_v44 = vadd.f32 %v6078_v45, %v5969_v50 }
 0x31f   : > { %8521 = vmatmul.msk.bf16.gmra.mxu3 %vm260_vm2, %v7057_v10  ;;  %8534 = vmatmul.msk.bf16.gmra.mxu0 %vm260_vm2, %v7275_v43  ;;  %v5837_v15 = vpop.f32.mrf.mxu2 }
 0x320   : > { %v5848_v20 = vadd.f32 %v5837_v15, %v5654_v52 }
 0x321   : > { %v5645_v39 = vpop.f32.mrf.mxu1 }
 0x322   : > { %v5959_v33 = vpop.f32.mrf.mxu3  ;;  %v5655_v46 = vadd.f32 %v5645_v39, %v5461_v59  ;;  %v12024_v39 = vld [vmem:[%s12119_s2] ss:$0 sm:$0xff] }
 0x323   : > { %v5970_v0 = vadd.f32 %v5959_v33, %v5848_v20 }
 0x324   : > { %v6083_v24 = vpop.f32.mrf.mxu0 }
 0x325   : > { %v11978_v23 = vadd.f32 %v6081_v31, %v5970_v0 }
 0x327   : > { %v5839_v19 = vpop.f32.mrf.mxu2 }
 0x328   : > { %v5849_v41 = vadd.f32 %v5839_v19, %v5655_v46 }
 0x329   : > { %v6284_v34 = vpop.f32.mrf.mxu1 }
 0x32a   : > { %v5961_v25 = vpop.f32.mrf.mxu3  ;;  %v6304_v6 = vadd.f32 %v6284_v34, %v11951_v5 }
 0x32b   : > { %v5971_v7 = vadd.f32 %v5961_v25, %v5849_v41 }
 0x32c   : > { %v6644_v17 = vpop.f32.mrf.mxu0 }
 0x32d   : > { %v11980_v21 = vadd.f32 %v6083_v24, %v5971_v7 }
 0x32f   : > { %v6367_v35 = vpop.f32.mrf.mxu2 }
 0x330   : > { %v6387_v26 = vadd.f32 %v6367_v35, %v6304_v6 }
 0x331   : > { %v6286_v57 = vpop.f32.mrf.mxu1 }
 0x332   : > { %v6450_v14 = vpop.f32.mrf.mxu3  ;;  %v6305_v9 = vadd.f32 %v6286_v57, %v11955_v38 }
 0x333   : > { %v6470_v54 = vadd.f32 %v6450_v14, %v6387_v26 }
 0x334   : > { %v6646_v42 = vpop.f32.mrf.mxu0 }
 0x335   : > { %v6664_v50 = vadd.f32 %v6644_v17, %v6470_v54 }
 0x337   : > { %v6369_v58 = vpop.f32.mrf.mxu2 }
 0x338   : > { %v6388_v2 = vadd.f32 %v6369_v58, %v6305_v9 }
 0x339   : > { %v6289_v11 = vpop.f32.mrf.mxu1 }
 0x33a   : > { %v6452_v8 = vpop.f32.mrf.mxu3  ;;  %v6306_v15 = vadd.f32 %v6289_v11, %v11959_v29 }
 0x33b   : > { %v6471_v31 = vadd.f32 %v6452_v8, %v6388_v2 }
 0x33c   : > { %v11982_v55 = vpop.f32.mrf.mxu0 }
 0x33d   : > { %v6665_v0 = vadd.f32 %v6646_v42, %v6471_v31 }
 0x33f   : > { %v6372_v32 = vpop.f32.mrf.mxu2 }
 0x340   : > { %v6389_v33 = vadd.f32 %v6372_v32, %v6306_v15 }
 0x341   : > { %v6291_v47 = vpop.f32.mrf.mxu1 }
 0x342   : > { %v6455_v56 = vpop.f32.mrf.mxu3  ;;  %v6307_v35 = vadd.f32 %v6291_v47, %v11964_v48 }
 0x343   : > { %v6472_v34 = vadd.f32 %v6455_v56, %v6389_v33 }
 0x344   : > { %v11984_v36 = vpop.f32.mrf.mxu0 }
 0x345   : > { %v6666_v8 = vadd.f32 %v11982_v55, %v6472_v34 }
 0x347   : > { %v6374_v37 = vpop.f32.mrf.mxu2 }
 0x348   : > { %v6390_v11 = vadd.f32 %v6374_v37, %v6307_v35 }
 0x349   : > { %v11986_v27 = vpop.f32.mrf.mxu1 }
 0x34a   : > { %v6457_v28 = vpop.f32.mrf.mxu3  ;;  %v6308_v37 = vadd.f32 %v11986_v27, %v11971_v51 }
 0x34b   : > { %v6473_v26 = vadd.f32 %v6457_v28, %v6390_v11 }
 0x34c   : > { %v11988_v45 = vpop.f32.mrf.mxu0 }
 0x34f   : > { %v11990_v18 = vpop.f32.mrf.mxu2 }
 0x351   : > { %v11992_v22 = vpop.f32.mrf.mxu1 }
 0x352   : > { %v11994_v16 = vpop.f32.mrf.mxu3  ;;  %v6309_v15 = vadd.f32 %v11992_v22, %v11976_v44 }
 0x354   : > { %v11996_v59 = vpop.f32.mrf.mxu0 }
 0x357   : > { %v11998_v13 = vpop.f32.mrf.mxu2 }
 0x359   : > { %v12000_v12 = vpop.f32.mrf.mxu1 }
 0x35a   : > { %v12002_v1 = vpop.f32.mrf.mxu3 }
 0x35c   : > { %v12004_v49 = vpop.f32.mrf.mxu0 }
 0x35f   : > { %v12006_v3 = vpop.f32.mrf.mxu2 }
 0x361   : > { %v12008_v63 = vpop.f32.mrf.mxu1 }
 0x362   : > { %v12010_v62 = vpop.f32.mrf.mxu3 }
 0x364   : > { %v12013_v40 = vpop.f32.mrf.mxu0 }
 0x367   : > { %v12015_v4 = vpop.f32.mrf.mxu2 }
 0x369   : > { %v6838_v60 = vpop.f32.mrf.mxu1 }
 0x36a   : > { %v12017_v61 = vpop.f32.mrf.mxu3  ;;  %v6858_v10 = vadd.f32 %v6838_v60, %v6664_v50  ;;  %v6391_v50 = vadd.f32 %v11990_v18, %v6308_v37 }
 0x36c   : > { %v7300_v52 = vpop.f32.mrf.mxu0 }
 0x36f   : > { %v6960_v53 = vpop.f32.mrf.mxu2 }
 0x370   : > { %v6980_v5 = vadd.f32 %v6960_v53, %v6858_v10  ;;  %v6667_v10 = vadd.f32 %v11984_v36, %v6473_v26 }
 0x371   : > { %v6840_v30 = vpop.f32.mrf.mxu1 }
 0x372   : > { %v7082_v43 = vpop.f32.mrf.mxu3  ;;  %v6859_v19 = vadd.f32 %v6840_v30, %v6665_v0 }
 0x373   : > { %v7102_v20 = vadd.f32 %v7082_v43, %v6980_v5  ;;  %v6474_v5 = vadd.f32 %v11994_v16, %v6391_v50 }
 0x374   : > { %v7302_v38 = vpop.f32.mrf.mxu0 }
 0x375   : > { %v7320_v46 = vadd.f32 %v7300_v52, %v7102_v20  ;;  %v6668_v33 = vadd.f32 %v11988_v45, %v6474_v5 }
 0x377   : > { %v7332_v24 = vadd.f32 %v12024_v39, %v7320_v46  ;;  %v6962_v41 = vpop.f32.mrf.mxu2 }
 0x378   : > { %v6981_v29 = vadd.f32 %v6962_v41, %v6859_v19 }
 0x379   : > { %v7340_v25 = vmax.f32 %v7332_v24, 0.0  ;;  %v6843_v7 = vpop.f32.mrf.mxu1 }
 0x37a   : > { %v7084_v17 = vpop.f32.mrf.mxu3  ;;  %v6860_v56 = vadd.f32 %v6843_v7, %v6666_v8 }
 0x37b   : > { %v7348_v57 = vpack.c.bf16 %v7340_v25, %v7340_v25  ;;  %v7103_v14 = vadd.f32 %v7084_v17, %v6981_v29 }
 0x37c   : > { %v7305_v58 = vpop.f32.mrf.mxu0 }
 0x37d   : > { %7357 = vst.msk [vmem:[%s12031_s8] sm:$0xf] %vm7356_vm12, %v7348_v57  ;;  %v7321_v42 = vadd.f32 %v7302_v38, %v7103_v14  ;;  %v6392_v38 = vadd.f32 %v11998_v13, %v6309_v15  ;;  %v6310_v13 = vadd.f32 %v12000_v12, %v11978_v23 }
 0x37f   : > { %v7333_v32 = vadd.f32 %v12024_v39, %v7321_v42  ;;  %v6965_v6 = vpop.f32.mrf.mxu2  ;;  %v6475_v19 = vadd.f32 %v12002_v1, %v6392_v38  ;;  %v6393_v7 = vadd.f32 %v12006_v3, %v6310_v13  ;;  %v6311_v3 = vadd.f32 %v12008_v63, %v11980_v21 }
 0x380   : > { %v6982_v48 = vadd.f32 %v6965_v6, %v6860_v56 }
 0x381   : > { %v7341_v54 = vmax.f32 %v7333_v32, 0.0  ;;  %v6845_v47 = vpop.f32.mrf.mxu1  ;;  %v6669_v17 = vadd.f32 %v11996_v59, %v6475_v19  ;;  %v6394_v56 = vadd.f32 %v12015_v4, %v6311_v3 }
 0x382   : > { %v7087_v60 = vpop.f32.mrf.mxu3  ;;  %v6861_v53 = vadd.f32 %v6845_v47, %v6667_v10 }
 0x383   : > { %v7349_v9 = vpack.c.bf16 %v7341_v54, %v7341_v54  ;;  %v7104_v52 = vadd.f32 %v7087_v60, %v6982_v48  ;;  %v6477_v48 = vadd.f32 %v12017_v61, %v6394_v56 }
 0x384   : > { %v7307_v2 = vpop.f32.mrf.mxu0 }
 0x385   : > { %7358 = vst.msk [vmem:[%s12031_s8 + $0x4] sm:$0xf] %vm7356_vm12, %v7349_v9  ;;  %v7322_v55 = vadd.f32 %v7305_v58, %v7104_v52  ;;  %v6476_v58 = vadd.f32 %v12010_v62, %v6393_v7 }
 0x387   : > { %v7334_v28 = vadd.f32 %v12024_v39, %v7322_v55  ;;  %v6967_v31 = vpop.f32.mrf.mxu2  ;;  %v6670_v6 = vadd.f32 %v12004_v49, %v6476_v58  ;;  %v6671_v49 = vadd.f32 %v12013_v40, %v6477_v48 }
 0x388   : > { %v6983_v43 = vadd.f32 %v6967_v31, %v6861_v53 }
 0x389   : > { %v7342_v30 = vmax.f32 %v7334_v28, 0.0  ;;  %v6848_v51 = vpop.f32.mrf.mxu1 }
 0x38a   : > { %v7089_v27 = vpop.f32.mrf.mxu3  ;;  %v6862_v0 = vadd.f32 %v6848_v51, %v6668_v33 }
 0x38b   : > { %v7350_v18 = vpack.c.bf16 %v7342_v30, %v7342_v30  ;;  %v7105_v20 = vadd.f32 %v7089_v27, %v6983_v43 }
 0x38c   : > { %v7310_v46 = vpop.f32.mrf.mxu0 }
 0x38d   : > { %7359 = vst.msk [vmem:[%s12031_s8 + $0x8] sm:$0xf] %vm7356_vm12, %v7350_v18  ;;  %v7323_v36 = vadd.f32 %v7307_v2, %v7105_v20 }
 0x38f   : > { %v7335_v16 = vadd.f32 %v12024_v39, %v7323_v36  ;;  %v6970_v24 = vpop.f32.mrf.mxu2 }
 0x390   : > { %v6984_v34 = vadd.f32 %v6970_v24, %v6862_v0 }
 0x391   : > { %v7343_v41 = vmax.f32 %v7335_v16, 0.0  ;;  %v6850_v44 = vpop.f32.mrf.mxu1 }
 0x392   : > { %v7092_v22 = vpop.f32.mrf.mxu3  ;;  %v6863_v1 = vadd.f32 %v6850_v44, %v6669_v17 }
 0x393   : > { %v7351_v25 = vpack.c.bf16 %v7343_v41, %v7343_v41  ;;  %v7106_v29 = vadd.f32 %v7092_v22, %v6984_v34 }
 0x394   : > { %v7312_v57 = vpop.f32.mrf.mxu0 }
 0x395   : > { %7360 = vst.msk [vmem:[%s12031_s8 + $0xc] sm:$0xf] %vm7356_vm12, %v7351_v25  ;;  %v7324_v45 = vadd.f32 %v7310_v46, %v7106_v29 }
 0x397   : > { %v7336_v35 = vadd.f32 %v12024_v39, %v7324_v45  ;;  %v6972_v14 = vpop.f32.mrf.mxu2 }
 0x398   : > { %v6985_v42 = vadd.f32 %v6972_v14, %v6863_v1 }
 0x399   : > { %v7344_v11 = vmax.f32 %v7336_v35, 0.0  ;;  %v6853_v12 = vpop.f32.mrf.mxu1 }
 0x39a   : > { %v7094_v23 = vpop.f32.mrf.mxu3  ;;  %v6864_v62 = vadd.f32 %v6853_v12, %v6670_v6 }
 0x39b   : > { %v7352_v8 = vpack.c.bf16 %v7344_v11, %v7344_v11  ;;  %v7107_v32 = vadd.f32 %v7094_v23, %v6985_v42 }
 0x39c   : > { %v7315_v21 = vpop.f32.mrf.mxu0 }
 0x39d   : > { %7361 = vst.msk [vmem:[%s12031_s8 + $0x10] sm:$0xf] %vm7356_vm12, %v7352_v8  ;;  %v7325_v59 = vadd.f32 %v7312_v57, %v7107_v32 }
 0x39f   : > { %v7337_v26 = vadd.f32 %v12024_v39, %v7325_v59  ;;  %v6975_v54 = vpop.f32.mrf.mxu2 }
 0x3a0   : > { %v6986_v60 = vadd.f32 %v6975_v54, %v6864_v62 }
 0x3a1   : > { %v7345_v47 = vmax.f32 %v7337_v26, 0.0  ;;  %v6855_v4 = vpop.f32.mrf.mxu1 }
 0x3a2   : > { %v7097_v63 = vpop.f32.mrf.mxu3  ;;  %v6865_v50 = vadd.f32 %v6855_v4, %v6671_v49 }
 0x3a3   : > { %v7353_v37 = vpack.c.bf16 %v7345_v47, %v7345_v47  ;;  %v7108_v9 = vadd.f32 %v7097_v63, %v6986_v60 }
 0x3a4   : > { %v7317_v5 = vpop.f32.mrf.mxu0 }
 0x3a5   : > { %7362 = vst.msk [vmem:[%s12031_s8 + $0x14] sm:$0xf] %vm7356_vm12, %v7353_v37  ;;  %v7326_v52 = vadd.f32 %v7315_v21, %v7108_v9 }
 0x3a7   : > { %v7338_v2 = vadd.f32 %v12024_v39, %v7326_v52  ;;  %v6977_v55 = vpop.f32.mrf.mxu2 }
 0x3a8   : > { %v6987_v10 = vadd.f32 %v6977_v55, %v6865_v50 }
 0x3a9   : > { %v7346_v61 = vmax.f32 %v7338_v2, 0.0 }
 0x3aa   : > { %v7099_v28 = vpop.f32.mrf.mxu3 }
 0x3ab   : > { %v7354_v53 = vpack.c.bf16 %v7346_v61, %v7346_v61  ;;  %v7109_v31 = vadd.f32 %v7099_v28, %v6987_v10 }
 0x3ad   : > { %7363 = vst.msk [vmem:[%s12031_s8 + $0x18] sm:$0xf] %vm7356_vm12, %v7354_v53  ;;  %v7327_v30 = vadd.f32 %v7317_v5, %v7109_v31 }
 0x3af   : > { %v7339_v40 = vadd.f32 %v12024_v39, %v7327_v30 }
 0x3b1   : > { %v7347_v43 = vmax.f32 %v7339_v40, 0.0 }
 0x3b3   : > { %v7355_v51 = vpack.c.bf16 %v7347_v43, %v7347_v43 }
 0x3b5   : > { %7364 = vst.msk [vmem:[%s12031_s8 + $0x1c] sm:$0xf] %vm7356_vm12, %v7355_v51 }
 0x3b6   : > { %8687 = shalt.err (!%p8684_p5)
}
 0x3b7   : > { %s8741_s5 = smov 64   ;;  %s8742_s6 = smov 4  }
 0x3b8   : > { %8601 = dma.vmem_to_hbm [thread:$0]  (%p8803_p4), %s7380_s19, 512, %s7382_s21, %s7366_s15, %s8741_s5, %s8741_s5, %s8742_s6  }
 0x3b9 PF: > { %p8607_p6 = scmp.ge.s32.totalorder %s8738_s17, 2  ;;  %s7396_s7 = sand.u32 1, %s8718_s12  }
 0x3ba   : > { %s7397_s8 = scalar_lea.sflag [#allocation3], %s7396_s7 }
 0x3bb   : > { %p8604_p7 = pnand %p8607_p6, %p8810_p8 }
 0x3bd   : > { %p8605_p9 = pneg %p8604_p7 }
 0x3bf   : > { %8713 = dma.done.wait (%p8605_p9), %s7397_s8, 512  }
 0x3c0   : > { %8715 = vsyncadd (%p8605_p9), %s7397_s8, 4294966784  ;;  %s16_s17 = sadd.s32 1, %s8738_s17   ;;  %s12133_s12 = smov %s8722_s13 }
 0x3c1   : > { %p13_p10 = scmp.ge.s32.totalorder %s16_s17, 4   ;;  %s12134_s13 = smov %s8726_s14 }
 0x3c2   : > { %s12135_s14 = smov %s8816_s25  ;;  %s12136_s15 = smov %s8734_s16 }
 0x3c3   : > { %s12137_s16 = smov %s12139_s20  ;;  %15 = sbr.rel (!%p13_p10) target bundleno = 4 (0x4), region = 134 }
 0x3c8   :  { %7403 = vsyncpa [#allocation3], 1 }
 0x3c9   :  { %7405 = vsyncpa [#allocation3 + $0x1], 1 }

</bundles_post_ra>
